<compile_context>
chip_gen: v7x
topology: tpu7x:2x2x1
jax: 0.10.0
libtpu: 0.0.40
codegen_flags: <defaults>
</compile_context>

<pallas_src>
import functools

import jax
import jax.numpy as jnp
from jax.experimental import pallas as pl
from jax.experimental.pallas import tpu as pltpu


LANE = 128

# Kernel parameter order (BN-folded, channel-padded, MXU-fused, bf16 weights).
KP_ORDER = (
    "w12", "b12",        # fused [cv1 | cv2] 1x1 weight (N = 2*c_p) + biases
    "wm1", "bm1",        # Bottleneck.cv1 (1x1)
    "wm2", "bm2",        # Bottleneck.cv2 (3x3, HWIO)
    "w3", "bnb1",        # cv3 (1x1, concat-BN scale folded) + concat-BN bias (y1)
    "w4", "b4",          # cv4 stacked [w4a; w4b] (K = 2*c_p) + bias
)


def _round_up(n, m=LANE):
    return ((n + m - 1) // m) * m


def _pad_axis(a, axis, target):
    pad = [(0, 0)] * a.ndim
    pad[axis] = (0, target - a.shape[axis])
    return jnp.pad(a, pad)


# ----------------------------------------------------------------------------
# Pallas kernel: whole BottleneckCSP forward for Bt batch elements per step
# ----------------------------------------------------------------------------
def _make_kernel(Bt, H, W):
    HW = H * W
    pad_top = _round_up(W + 1, 8)     # zeroed halo rows above the image

    def kernel(x_ref,
               w12_ref, b12_ref,
               wm1_ref, bm1_ref,
               wm2_ref, bm2_ref,
               w3_ref, bnb1_ref,
               w4_ref, b4_ref,
               o_ref,
               yz_ref, mpad_ref):
        cp = wm1_ref.shape[0]
        M = Bt * HW

        def silu(v):
            return v * jax.nn.sigmoid(v)

        def bdot(a, w):
            # bf16 MXU inputs, f32 accumulation.
            return jnp.dot(a.astype(jnp.bfloat16), w,
                           preferred_element_type=jnp.float32)

        x = x_ref[...].reshape(M, x_ref.shape[-1])            # f32 (M, cin_p)

        # ---- fused cv1 / cv2: one N = 2*c_p dot -> [t | z2] in the scratch.
        u = bdot(x, w12_ref[...]) + b12_ref[...]
        yz_ref[...] = silu(u)                                  # (M, 2*c_p) f32

        # ---- Bottleneck.cv1 (1x1): K = c_p
        t = yz_ref[:, pl.ds(0, cp)]                            # (M, c_p) f32
        m1 = silu(bdot(t, wm1_ref[...]) + bm1_ref[...])

        # ---- 3x3 conv (pad=1, stride=1) via row-padded VMEM scratch taps.
        # Zero the halo rows every invocation (scratch persists across steps
        # and across megacore shards, so no program_id gating here).
        mpad_ref[pl.ds(0, pad_top), :] = jnp.zeros((pad_top, cp), jnp.float32)
        tail = mpad_ref.shape[0] - (pad_top + HW)
        mpad_ref[pl.ds(pad_top + HW, tail), :] = jnp.zeros((tail, cp),
                                                           jnp.float32)

        # Column-validity masks, shared by all images / taps.
        xcoord = jax.lax.broadcasted_iota(jnp.int32, (HW, 1), 0) % W
        not_left = xcoord != 0                                 # dx = -1 taps
        not_right = xcoord != (W - 1)                          # dx = +1 taps

        t2_parts = []
        for b in range(Bt):
            m1_img = m1[b * HW:(b + 1) * HW]
            # Stage the image in the row-padded scratch (aligned store).
            mpad_ref[pl.ds(pad_top, HW), :] = m1_img
            # Center tap initializes the accumulator: no reload, no mask.
            acc = bdot(m1_img, wm2_ref[1, 1])
            for ky in range(3):
                for kx in range(3):
                    if ky == 1 and kx == 1:
                        continue
                    start = pad_top + (ky - 1) * W + (kx - 1)
                    tap = mpad_ref[pl.ds(start, HW), :]
                    if kx == 0:
                        tap = jnp.where(not_left, tap, 0.0)
                    elif kx == 2:
                        tap = jnp.where(not_right, tap, 0.0)
                    acc = acc + bdot(tap, wm2_ref[ky, kx])
            m2 = silu(acc + bm2_ref[...])
            t2_parts.append(t[b * HW:(b + 1) * HW] + m2)       # residual add

        t2 = t2_parts[0] if Bt == 1 else jnp.concatenate(t2_parts, axis=0)

        # ---- z1 = SiLU(concat-BN(cv3(t2))): overwrite the first lane half.
        z1 = silu(bdot(t2, w3_ref[...]) + bnb1_ref[...])
        yz_ref[:, pl.ds(0, cp)] = z1

        # ---- cv4: one K = 2*c_p dot on [z1 | z2] (concat never materialized
        #      as a separate copy; z2 was written once at the top).
        out = silu(bdot(yz_ref[...], w4_ref[...]) + b4_ref[...])
        o_ref[...] = out.reshape(Bt, HW, out.shape[-1]).astype(o_ref.dtype)

    return kernel


def _weight_spec(p, single_buffer):
    nd = p.ndim
    idx = lambda b, nd=nd: (0,) * nd
    if single_buffer and hasattr(pl, "Buffered"):
        try:
            # Constant-index blocks never re-DMA; single buffer saves VMEM.
            return pl.BlockSpec(p.shape, idx, pipeline_mode=pl.Buffered(1))
        except TypeError:
            pass
    return pl.BlockSpec(p.shape, idx)


# ----------------------------------------------------------------------------
# Wrapper
# ----------------------------------------------------------------------------
@functools.partial(
    jax.jit,
    static_argnames=("out_channels", "batch_tile", "single_buffer_weights"))
def bottleneck_csp(x_nhwc, kparams, out_channels, batch_tile=1,
                   single_buffer_weights=True):
    B, H, W, Cin = x_nhwc.shape
    HW = H * W
    Bt = batch_tile
    assert B % Bt == 0

    cin_p = kparams["w12"].shape[0]
    c_p = kparams["wm1"].shape[0]
    cout_p = kparams["b4"].shape[1]

    # Flatten spatial dims and pad channels to 128 at the XLA level.
    x2d = _pad_axis(x_nhwc.reshape(B, HW, Cin), -1, cin_p)

    in_specs = [pl.BlockSpec((Bt, HW, cin_p), lambda b: (b, 0, 0))]
    args = [x2d]
    for name in KP_ORDER:
        p = kparams[name]
        in_specs.append(_weight_spec(p, single_buffer_weights))
        args.append(p)

    pad_top = _round_up(W + 1, 8)
    mpad_rows = _round_up(pad_top + HW + W + 1, 8)

    out = pl.pallas_call(
        _make_kernel(Bt, H, W),
        out_shape=jax.ShapeDtypeStruct((B, HW, cout_p), jnp.float32),
        grid=(B // Bt,),
        in_specs=in_specs,
        out_specs=pl.BlockSpec((Bt, HW, cout_p), lambda b: (b, 0, 0)),
        scratch_shapes=[
            pltpu.VMEM((Bt * HW, 2 * c_p), jnp.float32),   # [z1|z2] buffer
            pltpu.VMEM((mpad_rows, c_p), jnp.float32),     # row-padded m1
        ],
        compiler_params=pltpu.CompilerParams(
            dimension_semantics=("parallel",),
            vmem_limit_bytes=32 * 1024 * 1024,
        ),
    )(*args)

    # Slice off padded output channels and restore NHWC (XLA-level plumbing).
    return out[:, :, :out_channels].reshape(B, H, W, out_channels)


# ----------------------------------------------------------------------------
# Raw (PyTorch-like) parameters and wrapper-side BN folding / channel padding
# ----------------------------------------------------------------------------
def make_params(key, cin, cout, expansion=0.5):
    c_ = int(cout * expansion)
    ks = iter(jax.random.split(key, 32))

    def conv_w(shape):
        return (0.2 * jax.random.normal(next(ks), shape)).astype(jnp.float32)

    def bn(c):
        gamma = (1.0 + 0.1 * jax.random.normal(next(ks), (c,))).astype(jnp.float32)
        beta = (0.05 * jax.random.normal(next(ks), (c,))).astype(jnp.float32)
        mean = (0.1 * jax.random.normal(next(ks), (c,))).astype(jnp.float32)
        var = (0.5 + jax.random.uniform(next(ks), (c,), minval=0.0,
                                        maxval=0.5)).astype(jnp.float32)
        return (gamma, beta, mean, var)

    raw = {}
    raw["w_cv1"] = conv_w((cin, c_))          # cv1 1x1, (in, out)
    raw["bn_cv1"] = bn(c_)
    raw["w_m1"] = conv_w((c_, c_))            # Bottleneck.cv1 1x1
    raw["bn_m1"] = bn(c_)
    raw["w_m2"] = conv_w((3, 3, c_, c_))      # Bottleneck.cv2 3x3 (HWIO)
    raw["bn_m2"] = bn(c_)
    raw["w_cv3"] = conv_w((c_, c_))           # cv3 raw 1x1
    raw["w_cv2"] = conv_w((cin, c_))          # cv2 raw 1x1
    raw["bn_cat"] = bn(2 * c_)                # standalone BN over concat
    raw["w_cv4"] = conv_w((2 * c_, cout))     # cv4 1x1
    raw["bn_cv4"] = bn(cout)
    return raw


def fold_params(raw, cin, cout, expansion=0.5, eps=1e-5):
    """One-time wrapper work: fold BN scales into conv weights, pad channels
    to multiples of 128, fuse cv1/cv2 and cv4 for the 256-wide MXU, and store
    matmul weights in bf16 (biases stay f32)."""
    c_ = int(cout * expansion)
    cin_p, c_p, cout_p = _round_up(cin), _round_up(c_), _round_up(cout)

    def fold(p):
        gamma, beta, mean, var = p
        s = gamma / jnp.sqrt(var + eps)
        return s, beta - mean * s

    s1, b1 = fold(raw["bn_cv1"])
    sm1, bm1 = fold(raw["bn_m1"])
    sm2, bm2 = fold(raw["bn_m2"])
    sbn, bbn = fold(raw["bn_cat"])
    s4, b4 = fold(raw["bn_cv4"])

    def pad2(w, rows, cols):
        return _pad_axis(_pad_axis(w, 0, rows), 1, cols)

    def padb(b, cols):
        return _pad_axis(b.reshape(1, -1), 1, cols)

    w1 = pad2(raw["w_cv1"] * s1[None, :], cin_p, c_p)
    w2r = pad2(raw["w_cv2"] * sbn[None, c_:], cin_p, c_p)

    kp = {}
    # Fused cv1/cv2 weight: one N = 2*c_p dot produces [t_pre | z2_pre].
    kp["w12"] = jnp.concatenate([w1, w2r], axis=1)
    kp["b12"] = jnp.concatenate([padb(b1, c_p), padb(bbn[c_:], c_p)], axis=1)

    kp["wm1"] = pad2(raw["w_m1"] * sm1[None, :], c_p, c_p)
    kp["bm1"] = padb(bm1, c_p)
    wm2 = raw["w_m2"] * sm2[None, None, None, :]
    kp["wm2"] = _pad_axis(_pad_axis(wm2, 2, c_p), 3, c_p)
    kp["bm2"] = padb(bm2, c_p)
    kp["w3"] = pad2(raw["w_cv3"] * sbn[None, :c_], c_p, c_p)
    kp["bnb1"] = padb(bbn[:c_], c_p)

    # Fused cv4 weight: stacked [w4a; w4b] so cv4 is one K = 2*c_p dot.
    w4a = pad2(raw["w_cv4"][:c_] * s4[None, :], c_p, cout_p)
    w4b = pad2(raw["w_cv4"][c_:] * s4[None, :], c_p, cout_p)
    kp["w4"] = jnp.concatenate([w4a, w4b], axis=0)
    kp["b4"] = padb(b4, cout_p)

    out = {}
    for k, v in kp.items():
        out[k] = v.astype(jnp.bfloat16 if k.startswith("w") else jnp.float32)
    return out


# ----------------------------------------------------------------------------
# Pure-JAX reference (eval-mode BN), for correctness check
# ----------------------------------------------------------------------------
def reference(x, raw, eps=1e-5):
    def silu(v):
        return v * jax.nn.sigmoid(v)

    def bn(v, p):
        gamma, beta, mean, var = p
        return (v - mean) * (gamma / jnp.sqrt(var + eps)) + beta

    def conv1x1(v, w):
        return jnp.einsum("bhwc,co->bhwo", v, w)

    t = silu(bn(conv1x1(x, raw["w_cv1"]), raw["bn_cv1"]))
    m1 = silu(bn(conv1x1(t, raw["w_m1"]), raw["bn_m1"]))
    m2 = jax.lax.conv_general_dilated(
        m1, raw["w_m2"], window_strides=(1, 1), padding="SAME",
        dimension_numbers=("NHWC", "HWIO", "NHWC"),
    )
    m2 = silu(bn(m2, raw["bn_m2"]))
    t2 = t + m2
    y1 = conv1x1(t2, raw["w_cv3"])
    y2 = conv1x1(x, raw["w_cv2"])
    cat = jnp.concatenate([y1, y2], axis=-1)
    z = silu(bn(cat, raw["bn_cat"]))
    return silu(bn(conv1x1(z, raw["w_cv4"]), raw["bn_cv4"]))


# ----------------------------------------------------------------------------
if __name__ == "__main__":
    key = jax.random.PRNGKey(0)
    k_x, k_p = jax.random.split(key)

    B, H, W = 2, 16, 16
    in_channel, out_channel = 8, 8          # hidden_channel = 4

    x = jax.random.normal(k_x, (B, H, W, in_channel), dtype=jnp.float32)
    raw = make_params(k_p, in_channel, out_channel)
    kparams = fold_params(raw, in_channel, out_channel)   # one-time wrapper work

    try:
        out = jax.block_until_ready(bottleneck_csp(x, kparams, out_channel))
    except Exception:
        # jax version without single-buffered (pl.Buffered(1)) BlockSpecs in
        # the TPU lowering: retry with default double-buffered weights.
        out = jax.block_until_ready(
            bottleneck_csp(x, kparams, out_channel,
                           single_buffer_weights=False))

    ref = reference(x, raw)
    assert out.shape == (B, H, W, out_channel)
    assert bool(jnp.all(jnp.isfinite(out)))
    max_err = float(jnp.max(jnp.abs(out - ref)))
    # bf16 MXU inputs (f32 accumulation): loosen the f32-reference tolerance.
    assert jnp.allclose(out, ref, rtol=5e-2, atol=5e-2), max_err

    print("KERNEL_OK")
</pallas_src>

<mosaic_0001>
module attributes {stable_mosaic.version = 11 : i64} {
  func.func @kernel(%arg0: i32, %arg1: memref<1x256x128xf32, #tpu.memory_space<vmem>>, %arg2: memref<128x256xbf16, #tpu.memory_space<vmem>>, %arg3: memref<1x256xf32, #tpu.memory_space<vmem>>, %arg4: memref<128x128xbf16, #tpu.memory_space<vmem>>, %arg5: memref<1x128xf32, #tpu.memory_space<vmem>>, %arg6: memref<3x3x128x128xbf16, #tpu.memory_space<vmem>>, %arg7: memref<1x128xf32, #tpu.memory_space<vmem>>, %arg8: memref<128x128xbf16, #tpu.memory_space<vmem>>, %arg9: memref<1x128xf32, #tpu.memory_space<vmem>>, %arg10: memref<256x128xbf16, #tpu.memory_space<vmem>>, %arg11: memref<1x128xf32, #tpu.memory_space<vmem>>, %arg12: memref<1x256x128xf32, #tpu.memory_space<vmem>>, %arg13: memref<256x256xf32, #tpu.memory_space<vmem>>, %arg14: memref<304x128xf32, #tpu.memory_space<vmem>>) attributes {dimension_semantics = [#tpu.dimension_semantics<parallel>], iteration_bounds = array<i64: 2>, scalar_prefetch = 0 : i64, scratch_operands = 2 : i64, tpu.core_type = #tpu.core_type<tc>, window_params = [{transform_indices = @transform_0, window_bounds = array<i64: 1, 256, 128>}, {pipeline_mode = #tpu.pipeline_mode<synchronous>, transform_indices = @transform_1, window_bounds = array<i64: 128, 256>}, {pipeline_mode = #tpu.pipeline_mode<synchronous>, transform_indices = @transform_2, window_bounds = array<i64: 1, 256>}, {pipeline_mode = #tpu.pipeline_mode<synchronous>, transform_indices = @transform_3, window_bounds = array<i64: 128, 128>}, {pipeline_mode = #tpu.pipeline_mode<synchronous>, transform_indices = @transform_4, window_bounds = array<i64: 1, 128>}, {pipeline_mode = #tpu.pipeline_mode<synchronous>, transform_indices = @transform_5, window_bounds = array<i64: 3, 3, 128, 128>}, {pipeline_mode = #tpu.pipeline_mode<synchronous>, transform_indices = @transform_6, window_bounds = array<i64: 1, 128>}, {pipeline_mode = #tpu.pipeline_mode<synchronous>, transform_indices = @transform_7, window_bounds = array<i64: 128, 128>}, {pipeline_mode = #tpu.pipeline_mode<synchronous>, transform_indices = @transform_8, window_bounds = array<i64: 1, 128>}, {pipeline_mode = #tpu.pipeline_mode<synchronous>, transform_indices = @transform_9, window_bounds = array<i64: 256, 128>}, {pipeline_mode = #tpu.pipeline_mode<synchronous>, transform_indices = @transform_10, window_bounds = array<i64: 1, 128>}, {transform_indices = @transform_11, window_bounds = array<i64: 1, 256, 128>}]} {
    %c0 = arith.constant 0 : index
    %c0_0 = arith.constant 0 : index
    %c0_1 = arith.constant 0 : index
    %0 = vector.load %arg1[%c0, %c0_0, %c0_1] : memref<1x256x128xf32, #tpu.memory_space<vmem>>, vector<1x256x128xf32>
    %1 = vector.shape_cast %0 : vector<1x256x128xf32> to vector<256x128xf32>
    %c0_2 = arith.constant 0 : index
    %c0_3 = arith.constant 0 : index
    %2 = vector.load %arg2[%c0_2, %c0_3] : memref<128x256xbf16, #tpu.memory_space<vmem>>, vector<128x256xbf16>
    %3 = arith.truncf %1 : vector<256x128xf32> to vector<256x128xbf16>
    %cst = arith.constant dense<0.000000e+00> : vector<256x256xf32>
    %4 = tpu.matmul %3, %2, %cst {dimension_numbers = #tpu.dot_dimension_numbers<[1], [0], [0], [1], [0, 0, 1, 1], [], []>} : vector<256x128xbf16>, vector<128x256xbf16>, vector<256x256xf32> -> vector<256x256xf32>
    %c0_4 = arith.constant 0 : index
    %c0_5 = arith.constant 0 : index
    %5 = vector.load %arg3[%c0_4, %c0_5] : memref<1x256xf32, #tpu.memory_space<vmem>>, vector<1x256xf32>
    %6 = vector.broadcast %5 : vector<1x256xf32> to vector<256x256xf32>
    %7 = arith.addf %4, %6 : vector<256x256xf32>
    %8 = arith.negf %7 : vector<256x256xf32>
    %9 = math.exp %8 : vector<256x256xf32>
    %cst_6 = arith.constant 1.000000e+00 : f32
    %10 = vector.broadcast %cst_6 : f32 to vector<256x256xf32>
    %11 = arith.addf %10, %9 : vector<256x256xf32>
    %12 = arith.divf %10, %11 : vector<256x256xf32>
    %13 = arith.mulf %7, %12 : vector<256x256xf32>
    %c0_7 = arith.constant 0 : index
    %c0_8 = arith.constant 0 : index
    %14 = vector.load %arg13[%c0_7, %c0_8] : memref<256x256xf32, #tpu.memory_space<vmem>>, vector<256x256xf32>
    tpu.vector_store %arg13[%c0_7, %c0_8], %13 {strides = array<i32>} : memref<256x256xf32, #tpu.memory_space<vmem>>, vector<256x256xf32>,
    %c0_9 = arith.constant 0 : index
    %c0_10 = arith.constant 0 : index
    %15 = vector.load %arg13[%c0_9, %c0_10] : memref<256x256xf32, #tpu.memory_space<vmem>>, vector<256x128xf32>
    %c0_11 = arith.constant 0 : index
    %c0_12 = arith.constant 0 : index
    %16 = vector.load %arg4[%c0_11, %c0_12] : memref<128x128xbf16, #tpu.memory_space<vmem>>, vector<128x128xbf16>
    %17 = arith.truncf %15 : vector<256x128xf32> to vector<256x128xbf16>
    %cst_13 = arith.constant dense<0.000000e+00> : vector<256x128xf32>
    %18 = tpu.matmul %17, %16, %cst_13 {dimension_numbers = #tpu.dot_dimension_numbers<[1], [0], [0], [1], [0, 0, 1, 1], [], []>} : vector<256x128xbf16>, vector<128x128xbf16>, vector<256x128xf32> -> vector<256x128xf32>
    %c0_14 = arith.constant 0 : index
    %c0_15 = arith.constant 0 : index
    %19 = vector.load %arg5[%c0_14, %c0_15] : memref<1x128xf32, #tpu.memory_space<vmem>>, vector<1x128xf32>
    %20 = vector.broadcast %19 : vector<1x128xf32> to vector<256x128xf32>
    %21 = arith.addf %18, %20 : vector<256x128xf32>
    %22 = arith.negf %21 : vector<256x128xf32>
    %23 = math.exp %22 : vector<256x128xf32>
    %cst_16 = arith.constant 1.000000e+00 : f32
    %24 = vector.broadcast %cst_16 : f32 to vector<256x128xf32>
    %25 = arith.addf %24, %23 : vector<256x128xf32>
    %26 = arith.divf %24, %25 : vector<256x128xf32>
    %27 = arith.mulf %21, %26 : vector<256x128xf32>
    %cst_17 = arith.constant 0.000000e+00 : f32
    %28 = vector.broadcast %cst_17 : f32 to vector<24x128xf32>
    %c0_18 = arith.constant 0 : index
    %c0_19 = arith.constant 0 : index
    %29 = vector.load %arg14[%c0_18, %c0_19] : memref<304x128xf32, #tpu.memory_space<vmem>>, vector<24x128xf32>
    tpu.vector_store %arg14[%c0_18, %c0_19], %28 {strides = array<i32>} : memref<304x128xf32, #tpu.memory_space<vmem>>, vector<24x128xf32>,
    %cst_20 = arith.constant 0.000000e+00 : f32
    %30 = vector.broadcast %cst_20 : f32 to vector<24x128xf32>
    %c280 = arith.constant 280 : index
    %c0_21 = arith.constant 0 : index
    %31 = vector.load %arg14[%c280, %c0_21] : memref<304x128xf32, #tpu.memory_space<vmem>>, vector<24x128xf32>
    tpu.vector_store %arg14[%c280, %c0_21], %30 {strides = array<i32>} : memref<304x128xf32, #tpu.memory_space<vmem>>, vector<24x128xf32>,
    %32 = tpu.iota {dimensions = array<i32: 0>} : vector<256x1xi32>
    %c16_i32 = arith.constant 16 : i32
    %c0_i32 = arith.constant 0 : i32
    %33 = arith.cmpi eq, %c16_i32, %c0_i32 : i32
    %c1_i32 = arith.constant 1 : i32
    %34 = arith.select %33, %c1_i32, %c16_i32 : i32
    %35 = vector.broadcast %34 : i32 to vector<256x1xi32>
    %36 = arith.remsi %32, %35 : vector<256x1xi32>
    %c0_i32_22 = arith.constant 0 : i32
    %37 = vector.broadcast %c0_i32_22 : i32 to vector<256x1xi32>
    %38 = arith.cmpi ne, %36, %37 : vector<256x1xi32>
    %c0_i32_23 = arith.constant 0 : i32
    %39 = vector.broadcast %c0_i32_23 : i32 to vector<256x1xi32>
    %40 = arith.cmpi slt, %36, %39 : vector<256x1xi32>
    %c0_i32_24 = arith.constant 0 : i32
    %41 = arith.cmpi slt, %34, %c0_i32_24 : i32
    %42 = vector.broadcast %41 : i1 to vector<256x1xi1>
    %43 = vector.broadcast %42 : vector<256x1xi1> to vector<256x1xi1>
    %44 = arith.xori %40, %43 : vector<256x1xi1>
    %45 = arith.andi %44, %38 : vector<256x1xi1>
    %46 = vector.broadcast %34 : i32 to vector<256x1xi32>
    %47 = arith.addi %36, %46 : vector<256x1xi32>
    %48 = arith.select %45, %47, %36 : vector<256x1xi1>, vector<256x1xi32>
    %c0_i32_25 = arith.constant 0 : i32
    %49 = vector.broadcast %c0_i32_25 : i32 to vector<256x1xi32>
    %50 = arith.cmpi ne, %48, %49 : vector<256x1xi32>
    %c15_i32 = arith.constant 15 : i32
    %51 = vector.broadcast %c15_i32 : i32 to vector<256x1xi32>
    %52 = arith.cmpi ne, %48, %51 : vector<256x1xi32>
    %c24 = arith.constant 24 : index
    %c0_26 = arith.constant 0 : index
    %53 = vector.load %arg14[%c24, %c0_26] : memref<304x128xf32, #tpu.memory_space<vmem>>, vector<256x128xf32>
    tpu.vector_store %arg14[%c24, %c0_26], %27 {strides = array<i32>} : memref<304x128xf32, #tpu.memory_space<vmem>>, vector<256x128xf32>,
    %c1 = arith.constant 1 : index
    %c1_27 = arith.constant 1 : index
    %c0_28 = arith.constant 0 : index
    %c0_29 = arith.constant 0 : index
    %54 = vector.load %arg6[%c1, %c1_27, %c0_28, %c0_29] : memref<3x3x128x128xbf16, #tpu.memory_space<vmem>>, vector<1x1x128x128xbf16>
    %55 = vector.shape_cast %54 : vector<1x1x128x128xbf16> to vector<128x128xbf16>
    %56 = arith.truncf %27 : vector<256x128xf32> to vector<256x128xbf16>
    %cst_30 = arith.constant dense<0.000000e+00> : vector<256x128xf32>
    %57 = tpu.matmul %56, %55, %cst_30 {dimension_numbers = #tpu.dot_dimension_numbers<[1], [0], [0], [1], [0, 0, 1, 1], [], []>} : vector<256x128xbf16>, vector<128x128xbf16>, vector<256x128xf32> -> vector<256x128xf32>
    %c7 = arith.constant 7 : index
    %c0_31 = arith.constant 0 : index
    %58 = vector.load %arg14[%c7, %c0_31] : memref<304x128xf32, #tpu.memory_space<vmem>>, vector<256x128xf32>
    %cst_32 = arith.constant 0.000000e+00 : f32
    %59 = vector.shape_cast %50 : vector<256x1xi1> to vector<256x1xi1>
    %60 = vector.broadcast %59 : vector<256x1xi1> to vector<256x128xi1>
    %61 = vector.broadcast %cst_32 : f32 to vector<256x128xf32>
    %62 = arith.select %60, %58, %61 : vector<256x128xi1>, vector<256x128xf32>
    %c0_33 = arith.constant 0 : index
    %c0_34 = arith.constant 0 : index
    %c0_35 = arith.constant 0 : index
    %c0_36 = arith.constant 0 : index
    %63 = vector.load %arg6[%c0_33, %c0_34, %c0_35, %c0_36] : memref<3x3x128x128xbf16, #tpu.memory_space<vmem>>, vector<1x1x128x128xbf16>
    %64 = vector.shape_cast %63 : vector<1x1x128x128xbf16> to vector<128x128xbf16>
    %65 = arith.truncf %62 : vector<256x128xf32> to vector<256x128xbf16>
    %cst_37 = arith.constant dense<0.000000e+00> : vector<256x128xf32>
    %66 = tpu.matmul %65, %64, %cst_37 {dimension_numbers = #tpu.dot_dimension_numbers<[1], [0], [0], [1], [0, 0, 1, 1], [], []>} : vector<256x128xbf16>, vector<128x128xbf16>, vector<256x128xf32> -> vector<256x128xf32>
    %67 = arith.addf %57, %66 : vector<256x128xf32>
    %c8 = arith.constant 8 : index
    %c0_38 = arith.constant 0 : index
    %68 = vector.load %arg14[%c8, %c0_38] : memref<304x128xf32, #tpu.memory_space<vmem>>, vector<256x128xf32>
    %c0_39 = arith.constant 0 : index
    %c1_40 = arith.constant 1 : index
    %c0_41 = arith.constant 0 : index
    %c0_42 = arith.constant 0 : index
    %69 = vector.load %arg6[%c0_39, %c1_40, %c0_41, %c0_42] : memref<3x3x128x128xbf16, #tpu.memory_space<vmem>>, vector<1x1x128x128xbf16>
    %70 = vector.shape_cast %69 : vector<1x1x128x128xbf16> to vector<128x128xbf16>
    %71 = arith.truncf %68 : vector<256x128xf32> to vector<256x128xbf16>
    %cst_43 = arith.constant dense<0.000000e+00> : vector<256x128xf32>
    %72 = tpu.matmul %71, %70, %cst_43 {dimension_numbers = #tpu.dot_dimension_numbers<[1], [0], [0], [1], [0, 0, 1, 1], [], []>} : vector<256x128xbf16>, vector<128x128xbf16>, vector<256x128xf32> -> vector<256x128xf32>
    %73 = arith.addf %67, %72 : vector<256x128xf32>
    %c9 = arith.constant 9 : index
    %c0_44 = arith.constant 0 : index
    %74 = vector.load %arg14[%c9, %c0_44] : memref<304x128xf32, #tpu.memory_space<vmem>>, vector<256x128xf32>
    %cst_45 = arith.constant 0.000000e+00 : f32
    %75 = vector.shape_cast %52 : vector<256x1xi1> to vector<256x1xi1>
    %76 = vector.broadcast %75 : vector<256x1xi1> to vector<256x128xi1>
    %77 = vector.broadcast %cst_45 : f32 to vector<256x128xf32>
    %78 = arith.select %76, %74, %77 : vector<256x128xi1>, vector<256x128xf32>
    %c0_46 = arith.constant 0 : index
    %c2 = arith.constant 2 : index
    %c0_47 = arith.constant 0 : index
    %c0_48 = arith.constant 0 : index
    %79 = vector.load %arg6[%c0_46, %c2, %c0_47, %c0_48] : memref<3x3x128x128xbf16, #tpu.memory_space<vmem>>, vector<1x1x128x128xbf16>
    %80 = vector.shape_cast %79 : vector<1x1x128x128xbf16> to vector<128x128xbf16>
    %81 = arith.truncf %78 : vector<256x128xf32> to vector<256x128xbf16>
    %cst_49 = arith.constant dense<0.000000e+00> : vector<256x128xf32>
    %82 = tpu.matmul %81, %80, %cst_49 {dimension_numbers = #tpu.dot_dimension_numbers<[1], [0], [0], [1], [0, 0, 1, 1], [], []>} : vector<256x128xbf16>, vector<128x128xbf16>, vector<256x128xf32> -> vector<256x128xf32>
    %83 = arith.addf %73, %82 : vector<256x128xf32>
    %c23 = arith.constant 23 : index
    %c0_50 = arith.constant 0 : index
    %84 = vector.load %arg14[%c23, %c0_50] : memref<304x128xf32, #tpu.memory_space<vmem>>, vector<256x128xf32>
    %cst_51 = arith.constant 0.000000e+00 : f32
    %85 = vector.shape_cast %50 : vector<256x1xi1> to vector<256x1xi1>
    %86 = vector.broadcast %85 : vector<256x1xi1> to vector<256x128xi1>
    %87 = vector.broadcast %cst_51 : f32 to vector<256x128xf32>
    %88 = arith.select %86, %84, %87 : vector<256x128xi1>, vector<256x128xf32>
    %c1_52 = arith.constant 1 : index
    %c0_53 = arith.constant 0 : index
    %c0_54 = arith.constant 0 : index
    %c0_55 = arith.constant 0 : index
    %89 = vector.load %arg6[%c1_52, %c0_53, %c0_54, %c0_55] : memref<3x3x128x128xbf16, #tpu.memory_space<vmem>>, vector<1x1x128x128xbf16>
    %90 = vector.shape_cast %89 : vector<1x1x128x128xbf16> to vector<128x128xbf16>
    %91 = arith.truncf %88 : vector<256x128xf32> to vector<256x128xbf16>
    %cst_56 = arith.constant dense<0.000000e+00> : vector<256x128xf32>
    %92 = tpu.matmul %91, %90, %cst_56 {dimension_numbers = #tpu.dot_dimension_numbers<[1], [0], [0], [1], [0, 0, 1, 1], [], []>} : vector<256x128xbf16>, vector<128x128xbf16>, vector<256x128xf32> -> vector<256x128xf32>
    %93 = arith.addf %83, %92 : vector<256x128xf32>
    %c25 = arith.constant 25 : index
    %c0_57 = arith.constant 0 : index
    %94 = vector.load %arg14[%c25, %c0_57] : memref<304x128xf32, #tpu.memory_space<vmem>>, vector<256x128xf32>
    %cst_58 = arith.constant 0.000000e+00 : f32
    %95 = vector.shape_cast %52 : vector<256x1xi1> to vector<256x1xi1>
    %96 = vector.broadcast %95 : vector<256x1xi1> to vector<256x128xi1>
    %97 = vector.broadcast %cst_58 : f32 to vector<256x128xf32>
    %98 = arith.select %96, %94, %97 : vector<256x128xi1>, vector<256x128xf32>
    %c1_59 = arith.constant 1 : index
    %c2_60 = arith.constant 2 : index
    %c0_61 = arith.constant 0 : index
    %c0_62 = arith.constant 0 : index
    %99 = vector.load %arg6[%c1_59, %c2_60, %c0_61, %c0_62] : memref<3x3x128x128xbf16, #tpu.memory_space<vmem>>, vector<1x1x128x128xbf16>
    %100 = vector.shape_cast %99 : vector<1x1x128x128xbf16> to vector<128x128xbf16>
    %101 = arith.truncf %98 : vector<256x128xf32> to vector<256x128xbf16>
    %cst_63 = arith.constant dense<0.000000e+00> : vector<256x128xf32>
    %102 = tpu.matmul %101, %100, %cst_63 {dimension_numbers = #tpu.dot_dimension_numbers<[1], [0], [0], [1], [0, 0, 1, 1], [], []>} : vector<256x128xbf16>, vector<128x128xbf16>, vector<256x128xf32> -> vector<256x128xf32>
    %103 = arith.addf %93, %102 : vector<256x128xf32>
    %c39 = arith.constant 39 : index
    %c0_64 = arith.constant 0 : index
    %104 = vector.load %arg14[%c39, %c0_64] : memref<304x128xf32, #tpu.memory_space<vmem>>, vector<256x128xf32>
    %cst_65 = arith.constant 0.000000e+00 : f32
    %105 = vector.shape_cast %50 : vector<256x1xi1> to vector<256x1xi1>
    %106 = vector.broadcast %105 : vector<256x1xi1> to vector<256x128xi1>
    %107 = vector.broadcast %cst_65 : f32 to vector<256x128xf32>
    %108 = arith.select %106, %104, %107 : vector<256x128xi1>, vector<256x128xf32>
    %c2_66 = arith.constant 2 : index
    %c0_67 = arith.constant 0 : index
    %c0_68 = arith.constant 0 : index
    %c0_69 = arith.constant 0 : index
    %109 = vector.load %arg6[%c2_66, %c0_67, %c0_68, %c0_69] : memref<3x3x128x128xbf16, #tpu.memory_space<vmem>>, vector<1x1x128x128xbf16>
    %110 = vector.shape_cast %109 : vector<1x1x128x128xbf16> to vector<128x128xbf16>
    %111 = arith.truncf %108 : vector<256x128xf32> to vector<256x128xbf16>
    %cst_70 = arith.constant dense<0.000000e+00> : vector<256x128xf32>
    %112 = tpu.matmul %111, %110, %cst_70 {dimension_numbers = #tpu.dot_dimension_numbers<[1], [0], [0], [1], [0, 0, 1, 1], [], []>} : vector<256x128xbf16>, vector<128x128xbf16>, vector<256x128xf32> -> vector<256x128xf32>
    %113 = arith.addf %103, %112 : vector<256x128xf32>
    %c40 = arith.constant 40 : index
    %c0_71 = arith.constant 0 : index
    %114 = vector.load %arg14[%c40, %c0_71] : memref<304x128xf32, #tpu.memory_space<vmem>>, vector<256x128xf32>
    %c2_72 = arith.constant 2 : index
    %c1_73 = arith.constant 1 : index
    %c0_74 = arith.constant 0 : index
    %c0_75 = arith.constant 0 : index
    %115 = vector.load %arg6[%c2_72, %c1_73, %c0_74, %c0_75] : memref<3x3x128x128xbf16, #tpu.memory_space<vmem>>, vector<1x1x128x128xbf16>
    %116 = vector.shape_cast %115 : vector<1x1x128x128xbf16> to vector<128x128xbf16>
    %117 = arith.truncf %114 : vector<256x128xf32> to vector<256x128xbf16>
    %cst_76 = arith.constant dense<0.000000e+00> : vector<256x128xf32>
    %118 = tpu.matmul %117, %116, %cst_76 {dimension_numbers = #tpu.dot_dimension_numbers<[1], [0], [0], [1], [0, 0, 1, 1], [], []>} : vector<256x128xbf16>, vector<128x128xbf16>, vector<256x128xf32> -> vector<256x128xf32>
    %119 = arith.addf %113, %118 : vector<256x128xf32>
    %c41 = arith.constant 41 : index
    %c0_77 = arith.constant 0 : index
    %120 = vector.load %arg14[%c41, %c0_77] : memref<304x128xf32, #tpu.memory_space<vmem>>, vector<256x128xf32>
    %cst_78 = arith.constant 0.000000e+00 : f32
    %121 = vector.shape_cast %52 : vector<256x1xi1> to vector<256x1xi1>
    %122 = vector.broadcast %121 : vector<256x1xi1> to vector<256x128xi1>
    %123 = vector.broadcast %cst_78 : f32 to vector<256x128xf32>
    %124 = arith.select %122, %120, %123 : vector<256x128xi1>, vector<256x128xf32>
    %c2_79 = arith.constant 2 : index
    %c2_80 = arith.constant 2 : index
    %c0_81 = arith.constant 0 : index
    %c0_82 = arith.constant 0 : index
    %125 = vector.load %arg6[%c2_79, %c2_80, %c0_81, %c0_82] : memref<3x3x128x128xbf16, #tpu.memory_space<vmem>>, vector<1x1x128x128xbf16>
    %126 = vector.shape_cast %125 : vector<1x1x128x128xbf16> to vector<128x128xbf16>
    %127 = arith.truncf %124 : vector<256x128xf32> to vector<256x128xbf16>
    %cst_83 = arith.constant dense<0.000000e+00> : vector<256x128xf32>
    %128 = tpu.matmul %127, %126, %cst_83 {dimension_numbers = #tpu.dot_dimension_numbers<[1], [0], [0], [1], [0, 0, 1, 1], [], []>} : vector<256x128xbf16>, vector<128x128xbf16>, vector<256x128xf32> -> vector<256x128xf32>
    %129 = arith.addf %119, %128 : vector<256x128xf32>
    %c0_84 = arith.constant 0 : index
    %c0_85 = arith.constant 0 : index
    %130 = vector.load %arg7[%c0_84, %c0_85] : memref<1x128xf32, #tpu.memory_space<vmem>>, vector<1x128xf32>
    %131 = vector.broadcast %130 : vector<1x128xf32> to vector<256x128xf32>
    %132 = arith.addf %129, %131 : vector<256x128xf32>
    %133 = arith.negf %132 : vector<256x128xf32>
    %134 = math.exp %133 : vector<256x128xf32>
    %cst_86 = arith.constant 1.000000e+00 : f32
    %135 = vector.broadcast %cst_86 : f32 to vector<256x128xf32>
    %136 = arith.addf %135, %134 : vector<256x128xf32>
    %137 = arith.divf %135, %136 : vector<256x128xf32>
    %138 = arith.mulf %132, %137 : vector<256x128xf32>
    %139 = arith.addf %15, %138 : vector<256x128xf32>
    %c0_87 = arith.constant 0 : index
    %c0_88 = arith.constant 0 : index
    %140 = vector.load %arg8[%c0_87, %c0_88] : memref<128x128xbf16, #tpu.memory_space<vmem>>, vector<128x128xbf16>
    %141 = arith.truncf %139 : vector<256x128xf32> to vector<256x128xbf16>
    %cst_89 = arith.constant dense<0.000000e+00> : vector<256x128xf32>
    %142 = tpu.matmul %141, %140, %cst_89 {dimension_numbers = #tpu.dot_dimension_numbers<[1], [0], [0], [1], [0, 0, 1, 1], [], []>} : vector<256x128xbf16>, vector<128x128xbf16>, vector<256x128xf32> -> vector<256x128xf32>
    %c0_90 = arith.constant 0 : index
    %c0_91 = arith.constant 0 : index
    %143 = vector.load %arg9[%c0_90, %c0_91] : memref<1x128xf32, #tpu.memory_space<vmem>>, vector<1x128xf32>
    %144 = vector.broadcast %143 : vector<1x128xf32> to vector<256x128xf32>
    %145 = arith.addf %142, %144 : vector<256x128xf32>
    %146 = arith.negf %145 : vector<256x128xf32>
    %147 = math.exp %146 : vector<256x128xf32>
    %cst_92 = arith.constant 1.000000e+00 : f32
    %148 = vector.broadcast %cst_92 : f32 to vector<256x128xf32>
    %149 = arith.addf %148, %147 : vector<256x128xf32>
    %150 = arith.divf %148, %149 : vector<256x128xf32>
    %151 = arith.mulf %145, %150 : vector<256x128xf32>
    %c0_93 = arith.constant 0 : index
    %c0_94 = arith.constant 0 : index
    %152 = vector.load %arg13[%c0_93, %c0_94] : memref<256x256xf32, #tpu.memory_space<vmem>>, vector<256x128xf32>
    tpu.vector_store %arg13[%c0_93, %c0_94], %151 {strides = array<i32>} : memref<256x256xf32, #tpu.memory_space<vmem>>, vector<256x128xf32>,
    %c0_95 = arith.constant 0 : index
    %c0_96 = arith.constant 0 : index
    %153 = vector.load %arg13[%c0_95, %c0_96] : memref<256x256xf32, #tpu.memory_space<vmem>>, vector<256x256xf32>
    %c0_97 = arith.constant 0 : index
    %c0_98 = arith.constant 0 : index
    %154 = vector.load %arg10[%c0_97, %c0_98] : memref<256x128xbf16, #tpu.memory_space<vmem>>, vector<256x128xbf16>
    %155 = arith.truncf %153 : vector<256x256xf32> to vector<256x256xbf16>
    %cst_99 = arith.constant dense<0.000000e+00> : vector<256x128xf32>
    %156 = tpu.matmul %155, %154, %cst_99 {dimension_numbers = #tpu.dot_dimension_numbers<[1], [0], [0], [1], [0, 0, 1, 1], [], []>} : vector<256x256xbf16>, vector<256x128xbf16>, vector<256x128xf32> -> vector<256x128xf32>
    %c0_100 = arith.constant 0 : index
    %c0_101 = arith.constant 0 : index
    %157 = vector.load %arg11[%c0_100, %c0_101] : memref<1x128xf32, #tpu.memory_space<vmem>>, vector<1x128xf32>
    %158 = vector.broadcast %157 : vector<1x128xf32> to vector<256x128xf32>
    %159 = arith.addf %156, %158 : vector<256x128xf32>
    %160 = arith.negf %159 : vector<256x128xf32>
    %161 = math.exp %160 : vector<256x128xf32>
    %cst_102 = arith.constant 1.000000e+00 : f32
    %162 = vector.broadcast %cst_102 : f32 to vector<256x128xf32>
    %163 = arith.addf %162, %161 : vector<256x128xf32>
    %164 = arith.divf %162, %163 : vector<256x128xf32>
    %165 = arith.mulf %159, %164 : vector<256x128xf32>
    %166 = vector.shape_cast %165 : vector<256x128xf32> to vector<1x256x128xf32>
    %c0_103 = arith.constant 0 : index
    %c0_104 = arith.constant 0 : index
    %c0_105 = arith.constant 0 : index
    %167 = vector.load %arg12[%c0_103, %c0_104, %c0_105] : memref<1x256x128xf32, #tpu.memory_space<vmem>>, vector<1x256x128xf32>
    tpu.vector_store %arg12[%c0_103, %c0_104, %c0_105], %166 {strides = array<i32>} : memref<1x256x128xf32, #tpu.memory_space<vmem>>, vector<1x256x128xf32>,
    return
  }
  func.func @transform_0(%arg0: i32) -> (i32, i32, i32) {
    %c0_i32 = arith.constant 0 : i32
    %c0_i32_0 = arith.constant 0 : i32
    %c0_i32_1 = arith.constant 0 : i32
    return %arg0, %c0_i32, %c0_i32_0 : i32, i32, i32
  }
  func.func @transform_1(%arg0: i32) -> (i32, i32) {
    %c0_i32 = arith.constant 0 : i32
    %c0_i32_0 = arith.constant 0 : i32
    %c0_i32_1 = arith.constant 0 : i32
    return %c0_i32, %c0_i32_0 : i32, i32
  }
  func.func @transform_2(%arg0: i32) -> (i32, i32) {
    %c0_i32 = arith.constant 0 : i32
    %c0_i32_0 = arith.constant 0 : i32
    %c0_i32_1 = arith.constant 0 : i32
    return %c0_i32, %c0_i32_0 : i32, i32
  }
  func.func @transform_3(%arg0: i32) -> (i32, i32) {
    %c0_i32 = arith.constant 0 : i32
    %c0_i32_0 = arith.constant 0 : i32
    %c0_i32_1 = arith.constant 0 : i32
    return %c0_i32, %c0_i32_0 : i32, i32
  }
  func.func @transform_4(%arg0: i32) -> (i32, i32) {
    %c0_i32 = arith.constant 0 : i32
    %c0_i32_0 = arith.constant 0 : i32
    %c0_i32_1 = arith.constant 0 : i32
    return %c0_i32, %c0_i32_0 : i32, i32
  }
  func.func @transform_5(%arg0: i32) -> (i32, i32, i32, i32) {
    %c0_i32 = arith.constant 0 : i32
    %c0_i32_0 = arith.constant 0 : i32
    %c0_i32_1 = arith.constant 0 : i32
    %c0_i32_2 = arith.constant 0 : i32
    %c0_i32_3 = arith.constant 0 : i32
    return %c0_i32, %c0_i32_0, %c0_i32_1, %c0_i32_2 : i32, i32, i32, i32
  }
  func.func @transform_6(%arg0: i32) -> (i32, i32) {
    %c0_i32 = arith.constant 0 : i32
    %c0_i32_0 = arith.constant 0 : i32
    %c0_i32_1 = arith.constant 0 : i32
    return %c0_i32, %c0_i32_0 : i32, i32
  }
  func.func @transform_7(%arg0: i32) -> (i32, i32) {
    %c0_i32 = arith.constant 0 : i32
    %c0_i32_0 = arith.constant 0 : i32
    %c0_i32_1 = arith.constant 0 : i32
    return %c0_i32, %c0_i32_0 : i32, i32
  }
  func.func @transform_8(%arg0: i32) -> (i32, i32) {
    %c0_i32 = arith.constant 0 : i32
    %c0_i32_0 = arith.constant 0 : i32
    %c0_i32_1 = arith.constant 0 : i32
    return %c0_i32, %c0_i32_0 : i32, i32
  }
  func.func @transform_9(%arg0: i32) -> (i32, i32) {
    %c0_i32 = arith.constant 0 : i32
    %c0_i32_0 = arith.constant 0 : i32
    %c0_i32_1 = arith.constant 0 : i32
    return %c0_i32, %c0_i32_0 : i32, i32
  }
  func.func @transform_10(%arg0: i32) -> (i32, i32) {
    %c0_i32 = arith.constant 0 : i32
    %c0_i32_0 = arith.constant 0 : i32
    %c0_i32_1 = arith.constant 0 : i32
    return %c0_i32, %c0_i32_0 : i32, i32
  }
  func.func @transform_11(%arg0: i32) -> (i32, i32, i32) {
    %c0_i32 = arith.constant 0 : i32
    %c0_i32_0 = arith.constant 0 : i32
    %c0_i32_1 = arith.constant 0 : i32
    return %arg0, %c0_i32, %c0_i32_0 : i32, i32, i32
  }
}

module attributes {stable_mosaic.version = 11 : i64} {
  func.func @kernel(%arg0: i32, %arg1: memref<1x256x128xf32, #tpu.memory_space<vmem>>, %arg2: memref<128x256xbf16, #tpu.memory_space<vmem>>, %arg3: memref<1x256xf32, #tpu.memory_space<vmem>>, %arg4: memref<128x128xbf16, #tpu.memory_space<vmem>>, %arg5: memref<1x128xf32, #tpu.memory_space<vmem>>, %arg6: memref<3x3x128x128xbf16, #tpu.memory_space<vmem>>, %arg7: memref<1x128xf32, #tpu.memory_space<vmem>>, %arg8: memref<128x128xbf16, #tpu.memory_space<vmem>>, %arg9: memref<1x128xf32, #tpu.memory_space<vmem>>, %arg10: memref<256x128xbf16, #tpu.memory_space<vmem>>, %arg11: memref<1x128xf32, #tpu.memory_space<vmem>>, %arg12: memref<1x256x128xf32, #tpu.memory_space<vmem>>, %arg13: memref<256x256xf32, #tpu.memory_space<vmem>>, %arg14: memref<304x128xf32, #tpu.memory_space<vmem>>) attributes {dimension_semantics = [#tpu.dimension_semantics<parallel>], iteration_bounds = array<i64: 2>, scalar_prefetch = 0 : i64, scratch_operands = 2 : i64, tpu.core_type = #tpu.core_type<tc>, window_params = [{transform_indices = @transform_0, window_bounds = array<i64: 1, 256, 128>}, {pipeline_mode = #tpu.pipeline_mode<synchronous>, transform_indices = @transform_1, window_bounds = array<i64: 128, 256>}, {pipeline_mode = #tpu.pipeline_mode<synchronous>, transform_indices = @transform_2, window_bounds = array<i64: 1, 256>}, {pipeline_mode = #tpu.pipeline_mode<synchronous>, transform_indices = @transform_3, window_bounds = array<i64: 128, 128>}, {pipeline_mode = #tpu.pipeline_mode<synchronous>, transform_indices = @transform_4, window_bounds = array<i64: 1, 128>}, {pipeline_mode = #tpu.pipeline_mode<synchronous>, transform_indices = @transform_5, window_bounds = array<i64: 3, 3, 128, 128>}, {pipeline_mode = #tpu.pipeline_mode<synchronous>, transform_indices = @transform_6, window_bounds = array<i64: 1, 128>}, {pipeline_mode = #tpu.pipeline_mode<synchronous>, transform_indices = @transform_7, window_bounds = array<i64: 128, 128>}, {pipeline_mode = #tpu.pipeline_mode<synchronous>, transform_indices = @transform_8, window_bounds = array<i64: 1, 128>}, {pipeline_mode = #tpu.pipeline_mode<synchronous>, transform_indices = @transform_9, window_bounds = array<i64: 256, 128>}, {pipeline_mode = #tpu.pipeline_mode<synchronous>, transform_indices = @transform_10, window_bounds = array<i64: 1, 128>}, {transform_indices = @transform_11, window_bounds = array<i64: 1, 256, 128>}]} {
    %c0 = arith.constant 0 : index
    %c0_0 = arith.constant 0 : index
    %c0_1 = arith.constant 0 : index
    %0 = vector.load %arg1[%c0, %c0_0, %c0_1] : memref<1x256x128xf32, #tpu.memory_space<vmem>>, vector<1x256x128xf32>
    %1 = vector.shape_cast %0 : vector<1x256x128xf32> to vector<256x128xf32>
    %c0_2 = arith.constant 0 : index
    %c0_3 = arith.constant 0 : index
    %2 = vector.load %arg2[%c0_2, %c0_3] : memref<128x256xbf16, #tpu.memory_space<vmem>>, vector<128x256xbf16>
    %3 = arith.truncf %1 : vector<256x128xf32> to vector<256x128xbf16>
    %cst = arith.constant dense<0.000000e+00> : vector<256x256xf32>
    %4 = tpu.matmul %3, %2, %cst {dimension_numbers = #tpu.dot_dimension_numbers<[1], [0], [0], [1], [0, 0, 1, 1], [], []>} : vector<256x128xbf16>, vector<128x256xbf16>, vector<256x256xf32> -> vector<256x256xf32>
    %c0_4 = arith.constant 0 : index
    %c0_5 = arith.constant 0 : index
    %5 = vector.load %arg3[%c0_4, %c0_5] : memref<1x256xf32, #tpu.memory_space<vmem>>, vector<1x256xf32>
    %6 = vector.broadcast %5 : vector<1x256xf32> to vector<256x256xf32>
    %7 = arith.addf %4, %6 : vector<256x256xf32>
    %8 = arith.negf %7 : vector<256x256xf32>
    %9 = math.exp %8 : vector<256x256xf32>
    %cst_6 = arith.constant 1.000000e+00 : f32
    %10 = vector.broadcast %cst_6 : f32 to vector<256x256xf32>
    %11 = arith.addf %10, %9 : vector<256x256xf32>
    %12 = arith.divf %10, %11 : vector<256x256xf32>
    %13 = arith.mulf %7, %12 : vector<256x256xf32>
    %c0_7 = arith.constant 0 : index
    %c0_8 = arith.constant 0 : index
    %14 = vector.load %arg13[%c0_7, %c0_8] : memref<256x256xf32, #tpu.memory_space<vmem>>, vector<256x256xf32>
    tpu.vector_store %arg13[%c0_7, %c0_8], %13 {strides = array<i32>} : memref<256x256xf32, #tpu.memory_space<vmem>>, vector<256x256xf32>,
    %c0_9 = arith.constant 0 : index
    %c0_10 = arith.constant 0 : index
    %15 = vector.load %arg13[%c0_9, %c0_10] : memref<256x256xf32, #tpu.memory_space<vmem>>, vector<256x128xf32>
    %c0_11 = arith.constant 0 : index
    %c0_12 = arith.constant 0 : index
    %16 = vector.load %arg4[%c0_11, %c0_12] : memref<128x128xbf16, #tpu.memory_space<vmem>>, vector<128x128xbf16>
    %17 = arith.truncf %15 : vector<256x128xf32> to vector<256x128xbf16>
    %cst_13 = arith.constant dense<0.000000e+00> : vector<256x128xf32>
    %18 = tpu.matmul %17, %16, %cst_13 {dimension_numbers = #tpu.dot_dimension_numbers<[1], [0], [0], [1], [0, 0, 1, 1], [], []>} : vector<256x128xbf16>, vector<128x128xbf16>, vector<256x128xf32> -> vector<256x128xf32>
    %c0_14 = arith.constant 0 : index
    %c0_15 = arith.constant 0 : index
    %19 = vector.load %arg5[%c0_14, %c0_15] : memref<1x128xf32, #tpu.memory_space<vmem>>, vector<1x128xf32>
    %20 = vector.broadcast %19 : vector<1x128xf32> to vector<256x128xf32>
    %21 = arith.addf %18, %20 : vector<256x128xf32>
    %22 = arith.negf %21 : vector<256x128xf32>
    %23 = math.exp %22 : vector<256x128xf32>
    %cst_16 = arith.constant 1.000000e+00 : f32
    %24 = vector.broadcast %cst_16 : f32 to vector<256x128xf32>
    %25 = arith.addf %24, %23 : vector<256x128xf32>
    %26 = arith.divf %24, %25 : vector<256x128xf32>
    %27 = arith.mulf %21, %26 : vector<256x128xf32>
    %cst_17 = arith.constant 0.000000e+00 : f32
    %28 = vector.broadcast %cst_17 : f32 to vector<24x128xf32>
    %c0_18 = arith.constant 0 : index
    %c0_19 = arith.constant 0 : index
    %29 = vector.load %arg14[%c0_18, %c0_19] : memref<304x128xf32, #tpu.memory_space<vmem>>, vector<24x128xf32>
    tpu.vector_store %arg14[%c0_18, %c0_19], %28 {strides = array<i32>} : memref<304x128xf32, #tpu.memory_space<vmem>>, vector<24x128xf32>,
    %cst_20 = arith.constant 0.000000e+00 : f32
    %30 = vector.broadcast %cst_20 : f32 to vector<24x128xf32>
    %c280 = arith.constant 280 : index
    %c0_21 = arith.constant 0 : index
    %31 = vector.load %arg14[%c280, %c0_21] : memref<304x128xf32, #tpu.memory_space<vmem>>, vector<24x128xf32>
    tpu.vector_store %arg14[%c280, %c0_21], %30 {strides = array<i32>} : memref<304x128xf32, #tpu.memory_space<vmem>>, vector<24x128xf32>,
    %32 = tpu.iota {dimensions = array<i32: 0>} : vector<256x1xi32>
    %c16_i32 = arith.constant 16 : i32
    %c0_i32 = arith.constant 0 : i32
    %33 = arith.cmpi eq, %c16_i32, %c0_i32 : i32
    %c1_i32 = arith.constant 1 : i32
    %34 = arith.select %33, %c1_i32, %c16_i32 : i32
    %35 = vector.broadcast %34 : i32 to vector<256x1xi32>
    %36 = arith.remsi %32, %35 : vector<256x1xi32>
    %c0_i32_22 = arith.constant 0 : i32
    %37 = vector.broadcast %c0_i32_22 : i32 to vector<256x1xi32>
    %38 = arith.cmpi ne, %36, %37 : vector<256x1xi32>
    %c0_i32_23 = arith.constant 0 : i32
    %39 = vector.broadcast %c0_i32_23 : i32 to vector<256x1xi32>
    %40 = arith.cmpi slt, %36, %39 : vector<256x1xi32>
    %c0_i32_24 = arith.constant 0 : i32
    %41 = arith.cmpi slt, %34, %c0_i32_24 : i32
    %42 = vector.broadcast %41 : i1 to vector<256x1xi1>
    %43 = vector.broadcast %42 : vector<256x1xi1> to vector<256x1xi1>
    %44 = arith.xori %40, %43 : vector<256x1xi1>
    %45 = arith.andi %44, %38 : vector<256x1xi1>
    %46 = vector.broadcast %34 : i32 to vector<256x1xi32>
    %47 = arith.addi %36, %46 : vector<256x1xi32>
    %48 = arith.select %45, %47, %36 : vector<256x1xi1>, vector<256x1xi32>
    %c0_i32_25 = arith.constant 0 : i32
    %49 = vector.broadcast %c0_i32_25 : i32 to vector<256x1xi32>
    %50 = arith.cmpi ne, %48, %49 : vector<256x1xi32>
    %c15_i32 = arith.constant 15 : i32
    %51 = vector.broadcast %c15_i32 : i32 to vector<256x1xi32>
    %52 = arith.cmpi ne, %48, %51 : vector<256x1xi32>
    %c24 = arith.constant 24 : index
    %c0_26 = arith.constant 0 : index
    %53 = vector.load %arg14[%c24, %c0_26] : memref<304x128xf32, #tpu.memory_space<vmem>>, vector<256x128xf32>
    tpu.vector_store %arg14[%c24, %c0_26], %27 {strides = array<i32>} : memref<304x128xf32, #tpu.memory_space<vmem>>, vector<256x128xf32>,
    %c1 = arith.constant 1 : index
    %c1_27 = arith.constant 1 : index
    %c0_28 = arith.constant 0 : index
    %c0_29 = arith.constant 0 : index
    %54 = vector.load %arg6[%c1, %c1_27, %c0_28, %c0_29] : memref<3x3x128x128xbf16, #tpu.memory_space<vmem>>, vector<1x1x128x128xbf16>
    %55 = vector.shape_cast %54 : vector<1x1x128x128xbf16> to vector<128x128xbf16>
    %56 = arith.truncf %27 : vector<256x128xf32> to vector<256x128xbf16>
    %cst_30 = arith.constant dense<0.000000e+00> : vector<256x128xf32>
    %57 = tpu.matmul %56, %55, %cst_30 {dimension_numbers = #tpu.dot_dimension_numbers<[1], [0], [0], [1], [0, 0, 1, 1], [], []>} : vector<256x128xbf16>, vector<128x128xbf16>, vector<256x128xf32> -> vector<256x128xf32>
    %c7 = arith.constant 7 : index
    %c0_31 = arith.constant 0 : index
    %58 = vector.load %arg14[%c7, %c0_31] : memref<304x128xf32, #tpu.memory_space<vmem>>, vector<256x128xf32>
    %cst_32 = arith.constant 0.000000e+00 : f32
    %59 = vector.shape_cast %50 : vector<256x1xi1> to vector<256x1xi1>
    %60 = vector.broadcast %59 : vector<256x1xi1> to vector<256x128xi1>
    %61 = vector.broadcast %cst_32 : f32 to vector<256x128xf32>
    %62 = arith.select %60, %58, %61 : vector<256x128xi1>, vector<256x128xf32>
    %c0_33 = arith.constant 0 : index
    %c0_34 = arith.constant 0 : index
    %c0_35 = arith.constant 0 : index
    %c0_36 = arith.constant 0 : index
    %63 = vector.load %arg6[%c0_33, %c0_34, %c0_35, %c0_36] : memref<3x3x128x128xbf16, #tpu.memory_space<vmem>>, vector<1x1x128x128xbf16>
    %64 = vector.shape_cast %63 : vector<1x1x128x128xbf16> to vector<128x128xbf16>
    %65 = arith.truncf %62 : vector<256x128xf32> to vector<256x128xbf16>
    %cst_37 = arith.constant dense<0.000000e+00> : vector<256x128xf32>
    %66 = tpu.matmul %65, %64, %cst_37 {dimension_numbers = #tpu.dot_dimension_numbers<[1], [0], [0], [1], [0, 0, 1, 1], [], []>} : vector<256x128xbf16>, vector<128x128xbf16>, vector<256x128xf32> -> vector<256x128xf32>
    %67 = arith.addf %57, %66 : vector<256x128xf32>
    %c8 = arith.constant 8 : index
    %c0_38 = arith.constant 0 : index
    %68 = vector.load %arg14[%c8, %c0_38] : memref<304x128xf32, #tpu.memory_space<vmem>>, vector<256x128xf32>
    %c0_39 = arith.constant 0 : index
    %c1_40 = arith.constant 1 : index
    %c0_41 = arith.constant 0 : index
    %c0_42 = arith.constant 0 : index
    %69 = vector.load %arg6[%c0_39, %c1_40, %c0_41, %c0_42] : memref<3x3x128x128xbf16, #tpu.memory_space<vmem>>, vector<1x1x128x128xbf16>
    %70 = vector.shape_cast %69 : vector<1x1x128x128xbf16> to vector<128x128xbf16>
    %71 = arith.truncf %68 : vector<256x128xf32> to vector<256x128xbf16>
    %cst_43 = arith.constant dense<0.000000e+00> : vector<256x128xf32>
    %72 = tpu.matmul %71, %70, %cst_43 {dimension_numbers = #tpu.dot_dimension_numbers<[1], [0], [0], [1], [0, 0, 1, 1], [], []>} : vector<256x128xbf16>, vector<128x128xbf16>, vector<256x128xf32> -> vector<256x128xf32>
    %73 = arith.addf %67, %72 : vector<256x128xf32>
    %c9 = arith.constant 9 : index
    %c0_44 = arith.constant 0 : index
    %74 = vector.load %arg14[%c9, %c0_44] : memref<304x128xf32, #tpu.memory_space<vmem>>, vector<256x128xf32>
    %cst_45 = arith.constant 0.000000e+00 : f32
    %75 = vector.shape_cast %52 : vector<256x1xi1> to vector<256x1xi1>
    %76 = vector.broadcast %75 : vector<256x1xi1> to vector<256x128xi1>
    %77 = vector.broadcast %cst_45 : f32 to vector<256x128xf32>
    %78 = arith.select %76, %74, %77 : vector<256x128xi1>, vector<256x128xf32>
    %c0_46 = arith.constant 0 : index
    %c2 = arith.constant 2 : index
    %c0_47 = arith.constant 0 : index
    %c0_48 = arith.constant 0 : index
    %79 = vector.load %arg6[%c0_46, %c2, %c0_47, %c0_48] : memref<3x3x128x128xbf16, #tpu.memory_space<vmem>>, vector<1x1x128x128xbf16>
    %80 = vector.shape_cast %79 : vector<1x1x128x128xbf16> to vector<128x128xbf16>
    %81 = arith.truncf %78 : vector<256x128xf32> to vector<256x128xbf16>
    %cst_49 = arith.constant dense<0.000000e+00> : vector<256x128xf32>
    %82 = tpu.matmul %81, %80, %cst_49 {dimension_numbers = #tpu.dot_dimension_numbers<[1], [0], [0], [1], [0, 0, 1, 1], [], []>} : vector<256x128xbf16>, vector<128x128xbf16>, vector<256x128xf32> -> vector<256x128xf32>
    %83 = arith.addf %73, %82 : vector<256x128xf32>
    %c23 = arith.constant 23 : index
    %c0_50 = arith.constant 0 : index
    %84 = vector.load %arg14[%c23, %c0_50] : memref<304x128xf32, #tpu.memory_space<vmem>>, vector<256x128xf32>
    %cst_51 = arith.constant 0.000000e+00 : f32
    %85 = vector.shape_cast %50 : vector<256x1xi1> to vector<256x1xi1>
    %86 = vector.broadcast %85 : vector<256x1xi1> to vector<256x128xi1>
    %87 = vector.broadcast %cst_51 : f32 to vector<256x128xf32>
    %88 = arith.select %86, %84, %87 : vector<256x128xi1>, vector<256x128xf32>
    %c1_52 = arith.constant 1 : index
    %c0_53 = arith.constant 0 : index
    %c0_54 = arith.constant 0 : index
    %c0_55 = arith.constant 0 : index
    %89 = vector.load %arg6[%c1_52, %c0_53, %c0_54, %c0_55] : memref<3x3x128x128xbf16, #tpu.memory_space<vmem>>, vector<1x1x128x128xbf16>
    %90 = vector.shape_cast %89 : vector<1x1x128x128xbf16> to vector<128x128xbf16>
    %91 = arith.truncf %88 : vector<256x128xf32> to vector<256x128xbf16>
    %cst_56 = arith.constant dense<0.000000e+00> : vector<256x128xf32>
    %92 = tpu.matmul %91, %90, %cst_56 {dimension_numbers = #tpu.dot_dimension_numbers<[1], [0], [0], [1], [0, 0, 1, 1], [], []>} : vector<256x128xbf16>, vector<128x128xbf16>, vector<256x128xf32> -> vector<256x128xf32>
    %93 = arith.addf %83, %92 : vector<256x128xf32>
    %c25 = arith.constant 25 : index
    %c0_57 = arith.constant 0 : index
    %94 = vector.load %arg14[%c25, %c0_57] : memref<304x128xf32, #tpu.memory_space<vmem>>, vector<256x128xf32>
    %cst_58 = arith.constant 0.000000e+00 : f32
    %95 = vector.shape_cast %52 : vector<256x1xi1> to vector<256x1xi1>
    %96 = vector.broadcast %95 : vector<256x1xi1> to vector<256x128xi1>
    %97 = vector.broadcast %cst_58 : f32 to vector<256x128xf32>
    %98 = arith.select %96, %94, %97 : vector<256x128xi1>, vector<256x128xf32>
    %c1_59 = arith.constant 1 : index
    %c2_60 = arith.constant 2 : index
    %c0_61 = arith.constant 0 : index
    %c0_62 = arith.constant 0 : index
    %99 = vector.load %arg6[%c1_59, %c2_60, %c0_61, %c0_62] : memref<3x3x128x128xbf16, #tpu.memory_space<vmem>>, vector<1x1x128x128xbf16>
    %100 = vector.shape_cast %99 : vector<1x1x128x128xbf16> to vector<128x128xbf16>
    %101 = arith.truncf %98 : vector<256x128xf32> to vector<256x128xbf16>
    %cst_63 = arith.constant dense<0.000000e+00> : vector<256x128xf32>
    %102 = tpu.matmul %101, %100, %cst_63 {dimension_numbers = #tpu.dot_dimension_numbers<[1], [0], [0], [1], [0, 0, 1, 1], [], []>} : vector<256x128xbf16>, vector<128x128xbf16>, vector<256x128xf32> -> vector<256x128xf32>
    %103 = arith.addf %93, %102 : vector<256x128xf32>
    %c39 = arith.constant 39 : index
    %c0_64 = arith.constant 0 : index
    %104 = vector.load %arg14[%c39, %c0_64] : memref<304x128xf32, #tpu.memory_space<vmem>>, vector<256x128xf32>
    %cst_65 = arith.constant 0.000000e+00 : f32
    %105 = vector.shape_cast %50 : vector<256x1xi1> to vector<256x1xi1>
    %106 = vector.broadcast %105 : vector<256x1xi1> to vector<256x128xi1>
    %107 = vector.broadcast %cst_65 : f32 to vector<256x128xf32>
    %108 = arith.select %106, %104, %107 : vector<256x128xi1>, vector<256x128xf32>
    %c2_66 = arith.constant 2 : index
    %c0_67 = arith.constant 0 : index
    %c0_68 = arith.constant 0 : index
    %c0_69 = arith.constant 0 : index
    %109 = vector.load %arg6[%c2_66, %c0_67, %c0_68, %c0_69] : memref<3x3x128x128xbf16, #tpu.memory_space<vmem>>, vector<1x1x128x128xbf16>
    %110 = vector.shape_cast %109 : vector<1x1x128x128xbf16> to vector<128x128xbf16>
    %111 = arith.truncf %108 : vector<256x128xf32> to vector<256x128xbf16>
    %cst_70 = arith.constant dense<0.000000e+00> : vector<256x128xf32>
    %112 = tpu.matmul %111, %110, %cst_70 {dimension_numbers = #tpu.dot_dimension_numbers<[1], [0], [0], [1], [0, 0, 1, 1], [], []>} : vector<256x128xbf16>, vector<128x128xbf16>, vector<256x128xf32> -> vector<256x128xf32>
    %113 = arith.addf %103, %112 : vector<256x128xf32>
    %c40 = arith.constant 40 : index
    %c0_71 = arith.constant 0 : index
    %114 = vector.load %arg14[%c40, %c0_71] : memref<304x128xf32, #tpu.memory_space<vmem>>, vector<256x128xf32>
    %c2_72 = arith.constant 2 : index
    %c1_73 = arith.constant 1 : index
    %c0_74 = arith.constant 0 : index
    %c0_75 = arith.constant 0 : index
    %115 = vector.load %arg6[%c2_72, %c1_73, %c0_74, %c0_75] : memref<3x3x128x128xbf16, #tpu.memory_space<vmem>>, vector<1x1x128x128xbf16>
    %116 = vector.shape_cast %115 : vector<1x1x128x128xbf16> to vector<128x128xbf16>
    %117 = arith.truncf %114 : vector<256x128xf32> to vector<256x128xbf16>
    %cst_76 = arith.constant dense<0.000000e+00> : vector<256x128xf32>
    %118 = tpu.matmul %117, %116, %cst_76 {dimension_numbers = #tpu.dot_dimension_numbers<[1], [0], [0], [1], [0, 0, 1, 1], [], []>} : vector<256x128xbf16>, vector<128x128xbf16>, vector<256x128xf32> -> vector<256x128xf32>
    %119 = arith.addf %113, %118 : vector<256x128xf32>
    %c41 = arith.constant 41 : index
    %c0_77 = arith.constant 0 : index
    %120 = vector.load %arg14[%c41, %c0_77] : memref<304x128xf32, #tpu.memory_space<vmem>>, vector<256x128xf32>
    %cst_78 = arith.constant 0.000000e+00 : f32
    %121 = vector.shape_cast %52 : vector<256x1xi1> to vector<256x1xi1>
    %122 = vector.broadcast %121 : vector<256x1xi1> to vector<256x128xi1>
    %123 = vector.broadcast %cst_78 : f32 to vector<256x128xf32>
    %124 = arith.select %122, %120, %123 : vector<256x128xi1>, vector<256x128xf32>
    %c2_79 = arith.constant 2 : index
    %c2_80 = arith.constant 2 : index
    %c0_81 = arith.constant 0 : index
    %c0_82 = arith.constant 0 : index
    %125 = vector.load %arg6[%c2_79, %c2_80, %c0_81, %c0_82] : memref<3x3x128x128xbf16, #tpu.memory_space<vmem>>, vector<1x1x128x128xbf16>
    %126 = vector.shape_cast %125 : vector<1x1x128x128xbf16> to vector<128x128xbf16>
    %127 = arith.truncf %124 : vector<256x128xf32> to vector<256x128xbf16>
    %cst_83 = arith.constant dense<0.000000e+00> : vector<256x128xf32>
    %128 = tpu.matmul %127, %126, %cst_83 {dimension_numbers = #tpu.dot_dimension_numbers<[1], [0], [0], [1], [0, 0, 1, 1], [], []>} : vector<256x128xbf16>, vector<128x128xbf16>, vector<256x128xf32> -> vector<256x128xf32>
    %129 = arith.addf %119, %128 : vector<256x128xf32>
    %c0_84 = arith.constant 0 : index
    %c0_85 = arith.constant 0 : index
    %130 = vector.load %arg7[%c0_84, %c0_85] : memref<1x128xf32, #tpu.memory_space<vmem>>, vector<1x128xf32>
    %131 = vector.broadcast %130 : vector<1x128xf32> to vector<256x128xf32>
    %132 = arith.addf %129, %131 : vector<256x128xf32>
    %133 = arith.negf %132 : vector<256x128xf32>
    %134 = math.exp %133 : vector<256x128xf32>
    %cst_86 = arith.constant 1.000000e+00 : f32
    %135 = vector.broadcast %cst_86 : f32 to vector<256x128xf32>
    %136 = arith.addf %135, %134 : vector<256x128xf32>
    %137 = arith.divf %135, %136 : vector<256x128xf32>
    %138 = arith.mulf %132, %137 : vector<256x128xf32>
    %139 = arith.addf %15, %138 : vector<256x128xf32>
    %c0_87 = arith.constant 0 : index
    %c0_88 = arith.constant 0 : index
    %140 = vector.load %arg8[%c0_87, %c0_88] : memref<128x128xbf16, #tpu.memory_space<vmem>>, vector<128x128xbf16>
    %141 = arith.truncf %139 : vector<256x128xf32> to vector<256x128xbf16>
    %cst_89 = arith.constant dense<0.000000e+00> : vector<256x128xf32>
    %142 = tpu.matmul %141, %140, %cst_89 {dimension_numbers = #tpu.dot_dimension_numbers<[1], [0], [0], [1], [0, 0, 1, 1], [], []>} : vector<256x128xbf16>, vector<128x128xbf16>, vector<256x128xf32> -> vector<256x128xf32>
    %c0_90 = arith.constant 0 : index
    %c0_91 = arith.constant 0 : index
    %143 = vector.load %arg9[%c0_90, %c0_91] : memref<1x128xf32, #tpu.memory_space<vmem>>, vector<1x128xf32>
    %144 = vector.broadcast %143 : vector<1x128xf32> to vector<256x128xf32>
    %145 = arith.addf %142, %144 : vector<256x128xf32>
    %146 = arith.negf %145 : vector<256x128xf32>
    %147 = math.exp %146 : vector<256x128xf32>
    %cst_92 = arith.constant 1.000000e+00 : f32
    %148 = vector.broadcast %cst_92 : f32 to vector<256x128xf32>
    %149 = arith.addf %148, %147 : vector<256x128xf32>
    %150 = arith.divf %148, %149 : vector<256x128xf32>
    %151 = arith.mulf %145, %150 : vector<256x128xf32>
    %c0_93 = arith.constant 0 : index
    %c0_94 = arith.constant 0 : index
    %152 = vector.load %arg13[%c0_93, %c0_94] : memref<256x256xf32, #tpu.memory_space<vmem>>, vector<256x128xf32>
    tpu.vector_store %arg13[%c0_93, %c0_94], %151 {strides = array<i32>} : memref<256x256xf32, #tpu.memory_space<vmem>>, vector<256x128xf32>,
    %c0_95 = arith.constant 0 : index
    %c0_96 = arith.constant 0 : index
    %153 = vector.load %arg13[%c0_95, %c0_96] : memref<256x256xf32, #tpu.memory_space<vmem>>, vector<256x256xf32>
    %c0_97 = arith.constant 0 : index
    %c0_98 = arith.constant 0 : index
    %154 = vector.load %arg10[%c0_97, %c0_98] : memref<256x128xbf16, #tpu.memory_space<vmem>>, vector<256x128xbf16>
    %155 = arith.truncf %153 : vector<256x256xf32> to vector<256x256xbf16>
    %cst_99 = arith.constant dense<0.000000e+00> : vector<256x128xf32>
    %156 = tpu.matmul %155, %154, %cst_99 {dimension_numbers = #tpu.dot_dimension_numbers<[1], [0], [0], [1], [0, 0, 1, 1], [], []>} : vector<256x256xbf16>, vector<256x128xbf16>, vector<256x128xf32> -> vector<256x128xf32>
    %c0_100 = arith.constant 0 : index
    %c0_101 = arith.constant 0 : index
    %157 = vector.load %arg11[%c0_100, %c0_101] : memref<1x128xf32, #tpu.memory_space<vmem>>, vector<1x128xf32>
    %158 = vector.broadcast %157 : vector<1x128xf32> to vector<256x128xf32>
    %159 = arith.addf %156, %158 : vector<256x128xf32>
    %160 = arith.negf %159 : vector<256x128xf32>
    %161 = math.exp %160 : vector<256x128xf32>
    %cst_102 = arith.constant 1.000000e+00 : f32
    %162 = vector.broadcast %cst_102 : f32 to vector<256x128xf32>
    %163 = arith.addf %162, %161 : vector<256x128xf32>
    %164 = arith.divf %162, %163 : vector<256x128xf32>
    %165 = arith.mulf %159, %164 : vector<256x128xf32>
    %166 = vector.shape_cast %165 : vector<256x128xf32> to vector<1x256x128xf32>
    %c0_103 = arith.constant 0 : index
    %c0_104 = arith.constant 0 : index
    %c0_105 = arith.constant 0 : index
    %167 = vector.load %arg12[%c0_103, %c0_104, %c0_105] : memref<1x256x128xf32, #tpu.memory_space<vmem>>, vector<1x256x128xf32>
    tpu.vector_store %arg12[%c0_103, %c0_104, %c0_105], %166 {strides = array<i32>} : memref<1x256x128xf32, #tpu.memory_space<vmem>>, vector<1x256x128xf32>,
    return
  }
  func.func @transform_0(%arg0: i32) -> (i32, i32, i32) {
    %c0_i32 = arith.constant 0 : i32
    %c0_i32_0 = arith.constant 0 : i32
    %c0_i32_1 = arith.constant 0 : i32
    return %arg0, %c0_i32, %c0_i32_0 : i32, i32, i32
  }
  func.func @transform_1(%arg0: i32) -> (i32, i32) {
    %c0_i32 = arith.constant 0 : i32
    %c0_i32_0 = arith.constant 0 : i32
    %c0_i32_1 = arith.constant 0 : i32
    return %c0_i32, %c0_i32_0 : i32, i32
  }
  func.func @transform_2(%arg0: i32) -> (i32, i32) {
    %c0_i32 = arith.constant 0 : i32
    %c0_i32_0 = arith.constant 0 : i32
    %c0_i32_1 = arith.constant 0 : i32
    return %c0_i32, %c0_i32_0 : i32, i32
  }
  func.func @transform_3(%arg0: i32) -> (i32, i32) {
    %c0_i32 = arith.constant 0 : i32
    %c0_i32_0 = arith.constant 0 : i32
    %c0_i32_1 = arith.constant 0 : i32
    return %c0_i32, %c0_i32_0 : i32, i32
  }
  func.func @transform_4(%arg0: i32) -> (i32, i32) {
    %c0_i32 = arith.constant 0 : i32
    %c0_i32_0 = arith.constant 0 : i32
    %c0_i32_1 = arith.constant 0 : i32
    return %c0_i32, %c0_i32_0 : i32, i32
  }
  func.func @transform_5(%arg0: i32) -> (i32, i32, i32, i32) {
    %c0_i32 = arith.constant 0 : i32
    %c0_i32_0 = arith.constant 0 : i32
    %c0_i32_1 = arith.constant 0 : i32
    %c0_i32_2 = arith.constant 0 : i32
    %c0_i32_3 = arith.constant 0 : i32
    return %c0_i32, %c0_i32_0, %c0_i32_1, %c0_i32_2 : i32, i32, i32, i32
  }
  func.func @transform_6(%arg0: i32) -> (i32, i32) {
    %c0_i32 = arith.constant 0 : i32
    %c0_i32_0 = arith.constant 0 : i32
    %c0_i32_1 = arith.constant 0 : i32
    return %c0_i32, %c0_i32_0 : i32, i32
  }
  func.func @transform_7(%arg0: i32) -> (i32, i32) {
    %c0_i32 = arith.constant 0 : i32
    %c0_i32_0 = arith.constant 0 : i32
    %c0_i32_1 = arith.constant 0 : i32
    return %c0_i32, %c0_i32_0 : i32, i32
  }
  func.func @transform_8(%arg0: i32) -> (i32, i32) {
    %c0_i32 = arith.constant 0 : i32
    %c0_i32_0 = arith.constant 0 : i32
    %c0_i32_1 = arith.constant 0 : i32
    return %c0_i32, %c0_i32_0 : i32, i32
  }
  func.func @transform_9(%arg0: i32) -> (i32, i32) {
    %c0_i32 = arith.constant 0 : i32
    %c0_i32_0 = arith.constant 0 : i32
    %c0_i32_1 = arith.constant 0 : i32
    return %c0_i32, %c0_i32_0 : i32, i32
  }
  func.func @transform_10(%arg0: i32) -> (i32, i32) {
    %c0_i32 = arith.constant 0 : i32
    %c0_i32_0 = arith.constant 0 : i32
    %c0_i32_1 = arith.constant 0 : i32
    return %c0_i32, %c0_i32_0 : i32, i32
  }
  func.func @transform_11(%arg0: i32) -> (i32, i32, i32) {
    %c0_i32 = arith.constant 0 : i32
    %c0_i32_0 = arith.constant 0 : i32
    %c0_i32_1 = arith.constant 0 : i32
    return %arg0, %c0_i32, %c0_i32_0 : i32, i32, i32
  }
}

</mosaic_0001>

<bundles_post_ra>
// kernel: bottleneck_csp.1
= control target key start
LH: loop header
LB: loop body
LE: loop exit
PB: predicated region body
PF: predicated region fallthrough
CT: control target
= control target key end

     0   :  { %s9651_s17 = smov 0   ;;  %s12167_s0 = inlined_call_operand.vmem [shape: f32[2,256,128], index: 0, kind: input, shape index: {}]   ;;  %s12168_s1 = inlined_call_operand.vmem [shape: bf16[128,256], index: 1, kind: input, shape index: {}]   ;;  %s12169_s2 = inlined_call_operand.vmem [shape: f32[1,256], index: 2, kind: input, shape index: {}]   ;;  %s12170_s3 = inlined_call_operand.vmem [shape: bf16[128,128], index: 3, kind: input, shape index: {}]   ;;  %s12171_s4 = inlined_call_operand.vmem [shape: f32[1,128], index: 4, kind: input, shape index: {}]   ;;  %s12172_s5 = inlined_call_operand.vmem [shape: bf16[3,3,128,128], index: 5, kind: input, shape index: {}]   ;;  %s12173_s6 = inlined_call_operand.vmem [shape: f32[1,128], index: 6, kind: input, shape index: {}]   ;;  %s12174_s7 = inlined_call_operand.vmem [shape: bf16[128,128], index: 7, kind: input, shape index: {}]   ;;  %s12175_s8 = inlined_call_operand.vmem [shape: f32[1,128], index: 8, kind: input, shape index: {}]   ;;  %s12176_s9 = inlined_call_operand.vmem [shape: bf16[256,128], index: 9, kind: input, shape index: {}]   ;;  %s12177_s10 = inlined_call_operand.vmem [shape: f32[1,128], index: 10, kind: input, shape index: {}]   ;;  %s12178_s11 = inlined_call_operand.vmem [shape: f32[2,256,128], index: 11, kind: output, shape index: {}]  }
   0x1 LB: > { %s6751_s18 = sadd.s32 4294967295, %s9586_s17   ;;  %p6755_p0 = scmp.ge.s32.totalorder %s9586_s17, 1  ;;  %s9586_s17 = sphi %s9651_s17, %s21_s17  }
   0x2   : > { %p337_p1 = scmp.lt.s32.totalorder %s9586_s17, 3 }
   0x4   : > { %p338_p2 = pnand %p6755_p0, %p337_p1 }
   0x6   : > { %341 = sbr.rel (%p338_p2) target bundleno = 1931 (0x78b), region = 64 }
   0xd   : > { %v8683_v0 = vld [vmem:[%s12168_s1 + $0x4] ss:$8 sps:$4 sm:$0xff]   ;;  %v8685_v1 = vld [vmem:[%s12168_s1] ss:$8 sps:$4 sm:$0xff]   ;;  %v9588_v2 = vmov 0   ;;  %p377_p3 = scmp.lt.s32.totalorder %s6751_s18, 1 }
   0xe   : > { %576 = vmatprep.mubr.bf16.mxu0 %v9588_v2  ;;  %544 = vmatprep.subr.bf16.mxu0 %v8683_v0  ;;  %v8686_v3 = vld [vmem:[%s12168_s1 + $0x14] ss:$8 sps:$4 sm:$0xff]   ;;  %v8688_v4 = vld [vmem:[%s12168_s1 + $0x10] ss:$8 sps:$4 sm:$0xff]   ;;  %v8689_v5 = vld [vmem:[%s12168_s1 + $0x24] ss:$8 sps:$4 sm:$0xff]  }
   0xf   : > { %545 = vmatpush1.bf16.msra.mxu0 %v8685_v1  ;;  %v8691_v6 = vld [vmem:[%s12168_s1 + $0x20] ss:$8 sps:$4 sm:$0xff]   ;;  %v8692_v7 = vld [vmem:[%s12168_s1 + $0x34] ss:$8 sps:$4 sm:$0xff]   ;;  %v8694_v8 = vld [vmem:[%s12168_s1 + $0x30] ss:$8 sps:$4 sm:$0xff]  }
  0x10   : > { %546 = vmatprep.subr.bf16.mxu0 %v8686_v3  ;;  %v8695_v9 = vld [vmem:[%s12168_s1 + $0x44] ss:$8 sps:$4 sm:$0xff]   ;;  %v8697_v10 = vld [vmem:[%s12168_s1 + $0x40] ss:$8 sps:$4 sm:$0xff]   ;;  %v8698_v11 = vld [vmem:[%s12168_s1 + $0x54] ss:$8 sps:$4 sm:$0xff]  }
  0x11   : > { %s12566_s18 = smov (!%p377_p3, %s6751_s18), 1  ;;  %v8700_v12 = vld [vmem:[%s12168_s1 + $0x50] ss:$8 sps:$4 sm:$0xff]   ;;  %v8701_v13 = vld [vmem:[%s12168_s1 + $0x64] ss:$8 sps:$4 sm:$0xff]   ;;  %vm9590_vm1 = vmmov 1  }
  0x12   : > { %s7494_s28 = sshll.u32 %s12566_s18, 8  ;;  %v8703_v14 = vld [vmem:[%s12168_s1 + $0x60] ss:$8 sps:$4 sm:$0xff]   ;;  %v8704_v15 = vld [vmem:[%s12168_s1 + $0x74] ss:$8 sps:$4 sm:$0xff]  }
  0x13   : > { %547 = vmatpush1.bf16.msra.mxu0 %v8688_v4  ;;  %s9713_s16 = scalar_lea.vmem %s12167_s0, %s7494_s28  ;;  %v8706_v16 = vld [vmem:[%s12168_s1 + $0x70] ss:$8 sps:$4 sm:$0xff]   ;;  %v8707_v19 = vld [vmem:[%s12170_s3] sm:$0xff]   ;;  %v8708_v21 = vld [vmem:[%s12170_s3 + $0x8] sm:$0xff]   ;;  %s12019_s15 = scalar_lea.vmem %s12178_s11, %s7494_s28 }
  0x14   : > { %548 = vmatprep.subr.bf16.mxu0 %v8689_v5  ;;  %v388_v17 = vld [vmem:[%s9713_s16] sm:$0xff]  ;;  %v389_v18 = vld [vmem:[%s9713_s16 + $0x8] sm:$0xff]  ;;  %v390_v22 = vld [vmem:[%s9713_s16 + $0x10] sm:$0xff] }
  0x15   : > { %v436_v20 = vpack.c.bf16 %v389_v18, %v388_v17  ;;  %v391_v23 = vld [vmem:[%s9713_s16 + $0x18] sm:$0xff]  ;;  %v392_v25 = vld [vmem:[%s9713_s16 + $0x20] sm:$0xff]  ;;  %v393_v26 = vld [vmem:[%s9713_s16 + $0x28] sm:$0xff] }
  0x16   : > { %v437_v24 = vpack.c.bf16 %v391_v23, %v390_v22  ;;  %v438_v27 = vpack.c.bf16 %v393_v26, %v392_v25  ;;  %v394_v28 = vld [vmem:[%s9713_s16 + $0x30] sm:$0xff]  ;;  %v395_v29 = vld [vmem:[%s9713_s16 + $0x38] sm:$0xff]  ;;  %v396_v31 = vld [vmem:[%s9713_s16 + $0x40] sm:$0xff] }
  0x17   : > { %549 = vmatpush1.bf16.msra.mxu0 %v8691_v6  ;;  %v439_v30 = vpack.c.bf16 %v395_v29, %v394_v28  ;;  %v397_v32 = vld [vmem:[%s9713_s16 + $0x48] sm:$0xff]  ;;  %v398_v34 = vld [vmem:[%s9713_s16 + $0x50] sm:$0xff]  ;;  %v399_v35 = vld [vmem:[%s9713_s16 + $0x58] sm:$0xff] }
  0x18   : > { %550 = vmatprep.subr.bf16.mxu0 %v8692_v7  ;;  %v440_v33 = vpack.c.bf16 %v397_v32, %v396_v31  ;;  %v441_v36 = vpack.c.bf16 %v399_v35, %v398_v34  ;;  %v400_v37 = vld [vmem:[%s9713_s16 + $0x60] sm:$0xff]  ;;  %v401_v38 = vld [vmem:[%s9713_s16 + $0x68] sm:$0xff]  ;;  %v402_v40 = vld [vmem:[%s9713_s16 + $0x70] sm:$0xff] }
  0x19   : > { %v442_v39 = vpack.c.bf16 %v401_v38, %v400_v37  ;;  %v403_v41 = vld [vmem:[%s9713_s16 + $0x78] sm:$0xff]  ;;  %v404_v43 = vld [vmem:[%s9713_s16 + $0x80] sm:$0xff]  ;;  %v405_v44 = vld [vmem:[%s9713_s16 + $0x88] sm:$0xff] }
  0x1a   : > { %v443_v42 = vpack.c.bf16 %v403_v41, %v402_v40  ;;  %v444_v45 = vpack.c.bf16 %v405_v44, %v404_v43  ;;  %v406_v46 = vld [vmem:[%s9713_s16 + $0x90] sm:$0xff]  ;;  %v407_v47 = vld [vmem:[%s9713_s16 + $0x98] sm:$0xff]  ;;  %v408_v49 = vld [vmem:[%s9713_s16 + $0xa0] sm:$0xff] }
  0x1b   : > { %551 = vmatpush1.bf16.msra.mxu0 %v8694_v8  ;;  %v445_v48 = vpack.c.bf16 %v407_v47, %v406_v46  ;;  %v409_v50 = vld [vmem:[%s9713_s16 + $0xa8] sm:$0xff]  ;;  %v410_v52 = vld [vmem:[%s9713_s16 + $0xb0] sm:$0xff]  ;;  %v411_v53 = vld [vmem:[%s9713_s16 + $0xb8] sm:$0xff] }
  0x1c   : > { %552 = vmatprep.subr.bf16.mxu0 %v8695_v9  ;;  %v446_v51 = vpack.c.bf16 %v409_v50, %v408_v49  ;;  %v447_v54 = vpack.c.bf16 %v411_v53, %v410_v52  ;;  %v412_v55 = vld [vmem:[%s9713_s16 + $0xc0] sm:$0xff]  ;;  %v413_v56 = vld [vmem:[%s9713_s16 + $0xc8] sm:$0xff]  ;;  %v414_v58 = vld [vmem:[%s9713_s16 + $0xd0] sm:$0xff]  ;;  %v454_v9 = vlaneseq }
  0x1d   : > { %v448_v57 = vpack.c.bf16 %v413_v56, %v412_v55  ;;  %v415_v59 = vld [vmem:[%s9713_s16 + $0xd8] sm:$0xff]  ;;  %v8709_v61 = vld [vmem:[%s12170_s3 + $0x10] sm:$0xff]   ;;  %v416_v62 = vld [vmem:[%s9713_s16 + $0xe0] sm:$0xff] }
  0x1e   : > { %v449_v60 = vpack.c.bf16 %v415_v59, %v414_v58  ;;  %v417_v63 = vld [vmem:[%s9713_s16 + $0xe8] sm:$0xff]  ;;  %v8710_v0 = vld [vmem:[%s12170_s3 + $0x18] sm:$0xff]   ;;  %v8711_v3 = vld [vmem:[%s12170_s3 + $0x20] sm:$0xff]  }
  0x1f   : > { %553 = vmatpush1.bf16.msra.mxu0 %v8697_v10  ;;  %v450_v1 = vpack.c.bf16 %v417_v63, %v416_v62  ;;  %v418_v4 = vld [vmem:[%s9713_s16 + $0xf0] sm:$0xff]  ;;  %v419_v5 = vld [vmem:[%s9713_s16 + $0xf8] sm:$0xff]  ;;  %v8712_v6 = vld [vmem:[%s12170_s3 + $0x28] sm:$0xff]   ;;  %v9789_v10 = vshrl.u32 %v454_v9, 7 }
  0x20   : > { %554 = vmatprep.subr.bf16.mxu0 %v8698_v11  ;;  %v451_v7 = vpack.c.bf16 %v419_v5, %v418_v4  ;;  %v8713_v8 = vld [vmem:[%s12170_s3 + $0x30] sm:$0xff]  }
  0x21   : > { %v456_v11 = vsub.s32 0, %v9789_v10 }
  0x23   : > { %555 = vmatpush1.bf16.msra.mxu0 %v8700_v12  ;;  %v452_v12 = vld [vmem:[%s12169_s2] sm:$0x3] }
  0x24   : > { %556 = vmatprep.subr.bf16.mxu0 %v8701_v13  ;;  %v460_v13 = vsub.s32 1, %v9789_v10 }
  0x27   : > { %557 = vmatpush1.bf16.msra.mxu0 %v8703_v14  ;;  %v9796_v14 = vrot.slane %v452_v12, %v456_v11 }
  0x28   : > { %558 = vmatprep.subr.bf16.mxu0 %v8704_v15  ;;  %v9798_v15 = vrot.slane %v452_v12, %v460_v13 }
  0x2b   : > { %559 = vmatpush1.bf16.msra.mxu0 %v8706_v16 }
  0x2c   : > { %7872 = vmatprep.subr.bf16.mxu0 %v8707_v19 }
  0x2e   : > { %577 = vmatmul.mubr.bf16.vlgmr.msra.gmra.mrb[0].mxu0 %v436_v20 }
  0x2f   : > { %586 = vmatprep.mubr.bf16.mxu0 %v9588_v2  ;;  %7873 = vmatpush3.bf16.msra.mxu0 %v8707_v19 }
  0x30   : > { %7874 = vmatprep.subr.bf16.mxu0 %v8708_v21 }
  0x33   : > { %7875 = vmatpush3.bf16.msra.mxu0 %v8708_v21 }
  0x34   : > { %7876 = vmatprep.subr.bf16.mxu0 %v8709_v61 }
  0x36   : > { %587 = vmatmul.mubr.bf16.gmra.mrb[4].mxu0 %v437_v24 }
  0x37   : > { %596 = vmatprep.mubr.bf16.mxu0 %v9588_v2  ;;  %7877 = vmatpush3.bf16.msra.mxu0 %v8709_v61 }
  0x38   : > { %7878 = vmatprep.subr.bf16.mxu0 %v8710_v0 }
  0x3b   : > { %7879 = vmatpush3.bf16.msra.mxu0 %v8710_v0 }
  0x3c   : > { %7880 = vmatprep.subr.bf16.mxu0 %v8711_v3 }
  0x3e   : > { %597 = vmatmul.mubr.bf16.gmra.mrb[8].mxu0 %v438_v27 }
  0x3f   : > { %606 = vmatprep.mubr.bf16.mxu0 %v9588_v2  ;;  %7881 = vmatpush3.bf16.msra.mxu0 %v8711_v3 }
  0x40   : > { %7882 = vmatprep.subr.bf16.mxu0 %v8712_v6 }
  0x43   : > { %7883 = vmatpush3.bf16.msra.mxu0 %v8712_v6 }
  0x44   : > { %7884 = vmatprep.subr.bf16.mxu0 %v8713_v8 }
  0x46   : > { %607 = vmatmul.mubr.bf16.gmra.mrb[12].mxu0 %v439_v30 }
  0x47   : > { %616 = vmatprep.mubr.bf16.mxu0 %v9588_v2  ;;  %7885 = vmatpush3.bf16.msra.mxu0 %v8713_v8 }
  0x4e   : > { %617 = vmatmul.mubr.bf16.gmra.mrb[16].mxu0 %v440_v33 }
  0x4f   : > { %626 = vmatprep.mubr.bf16.mxu0 %v9588_v2 }
  0x56   : > { %627 = vmatmul.mubr.bf16.gmra.mrb[20].mxu0 %v441_v36 }
  0x57   : > { %636 = vmatprep.mubr.bf16.mxu0 %v9588_v2 }
  0x5e   : > { %637 = vmatmul.mubr.bf16.gmra.mrb[24].mxu0 %v442_v39 }
  0x5f   : > { %646 = vmatprep.mubr.bf16.mxu0 %v9588_v2 }
  0x66   : > { %647 = vmatmul.mubr.bf16.gmra.mrb[28].mxu0 %v443_v42 }
  0x67   : > { %656 = vmatprep.mubr.bf16.mxu0 %v9588_v2 }
  0x6e   : > { %657 = vmatmul.mubr.bf16.gmra.mrb[32].mxu0 %v444_v45 }
  0x6f   : > { %666 = vmatprep.mubr.bf16.mxu0 %v9588_v2 }
  0x76   : > { %667 = vmatmul.mubr.bf16.gmra.mrb[36].mxu0 %v445_v48 }
  0x77   : > { %676 = vmatprep.mubr.bf16.mxu0 %v9588_v2 }
  0x7e   : > { %677 = vmatmul.mubr.bf16.gmra.mrb[40].mxu0 %v446_v51 }
  0x7f   : > { %686 = vmatprep.mubr.bf16.mxu0 %v9588_v2 }
  0x86   : > { %687 = vmatmul.mubr.bf16.gmra.mrb[44].mxu0 %v447_v54 }
  0x87   : > { %696 = vmatprep.mubr.bf16.mxu0 %v9588_v2 }
  0x8e   : > { %697 = vmatmul.mubr.bf16.gmra.mrb[48].mxu0 %v448_v57 }
  0x8f   : > { %706 = vmatprep.mubr.bf16.mxu0 %v9588_v2 }
  0x96   : > { %707 = vmatmul.mubr.bf16.gmra.mrb[52].mxu0 %v449_v60 }
  0x97   : > { %716 = vmatprep.mubr.bf16.mxu0 %v9588_v2 }
  0x9e   : > { %717 = vmatmul.mubr.bf16.gmra.mrb[56].mxu0 %v450_v1 }
  0x9f   : > { %726 = vmatprep.mubr.bf16.mxu0 %v9588_v2  ;;  %v8714_v2 = vld [vmem:[%s12170_s3 + $0x38] sm:$0xff]  }
  0xa0   : > { %7886 = vmatprep.subr.bf16.mxu0 %v8714_v2 }
  0xa1   : > { %7887 = vmatpush3.bf16.msra.mxu0 %v8714_v2 }
  0xa6   : > { %727 = vmatmul.mubr.bf16.gmra.mrb[60].mxu0 %v451_v7 }
 0x101   : > { %v578_v16 = vpop.f32.mrb[0].mxu0 }
 0x102   : > { %v9801_v17 = vadd.f32 %v578_v16, %v9796_v14  ;;  %v580_v18 = vpop.f32.mrb[1].mxu0 }
 0x103   : > { %v9804_v19 = vadd.f32 %v580_v18, %v9798_v15  ;;  %v582_v20 = vpop.f32.mrb[2].mxu0 }
 0x104   : > { %v6776_v21 = vmul.f32 -1.442695, %v9801_v17  ;;  %v9808_v22 = vadd.f32 %v582_v20, %v9796_v14  ;;  %v584_v23 = vpop.f32.mrb[3].mxu0 }
 0x105   : > { %v6777_v24 = vmul.f32 -1.442695, %v9804_v19  ;;  %v9812_v25 = vadd.f32 %v584_v23, %v9798_v15 }
 0x106   : > { %8811 = vpow2.f32 %v6776_v21  ;;  %v6778_v26 = vmul.f32 -1.442695, %v9808_v22 }
 0x107   : > { %8813 = vpow2.f32 %v6777_v24  ;;  %v6779_v27 = vmul.f32 -1.442695, %v9812_v25 }
 0x108   : > { %8815 = vpow2.f32 %v6778_v26 }
 0x109   : > { %8817 = vpow2.f32 %v6779_v27  ;;  %v588_v28 = vpop.f32.mrb[4].mxu0 }
 0x10a   : > { %v9817_v29 = vadd.f32 %v588_v28, %v9796_v14  ;;  %v590_v30 = vpop.f32.mrb[5].mxu0 }
 0x10b   : > { %v9820_v31 = vadd.f32 %v590_v30, %v9798_v15  ;;  %v592_v32 = vpop.f32.mrb[6].mxu0 }
 0x10c   : > { %v6780_v33 = vmul.f32 -1.442695, %v9817_v29  ;;  %v9824_v34 = vadd.f32 %v592_v32, %v9796_v14  ;;  %v594_v35 = vpop.f32.mrb[7].mxu0 }
 0x10d   : > { %v6781_v36 = vmul.f32 -1.442695, %v9820_v31  ;;  %v9828_v37 = vadd.f32 %v594_v35, %v9798_v15 }
 0x10e   : > { %8819 = vpow2.f32 %v6780_v33  ;;  %v6782_v38 = vmul.f32 -1.442695, %v9824_v34 }
 0x10f   : > { %8821 = vpow2.f32 %v6781_v36  ;;  %v6783_v39 = vmul.f32 -1.442695, %v9828_v37 }
 0x110   : > { %v8812_v40 = vpop.eup %8811  ;;  %8823 = vpow2.f32 %v6782_v38 }
 0x111   : > { %v8814_v41 = vpop.eup %8813  ;;  %v929_v42 = vadd.f32 1.0, %v8812_v40  ;;  %8825 = vpow2.f32 %v6783_v39  ;;  %v598_v43 = vpop.f32.mrb[8].mxu0 }
 0x112   : > { %v8816_v44 = vpop.eup %8815  ;;  %v930_v45 = vadd.f32 1.0, %v8814_v41  ;;  %v9833_v46 = vadd.f32 %v598_v43, %v9796_v14  ;;  %v600_v47 = vpop.f32.mrb[9].mxu0 }
 0x113   : > { %v8818_v48 = vpop.eup %8817  ;;  %8827 = vrcp.f32 %v929_v42  ;;  %v931_v49 = vadd.f32 1.0, %v8816_v44  ;;  %v9836_v50 = vadd.f32 %v600_v47, %v9798_v15  ;;  %v602_v51 = vpop.f32.mrb[10].mxu0 }
 0x114   : > { %8829 = vrcp.f32 %v930_v45  ;;  %v932_v52 = vadd.f32 1.0, %v8818_v48  ;;  %v6784_v53 = vmul.f32 -1.442695, %v9833_v46  ;;  %v9840_v54 = vadd.f32 %v602_v51, %v9796_v14  ;;  %v604_v55 = vpop.f32.mrb[11].mxu0 }
 0x115   : > { %8831 = vrcp.f32 %v931_v49  ;;  %v6785_v56 = vmul.f32 -1.442695, %v9836_v50  ;;  %v9844_v57 = vadd.f32 %v604_v55, %v9798_v15 }
 0x116   : > { %8833 = vrcp.f32 %v932_v52  ;;  %v6786_v58 = vmul.f32 -1.442695, %v9840_v54 }
 0x117   : > { %8835 = vpow2.f32 %v6784_v53  ;;  %v6787_v59 = vmul.f32 -1.442695, %v9844_v57 }
 0x118   : > { %v8820_v60 = vpop.eup %8819  ;;  %8837 = vpow2.f32 %v6785_v56 }
 0x119   : > { %v8822_v61 = vpop.eup %8821  ;;  %v933_v62 = vadd.f32 1.0, %v8820_v60  ;;  %8839 = vpow2.f32 %v6786_v58  ;;  %v608_v63 = vpop.f32.mrb[12].mxu0 }
 0x11a   : > { %v8824_v0 = vpop.eup %8823  ;;  %v934_v1 = vadd.f32 1.0, %v8822_v61  ;;  %8841 = vpow2.f32 %v6787_v59  ;;  %v9849_v3 = vadd.f32 %v608_v63, %v9796_v14  ;;  %v610_v4 = vpop.f32.mrb[13].mxu0 }
 0x11b   : > { %v8826_v5 = vpop.eup %8825  ;;  %8843 = vrcp.f32 %v933_v62  ;;  %v935_v6 = vadd.f32 1.0, %v8824_v0  ;;  %v9852_v7 = vadd.f32 %v610_v4, %v9798_v15  ;;  %v612_v8 = vpop.f32.mrb[14].mxu0 }
 0x11c   : > { %8845 = vrcp.f32 %v934_v1  ;;  %v936_v2 = vadd.f32 1.0, %v8826_v5  ;;  %v6788_v9 = vmul.f32 -1.442695, %v9849_v3  ;;  %v9856_v11 = vadd.f32 %v612_v8, %v9796_v14  ;;  %v614_v12 = vpop.f32.mrb[15].mxu0 }
 0x11d   : > { %v8828_v13 = vpop.eup %8827  ;;  %8847 = vrcp.f32 %v935_v6  ;;  %v6789_v16 = vmul.f32 -1.442695, %v9852_v7  ;;  %v9860_v18 = vadd.f32 %v614_v12, %v9798_v15 }
 0x11e   : > { %v8830_v20 = vpop.eup %8829  ;;  %8849 = vrcp.f32 %v936_v2  ;;  %v6790_v21 = vmul.f32 -1.442695, %v9856_v11  ;;  %v9865_v27 = vmul.f32 %v8828_v13, %v9801_v17 }
 0x11f   : > { %v8832_v23 = vpop.eup %8831  ;;  %8851 = vpow2.f32 %v6788_v9  ;;  %v6791_v24 = vmul.f32 -1.442695, %v9860_v18  ;;  %v9871_v32 = vmul.f32 %v8830_v20, %v9804_v19 }
 0x120   : > { %v8834_v26 = vpop.eup %8833  ;;  %12287 = vst [vmem:[#allocation4_spill] sm:$0xff] %v9865_v27  ;;  %v9868_v28 = vmul.f32 %v8832_v23, %v9808_v22  ;;  %8853 = vpow2.f32 %v6789_v16 }
 0x121   : > { %v8836_v30 = vpop.eup %8835  ;;  %12289 = vst [vmem:[#allocation6_spill] sm:$0xff] %v9871_v32  ;;  %v9874_v33 = vmul.f32 %v8834_v26, %v9812_v25  ;;  %8855 = vpow2.f32 %v6790_v21  ;;  %v618_v35 = vpop.f32.mrb[16].mxu0 }
 0x122   : > { %12288 = vst [vmem:[#allocation5_spill] sm:$0xff] %v9868_v28  ;;  %v8838_v36 = vpop.eup %8837  ;;  %v937_v38 = vadd.f32 1.0, %v8836_v30  ;;  %8857 = vpow2.f32 %v6791_v24  ;;  %v9877_v39 = vadd.f32 %v618_v35, %v9796_v14  ;;  %v620_v17 = vpop.f32.mrb[17].mxu0  ;;  %v1297_v22 = vpack.c.bf16 %v9868_v28, %v9865_v27 }
 0x123   : > { %12290 = vst [vmem:[#allocation7_spill] sm:$0xff] %v9874_v33  ;;  %v8840_v40 = vpop.eup %8839  ;;  %v938_v41 = vadd.f32 1.0, %v8838_v36  ;;  %v9882_v19 = vadd.f32 %v620_v17, %v9798_v15  ;;  %v622_v42 = vpop.f32.mrb[18].mxu0 }
 0x124   : > { %v8842_v43 = vpop.eup %8841  ;;  %8859 = vrcp.f32 %v937_v38  ;;  %v939_v44 = vadd.f32 1.0, %v8840_v40  ;;  %v6792_v45 = vmul.f32 -1.442695, %v9877_v39  ;;  %v9888_v47 = vadd.f32 %v622_v42, %v9796_v14  ;;  %v624_v48 = vpop.f32.mrb[19].mxu0  ;;  %7888 = vmatprep.mubr.bf16.mxu0 %v1297_v22 }
 0x125   : > { %v8844_v49 = vpop.eup %8843  ;;  %8861 = vrcp.f32 %v938_v41  ;;  %v940_v51 = vadd.f32 1.0, %v8842_v43  ;;  %v6793_v52 = vmul.f32 -1.442695, %v9882_v19  ;;  %v9892_v53 = vadd.f32 %v624_v48, %v9798_v15 }
 0x126   : > { %v8846_v55 = vpop.eup %8845  ;;  %8863 = vrcp.f32 %v939_v44  ;;  %v6794_v56 = vmul.f32 -1.442695, %v9888_v47  ;;  %v9897_v61 = vmul.f32 %v8844_v49, %v9817_v29 }
 0x127   : > { %v8848_v58 = vpop.eup %8847  ;;  %8865 = vrcp.f32 %v940_v51  ;;  %v6795_v59 = vmul.f32 -1.442695, %v9892_v53  ;;  %v9903_v0 = vmul.f32 %v8846_v55, %v9820_v31 }
 0x128   : > { %v8850_v60 = vpop.eup %8849  ;;  %12291 = vst [vmem:[#allocation8_spill] sm:$0xff] %v9897_v61  ;;  %v9900_v62 = vmul.f32 %v8848_v58, %v9824_v34  ;;  %8867 = vpow2.f32 %v6792_v45 }
 0x129   : > { %v8852_v63 = vpop.eup %8851  ;;  %12293 = vst [vmem:[#allocation10_spill] sm:$0xff] %v9903_v0  ;;  %v9906_v1 = vmul.f32 %v8850_v60, %v9828_v37  ;;  %8869 = vpow2.f32 %v6793_v52  ;;  %v628_v4 = vpop.f32.mrb[20].mxu0 }
 0x12a   : > { %12292 = vst [vmem:[#allocation9_spill] sm:$0xff] %v9900_v62  ;;  %v8854_v5 = vpop.eup %8853  ;;  %v1298_v6 = vpack.c.bf16 %v9900_v62, %v9897_v61  ;;  %v941_v8 = vadd.f32 1.0, %v8852_v63  ;;  %8871 = vpow2.f32 %v6794_v56  ;;  %v9911_v29 = vadd.f32 %v628_v4, %v9796_v14  ;;  %v630_v34 = vpop.f32.mrb[21].mxu0 }
 0x12b   : > { %12294 = vst [vmem:[#allocation11_spill] sm:$0xff] %v9906_v1  ;;  %v8856_v2 = vpop.eup %8855  ;;  %v942_v9 = vadd.f32 1.0, %v8854_v5  ;;  %8873 = vpow2.f32 %v6795_v59  ;;  %v9914_v31 = vadd.f32 %v630_v34, %v9798_v15  ;;  %v632_v37 = vpop.f32.mrb[22].mxu0 }
 0x12c   : > { %v8858_v13 = vpop.eup %8857  ;;  %8875 = vrcp.f32 %v941_v8  ;;  %v943_v16 = vadd.f32 1.0, %v8856_v2  ;;  %v6796_v20 = vmul.f32 -1.442695, %v9911_v29  ;;  %v9920_v21 = vadd.f32 %v632_v37, %v9796_v14  ;;  %v634_v23 = vpop.f32.mrb[23].mxu0  ;;  %7889 = vmatmul.mubr.bf16.vlgmr.msra.gmra.mrb[64].mxu0 %v1298_v6 }
 0x12d   : > { %8877 = vrcp.f32 %v942_v9  ;;  %v944_v24 = vadd.f32 1.0, %v8858_v13  ;;  %v6797_v26 = vmul.f32 -1.442695, %v9914_v31  ;;  %v9924_v30 = vadd.f32 %v634_v23, %v9798_v15 }
 0x12e   : > { %v8860_v35 = vpop.eup %8859  ;;  %8879 = vrcp.f32 %v943_v16  ;;  %v6798_v36 = vmul.f32 -1.442695, %v9920_v21 }
 0x12f   : > { %v8862_v38 = vpop.eup %8861  ;;  %8881 = vrcp.f32 %v944_v24  ;;  %v6799_v17 = vmul.f32 -1.442695, %v9924_v30  ;;  %v9929_v41 = vmul.f32 %v8860_v35, %v9833_v46 }
 0x130   : > { %v8864_v22 = vpop.eup %8863  ;;  %8883 = vpow2.f32 %v6796_v20  ;;  %v9935_v45 = vmul.f32 %v8862_v38, %v9836_v50 }
 0x131   : > { %v8866_v40 = vpop.eup %8865  ;;  %12295 = vst [vmem:[#allocation12_spill] sm:$0xff] %v9929_v41  ;;  %v9932_v42 = vmul.f32 %v8864_v22, %v9840_v54  ;;  %8885 = vpow2.f32 %v6797_v26  ;;  %v638_v43 = vpop.f32.mrb[24].mxu0 }
 0x132   : > { %v8868_v44 = vpop.eup %8867  ;;  %12297 = vst [vmem:[#allocation14_spill] sm:$0xff] %v9935_v45  ;;  %v9938_v48 = vmul.f32 %v8866_v40, %v9844_v57  ;;  %8887 = vpow2.f32 %v6798_v36  ;;  %v9941_v49 = vadd.f32 %v638_v43, %v9796_v14  ;;  %v640_v51 = vpop.f32.mrb[25].mxu0 }
 0x133   : > { %12296 = vst [vmem:[#allocation13_spill] sm:$0xff] %v9932_v42  ;;  %v8870_v52 = vpop.eup %8869  ;;  %v945_v46 = vadd.f32 1.0, %v8868_v44  ;;  %8889 = vpow2.f32 %v6799_v17  ;;  %v9944_v54 = vadd.f32 %v640_v51, %v9798_v15  ;;  %v642_v55 = vpop.f32.mrb[26].mxu0  ;;  %v1299_v56 = vpack.c.bf16 %v9932_v42, %v9929_v41 }
 0x134   : > { %12298 = vst [vmem:[#allocation15_spill] sm:$0xff] %v9938_v48  ;;  %v8872_v50 = vpop.eup %8871  ;;  %v946_v58 = vadd.f32 1.0, %v8870_v52  ;;  %v9949_v57 = vadd.f32 %v642_v55, %v9796_v14  ;;  %v644_v59 = vpop.f32.mrb[27].mxu0  ;;  %v6800_v5 = vmul.f32 -1.442695, %v9941_v49 }
 0x135   : > { %v8874_v63 = vpop.eup %8873  ;;  %8891 = vrcp.f32 %v945_v46  ;;  %v947_v4 = vadd.f32 1.0, %v8872_v50  ;;  %v9955_v6 = vadd.f32 %v644_v59, %v9798_v15  ;;  %7892 = vmatprep.mubr.bf16.mxu0 %v1299_v56  ;;  %v6801_v2 = vmul.f32 -1.442695, %v9944_v54 }
 0x136   : > { %v8876_v8 = vpop.eup %8875  ;;  %8893 = vrcp.f32 %v946_v58  ;;  %v948_v34 = vadd.f32 1.0, %v8874_v63  ;;  %v6802_v37 = vmul.f32 -1.442695, %v9949_v57 }
 0x137   : > { %v8878_v9 = vpop.eup %8877  ;;  %8895 = vrcp.f32 %v947_v4  ;;  %v6803_v16 = vmul.f32 -1.442695, %v9955_v6  ;;  %v9961_v23 = vmul.f32 %v8876_v8, %v9849_v3 }
 0x138   : > { %v8880_v13 = vpop.eup %8879  ;;  %8897 = vrcp.f32 %v948_v34  ;;  %v9978_v51 = vmul.f32 %v8878_v9, %v9852_v7 }
 0x139   : > { %v8882_v20 = vpop.eup %8881  ;;  %12299 = vst [vmem:[#allocation16_spill] sm:$0xff] %v9961_v23  ;;  %v9964_v24 = vmul.f32 %v8880_v13, %v9856_v11  ;;  %8899 = vpow2.f32 %v6800_v5  ;;  %v648_v26 = vpop.f32.mrb[28].mxu0 }
 0x13a   : > { %v8884_v35 = vpop.eup %8883  ;;  %v9967_v36 = vmul.f32 %v8882_v20, %v9860_v18  ;;  %8901 = vpow2.f32 %v6801_v2  ;;  %v9970_v38 = vadd.f32 %v648_v26, %v9796_v14  ;;  %v650_v17 = vpop.f32.mrb[29].mxu0  ;;  %12302 = vst [vmem:[#allocation19_spill] sm:$0xff] %v9978_v51 }
 0x13b   : > { %12300 = vst [vmem:[#allocation17_spill] sm:$0xff] %v9964_v24  ;;  %v8886_v22 = vpop.eup %8885  ;;  %v949_v40 = vadd.f32 1.0, %v8884_v35  ;;  %8903 = vpow2.f32 %v6802_v37  ;;  %v9973_v3 = vadd.f32 %v650_v17, %v9798_v15  ;;  %v652_v43 = vpop.f32.mrb[30].mxu0  ;;  %v1300_v11 = vpack.c.bf16 %v9964_v24, %v9961_v23 }
 0x13c   : > { %12301 = vst [vmem:[#allocation18_spill] sm:$0xff] %v9967_v36  ;;  %v8888_v44 = vpop.eup %8887  ;;  %v950_v18 = vadd.f32 1.0, %v8886_v22  ;;  %8905 = vpow2.f32 %v6803_v16  ;;  %v9981_v52 = vadd.f32 %v652_v43, %v9796_v14  ;;  %v654_v46 = vpop.f32.mrb[31].mxu0  ;;  %v6804_v50 = vmul.f32 -1.442695, %v9970_v38 }
 0x13d   : > { %v8890_v55 = vpop.eup %8889  ;;  %8907 = vrcp.f32 %v949_v40  ;;  %v951_v56 = vadd.f32 1.0, %v8888_v44  ;;  %v9985_v58 = vadd.f32 %v654_v46, %v9798_v15  ;;  %7893 = vmatmul.mubr.bf16.gmra.mrb[68].mxu0 %v1300_v11  ;;  %v6805_v7 = vmul.f32 -1.442695, %v9973_v3 }
 0x13e   : > { %8909 = vrcp.f32 %v950_v18  ;;  %v952_v59 = vadd.f32 1.0, %v8890_v55  ;;  %v6806_v5 = vmul.f32 -1.442695, %v9981_v52 }
 0x13f   : > { %v8892_v4 = vpop.eup %8891  ;;  %8911 = vrcp.f32 %v951_v56  ;;  %v6807_v34 = vmul.f32 -1.442695, %v9985_v58 }
 0x140   : > { %v8894_v8 = vpop.eup %8893  ;;  %8913 = vrcp.f32 %v952_v59  ;;  %v9999_v35 = vmul.f32 %v8892_v4, %v9877_v39 }
 0x141   : > { %v8896_v2 = vpop.eup %8895  ;;  %8915 = vpow2.f32 %v6804_v50  ;;  %v658_v9 = vpop.f32.mrb[32].mxu0 }
 0x142   : > { %v8898_v37 = vpop.eup %8897  ;;  %v9993_v13 = vmul.f32 %v8896_v2, %v9888_v47  ;;  %8917 = vpow2.f32 %v6805_v7  ;;  %v9996_v16 = vadd.f32 %v658_v9, %v9796_v14  ;;  %v660_v20 = vpop.f32.mrb[33].mxu0  ;;  %12304 = vst [vmem:[#allocation21_spill] sm:$0xff] %v9999_v35  ;;  %v10008_v47 = vmul.f32 %v8894_v8, %v9882_v19 }
 0x143   : > { %v8900_v26 = vpop.eup %8899  ;;  %v10002_v17 = vmul.f32 %v8898_v37, %v9892_v53  ;;  %8919 = vpow2.f32 %v6806_v5  ;;  %v10005_v22 = vadd.f32 %v660_v20, %v9798_v15  ;;  %v662_v40 = vpop.f32.mrb[34].mxu0 }
 0x144   : > { %12303 = vst [vmem:[#allocation20_spill] sm:$0xff] %v9993_v13  ;;  %v8902_v43 = vpop.eup %8901  ;;  %12306 = vst [vmem:[#allocation23_spill] sm:$0xff] %v10008_v47  ;;  %v953_v11 = vadd.f32 1.0, %v8900_v26  ;;  %8921 = vpow2.f32 %v6807_v34  ;;  %v10011_v44 = vadd.f32 %v662_v40, %v9796_v14  ;;  %v664_v18 = vpop.f32.mrb[35].mxu0  ;;  %v1301_v55 = vpack.c.bf16 %v9993_v13, %v9999_v35 }
 0x145   : > { %12305 = vst [vmem:[#allocation22_spill] sm:$0xff] %v10002_v17  ;;  %v8904_v39 = vpop.eup %8903  ;;  %v954_v46 = vadd.f32 1.0, %v8902_v43  ;;  %v10014_v53 = vadd.f32 %v664_v18, %v9798_v15  ;;  %v6808_v19 = vmul.f32 -1.442695, %v9996_v16  ;;  %v6809_v5 = vmul.f32 -1.442695, %v10005_v22 }
 0x146   : > { %v8906_v56 = vpop.eup %8905  ;;  %8923 = vrcp.f32 %v953_v11  ;;  %v955_v50 = vadd.f32 1.0, %v8904_v39  ;;  %7896 = vmatprep.mubr.bf16.mxu0 %v1301_v55  ;;  %v6810_v34 = vmul.f32 -1.442695, %v10011_v44 }
 0x147   : > { %v8908_v7 = vpop.eup %8907  ;;  %8925 = vrcp.f32 %v954_v46  ;;  %v956_v4 = vadd.f32 1.0, %v8906_v56  ;;  %v6811_v9 = vmul.f32 -1.442695, %v10014_v53 }
 0x148   : > { %v8910_v8 = vpop.eup %8909  ;;  %8927 = vrcp.f32 %v955_v50  ;;  %v10037_v56 = vmul.f32 %v8908_v7, %v9911_v29 }
 0x149   : > { %v8912_v2 = vpop.eup %8911  ;;  %8929 = vrcp.f32 %v956_v4  ;;  %v668_v37 = vpop.f32.mrb[36].mxu0 }
 0x14a   : > { %v8914_v20 = vpop.eup %8913  ;;  %v10025_v26 = vmul.f32 %v8912_v2, %v9920_v21  ;;  %8931 = vpow2.f32 %v6808_v19  ;;  %v10028_v40 = vadd.f32 %v668_v37, %v9796_v14  ;;  %v670_v43 = vpop.f32.mrb[37].mxu0  ;;  %12309 = vst [vmem:[#allocation26_spill] sm:$0xff] %v10037_v56  ;;  %v10043_v2 = vmul.f32 %v8910_v8, %v9914_v31 }
 0x14b   : > { %v8916_v11 = vpop.eup %8915  ;;  %v10031_v18 = vmul.f32 %v8914_v20, %v9924_v30  ;;  %8933 = vpow2.f32 %v6809_v5  ;;  %v10034_v39 = vadd.f32 %v670_v43, %v9798_v15  ;;  %v672_v46 = vpop.f32.mrb[38].mxu0 }
 0x14c   : > { %12307 = vst [vmem:[#allocation24_spill] sm:$0xff] %v10025_v26  ;;  %v8918_v55 = vpop.eup %8917  ;;  %v957_v21 = vadd.f32 1.0, %v8916_v11  ;;  %8935 = vpow2.f32 %v6810_v34  ;;  %v10040_v50 = vadd.f32 %v672_v46, %v9796_v14  ;;  %v674_v19 = vpop.f32.mrb[39].mxu0  ;;  %12310 = vst [vmem:[#allocation27_spill] sm:$0xff] %v10043_v2  ;;  %v6812_v29 = vmul.f32 -1.442695, %v10028_v40 }
 0x14d   : > { %12308 = vst [vmem:[#allocation25_spill] sm:$0xff] %v10031_v18  ;;  %v8920_v4 = vpop.eup %8919  ;;  %v958_v30 = vadd.f32 1.0, %v8918_v55  ;;  %8937 = vpow2.f32 %v6811_v9  ;;  %v10046_v5 = vadd.f32 %v674_v19, %v9798_v15  ;;  %v1302_v7 = vpack.c.bf16 %v10025_v26, %v10037_v56 }
 0x14e   : > { %v8922_v37 = vpop.eup %8921  ;;  %8939 = vrcp.f32 %v957_v21  ;;  %v959_v20 = vadd.f32 1.0, %v8920_v4  ;;  %v6813_v43 = vmul.f32 -1.442695, %v10034_v39  ;;  %v6814_v9 = vmul.f32 -1.442695, %v10040_v50 }
 0x14f   : > { %8941 = vrcp.f32 %v958_v30  ;;  %v960_v34 = vadd.f32 1.0, %v8922_v37  ;;  %7897 = vmatmul.mubr.bf16.gmra.mrb[72].mxu0 %v1302_v7  ;;  %v6815_v46 = vmul.f32 -1.442695, %v10046_v5 }
 0x150   : > { %v8924_v8 = vpop.eup %8923  ;;  %8943 = vrcp.f32 %v959_v20 }
 0x151   : > { %v8926_v11 = vpop.eup %8925  ;;  %8945 = vrcp.f32 %v960_v34  ;;  %v678_v55 = vpop.f32.mrb[40].mxu0  ;;  %v10060_v37 = vmul.f32 %v8924_v8, %v9941_v49 }
 0x152   : > { %v8928_v21 = vpop.eup %8927  ;;  %8947 = vpow2.f32 %v6812_v29  ;;  %v10057_v19 = vadd.f32 %v678_v55, %v9796_v14  ;;  %v680_v4 = vpop.f32.mrb[41].mxu0 }
 0x153   : > { %v8930_v30 = vpop.eup %8929  ;;  %12311 = vst [vmem:[#allocation28_spill] sm:$0xff] %v10060_v37  ;;  %v10063_v20 = vmul.f32 %v8928_v21, %v9949_v57  ;;  %8949 = vpow2.f32 %v6813_v43  ;;  %v10066_v7 = vadd.f32 %v680_v4, %v9798_v15  ;;  %v682_v34 = vpop.f32.mrb[42].mxu0  ;;  %v10076_v57 = vmul.f32 %v8926_v11, %v9944_v54 }
 0x154   : > { %v8932_v31 = vpop.eup %8931  ;;  %v10069_v59 = vmul.f32 %v8930_v30, %v9955_v6  ;;  %8951 = vpow2.f32 %v6814_v9  ;;  %v6816_v29 = vmul.f32 -1.442695, %v10057_v19  ;;  %v10073_v55 = vadd.f32 %v682_v34, %v9796_v14  ;;  %v684_v49 = vpop.f32.mrb[43].mxu0 }
 0x155   : > { %12312 = vst [vmem:[#allocation29_spill] sm:$0xff] %v10063_v20  ;;  %v8934_v8 = vpop.eup %8933  ;;  %12314 = vst [vmem:[#allocation31_spill] sm:$0xff] %v10076_v57  ;;  %v961_v43 = vadd.f32 1.0, %v8932_v31  ;;  %8953 = vpow2.f32 %v6815_v46  ;;  %v10079_v21 = vadd.f32 %v684_v49, %v9798_v15  ;;  %v1303_v6 = vpack.c.bf16 %v10063_v20, %v10060_v37 }
 0x156   : > { %12313 = vst [vmem:[#allocation30_spill] sm:$0xff] %v10069_v59  ;;  %v8936_v4 = vpop.eup %8935  ;;  %v962_v63 = vadd.f32 1.0, %v8934_v8  ;;  %8955 = vpow2.f32 %v6816_v29  ;;  %v6817_v34 = vmul.f32 -1.442695, %v10066_v7  ;;  %v6818_v46 = vmul.f32 -1.442695, %v10073_v55 }
 0x157   : > { %v8938_v9 = vpop.eup %8937  ;;  %8957 = vrcp.f32 %v961_v43  ;;  %v963_v30 = vadd.f32 1.0, %v8936_v4  ;;  %7900 = vmatprep.mubr.bf16.mxu0 %v1303_v6  ;;  %v6819_v29 = vmul.f32 -1.442695, %v10079_v21 }
 0x158   : > { %v8940_v11 = vpop.eup %8939  ;;  %8959 = vrcp.f32 %v962_v63  ;;  %v964_v31 = vadd.f32 1.0, %v8938_v9 }
 0x159   : > { %v8942_v49 = vpop.eup %8941  ;;  %8961 = vrcp.f32 %v963_v30  ;;  %v688_v8 = vpop.f32.mrb[44].mxu0  ;;  %v10092_v54 = vmul.f32 %v8940_v11, %v9970_v38 }
 0x15a   : > { %v8944_v60 = vpop.eup %8943  ;;  %8963 = vrcp.f32 %v964_v31  ;;  %v10089_v43 = vadd.f32 %v688_v8, %v9796_v14  ;;  %v690_v4 = vpop.f32.mrb[45].mxu0  ;;  %v10105_v38 = vmul.f32 %v8942_v49, %v9973_v3 }
 0x15b   : > { %v8946_v12 = vpop.eup %8945  ;;  %12315 = vst [vmem:[#allocation32_spill] sm:$0xff] %v10092_v54  ;;  %v10095_v63 = vmul.f32 %v8944_v60, %v9981_v52  ;;  %8965 = vpow2.f32 %v6817_v34  ;;  %v692_v6 = vpop.f32.mrb[46].mxu0  ;;  %v10102_v8 = vadd.f32 %v690_v4, %v9798_v15 }
 0x15c   : > { %v8948_v9 = vpop.eup %8947  ;;  %v10098_v30 = vmul.f32 %v8946_v12, %v9985_v58  ;;  %8967 = vpow2.f32 %v6818_v46  ;;  %v6820_v31 = vmul.f32 -1.442695, %v10089_v43  ;;  %v694_v25 = vpop.f32.mrb[47].mxu0  ;;  %12318 = vst [vmem:[#allocation35_spill] sm:$0xff] %v10105_v38  ;;  %v10108_v60 = vadd.f32 %v692_v6, %v9796_v14 }
 0x15d   : > { %12316 = vst [vmem:[#allocation33_spill] sm:$0xff] %v10095_v63  ;;  %v8950_v57 = vpop.eup %8949  ;;  %v965_v11 = vadd.f32 1.0, %v8948_v9  ;;  %8969 = vpow2.f32 %v6819_v29  ;;  %v10111_v12 = vadd.f32 %v694_v25, %v9798_v15  ;;  %v1304_v58 = vpack.c.bf16 %v10095_v63, %v10092_v54 }
 0x15e   : > { %12317 = vst [vmem:[#allocation34_spill] sm:$0xff] %v10098_v30  ;;  %v8952_v52 = vpop.eup %8951  ;;  %v966_v34 = vadd.f32 1.0, %v8950_v57  ;;  %8971 = vpow2.f32 %v6820_v31  ;;  %v6821_v6 = vmul.f32 -1.442695, %v10102_v8  ;;  %v6822_v25 = vmul.f32 -1.442695, %v10108_v60 }
 0x15f   : > { %v8954_v46 = vpop.eup %8953  ;;  %8973 = vrcp.f32 %v965_v11  ;;  %v967_v4 = vadd.f32 1.0, %v8952_v52  ;;  %7901 = vmatmul.mubr.bf16.gmra.mrb[76].mxu0 %v1304_v58  ;;  %v6823_v11 = vmul.f32 -1.442695, %v10111_v12 }
 0x160   : > { %v8956_v49 = vpop.eup %8955  ;;  %8975 = vrcp.f32 %v966_v34  ;;  %v968_v29 = vadd.f32 1.0, %v8954_v46 }
 0x161   : > { %v8958_v57 = vpop.eup %8957  ;;  %8977 = vrcp.f32 %v967_v4  ;;  %v969_v9 = vadd.f32 1.0, %v8956_v49  ;;  %v698_v31 = vpop.f32.mrb[48].mxu0 }
 0x162   : > { %v8960_v59 = vpop.eup %8959  ;;  %8979 = vrcp.f32 %v968_v29  ;;  %v10121_v52 = vadd.f32 %v698_v31, %v9796_v14  ;;  %v700_v3 = vpop.f32.mrb[49].mxu0  ;;  %v10124_v34 = vmul.f32 %v8958_v57, %v9996_v16 }
 0x163   : > { %v8962_v38 = vpop.eup %8961  ;;  %8981 = vrcp.f32 %v969_v9  ;;  %v702_v58 = vpop.f32.mrb[50].mxu0  ;;  %v10131_v29 = vadd.f32 %v700_v3, %v9798_v15  ;;  %v10134_v2 = vmul.f32 %v8960_v59, %v10005_v22 }
 0x164   : > { %12319 = vst [vmem:[#allocation36_spill] sm:$0xff] %v10124_v34  ;;  %v8964_v46 = vpop.eup %8963  ;;  %v10127_v4 = vmul.f32 %v8962_v38, %v10011_v44  ;;  %8983 = vpow2.f32 %v6821_v6  ;;  %v6824_v49 = vmul.f32 -1.442695, %v10121_v52  ;;  %v704_v30 = vpop.f32.mrb[51].mxu0  ;;  %v10140_v57 = vadd.f32 %v702_v58, %v9796_v14 }
 0x165   : > { %v8966_v31 = vpop.eup %8965  ;;  %12321 = vst [vmem:[#allocation38_spill] sm:$0xff] %v10134_v2  ;;  %v10137_v16 = vmul.f32 %v8964_v46, %v10014_v53  ;;  %8985 = vpow2.f32 %v6822_v25  ;;  %v10143_v6 = vadd.f32 %v704_v30, %v9798_v15  ;;  %v6825_v25 = vmul.f32 -1.442695, %v10131_v29 }
 0x166   : > { %12320 = vst [vmem:[#allocation37_spill] sm:$0xff] %v10127_v4  ;;  %v8968_v44 = vpop.eup %8967  ;;  %v970_v38 = vadd.f32 1.0, %v8966_v31  ;;  %8987 = vpow2.f32 %v6823_v11  ;;  %v1305_v3 = vpack.c.bf16 %v10127_v4, %v10124_v34  ;;  %v6826_v30 = vmul.f32 -1.442695, %v10140_v57 }
 0x167   : > { %12322 = vst [vmem:[#allocation39_spill] sm:$0xff] %v10137_v16  ;;  %v8970_v9 = vpop.eup %8969  ;;  %v971_v18 = vadd.f32 1.0, %v8968_v44  ;;  %8989 = vpow2.f32 %v6824_v49  ;;  %v6827_v44 = vmul.f32 -1.442695, %v10143_v6 }
 0x168   : > { %v8972_v53 = vpop.eup %8971  ;;  %8991 = vrcp.f32 %v970_v38  ;;  %v972_v59 = vadd.f32 1.0, %v8970_v9  ;;  %7904 = vmatprep.mubr.bf16.mxu0 %v1305_v3 }
 0x169   : > { %v8974_v58 = vpop.eup %8973  ;;  %8993 = vrcp.f32 %v971_v18  ;;  %v973_v11 = vadd.f32 1.0, %v8972_v53  ;;  %v708_v46 = vpop.f32.mrb[52].mxu0 }
 0x16a   : > { %v8976_v31 = vpop.eup %8975  ;;  %8995 = vrcp.f32 %v972_v59  ;;  %v10153_v49 = vadd.f32 %v708_v46, %v9796_v14  ;;  %v710_v22 = vpop.f32.mrb[53].mxu0  ;;  %v10156_v38 = vmul.f32 %v8974_v58, %v10028_v40 }
 0x16b   : > { %v8978_v2 = vpop.eup %8977  ;;  %8997 = vrcp.f32 %v973_v11  ;;  %v10159_v3 = vadd.f32 %v710_v22, %v9798_v15  ;;  %v712_v18 = vpop.f32.mrb[54].mxu0  ;;  %v10162_v53 = vmul.f32 %v8976_v31, %v10034_v39 }
 0x16c   : > { %12323 = vst [vmem:[#allocation40_spill] sm:$0xff] %v10156_v38  ;;  %v8980_v9 = vpop.eup %8979  ;;  %v10165_v59 = vmul.f32 %v8978_v2, %v10040_v50  ;;  %8999 = vpow2.f32 %v6825_v25  ;;  %v6828_v46 = vmul.f32 -1.442695, %v10153_v49  ;;  %v714_v16 = vpop.f32.mrb[55].mxu0  ;;  %v10173_v58 = vadd.f32 %v712_v18, %v9796_v14 }
 0x16d   : > { %12324 = vst [vmem:[#allocation41_spill] sm:$0xff] %v10162_v53  ;;  %v8982_v47 = vpop.eup %8981  ;;  %v10169_v40 = vmul.f32 %v8980_v9, %v10046_v5  ;;  %9001 = vpow2.f32 %v6826_v30  ;;  %v6829_v22 = vmul.f32 -1.442695, %v10159_v3  ;;  %v10176_v39 = vadd.f32 %v714_v16, %v9798_v15 }
 0x16e   : > { %12325 = vst [vmem:[#allocation42_spill] sm:$0xff] %v10165_v59  ;;  %v8984_v11 = vpop.eup %8983  ;;  %9003 = vpow2.f32 %v6827_v44  ;;  %v1306_v50 = vpack.c.bf16 %v10165_v59, %v10156_v38  ;;  %v6830_v44 = vmul.f32 -1.442695, %v10173_v58 }
 0x16f   : > { %12326 = vst [vmem:[#allocation43_spill] sm:$0xff] %v10169_v40  ;;  %v8986_v2 = vpop.eup %8985  ;;  %v974_v25 = vadd.f32 1.0, %v8984_v11  ;;  %9005 = vpow2.f32 %v6828_v46  ;;  %v6831_v36 = vmul.f32 -1.442695, %v10176_v39 }
 0x170   : > { %v8988_v30 = vpop.eup %8987  ;;  %v975_v31 = vadd.f32 1.0, %v8986_v2  ;;  %9007 = vpow2.f32 %v6829_v22  ;;  %7905 = vmatmul.mubr.bf16.gmra.mrb[80].mxu0 %v1306_v50 }
 0x171   : > { %v8990_v18 = vpop.eup %8989  ;;  %9009 = vrcp.f32 %v974_v25  ;;  %v976_v9 = vadd.f32 1.0, %v8988_v30  ;;  %v718_v16 = vpop.f32.mrb[56].mxu0  ;;  %v10191_v25 = vmul.f32 %v8982_v47, %v10057_v19 }
 0x172   : > { %v8992_v17 = vpop.eup %8991  ;;  %9011 = vrcp.f32 %v975_v31  ;;  %v977_v51 = vadd.f32 1.0, %v8990_v18  ;;  %v10185_v46 = vadd.f32 %v718_v16, %v9796_v14  ;;  %v720_v11 = vpop.f32.mrb[57].mxu0 }
 0x173   : > { %v8994_v5 = vpop.eup %8993  ;;  %9013 = vrcp.f32 %v976_v9  ;;  %v10188_v22 = vadd.f32 %v720_v11, %v9798_v15  ;;  %v722_v50 = vpop.f32.mrb[58].mxu0  ;;  %12327 = vst [vmem:[#allocation44_spill] sm:$0xff] %v10191_v25  ;;  %v10198_v53 = vmul.f32 %v8992_v17, %v10066_v7 }
 0x174   : > { %v8996_v2 = vpop.eup %8995  ;;  %v10194_v30 = vmul.f32 %v8994_v5, %v10073_v55  ;;  %9015 = vrcp.f32 %v977_v51  ;;  %v6832_v31 = vmul.f32 -1.442695, %v10185_v46  ;;  %v724_v18 = vpop.f32.mrb[59].mxu0  ;;  %v10205_v47 = vadd.f32 %v722_v50, %v9796_v14 }
 0x175   : > { %v8998_v16 = vpop.eup %8997  ;;  %12329 = vst [vmem:[#allocation46_spill] sm:$0xff] %v10198_v53  ;;  %v10201_v9 = vmul.f32 %v8996_v2, %v10079_v21  ;;  %9017 = vpow2.f32 %v6830_v44  ;;  %v6833_v11 = vmul.f32 -1.442695, %v10188_v22  ;;  %v10210_v17 = vadd.f32 %v724_v18, %v9798_v15 }
 0x176   : > { %12328 = vst [vmem:[#allocation45_spill] sm:$0xff] %v10194_v30  ;;  %v9000_v40 = vpop.eup %8999  ;;  %9019 = vpow2.f32 %v6831_v36  ;;  %v1307_v51 = vpack.c.bf16 %v10194_v30, %v10191_v25  ;;  %v10224_v53 = vmul.f32 %v8998_v16, %v10089_v43 }
 0x177   : > { %12330 = vst [vmem:[#allocation47_spill] sm:$0xff] %v10201_v9  ;;  %v9002_v19 = vpop.eup %9001  ;;  %v978_v55 = vadd.f32 1.0, %v9000_v40  ;;  %9021 = vpow2.f32 %v6832_v31  ;;  %v6834_v40 = vmul.f32 -1.442695, %v10205_v47 }
 0x178   : > { %v9004_v21 = vpop.eup %9003  ;;  %v979_v5 = vadd.f32 1.0, %v9002_v19  ;;  %9023 = vpow2.f32 %v6833_v11  ;;  %7908 = vmatprep.mubr.bf16.mxu0 %v1307_v51  ;;  %v6835_v19 = vmul.f32 -1.442695, %v10210_v17  ;;  %12331 = vst [vmem:[#allocation48_spill] sm:$0xff] %v10224_v53 }
 0x179   : > { %v9006_v36 = vpop.eup %9005  ;;  %9025 = vrcp.f32 %v978_v55  ;;  %v980_v44 = vadd.f32 1.0, %v9004_v21  ;;  %v728_v50 = vpop.f32.mrb[60].mxu0 }
 0x17a   : > { %v9008_v2 = vpop.eup %9007  ;;  %9027 = vrcp.f32 %v979_v5  ;;  %v981_v45 = vadd.f32 1.0, %v9006_v36  ;;  %v10216_v31 = vadd.f32 %v728_v50, %v9796_v14  ;;  %v730_v18 = vpop.f32.mrb[61].mxu0 }
 0x17b   : > { %v9010_v48 = vpop.eup %9009  ;;  %9029 = vrcp.f32 %v980_v44  ;;  %v982_v7 = vadd.f32 1.0, %v9008_v2  ;;  %v10220_v11 = vadd.f32 %v730_v18, %v9798_v15  ;;  %v732_v51 = vpop.f32.mrb[62].mxu0 }
 0x17c   : > { %v9012_v55 = vpop.eup %9011  ;;  %9031 = vrcp.f32 %v981_v45  ;;  %v6836_v21 = vmul.f32 -1.442695, %v10216_v31  ;;  %v734_v5 = vpop.f32.mrb[63].mxu0  ;;  %v10231_v18 = vmul.f32 %v9010_v48, %v10102_v8  ;;  %v10237_v45 = vadd.f32 %v732_v51, %v9796_v14 }
 0x17d   : > { %v9014_v36 = vpop.eup %9013  ;;  %v10227_v50 = vmul.f32 %v9012_v55, %v10108_v60  ;;  %9033 = vrcp.f32 %v982_v7  ;;  %v6837_v44 = vmul.f32 -1.442695, %v10220_v11  ;;  %v10240_v43 = vadd.f32 %v734_v5, %v9798_v15 }
 0x17e   : > { %v9016_v2 = vpop.eup %9015  ;;  %12333 = vst [vmem:[#allocation50_spill] sm:$0xff] %v10231_v18  ;;  %v10234_v9 = vmul.f32 %v9014_v36, %v10111_v12  ;;  %9035 = vpow2.f32 %v6834_v40  ;;  %v6838_v40 = vmul.f32 -1.442695, %v10237_v45 }
 0x17f   : > { %12332 = vst [vmem:[#allocation49_spill] sm:$0xff] %v10227_v50  ;;  %v9018_v0 = vpop.eup %9017  ;;  %9037 = vpow2.f32 %v6835_v19  ;;  %v1308_v60 = vpack.c.bf16 %v10227_v50, %v10224_v53  ;;  %v6839_v15 = vmul.f32 -1.442695, %v10240_v43 }
 0x180   : > { %12334 = vst [vmem:[#allocation51_spill] sm:$0xff] %v10234_v9  ;;  %v9020_v16 = vpop.eup %9019  ;;  %v983_v7 = vadd.f32 1.0, %v9018_v0  ;;  %9039 = vpow2.f32 %v6836_v21  ;;  %v10249_v0 = vmul.f32 %v9016_v2, %v10121_v52 }
 0x181   : > { %v9022_v8 = vpop.eup %9021  ;;  %v984_v12 = vadd.f32 1.0, %v9020_v16  ;;  %9041 = vpow2.f32 %v6837_v44  ;;  %7909 = vmatmul.mubr.bf16.gmra.mrb[84].mxu0 %v1308_v60 }
 0x182   : > { %v9024_v14 = vpop.eup %9023  ;;  %9043 = vrcp.f32 %v983_v7  ;;  %12335 = vst [vmem:[#allocation52_spill] sm:$0xff] %v10249_v0  ;;  %v985_v5 = vadd.f32 1.0, %v9022_v8 }
 0x183   : > { %v9026_v19 = vpop.eup %9025  ;;  %9045 = vrcp.f32 %v984_v12  ;;  %v986_v16 = vadd.f32 1.0, %v9024_v14 }
 0x184   : > { %v9028_v51 = vpop.eup %9027  ;;  %v10255_v44 = vmul.f32 %v9026_v19, %v10131_v29  ;;  %9047 = vpow2.f32 %v6838_v40 }
 0x185   : > { %v9030_v55 = vpop.eup %9029  ;;  %v10252_v21 = vmul.f32 %v9028_v51, %v10140_v57  ;;  %9049 = vpow2.f32 %v6839_v15 }
 0x186   : > { %v9032_v36 = vpop.eup %9031  ;;  %12337 = vst [vmem:[#allocation54_spill] sm:$0xff] %v10255_v44  ;;  %v10258_v60 = vmul.f32 %v9030_v55, %v10143_v6  ;;  %9051 = vrcp.f32 %v985_v5 }
 0x187   : > { %12336 = vst [vmem:[#allocation53_spill] sm:$0xff] %v10252_v21  ;;  %v9034_v7 = vpop.eup %9033  ;;  %v1309_v12 = vpack.c.bf16 %v10252_v21, %v10249_v0  ;;  %9053 = vrcp.f32 %v986_v16  ;;  %v10265_v15 = vmul.f32 %v9032_v36, %v10153_v49 }
 0x188   : > { %12338 = vst [vmem:[#allocation55_spill] sm:$0xff] %v10258_v60  ;;  %v9036_v52 = vpop.eup %9035  ;;  %v10271_v57 = vmul.f32 %v9034_v7, %v10159_v3  ;;  %v8716_v7 = vld [vmem:[%s12172_s5 + $0x8] sm:$0xff]  }
 0x189   : > { %v9038_v2 = vpop.eup %9037  ;;  %v987_v8 = vadd.f32 1.0, %v9036_v52  ;;  %7912 = vmatprep.mubr.bf16.mxu0 %v1309_v12  ;;  %12339 = vst [vmem:[#allocation56_spill] sm:$0xff] %v10265_v15  ;;  %v8715_v52 = vld [vmem:[%s12172_s5] sm:$0xff]  }
 0x18a   : > { %v9040_v29 = vpop.eup %9039  ;;  %v988_v19 = vadd.f32 1.0, %v9038_v2  ;;  %12341 = vst [vmem:[#allocation58_spill] sm:$0xff] %v10271_v57  ;;  %7920 = vmatprep.subr.bf16.mxu0 %v8715_v52 }
 0x18b   : > { %v9042_v6 = vpop.eup %9041  ;;  %9055 = vrcp.f32 %v987_v8  ;;  %v989_v55 = vadd.f32 1.0, %v9040_v29  ;;  %7921 = vmatpush3.bf16.msra.mxu0 %v8715_v52 }
 0x18c   : > { %v9044_v14 = vpop.eup %9043  ;;  %9057 = vrcp.f32 %v988_v19  ;;  %v990_v16 = vadd.f32 1.0, %v9042_v6  ;;  %7922 = vmatprep.subr.bf16.mxu0 %v8716_v7 }
 0x18d   : > { %v9046_v40 = vpop.eup %9045  ;;  %v10268_v51 = vmul.f32 %v9044_v14, %v10173_v58  ;;  %9059 = vrcp.f32 %v989_v55 }
 0x18e   : > { %v10274_v5 = vmul.f32 %v9046_v40, %v10176_v39  ;;  %v9048_v49 = vpop.eup %9047  ;;  %9061 = vrcp.f32 %v990_v16  ;;  %v8717_v16 = vld [vmem:[%s12172_s5 + $0x10] sm:$0xff]  }
 0x18f   : > { %12340 = vst [vmem:[#allocation57_spill] sm:$0xff] %v10268_v51  ;;  %v1310_v12 = vpack.c.bf16 %v10268_v51, %v10265_v15  ;;  %v9050_v36 = vpop.eup %9049  ;;  %v991_v2 = vadd.f32 1.0, %v9048_v49  ;;  %7923 = vmatpush3.bf16.msra.mxu0 %v8716_v7  ;;  %v8719_v7 = vld [vmem:[%s12172_s5 + $0x20] sm:$0xff]  }
 0x190   : > { %12342 = vst [vmem:[#allocation59_spill] sm:$0xff] %v10274_v5  ;;  %v992_v3 = vadd.f32 1.0, %v9050_v36  ;;  %v9052_v39 = vpop.eup %9051  ;;  %7924 = vmatprep.subr.bf16.mxu0 %v8717_v16 }
 0x191   : > { %7913 = vmatmul.mubr.bf16.gmra.mrb[88].mxu0 %v1310_v12  ;;  %9063 = vrcp.f32 %v991_v2  ;;  %v9054_v8 = vpop.eup %9053  ;;  %v10287_v6 = vmul.f32 %v9052_v39, %v10185_v46 }
 0x192   : > { %9065 = vrcp.f32 %v992_v3  ;;  %v10293_v40 = vmul.f32 %v9054_v8, %v10188_v22  ;;  %v8718_v22 = vld [vmem:[%s12172_s5 + $0x18] sm:$0xff]  }
 0x193   : > { %12343 = vst [vmem:[#allocation60_spill] sm:$0xff] %v10287_v6  ;;  %7925 = vmatpush3.bf16.msra.mxu0 %v8717_v16 }
 0x194   : > { %12345 = vst [vmem:[#allocation62_spill] sm:$0xff] %v10293_v40  ;;  %7926 = vmatprep.subr.bf16.mxu0 %v8718_v22  ;;  %v10413_v40 = vld [vmem:[%s12172_s5 + $0x40] sm:$0xff]  }
 0x195   : > { %v9056_v29 = vpop.eup %9055 }
 0x196   : > { %v9058_v19 = vpop.eup %9057  ;;  %v10290_v14 = vmul.f32 %v9056_v29, %v10205_v47  ;;  %v8722_v29 = vld [vmem:[%s12172_s5 + $0x38] sm:$0xff]  }
 0x197   : > { %v10296_v55 = vmul.f32 %v9058_v19, %v10210_v17  ;;  %v9060_v47 = vpop.eup %9059  ;;  %7927 = vmatpush3.bf16.msra.mxu0 %v8718_v22  ;;  %v1796_v19 = vand.u32 15, %v9789_v10  ;;  %v8774_v22 = vld [vmem:[%s12172_s5 + $0x1d8] sm:$0xff]  }
 0x198   : > { %12344 = vst [vmem:[#allocation61_spill] sm:$0xff] %v10290_v14  ;;  %v1311_v12 = vpack.c.bf16 %v10290_v14, %v10287_v6  ;;  %v9062_v17 = vpop.eup %9061  ;;  %v10309_v36 = vmul.f32 %v9060_v47, %v10216_v31  ;;  %7928 = vmatprep.subr.bf16.mxu0 %v8719_v7 }
 0x199   : > { %12346 = vst [vmem:[#allocation63_spill] sm:$0xff] %v10296_v55  ;;  %v10315_v3 = vmul.f32 %v9062_v17, %v10220_v11  ;;  %v8720_v11 = vld [vmem:[%s12172_s5 + $0x28] sm:$0xff]   ;;  %vm2176_vm0 = vcmp.ne.s32.totalorder %v1796_v19, 0  ;;  %v10347_v17 = vld [vmem:[%s12172_s5 + $0x100] sm:$0xff]  }
 0x19a   : > { %7916 = vmatprep.mubr.bf16.mxu0 %v1311_v12  ;;  %12347 = vst [vmem:[#allocation64_spill] sm:$0xff] %v10309_v36  ;;  %vm10338_vm2 = vmpackc.low %vm9590_vm1, %vm2176_vm0  ;;  %8400 = vmatprep.subr.bf16.mxu1 %v10347_v17 }
 0x19b   : > { %v9064_v52 = vpop.eup %9063  ;;  %12349 = vst [vmem:[#allocation66_spill] sm:$0xff] %v10315_v3  ;;  %7929 = vmatpush3.bf16.msra.mxu0 %v8719_v7  ;;  %8408 = vmatpush3.bf16.msra.mxu1 %v10347_v17  ;;  %v10369_v7 = vld [vmem:[%s12172_s5 + $0x118] sm:$0xff]  }
 0x19c   : > { %v9066_v49 = vpop.eup %9065  ;;  %v10312_v2 = vmul.f32 %v9064_v52, %v10237_v45  ;;  %7930 = vmatprep.subr.bf16.mxu0 %v8720_v11  ;;  %v9589_v45 = vmov 0.0   ;;  %v10355_v52 = vld [vmem:[%s12172_s5 + $0x108] sm:$0xff]  }
 0x19d   : > { %v10318_v39 = vmul.f32 %v9066_v49, %v10240_v43  ;;  %1753 = vst [vmem:[#allocation3] sm:$0xff] %v9589_v45  ;;  %1754 = vst [vmem:[#allocation3 + $0x8] sm:$0xff] %v9589_v45  ;;  %v8721_v43 = vld [vmem:[%s12172_s5 + $0x30] sm:$0xff]   ;;  %8401 = vmatprep.subr.bf16.mxu1 %v10355_v52 }
 0x19e   : > { %12348 = vst [vmem:[#allocation65_spill] sm:$0xff] %v10312_v2  ;;  %v1312_v8 = vpack.c.bf16 %v10312_v2, %v10309_v36  ;;  %1755 = vst [vmem:[#allocation3 + $0x10] sm:$0xff] %v9589_v45  ;;  %v10362_v49 = vld [vmem:[%s12172_s5 + $0x110] sm:$0xff]  }
 0x19f   : > { %12350 = vst [vmem:[#allocation67_spill] sm:$0xff] %v10318_v39  ;;  %1756 = vst [vmem:[#allocation3 + $0x118] sm:$0xff] %v9589_v45  ;;  %7931 = vmatpush3.bf16.msra.mxu0 %v8720_v11  ;;  %8409 = vmatpush3.bf16.msra.mxu1 %v10355_v52  ;;  %v10383_v11 = vld [vmem:[%s12172_s5 + $0x128] sm:$0xff]  }
 0x1a0   : > { %7917 = vmatmul.mubr.bf16.gmra.mrb[92].mxu0 %v1312_v8  ;;  %1757 = vst [vmem:[#allocation3 + $0x120] sm:$0xff] %v9589_v45  ;;  %1758 = vst [vmem:[#allocation3 + $0x128] sm:$0xff] %v9589_v45  ;;  %7932 = vmatprep.subr.bf16.mxu0 %v8721_v43  ;;  %v10376_v8 = vld [vmem:[%s12172_s5 + $0x120] sm:$0xff]   ;;  %v10390_v45 = vld [vmem:[%s12172_s5 + $0x130] sm:$0xff]  }
 0x1a1   : > { %8402 = vmatprep.subr.bf16.mxu1 %v10362_v49 }
 0x1a3   : > { %7933 = vmatpush3.bf16.msra.mxu0 %v8721_v43  ;;  %8410 = vmatpush3.bf16.msra.mxu1 %v10362_v49  ;;  %v10397_v43 = vld [vmem:[%s12172_s5 + $0x138] sm:$0xff]  }
 0x1a4   : > { %7934 = vmatprep.subr.bf16.mxu0 %v8722_v29  ;;  %v2305_v16 = vld [vmem:[#allocation3 + $0x7] sm:$0xff]  ;;  %8403 = vmatprep.subr.bf16.mxu1 %v10369_v7 }
 0x1a5   : > { %v2306_v12 = vld [vmem:[#allocation3 + $0xf] sm:$0xff] }
 0x1a6   : > { %v6906_v47 = vpack.c.bf16 %v2306_v12, %v2305_v16 }
 0x1a7   : > { %7935 = vmatpush3.bf16.msra.mxu0 %v8722_v29  ;;  %8411 = vmatpush3.bf16.msra.mxu1 %v10369_v7  ;;  %v10404_v29 = vld [vmem:[%s12171_s4] ss:$0 sm:$0xff] }
 0x1a8   : > { %7936 = vmatprep.mubr.msk.bf16.mxu0 %vm10338_vm2, %v6906_v47  ;;  %7968 = vmatprep.subr.bf16.mxu0 %v10347_v17 }
 0x1a9   : > { %8404 = vmatprep.subr.bf16.mxu1 %v10376_v8 }
 0x1ab   : > { %8412 = vmatpush3.bf16.msra.mxu1 %v10376_v8 }
 0x1ac   : > { %8405 = vmatprep.subr.bf16.mxu1 %v10383_v11 }
 0x1af   : > { %8413 = vmatpush3.bf16.msra.mxu1 %v10383_v11 }
 0x1b0   : > { %8406 = vmatprep.subr.bf16.mxu1 %v10390_v45 }
 0x1b3   : > { %8414 = vmatpush3.bf16.msra.mxu1 %v10390_v45 }
 0x1b4   : > { %8407 = vmatprep.subr.bf16.mxu1 %v10397_v43 }
 0x1b7   : > { %8415 = vmatpush3.bf16.msra.mxu1 %v10397_v43 }
 0x1b8   : > { %8016 = vmatprep.subr.bf16.mxu1 %v10413_v40 }
 0x1ff   : > { %v7890_v19 = vpop.f32.mrb[64].mxu0 }
 0x200   : > { %v1411_v16 = vadd.f32 %v7890_v19, %v10404_v29  ;;  %v1402_v12 = vpop.f32.mrb[65].mxu0 }
 0x201   : > { %v1403_v47 = vadd.f32 %v10404_v29, %v1402_v12  ;;  %v7891_v31 = vpop.f32.mrb[66].mxu0 }
 0x202   : > { %v6851_v46 = vmul.f32 -1.442695, %v1411_v16  ;;  %v1414_v58 = vadd.f32 %v7891_v31, %v10404_v29  ;;  %v1405_v48 = vpop.f32.mrb[67].mxu0 }
 0x203   : > { %v6849_v3 = vmul.f32 -1.442695, %v1403_v47  ;;  %v1406_v39 = vadd.f32 %v10404_v29, %v1405_v48 }
 0x204   : > { %9067 = vpow2.f32 %v6851_v46  ;;  %v6852_v55 = vmul.f32 -1.442695, %v1414_v58 }
 0x205   : > { %9069 = vpow2.f32 %v6849_v3  ;;  %v6850_v19 = vmul.f32 -1.442695, %v1406_v39 }
 0x206   : > { %9071 = vpow2.f32 %v6852_v55 }
 0x207   : > { %9073 = vpow2.f32 %v6850_v19 }
 0x20e   : > { %v9068_v12 = vpop.eup %9067 }
 0x20f   : > { %v9070_v57 = vpop.eup %9069  ;;  %v1627_v31 = vadd.f32 1.0, %v9068_v12 }
 0x210   : > { %v9072_v5 = vpop.eup %9071  ;;  %v1625_v44 = vadd.f32 1.0, %v9070_v57  ;;  %v7894_v60 = vpop.f32.mrb[68].mxu0 }
 0x211   : > { %v9074_v48 = vpop.eup %9073  ;;  %9075 = vrcp.f32 %v1627_v31  ;;  %v1628_v18 = vadd.f32 1.0, %v9072_v5  ;;  %v10417_v9 = vadd.f32 %v7894_v60, %v10404_v29  ;;  %v1418_v46 = vpop.f32.mrb[69].mxu0 }
 0x212   : > { %9077 = vrcp.f32 %v1625_v44  ;;  %v1626_v3 = vadd.f32 1.0, %v9074_v48  ;;  %v10420_v1 = vadd.f32 %v10404_v29, %v1418_v46  ;;  %v7895_v55 = vpop.f32.mrb[70].mxu0 }
 0x213   : > { %9079 = vrcp.f32 %v1628_v18  ;;  %v6855_v19 = vmul.f32 -1.442695, %v10417_v9  ;;  %v10424_v12 = vadd.f32 %v7895_v55, %v10404_v29  ;;  %v1421_v57 = vpop.f32.mrb[71].mxu0  ;;  %v1762_v55 = vadd.s32 16, %v9789_v10 }
 0x214   : > { %9081 = vrcp.f32 %v1626_v3  ;;  %v6853_v5 = vmul.f32 -1.442695, %v10420_v1  ;;  %v10428_v60 = vadd.f32 %v10404_v29, %v1421_v57  ;;  %v1764_v57 = vadd.s32 32, %v9789_v10 }
 0x215   : > { %9083 = vpow2.f32 %v6855_v19  ;;  %v6856_v44 = vmul.f32 -1.442695, %v10424_v12 }
 0x216   : > { %9085 = vpow2.f32 %v6853_v5  ;;  %v6854_v31 = vmul.f32 -1.442695, %v10428_v60 }
 0x217   : > { %9087 = vpow2.f32 %v6856_v44 }
 0x218   : > { %9089 = vpow2.f32 %v6854_v31 }
 0x21b   : > { %v9076_v18 = vpop.eup %9075 }
 0x21c   : > { %v9078_v48 = vpop.eup %9077  ;;  %v10432_v46 = vmul.f32 %v9076_v18, %v1411_v16  ;;  %v1810_v18 = vand.u32 15, %v1762_v55 }
 0x21d   : > { %v9080_v3 = vpop.eup %9079  ;;  %v10435_v32 = vmul.f32 %v9078_v48, %v1403_v47 }
 0x21e   : > { %v9082_v33 = vpop.eup %9081  ;;  %2242 = vst [vmem:[#allocation3 + $0x28] sm:$0xff] %v10432_v46  ;;  %v10438_v19 = vmul.f32 %v9080_v3, %v1414_v58  ;;  %vm2178_vm3 = vcmp.ne.s32.totalorder %v1810_v18, 0 }
 0x21f   : > { %v9084_v5 = vpop.eup %9083  ;;  %2240 = vst [vmem:[#allocation3 + $0x18] sm:$0xff] %v10435_v32  ;;  %v10442_v44 = vmul.f32 %v9082_v33, %v1406_v39  ;;  %v1824_v33 = vand.u32 15, %v1764_v57  ;;  %vm10465_vm5 = vmpackc.low %vm9590_vm1, %vm2178_vm3 }
 0x220   : > { %v9086_v31 = vpop.eup %9085  ;;  %2243 = vst [vmem:[#allocation3 + $0x30] sm:$0xff] %v10438_v19  ;;  %v1631_v47 = vadd.f32 1.0, %v9084_v5 }
 0x221   : > { %v9088_v48 = vpop.eup %9087  ;;  %2241 = vst [vmem:[#allocation3 + $0x20] sm:$0xff] %v10442_v44  ;;  %v1629_v58 = vadd.f32 1.0, %v9086_v31  ;;  %vm2180_vm4 = vcmp.ne.s32.totalorder %v1824_v33, 0 }
 0x222   : > { %v9090_v14 = vpop.eup %9089  ;;  %9091 = vrcp.f32 %v1631_v47  ;;  %v1632_v6 = vadd.f32 1.0, %v9088_v48  ;;  %v7898_v2 = vpop.f32.mrb[72].mxu0  ;;  %vm10472_vm6 = vmpackc.low %vm9590_vm1, %vm2180_vm4 }
 0x223   : > { %9093 = vrcp.f32 %v1629_v58  ;;  %v1630_v39 = vadd.f32 1.0, %v9090_v14  ;;  %v10451_v36 = vadd.f32 %v7898_v2, %v10404_v29  ;;  %v1434_v5 = vpop.f32.mrb[73].mxu0 }
 0x224   : > { %9095 = vrcp.f32 %v1632_v6  ;;  %v10454_v55 = vadd.f32 %v10404_v29, %v1434_v5  ;;  %v7899_v31 = vpop.f32.mrb[74].mxu0 }
 0x225   : > { %9097 = vrcp.f32 %v1630_v39  ;;  %v6859_v16 = vmul.f32 -1.442695, %v10451_v36  ;;  %v10458_v47 = vadd.f32 %v7899_v31, %v10404_v29  ;;  %v1437_v57 = vpop.f32.mrb[75].mxu0 }
 0x226   : > { %v6857_v14 = vmul.f32 -1.442695, %v10454_v55  ;;  %v10462_v6 = vadd.f32 %v10404_v29, %v1437_v57  ;;  %v2307_v58 = vld [vmem:[#allocation3 + $0x17] sm:$0xff]  ;;  %v12355_v57 = vmov 0 }
 0x227   : > { %v2310_v18 = vld [vmem:[#allocation3 + $0x2f] sm:$0xff]  ;;  %9099 = vpow2.f32 %v6859_v16  ;;  %v6860_v48 = vmul.f32 -1.442695, %v10458_v47  ;;  %v12356_v57 = vsel %vm10472_vm6, 4294967295, %v12355_v57 }
 0x228   : > { %v2308_v39 = vld [vmem:[#allocation3 + $0x1f] sm:$0xff]  ;;  %v2309_v5 = vld [vmem:[#allocation3 + $0x27] sm:$0xff]  ;;  %9101 = vpow2.f32 %v6857_v14  ;;  %v6858_v33 = vmul.f32 -1.442695, %v10462_v6  ;;  %12357 = vst [vmem:[#allocation68_spill] sm:$0xff] %v12356_v57  ;;  %v3594_v62 = vld [vmem:[#allocation3 + $0x2f] sm:$0xff] }
 0x229   : > { %v6909_v31 = vpack.c.bf16 %v2308_v39, %v2307_v58  ;;  %v6912_v3 = vpack.c.bf16 %v2310_v18, %v2309_v5  ;;  %9103 = vpow2.f32 %v6860_v48  ;;  %v1766_v39 = vadd.s32 48, %v9789_v10 }
 0x22a   : > { %9105 = vpow2.f32 %v6858_v33 }
 0x22b   : > { %7937 = vmatmul.mubr.msk.bf16.vlgmr.msra.gmra.mrb[96].mxu0 %vm10465_vm5, %v6909_v31 }
 0x22c   : > { %v9092_v16 = vpop.eup %9091  ;;  %7940 = vmatprep.mubr.msk.bf16.mxu0 %vm10472_vm6, %v6912_v3  ;;  %7969 = vmatpush3.bf16.msra.mxu0 %v10347_v17  ;;  %v1768_v17 = vadd.s32 64, %v9789_v10  ;;  %v1838_v3 = vand.u32 15, %v1766_v39 }
 0x22d   : > { %v9094_v14 = vpop.eup %9093  ;;  %v10482_v58 = vmul.f32 %v9092_v16, %v10417_v9  ;;  %7970 = vmatprep.subr.bf16.mxu0 %v10355_v52 }
 0x22e   : > { %v9096_v18 = vpop.eup %9095  ;;  %v10487_v48 = vmul.f32 %v9094_v14, %v10420_v1  ;;  %vm2182_vm7 = vcmp.ne.s32.totalorder %v1838_v3, 0 }
 0x22f   : > { %v9098_v5 = vpop.eup %9097  ;;  %2246 = vst [vmem:[#allocation3 + $0x48] sm:$0xff] %v10482_v58  ;;  %v10491_v33 = vmul.f32 %v9096_v18, %v10424_v12  ;;  %v1852_v18 = vand.u32 15, %v1768_v17  ;;  %vm10524_vm9 = vmpackc.low %vm9590_vm1, %vm2182_vm7 }
 0x230   : > { %2244 = vst [vmem:[#allocation3 + $0x38] sm:$0xff] %v10487_v48  ;;  %v10496_v9 = vmul.f32 %v9098_v5, %v10428_v60  ;;  %7971 = vmatpush3.bf16.msra.mxu0 %v10355_v52 }
 0x231   : > { %2247 = vst [vmem:[#allocation3 + $0x50] sm:$0xff] %v10491_v33  ;;  %7972 = vmatprep.subr.bf16.mxu0 %v10362_v49  ;;  %v9100_v31 = vpop.eup %9099  ;;  %vm2184_vm8 = vcmp.ne.s32.totalorder %v1852_v18, 0 }
 0x232   : > { %2245 = vst [vmem:[#allocation3 + $0x40] sm:$0xff] %v10496_v9  ;;  %v9102_v16 = vpop.eup %9101  ;;  %v1635_v14 = vadd.f32 1.0, %v9100_v31  ;;  %v7902_v60 = vpop.f32.mrb[76].mxu0  ;;  %vm10532_vm10 = vmpackc.low %vm9590_vm1, %vm2184_vm8 }
 0x233   : > { %v9104_v5 = vpop.eup %9103  ;;  %v1633_v52 = vadd.f32 1.0, %v9102_v16  ;;  %v10507_v21 = vadd.f32 %v7902_v60, %v10404_v29  ;;  %v1450_v39 = vpop.f32.mrb[77].mxu0 }
 0x234   : > { %7973 = vmatpush3.bf16.msra.mxu0 %v10362_v49  ;;  %v9106_v0 = vpop.eup %9105  ;;  %9107 = vrcp.f32 %v1635_v14  ;;  %v1636_v1 = vadd.f32 1.0, %v9104_v5  ;;  %v10511_v51 = vadd.f32 %v10404_v29, %v1450_v39  ;;  %v7903_v15 = vpop.f32.mrb[78].mxu0  ;;  %v12358_v5 = vmov 0 }
 0x235   : > { %7974 = vmatprep.subr.bf16.mxu0 %v10369_v7  ;;  %9109 = vrcp.f32 %v1633_v52  ;;  %v1634_v17 = vadd.f32 1.0, %v9106_v0  ;;  %v6863_v31 = vmul.f32 -1.442695, %v10507_v21  ;;  %v10516_v16 = vadd.f32 %v7903_v15, %v10404_v29  ;;  %v1453_v60 = vpop.f32.mrb[79].mxu0 }
 0x236   : > { %9111 = vrcp.f32 %v1636_v1  ;;  %v6861_v49 = vmul.f32 -1.442695, %v10511_v51  ;;  %v10520_v14 = vadd.f32 %v10404_v29, %v1453_v60  ;;  %v12359_v5 = vsel %vm10524_vm9, 4294967295, %v12358_v5 }
 0x237   : > { %9113 = vrcp.f32 %v1634_v17  ;;  %v6864_v3 = vmul.f32 -1.442695, %v10516_v16  ;;  %12360 = vst [vmem:[#allocation69_spill] sm:$0xff] %v12359_v5  ;;  %v2311_v1 = vld [vmem:[#allocation3 + $0x37] sm:$0xff]  ;;  %v12361_v17 = vmov 0  ;;  %v8760_v5 = vld [vmem:[%s12172_s5 + $0x168] sm:$0xff]  }
 0x238   : > { %v2314_v0 = vld [vmem:[#allocation3 + $0x4f] sm:$0xff]  ;;  %7975 = vmatpush3.bf16.msra.mxu0 %v10369_v7  ;;  %9115 = vpow2.f32 %v6863_v31  ;;  %v6862_v15 = vmul.f32 -1.442695, %v10520_v14  ;;  %v12362_v17 = vsel %vm10532_vm10, 4294967295, %v12361_v17 }
 0x239   : > { %v2312_v52 = vld [vmem:[#allocation3 + $0x3f] sm:$0xff]  ;;  %v2313_v39 = vld [vmem:[#allocation3 + $0x47] sm:$0xff]  ;;  %7976 = vmatprep.subr.bf16.mxu0 %v10376_v8  ;;  %9117 = vpow2.f32 %v6861_v49  ;;  %12363 = vst [vmem:[#allocation70_spill] sm:$0xff] %v12362_v17 }
 0x23a   : > { %v6915_v18 = vpack.c.bf16 %v2312_v52, %v2311_v1  ;;  %v6918_v60 = vpack.c.bf16 %v2314_v0, %v2313_v39  ;;  %9119 = vpow2.f32 %v6864_v3  ;;  %v1770_v1 = vadd.s32 80, %v9789_v10  ;;  %v3596_v61 = vld [vmem:[#allocation3 + $0x3f] sm:$0xff] }
 0x23b   : > { %9121 = vpow2.f32 %v6862_v15  ;;  %v1772_v0 = vadd.s32 96, %v9789_v10 }
 0x23c   : > { %7941 = vmatmul.mubr.msk.bf16.gmra.mrb[100].mxu0 %vm10524_vm9, %v6915_v18  ;;  %v1866_v12 = vand.u32 15, %v1770_v1 }
 0x23d   : > { %7944 = vmatprep.mubr.msk.bf16.mxu0 %vm10532_vm10, %v6918_v60  ;;  %7977 = vmatpush3.bf16.msra.mxu0 %v10376_v8  ;;  %v1880_v50 = vand.u32 15, %v1772_v0 }
 0x23e   : > { %7978 = vmatprep.subr.bf16.mxu0 %v10383_v11  ;;  %v9108_v7 = vpop.eup %9107  ;;  %vm2186_vm11 = vcmp.ne.s32.totalorder %v1866_v12, 0 }
 0x23f   : > { %v9110_v31 = vpop.eup %9109  ;;  %v1731_v49 = vmul.f32 %v9108_v7, %v10451_v36  ;;  %vm2188_vm12 = vcmp.ne.s32.totalorder %v1880_v50, 0  ;;  %vm10574_vm13 = vmpackc.low %vm9590_vm1, %vm2186_vm11 }
 0x240   : > { %v9112_v52 = vpop.eup %9111  ;;  %v1729_v3 = vmul.f32 %v9110_v31, %v10454_v55  ;;  %vm10579_vm14 = vmpackc.low %vm9590_vm1, %vm2188_vm12 }
 0x241   : > { %7979 = vmatpush3.bf16.msra.mxu0 %v10383_v11  ;;  %v9114_v15 = vpop.eup %9113  ;;  %2250 = vst [vmem:[#allocation3 + $0x68] sm:$0xff] %v1731_v49  ;;  %v1732_v39 = vmul.f32 %v9112_v52, %v10458_v47 }
 0x242   : > { %7980 = vmatprep.subr.bf16.mxu0 %v10390_v45  ;;  %v9116_v8 = vpop.eup %9115  ;;  %2248 = vst [vmem:[#allocation3 + $0x58] sm:$0xff] %v1729_v3  ;;  %v1730_v18 = vmul.f32 %v9114_v15, %v10462_v6 }
 0x243   : > { %v7906_v36 = vpop.f32.mrb[80].mxu0  ;;  %v9118_v60 = vpop.eup %9117  ;;  %2251 = vst [vmem:[#allocation3 + $0x70] sm:$0xff] %v1732_v39  ;;  %v1639_v7 = vadd.f32 1.0, %v9116_v8  ;;  %v10553_v11 = vpack.c.bf16 %v1732_v39, %v1731_v49 }
 0x244   : > { %v10551_v55 = vadd.f32 %v7906_v36, %v10404_v29  ;;  %v1466_v31 = vpop.f32.mrb[81].mxu0  ;;  %v9120_v30 = vpop.eup %9119  ;;  %2249 = vst [vmem:[#allocation3 + $0x60] sm:$0xff] %v1730_v18  ;;  %v1637_v47 = vadd.f32 1.0, %v9118_v60  ;;  %v10559_v6 = vpack.c.bf16 %v1730_v18, %v1729_v3 }
 0x245   : > { %v10556_v52 = vadd.f32 %v10404_v29, %v1466_v31  ;;  %v7907_v25 = vpop.f32.mrb[82].mxu0  ;;  %7981 = vmatpush3.bf16.msra.mxu0 %v10390_v45  ;;  %v9122_v15 = vpop.eup %9121  ;;  %9123 = vrcp.f32 %v1639_v7  ;;  %v1640_v8 = vadd.f32 1.0, %v9120_v30 }
 0x246   : > { %v6867_v36 = vmul.f32 -1.442695, %v10551_v55  ;;  %v10563_v49 = vadd.f32 %v7907_v25, %v10404_v29  ;;  %v1469_v1 = vpop.f32.mrb[83].mxu0  ;;  %7982 = vmatprep.subr.bf16.mxu0 %v10397_v43  ;;  %9125 = vrcp.f32 %v1637_v47  ;;  %v1638_v39 = vadd.f32 1.0, %v9122_v15  ;;  %v8779_v47 = vld [vmem:[%s12172_s5 + $0x200] sm:$0xff]  }
 0x247   : > { %v6865_v60 = vmul.f32 -1.442695, %v10556_v52  ;;  %v10568_v0 = vadd.f32 %v10404_v29, %v1469_v1  ;;  %9127 = vrcp.f32 %v1640_v8 }
 0x248   : > { %v6868_v45 = vmul.f32 -1.442695, %v10563_v49  ;;  %9129 = vrcp.f32 %v1638_v39 }
 0x249   : > { %v6866_v30 = vmul.f32 -1.442695, %v10568_v0  ;;  %7983 = vmatpush3.bf16.msra.mxu0 %v10397_v43  ;;  %9131 = vpow2.f32 %v6867_v36  ;;  %v2315_v18 = vld [vmem:[#allocation3 + $0x57] sm:$0xff]  ;;  %v1774_v36 = vadd.s32 112, %v9789_v10 }
 0x24a   : > { %9133 = vpow2.f32 %v6865_v60  ;;  %v2318_v3 = vld [vmem:[#allocation3 + $0x6f] sm:$0xff]  ;;  %v1776_v60 = vadd.s32 128, %v9789_v10 }
 0x24b   : > { %9135 = vpow2.f32 %v6868_v45  ;;  %v2316_v7 = vld [vmem:[#allocation3 + $0x5f] sm:$0xff]  ;;  %v2317_v31 = vld [vmem:[#allocation3 + $0x67] sm:$0xff] }
 0x24c   : > { %9137 = vpow2.f32 %v6866_v30  ;;  %v6921_v12 = vpack.c.bf16 %v2316_v7, %v2315_v18  ;;  %v6924_v43 = vpack.c.bf16 %v2318_v3, %v2317_v31  ;;  %v1908_v4 = vand.u32 15, %v1776_v60 }
 0x24e   : > { %7945 = vmatmul.mubr.msk.bf16.gmra.mrb[104].mxu0 %vm10574_vm13, %v6921_v12  ;;  %vm2192_vm0 = vcmp.ne.s32.totalorder %v1908_v4, 0 }
 0x24f   : > { %v9124_v50 = vpop.eup %9123  ;;  %7948 = vmatprep.mubr.msk.bf16.mxu0 %vm10579_vm14, %v6924_v43  ;;  %vm10619_vm4 = vmpackc.low %vm9590_vm1, %vm2192_vm0 }
 0x250   : > { %v9126_v15 = vpop.eup %9125  ;;  %v1735_v8 = vmul.f32 %v9124_v50, %v10507_v21  ;;  %v1894_v50 = vand.u32 15, %v1774_v36 }
 0x251   : > { %v9128_v1 = vpop.eup %9127  ;;  %v1733_v39 = vmul.f32 %v9126_v15, %v10511_v51 }
 0x252   : > { %v9130_v45 = vpop.eup %9129  ;;  %2254 = vst [vmem:[#allocation3 + $0x88] sm:$0xff] %v1735_v8  ;;  %v1736_v30 = vmul.f32 %v9128_v1, %v10516_v16  ;;  %vm2190_vm15 = vcmp.ne.s32.totalorder %v1894_v50, 0  ;;  %v12370_v50 = vmov 0 }
 0x253   : > { %v9132_v3 = vpop.eup %9131  ;;  %2252 = vst [vmem:[#allocation3 + $0x78] sm:$0xff] %v1733_v39  ;;  %v1734_v18 = vmul.f32 %v9130_v45, %v10520_v14  ;;  %vm10614_vm3 = vmpackc.low %vm9590_vm1, %vm2190_vm15  ;;  %v12371_v50 = vsel %vm10619_vm4, 4294967295, %v12370_v50 }
 0x254   : > { %v7910_v7 = vpop.f32.mrb[84].mxu0  ;;  %v9134_v31 = vpop.eup %9133  ;;  %2255 = vst [vmem:[#allocation3 + $0x90] sm:$0xff] %v1736_v30  ;;  %v1643_v12 = vadd.f32 1.0, %v9132_v3  ;;  %v10596_v51 = vpack.c.bf16 %v1736_v30, %v1735_v8 }
 0x255   : > { %v10594_v21 = vadd.f32 %v7910_v7, %v10404_v29  ;;  %v1482_v43 = vpop.f32.mrb[85].mxu0  ;;  %v9136_v15 = vpop.eup %9135  ;;  %2253 = vst [vmem:[#allocation3 + $0x80] sm:$0xff] %v1734_v18  ;;  %v1641_v53 = vadd.f32 1.0, %v9134_v31  ;;  %v10601_v14 = vpack.c.bf16 %v1734_v18, %v1733_v39 }
 0x256   : > { %v10599_v16 = vadd.f32 %v10404_v29, %v1482_v43  ;;  %v7911_v1 = vpop.f32.mrb[86].mxu0  ;;  %v9138_v45 = vpop.eup %9137  ;;  %9139 = vrcp.f32 %v1643_v12  ;;  %v1644_v3 = vadd.f32 1.0, %v9136_v15 }
 0x257   : > { %v6871_v7 = vmul.f32 -1.442695, %v10594_v21  ;;  %v10605_v34 = vadd.f32 %v7911_v1, %v10404_v29  ;;  %v1485_v8 = vpop.f32.mrb[87].mxu0  ;;  %9141 = vrcp.f32 %v1641_v53  ;;  %v1642_v36 = vadd.f32 1.0, %v9138_v45 }
 0x258   : > { %v6869_v30 = vmul.f32 -1.442695, %v10599_v16  ;;  %v10609_v31 = vadd.f32 %v10404_v29, %v1485_v8  ;;  %9143 = vrcp.f32 %v1644_v3  ;;  %v1778_v8 = vadd.s32 144, %v9789_v10 }
 0x259   : > { %v6872_v39 = vmul.f32 -1.442695, %v10605_v34  ;;  %9145 = vrcp.f32 %v1642_v36 }
 0x25a   : > { %v6870_v60 = vmul.f32 -1.442695, %v10609_v31  ;;  %9147 = vpow2.f32 %v6871_v7  ;;  %v2319_v12 = vld [vmem:[#allocation3 + $0x77] sm:$0xff]  ;;  %v1922_v38 = vand.u32 15, %v1778_v8 }
 0x25b   : > { %9149 = vpow2.f32 %v6869_v30  ;;  %v2322_v53 = vld [vmem:[#allocation3 + $0x8f] sm:$0xff] }
 0x25c   : > { %9151 = vpow2.f32 %v6872_v39  ;;  %v2320_v43 = vld [vmem:[#allocation3 + $0x7f] sm:$0xff]  ;;  %v2321_v15 = vld [vmem:[#allocation3 + $0x87] sm:$0xff]  ;;  %v1780_v39 = vadd.s32 160, %v9789_v10  ;;  %vm2194_vm7 = vcmp.ne.s32.totalorder %v1922_v38, 0 }
 0x25d   : > { %9153 = vpow2.f32 %v6870_v60  ;;  %v6927_v1 = vpack.c.bf16 %v2320_v43, %v2319_v12  ;;  %v6930_v45 = vpack.c.bf16 %v2322_v53, %v2321_v15  ;;  %vm10663_vm11 = vmpackc.low %vm9590_vm1, %vm2194_vm7  ;;  %v3604_v57 = vld [vmem:[#allocation3 + $0x7f] sm:$0xff] }
 0x25f   : > { %7949 = vmatmul.mubr.msk.bf16.gmra.mrb[108].mxu0 %vm10614_vm3, %v6927_v1 }
 0x260   : > { %v9140_v4 = vpop.eup %9139  ;;  %7952 = vmatprep.mubr.msk.bf16.mxu0 %vm10619_vm4, %v6930_v45 }
 0x261   : > { %v9142_v3 = vpop.eup %9141  ;;  %v1739_v7 = vmul.f32 %v9140_v4, %v10551_v55 }
 0x262   : > { %v9144_v36 = vpop.eup %9143  ;;  %v1737_v30 = vmul.f32 %v9142_v3, %v10556_v52 }
 0x263   : > { %v9146_v60 = vpop.eup %9145  ;;  %2258 = vst [vmem:[#allocation3 + $0xa8] sm:$0xff] %v1739_v7  ;;  %v1740_v53 = vmul.f32 %v9144_v36, %v10563_v49 }
 0x264   : > { %v7914_v12 = vpop.f32.mrb[88].mxu0  ;;  %v9148_v43 = vpop.eup %9147  ;;  %v1738_v45 = vmul.f32 %v9146_v60, %v10568_v0  ;;  %2256 = vst [vmem:[#allocation3 + $0x98] sm:$0xff] %v1737_v30  ;;  %v1936_v0 = vand.u32 15, %v1780_v39 }
 0x265   : > { %v10633_v15 = vadd.f32 %v7914_v12, %v10404_v29  ;;  %v1498_v1 = vpop.f32.mrb[89].mxu0  ;;  %v9150_v55 = vpop.eup %9149  ;;  %2259 = vst [vmem:[#allocation3 + $0xb0] sm:$0xff] %v1740_v53  ;;  %v1647_v4 = vadd.f32 1.0, %v9148_v43  ;;  %v10639_v59 = vpack.c.bf16 %v1740_v53, %v1739_v7  ;;  %v8732_v7 = vld [vmem:[%s12172_s5 + $0x48] sm:$0xff]  }
 0x266   : > { %v10637_v52 = vadd.f32 %v10404_v29, %v1498_v1  ;;  %v7915_v3 = vpop.f32.mrb[90].mxu0  ;;  %v9152_v49 = vpop.eup %9151  ;;  %v1645_v36 = vadd.f32 1.0, %v9150_v55  ;;  %2257 = vst [vmem:[#allocation3 + $0xa0] sm:$0xff] %v1738_v45  ;;  %v10644_v54 = vpack.c.bf16 %v1738_v45, %v1737_v30  ;;  %vm2196_vm8 = vcmp.ne.s32.totalorder %v1936_v0, 0  ;;  %v8733_v45 = vld [vmem:[%s12172_s5 + $0x50] sm:$0xff]   ;;  %v8734_v0 = vld [vmem:[%s12172_s5 + $0x58] sm:$0xff]  }
 0x267   : > { %v10642_v63 = vadd.f32 %v7915_v3, %v10404_v29  ;;  %v1501_v12 = vpop.f32.mrb[91].mxu0  ;;  %v9154_v60 = vpop.eup %9153  ;;  %9155 = vrcp.f32 %v1647_v4  ;;  %v1648_v43 = vadd.f32 1.0, %v9152_v49  ;;  %v6875_v1 = vmul.f32 -1.442695, %v10633_v15  ;;  %vm10670_vm12 = vmpackc.low %vm9590_vm1, %vm2196_vm8 }
 0x268   : > { %v10648_v20 = vadd.f32 %v10404_v29, %v1501_v12  ;;  %9157 = vrcp.f32 %v1645_v36  ;;  %v1646_v8 = vadd.f32 1.0, %v9154_v60  ;;  %v6873_v53 = vmul.f32 -1.442695, %v10637_v52  ;;  %8000 = vmatprep.mubr.bf16.mxu1 %v10644_v54 }
 0x269   : > { %9159 = vrcp.f32 %v1648_v43  ;;  %v6876_v30 = vmul.f32 -1.442695, %v10642_v63  ;;  %8001 = vmatmul.mubr.bf16.vlgmr.msra.gmra.mrb[0].mxu1 %v10639_v59  ;;  %v12372_v55 = vmov 0  ;;  %v12374_v36 = vmov 0 }
 0x26a   : > { %9161 = vrcp.f32 %v1646_v8  ;;  %v6874_v39 = vmul.f32 -1.442695, %v10648_v20  ;;  %8017 = vmatpush3.bf16.msra.mxu1 %v10413_v40  ;;  %v12373_v55 = vsel %vm10663_vm11, 4294967295, %v12372_v55  ;;  %v12375_v36 = vsel %vm10670_vm12, 4294967295, %v12374_v36 }
 0x26b   : > { %9163 = vpow2.f32 %v6875_v1  ;;  %8018 = vmatprep.subr.bf16.mxu1 %v8732_v7  ;;  %v2323_v38 = vld [vmem:[#allocation3 + $0x97] sm:$0xff]  ;;  %v1782_v8 = vadd.s32 176, %v9789_v10 }
 0x26c   : > { %9165 = vpow2.f32 %v6873_v53  ;;  %v2326_v4 = vld [vmem:[#allocation3 + $0xaf] sm:$0xff] }
 0x26d   : > { %9167 = vpow2.f32 %v6876_v30  ;;  %v2324_v3 = vld [vmem:[#allocation3 + $0x9f] sm:$0xff]  ;;  %v2325_v49 = vld [vmem:[#allocation3 + $0xa7] sm:$0xff]  ;;  %v1784_v30 = vadd.s32 192, %v9789_v10  ;;  %v1950_v13 = vand.u32 15, %v1782_v8 }
 0x26e   : > { %9169 = vpow2.f32 %v6874_v39  ;;  %v10667_v40 = vpack.c.bf16 %v2324_v3, %v2323_v38  ;;  %v10674_v12 = vpack.c.bf16 %v2326_v4, %v2325_v49  ;;  %8019 = vmatpush3.bf16.msra.mxu1 %v8732_v7  ;;  %v8735_v39 = vld [vmem:[%s12172_s5 + $0x60] sm:$0xff]  }
 0x26f   : > { %8020 = vmatprep.subr.bf16.mxu1 %v8733_v45  ;;  %v1964_v35 = vand.u32 15, %v1784_v30  ;;  %vm2198_vm15 = vcmp.ne.s32.totalorder %v1950_v13, 0  ;;  %v8737_v30 = vld [vmem:[%s12172_s5 + $0x70] sm:$0xff]  }
 0x270   : > { %7953 = vmatmul.mubr.msk.bf16.gmra.mrb[112].mxu0 %vm10663_vm11, %v10667_v40  ;;  %vm10723_vm7 = vmpackc.low %vm9590_vm1, %vm2198_vm15 }
 0x271   : > { %v9156_v60 = vpop.eup %9155  ;;  %7956 = vmatprep.mubr.msk.bf16.mxu0 %vm10670_vm12, %v10674_v12  ;;  %vm2200_vm0 = vcmp.ne.s32.totalorder %v1964_v35, 0 }
 0x272   : > { %v9158_v43 = vpop.eup %9157  ;;  %v1743_v1 = vmul.f32 %v9156_v60, %v10594_v21  ;;  %8021 = vmatpush3.bf16.msra.mxu1 %v8733_v45  ;;  %vm10730_vm8 = vmpackc.low %vm9590_vm1, %vm2200_vm0 }
 0x273   : > { %v9160_v7 = vpop.eup %9159  ;;  %v1741_v53 = vmul.f32 %v9158_v43, %v10599_v16  ;;  %8022 = vmatprep.subr.bf16.mxu1 %v8734_v0  ;;  %v7918_v3 = vpop.f32.mrb[92].mxu0 }
 0x274   : > { %v9162_v4 = vpop.eup %9161  ;;  %2262 = vst [vmem:[#allocation3 + $0xc8] sm:$0xff] %v1743_v1  ;;  %v1744_v38 = vmul.f32 %v9160_v7, %v10605_v34  ;;  %v10695_v45 = vadd.f32 %v7918_v3, %v10404_v29  ;;  %v1514_v16 = vpop.f32.mrb[93].mxu0 }
 0x275   : > { %v9164_v49 = vpop.eup %9163  ;;  %2260 = vst [vmem:[#allocation3 + $0xb8] sm:$0xff] %v1741_v53  ;;  %v1742_v21 = vmul.f32 %v9162_v4, %v10609_v31  ;;  %v10698_v37 = vadd.f32 %v10404_v29, %v1514_v16  ;;  %v7919_v26 = vpop.f32.mrb[94].mxu0 }
 0x276   : > { %v9166_v60 = vpop.eup %9165  ;;  %2263 = vst [vmem:[#allocation3 + $0xd0] sm:$0xff] %v1744_v38  ;;  %v1651_v43 = vadd.f32 1.0, %v9164_v49  ;;  %v10700_v56 = vpack.c.bf16 %v1744_v38, %v1743_v1  ;;  %8023 = vmatpush3.bf16.msra.mxu1 %v8734_v0  ;;  %v10703_v31 = vadd.f32 %v7919_v26, %v10404_v29  ;;  %v1517_v4 = vpop.f32.mrb[95].mxu0  ;;  %v6879_v24 = vmul.f32 -1.442695, %v10695_v45  ;;  %v8736_v0 = vld [vmem:[%s12172_s5 + $0x68] sm:$0xff]  }
 0x277   : > { %v9168_v34 = vpop.eup %9167  ;;  %2261 = vst [vmem:[#allocation3 + $0xc0] sm:$0xff] %v1742_v21  ;;  %v1649_v7 = vadd.f32 1.0, %v9166_v60  ;;  %v10705_v3 = vpack.c.bf16 %v1742_v21, %v1741_v53  ;;  %8024 = vmatprep.subr.bf16.mxu1 %v8735_v39  ;;  %v10709_v1 = vadd.f32 %v10404_v29, %v1517_v4  ;;  %v6877_v8 = vmul.f32 -1.442695, %v10698_v37 }
 0x278   : > { %v9170_v49 = vpop.eup %9169  ;;  %9171 = vrcp.f32 %v1651_v43  ;;  %v1652_v16 = vadd.f32 1.0, %v9168_v34  ;;  %v6880_v53 = vmul.f32 -1.442695, %v10703_v31  ;;  %v12376_v38 = vmov 0  ;;  %v8738_v34 = vld [vmem:[%s12172_s5 + $0x78] sm:$0xff]  }
 0x279   : > { %9173 = vrcp.f32 %v1649_v7  ;;  %v1650_v26 = vadd.f32 1.0, %v9170_v49  ;;  %8004 = vmatprep.mubr.bf16.mxu1 %v10705_v3  ;;  %v6878_v29 = vmul.f32 -1.442695, %v10709_v1  ;;  %v12377_v38 = vsel %vm10723_vm7, 4294967295, %v12376_v38 }
 0x27a   : > { %9175 = vrcp.f32 %v1652_v16  ;;  %8005 = vmatmul.mubr.bf16.gmra.mrb[4].mxu1 %v10700_v56  ;;  %v1786_v16 = vadd.s32 208, %v9789_v10 }
 0x27b   : > { %9177 = vrcp.f32 %v1650_v26  ;;  %8025 = vmatpush3.bf16.msra.mxu1 %v8735_v39 }
 0x27c   : > { %9179 = vpow2.f32 %v6879_v24  ;;  %8026 = vmatprep.subr.bf16.mxu1 %v8736_v0  ;;  %v2327_v13 = vld [vmem:[#allocation3 + $0xb7] sm:$0xff]  ;;  %v12378_v24 = vmov 0 }
 0x27d   : > { %9181 = vpow2.f32 %v6877_v8  ;;  %v2330_v21 = vld [vmem:[#allocation3 + $0xcf] sm:$0xff]  ;;  %v12379_v24 = vsel %vm10730_vm8, 4294967295, %v12378_v24  ;;  %v10751_v8 = vld [vmem:[%s12172_s5 + $0x80] sm:$0xff]   ;;  %v4285_v2 = vld [vmem:[#allocation3 + $0xb7] sm:$0xff] }
 0x27e   : > { %9183 = vpow2.f32 %v6880_v53  ;;  %v2328_v60 = vld [vmem:[#allocation3 + $0xbf] sm:$0xff]  ;;  %v2329_v43 = vld [vmem:[#allocation3 + $0xc7] sm:$0xff] }
 0x27f   : > { %9185 = vpow2.f32 %v6878_v29  ;;  %v10727_v39 = vpack.c.bf16 %v2328_v60, %v2327_v13  ;;  %v10734_v35 = vpack.c.bf16 %v2330_v21, %v2329_v43  ;;  %8027 = vmatpush3.bf16.msra.mxu1 %v8736_v0  ;;  %v1788_v21 = vadd.s32 224, %v9789_v10 }
 0x280   : > { %8028 = vmatprep.subr.bf16.mxu1 %v8737_v30  ;;  %v1978_v43 = vand.u32 15, %v1786_v16 }
 0x281   : > { %7957 = vmatmul.mubr.msk.bf16.gmra.mrb[116].mxu0 %vm10723_vm7, %v10727_v39  ;;  %v1992_v42 = vand.u32 15, %v1788_v21  ;;  %v12382_v21 = vmov 0 }
 0x282   : > { %v9172_v7 = vpop.eup %9171  ;;  %7960 = vmatprep.mubr.msk.bf16.mxu0 %vm10730_vm8, %v10734_v35  ;;  %vm2202_vm15 = vcmp.ne.s32.totalorder %v1978_v43, 0 }
 0x283   : > { %v9174_v4 = vpop.eup %9173  ;;  %v1747_v49 = vmul.f32 %v9172_v7, %v10633_v15  ;;  %8029 = vmatpush3.bf16.msra.mxu1 %v8737_v30  ;;  %vm2204_vm0 = vcmp.ne.s32.totalorder %v1992_v42, 0  ;;  %vm10764_vm8 = vmpackc.low %vm9590_vm1, %vm2202_vm15 }
 0x284   : > { %v9176_v0 = vpop.eup %9175  ;;  %v1745_v26 = vmul.f32 %v9174_v4, %v10637_v52  ;;  %8030 = vmatprep.subr.bf16.mxu1 %v8738_v34  ;;  %vm10771_vm7 = vmpackc.low %vm9590_vm1, %vm2204_vm0 }
 0x285   : > { %v9178_v53 = vpop.eup %9177  ;;  %2266 = vst [vmem:[#allocation3 + $0xe8] sm:$0xff] %v1747_v49  ;;  %v1748_v29 = vmul.f32 %v9176_v0, %v10642_v63  ;;  %v12383_v21 = vsel %vm10771_vm7, 4294967295, %v12382_v21 }
 0x286   : > { %v9180_v13 = vpop.eup %9179  ;;  %2264 = vst [vmem:[#allocation3 + $0xd8] sm:$0xff] %v1745_v26  ;;  %v1746_v15 = vmul.f32 %v9178_v53, %v10648_v20 }
 0x287   : > { %v9182_v30 = vpop.eup %9181  ;;  %2267 = vst [vmem:[#allocation3 + $0xf0] sm:$0xff] %v1748_v29  ;;  %v1655_v60 = vadd.f32 1.0, %v9180_v13  ;;  %v10756_v52 = vpack.c.bf16 %v1748_v29, %v1747_v49  ;;  %8031 = vmatpush3.bf16.msra.mxu1 %v8738_v34  ;;  %v12380_v34 = vmov 0 }
 0x288   : > { %v9184_v7 = vpop.eup %9183  ;;  %2265 = vst [vmem:[#allocation3 + $0xe0] sm:$0xff] %v1746_v15  ;;  %v1653_v4 = vadd.f32 1.0, %v9182_v30  ;;  %v10758_v23 = vpack.c.bf16 %v1746_v15, %v1745_v26  ;;  %8064 = vmatprep.subr.bf16.mxu1 %v10751_v8  ;;  %v12381_v34 = vsel %vm10764_vm8, 4294967295, %v12380_v34 }
 0x289   : > { %v9186_v63 = vpop.eup %9185  ;;  %9187 = vrcp.f32 %v1655_v60  ;;  %v1656_v0 = vadd.f32 1.0, %v9184_v7  ;;  %v1790_v60 = vadd.s32 240, %v9789_v10 }
 0x28a   : > { %9189 = vrcp.f32 %v1653_v4  ;;  %v1654_v20 = vadd.f32 1.0, %v9186_v63  ;;  %8008 = vmatprep.mubr.bf16.mxu1 %v10758_v23 }
 0x28b   : > { %9191 = vrcp.f32 %v1656_v0  ;;  %8009 = vmatmul.mubr.bf16.gmra.mrb[8].mxu1 %v10756_v52 }
 0x28c   : > { %9193 = vrcp.f32 %v1654_v20 }
 0x28d   : > { %v2331_v16 = vld [vmem:[#allocation3 + $0xd7] sm:$0xff] }
 0x28e   : > { %v2334_v49 = vld [vmem:[#allocation3 + $0xef] sm:$0xff] }
 0x28f   : > { %v2332_v26 = vld [vmem:[#allocation3 + $0xdf] sm:$0xff]  ;;  %v2333_v53 = vld [vmem:[#allocation3 + $0xe7] sm:$0xff] }
 0x290   : > { %v10768_v29 = vpack.c.bf16 %v2332_v26, %v2331_v16  ;;  %v10775_v13 = vpack.c.bf16 %v2334_v49, %v2333_v53  ;;  %v2006_v49 = vand.u32 15, %v1790_v60  ;;  %v9579_v26 = vld [vmem:[#allocation3] sm:$0xff] }
 0x291   : > { %v3216_v41 = vld [vmem:[#allocation3 + $0xe1] sm:$0xff] }
 0x292   : > { %7961 = vmatmul.mubr.msk.bf16.gmra.mrb[120].mxu0 %vm10764_vm8, %v10768_v29  ;;  %vm2206_vm15 = vcmp.ne.s32.totalorder %v2006_v49, 0  ;;  %v2891_v49 = vld [vmem:[#allocation3 + $0x48] sm:$0xff]  ;;  %v4290_v18 = vld [vmem:[#allocation3 + $0xdf] sm:$0xff] }
 0x293   : > { %v9188_v42 = vpop.eup %9187  ;;  %7964 = vmatprep.mubr.msk.bf16.mxu0 %vm10771_vm7, %v10775_v13  ;;  %vm10795_vm0 = vmpackc.low %vm9590_vm1, %vm2206_vm15 }
 0x294   : > { %v9190_v15 = vpop.eup %9189  ;;  %v1751_v30 = vmul.f32 %v9188_v42, %v10695_v45  ;;  %v10790_v45 = vpack.c.bf16 %v9579_v26, %v9579_v26  ;;  %v2888_v42 = vld [vmem:[#allocation3 + $0x30] sm:$0xff] }
 0x295   : > { %v9192_v43 = vpop.eup %9191  ;;  %v1749_v7 = vmul.f32 %v9190_v15, %v10698_v37  ;;  %v12385_v37 = vmov 0 }
 0x296   : > { %v9194_v4 = vpop.eup %9193  ;;  %2270 = vst [vmem:[#allocation3 + $0x108] sm:$0xff] %v1751_v30  ;;  %v1752_v63 = vmul.f32 %v9192_v43, %v10703_v31  ;;  %12384 = vst [vmem:[#allocation71_spill] sm:$0xff] %v10790_v45  ;;  %v12386_v37 = vsel %vm10795_vm0, 4294967295, %v12385_v37  ;;  %v2886_v31 = vld [vmem:[#allocation3 + $0x20] sm:$0xff]  ;;  %v2887_v43 = vld [vmem:[#allocation3 + $0x28] sm:$0xff] }
 0x297   : > { %2268 = vst [vmem:[#allocation3 + $0xf8] sm:$0xff] %v1749_v7  ;;  %v1750_v0 = vmul.f32 %v9194_v4, %v10709_v1  ;;  %v2934_v4 = vpack.c.bf16 %v2888_v42, %v2887_v43  ;;  %v3192_v42 = vld [vmem:[#allocation3 + $0x21] sm:$0xff]  ;;  %v12393_v43 = vmov 0 }
 0x298   : > { %2271 = vst [vmem:[#allocation3 + $0x110] sm:$0xff] %v1752_v63  ;;  %v2304_v20 = vpack.c.bf16 %v1752_v63, %v1751_v30  ;;  %v2885_v30 = vld [vmem:[#allocation3 + $0x18] sm:$0xff]  ;;  %v12387_v63 = vpack.c.bf16 %v10442_v44, %v10435_v32  ;;  %v12388_v44 = vpack.c.bf16 %v10438_v19, %v10432_v46  ;;  %v8744_v46 = vld [vmem:[%s12172_s5 + $0xa8] sm:$0xff]   ;;  %v12390_v19 = vpack.c.bf16 %v10491_v33, %v10482_v58  ;;  %v8747_v58 = vld [vmem:[%s12172_s5 + $0xc0] sm:$0xff]  }
 0x299   : > { %2269 = vst [vmem:[#allocation3 + $0x100] sm:$0xff] %v1750_v0  ;;  %v10788_v16 = vpack.c.bf16 %v1750_v0, %v1749_v7  ;;  %v2933_v60 = vpack.c.bf16 %v2886_v31, %v2885_v30  ;;  %v8740_v7 = vld [vmem:[%s12172_s5 + $0x88] sm:$0xff]   ;;  %v8741_v0 = vld [vmem:[%s12172_s5 + $0x90] sm:$0xff]   ;;  %v8742_v32 = vld [vmem:[%s12172_s5 + $0x98] sm:$0xff]   ;;  %v12389_v31 = vpack.c.bf16 %v10496_v9, %v10487_v48  ;;  %v1769_v30 = vadd.s32 72, %v9789_v10 }
 0x29a   : > { %v8745_v48 = vld [vmem:[%s12172_s5 + $0xb0] sm:$0xff]  }
 0x29b   : > { %8012 = vmatprep.mubr.bf16.mxu1 %v10788_v16 }
 0x29c   : > { %8013 = vmatmul.mubr.bf16.gmra.mrb[12].mxu1 %v2304_v20  ;;  %v2889_v20 = vld [vmem:[#allocation3 + $0x38] sm:$0xff] }
 0x29d   : > { %8032 = vmatprep.mubr.bf16.mxu1 %v10790_v45  ;;  %v2935_v26 = vpack.c.bf16 %v10496_v9, %v2889_v20  ;;  %v8746_v9 = vld [vmem:[%s12172_s5 + $0xb8] sm:$0xff]  }
 0x29e   : > { %v2335_v1 = vld [vmem:[#allocation3 + $0xf7] sm:$0xff] }
 0x29f   : > { %v3218_v28 = vld [vmem:[#allocation3 + $0xf1] sm:$0xff] }
 0x2a0   : > { %v2336_v53 = vld [vmem:[#allocation3 + $0xff] sm:$0xff] }
 0x2a1   : > { %v10799_v15 = vpack.c.bf16 %v2336_v53, %v2335_v1  ;;  %v8743_v1 = vld [vmem:[%s12172_s5 + $0xa0] sm:$0xff]  }
 0x2a3   : > { %7965 = vmatmul.mubr.msk.bf16.gmra.mrb[124].mxu0 %vm10795_vm0, %v10799_v15 }
 0x2a4   : > { %7984 = vmatprep.mubr.bf16.mxu0 %v12387_v63  ;;  %8033 = vmatmul.mubr.bf16.vlgmr.msra.gmra.mrb[16].mxu1 %v2933_v60  ;;  %v3194_v60 = vld [vmem:[#allocation3 + $0x31] sm:$0xff]  ;;  %v8748_v63 = vld [vmem:[%s12172_s5 + $0xc8] sm:$0xff]  }
 0x2a5   : > { %8065 = vmatpush3.bf16.msra.mxu1 %v10751_v8  ;;  %8036 = vmatprep.mubr.bf16.mxu1 %v2934_v4  ;;  %v2936_v8 = vpack.c.bf16 %v10491_v33, %v2891_v49  ;;  %v1761_v33 = vadd.s32 8, %v9789_v10  ;;  %v12395_v4 = vmov 0  ;;  %v1859_v49 = vand.u32 15, %v1769_v30 }
 0x2a6   : > { %8066 = vmatprep.subr.bf16.mxu1 %v8740_v7  ;;  %v12403_v30 = vmov 0 }
 0x2a9   : > { %8067 = vmatpush3.bf16.msra.mxu1 %v8740_v7 }
 0x2aa   : > { %8068 = vmatprep.subr.bf16.mxu1 %v8741_v0 }
 0x2ab   : > { %7985 = vmatmul.mubr.bf16.vlgmr.msra.gmra.mrb[96].mxu0 %v12388_v44  ;;  %v3195_v44 = vld [vmem:[#allocation3 + $0x39] sm:$0xff] }
 0x2ac   : > { %7988 = vmatprep.mubr.bf16.mxu0 %v12389_v31  ;;  %8037 = vmatmul.mubr.bf16.gmra.mrb[20].mxu1 %v2935_v26  ;;  %v8749_v26 = vld [vmem:[%s12172_s5 + $0xd0] sm:$0xff]   ;;  %v1773_v31 = vadd.s32 104, %v9789_v10 }
 0x2ad   : > { %8040 = vmatprep.mubr.bf16.mxu1 %v2936_v8  ;;  %8069 = vmatpush3.bf16.msra.mxu1 %v8741_v0  ;;  %v3196_v8 = vld [vmem:[#allocation3 + $0x41] sm:$0xff] }
 0x2ae   : > { %8070 = vmatprep.subr.bf16.mxu1 %v8742_v32 }
 0x2b1   : > { %8071 = vmatpush3.bf16.msra.mxu1 %v8742_v32  ;;  %v1771_v32 = vadd.s32 88, %v9789_v10 }
 0x2b2   : > { %8072 = vmatprep.subr.bf16.mxu1 %v8743_v1 }
 0x2b3   : > { %7989 = vmatmul.mubr.bf16.gmra.mrb[100].mxu0 %v12390_v19  ;;  %v10903_v19 = vpack.c.bf16 %v3196_v8, %v3195_v44  ;;  %v3204_v44 = vld [vmem:[#allocation3 + $0x81] sm:$0xff]  ;;  %v1781_v8 = vadd.s32 168, %v9789_v10 }
 0x2b4   : > { %7992 = vmatprep.mubr.bf16.mxu0 %v10559_v6  ;;  %8041 = vmatmul.mubr.bf16.gmra.mrb[24].mxu1 %v10559_v6  ;;  %v1763_v6 = vadd.s32 24, %v9789_v10 }
 0x2b5   : > { %8044 = vmatprep.mubr.bf16.mxu1 %v10553_v11  ;;  %8073 = vmatpush3.bf16.msra.mxu1 %v8743_v1  ;;  %v3198_v1 = vld [vmem:[#allocation3 + $0x51] sm:$0xff] }
 0x2b6   : > { %8074 = vmatprep.subr.bf16.mxu1 %v8744_v46 }
 0x2b9   : > { %8075 = vmatpush3.bf16.msra.mxu1 %v8744_v46  ;;  %v12397_v46 = vmov 0 }
 0x2ba   : > { %8076 = vmatprep.subr.bf16.mxu1 %v8745_v48 }
 0x2bb   : > { %7993 = vmatmul.mubr.bf16.gmra.mrb[104].mxu0 %v10553_v11  ;;  %v1803_v11 = vand.u32 15, %v1761_v33  ;;  %v8750_v33 = vld [vmem:[%s12172_s5 + $0xd8] sm:$0xff]  }
 0x2bc   : > { %7996 = vmatprep.mubr.bf16.mxu0 %v10601_v14  ;;  %8045 = vmatmul.mubr.bf16.gmra.mrb[28].mxu1 %v10601_v14  ;;  %v3189_v14 = vld [vmem:[#allocation3 + $0x9] sm:$0xff] }
 0x2bd   : > { %8048 = vmatprep.mubr.bf16.mxu1 %v10596_v51  ;;  %8077 = vmatpush3.bf16.msra.mxu1 %v8745_v48  ;;  %vm2209_vm15 = vcmp.ne.s32.totalorder %v1803_v11, 15  ;;  %v3197_v48 = vld [vmem:[#allocation3 + $0x49] sm:$0xff] }
 0x2be   : > { %8078 = vmatprep.subr.bf16.mxu1 %v8746_v9  ;;  %vm10861_vm0 = vmpackc.low %vm2209_vm15, %vm9590_vm1  ;;  %v10913_v11 = vpack.c.bf16 %v3198_v1, %v3197_v48  ;;  %v12405_v1 = vmov 0 }
 0x2c1   : > { %8079 = vmatpush3.bf16.msra.mxu1 %v8746_v9  ;;  %v12399_v9 = vmov 0 }
 0x2c2   : > { %8112 = vmatprep.subr.bf16.mxu1 %v8747_v58 }
 0x2c3   : > { %7997 = vmatmul.mubr.bf16.gmra.mrb[108].mxu0 %v10596_v51  ;;  %v1765_v51 = vadd.s32 40, %v9789_v10 }
 0x2c4   : > { %8049 = vmatmul.mubr.bf16.gmra.mrb[0].mxu1 %v10644_v54  ;;  %v3190_v54 = vld [vmem:[#allocation3 + $0x11] sm:$0xff] }
 0x2c5   : > { %8052 = vmatprep.mubr.bf16.mxu1 %v10639_v59  ;;  %v12391_v59 = vmov 0  ;;  %v1831_v53 = vand.u32 15, %v1765_v51  ;;  %v1775_v51 = vadd.s32 120, %v9789_v10 }
 0x2c6   : > { %v12392_v59 = vsel %vm10861_vm0, 4294967295, %v12391_v59 }
 0x2c7   : > { %vm2213_vm8 = vcmp.ne.s32.totalorder %v1831_v53, 15  ;;  %v3202_v53 = vld [vmem:[#allocation3 + $0x71] sm:$0xff] }
 0x2c8   : > { %vm10878_vm12 = vmpackc.low %vm2213_vm8, %vm9590_vm1  ;;  %vm2217_vm8 = vcmp.ne.s32.totalorder %v1859_v49, 15  ;;  %v1779_v49 = vadd.s32 152, %v9789_v10 }
 0x2c9   : > { %v12396_v4 = vsel %vm10878_vm12, 4294967295, %v12395_v4 }
 0x2cc   : > { %8053 = vmatmul.mubr.bf16.gmra.mrb[4].mxu1 %v10705_v3  ;;  %v7010_v3 = vpack.c.bf16 %v3190_v54, %v3189_v14  ;;  %v8751_v14 = vld [vmem:[%s12172_s5 + $0xe0] sm:$0xff]  }
 0x2cd   : > { %8056 = vmatprep.mubr.bf16.mxu1 %v10700_v56  ;;  %v1817_v56 = vand.u32 15, %v1763_v6  ;;  %v1887_v6 = vand.u32 15, %v1773_v31  ;;  %v3199_v54 = vld [vmem:[#allocation3 + $0x59] sm:$0xff]  ;;  %v3206_v31 = vld [vmem:[#allocation3 + $0x91] sm:$0xff] }
 0x2cf   : > { %vm2211_vm7 = vcmp.ne.s32.totalorder %v1817_v56, 15  ;;  %v3200_v56 = vld [vmem:[#allocation3 + $0x61] sm:$0xff] }
 0x2d0   : > { %vm10871_vm15 = vmpackc.low %vm2211_vm7, %vm9590_vm1 }
 0x2d1   : > { %v12394_v43 = vsel %vm10871_vm15, 4294967295, %v12393_v43 }
 0x2d4   : > { %8057 = vmatmul.mubr.bf16.gmra.mrb[8].mxu1 %v10758_v23  ;;  %v1767_v23 = vadd.s32 56, %v9789_v10 }
 0x2d5   : > { %8060 = vmatprep.mubr.bf16.mxu1 %v10756_v52  ;;  %v3191_v52 = vld [vmem:[#allocation3 + $0x19] sm:$0xff] }
 0x2d6   : > { %v10875_v7 = vpack.c.bf16 %v3192_v42, %v3191_v52  ;;  %v1845_v0 = vand.u32 15, %v1767_v23  ;;  %v12401_v23 = vmov 0  ;;  %v10931_v52 = vpack.c.bf16 %v3200_v56, %v3199_v54  ;;  %v3201_v42 = vld [vmem:[#allocation3 + $0x69] sm:$0xff] }
 0x2d7   : > { %v1943_v54 = vand.u32 15, %v1781_v8  ;;  %v1783_v56 = vadd.s32 184, %v9789_v10 }
 0x2d8   : > { %vm2215_vm7 = vcmp.ne.s32.totalorder %v1845_v0, 15 }
 0x2dc   : > { %8061 = vmatmul.mubr.bf16.gmra.mrb[12].mxu1 %v10788_v16  ;;  %v3193_v16 = vld [vmem:[#allocation3 + $0x29] sm:$0xff] }
 0x2dd   : > { %8080 = vmatprep.mubr.msk.bf16.mxu1 %vm10861_vm0, %v7010_v3  ;;  %v10885_v20 = vpack.c.bf16 %v3194_v60, %v3193_v16  ;;  %v1777_v3 = vadd.s32 136, %v9789_v10  ;;  %v1901_v60 = vand.u32 15, %v1775_v51  ;;  %v8752_v16 = vld [vmem:[%s12172_s5 + $0xe8] sm:$0xff]   ;;  %v8754_v51 = vld [vmem:[%s12172_s5 + $0xf8] sm:$0xff]  }
 0x2df   : > { %v1915_v0 = vand.u32 15, %v1777_v3  ;;  %v10981_v3 = vld [vmem:[%s12172_s5 + $0x140] sm:$0xff]  }
 0x2e4   : > { %8081 = vmatmul.mubr.msk.bf16.vlgmr.msra.gmra.mrb[16].mxu1 %vm10871_vm15, %v10875_v7  ;;  %vm10899_vm15 = vmpackc.low %vm2215_vm7, %vm9590_vm1 }
 0x2e5   : > { %8113 = vmatpush3.bf16.msra.mxu1 %v8747_v58  ;;  %8084 = vmatprep.mubr.msk.bf16.mxu1 %vm10878_vm12, %v10885_v20  ;;  %v12398_v46 = vsel %vm10899_vm15, 4294967295, %v12397_v46  ;;  %vm10906_vm12 = vmpackc.low %vm2217_vm8, %vm9590_vm1  ;;  %v1873_v58 = vand.u32 15, %v1771_v32  ;;  %vm2221_vm8 = vcmp.ne.s32.totalorder %v1887_v6, 15  ;;  %v3203_v32 = vld [vmem:[#allocation3 + $0x79] sm:$0xff]  ;;  %v1929_v6 = vand.u32 15, %v1779_v49 }
 0x2e6   : > { %8114 = vmatprep.subr.bf16.mxu1 %v8748_v63  ;;  %v12400_v9 = vsel %vm10906_vm12, 4294967295, %v12399_v9  ;;  %v10959_v48 = vpack.c.bf16 %v3204_v44, %v3203_v32  ;;  %v12411_v32 = vmov 0  ;;  %v1957_v44 = vand.u32 15, %v1783_v56  ;;  %v3214_v56 = vld [vmem:[#allocation3 + $0xd1] sm:$0xff] }
 0x2e7   : > { %vm2219_vm7 = vcmp.ne.s32.totalorder %v1873_v58, 15  ;;  %v3205_v58 = vld [vmem:[#allocation3 + $0x89] sm:$0xff] }
 0x2e9   : > { %8115 = vmatpush3.bf16.msra.mxu1 %v8748_v63  ;;  %v10941_v63 = vpack.c.bf16 %v3202_v53, %v3201_v42  ;;  %v3207_v53 = vld [vmem:[#allocation3 + $0x99] sm:$0xff]  ;;  %v3208_v42 = vld [vmem:[#allocation3 + $0xa1] sm:$0xff] }
 0x2ea   : > { %8116 = vmatprep.subr.bf16.mxu1 %v8749_v26  ;;  %v10989_v49 = vpack.c.bf16 %v3208_v42, %v3207_v53  ;;  %v12413_v53 = vmov 0 }
 0x2ec   : > { %8085 = vmatmul.mubr.msk.bf16.gmra.mrb[20].mxu1 %vm10899_vm15, %v10903_v19  ;;  %vm10927_vm15 = vmpackc.low %vm2219_vm7, %vm9590_vm1  ;;  %vm2223_vm7 = vcmp.ne.s32.totalorder %v1901_v60, 15  ;;  %v1785_v60 = vadd.s32 200, %v9789_v10 }
 0x2ed   : > { %8088 = vmatprep.mubr.msk.bf16.mxu1 %vm10906_vm12, %v10913_v11  ;;  %8117 = vmatpush3.bf16.msra.mxu1 %v8749_v26  ;;  %v12402_v23 = vsel %vm10927_vm15, 4294967295, %v12401_v23  ;;  %vm10934_vm12 = vmpackc.low %vm2221_vm8, %vm9590_vm1  ;;  %v8753_v26 = vld [vmem:[%s12172_s5 + $0xf0] sm:$0xff]   ;;  %vm2225_vm8 = vcmp.ne.s32.totalorder %v1915_v0, 15  ;;  %v12409_v0 = vmov 0 }
 0x2ee   : > { %8118 = vmatprep.subr.bf16.mxu1 %v8750_v33  ;;  %v12404_v30 = vsel %vm10934_vm12, 4294967295, %v12403_v30 }
 0x2f1   : > { %8119 = vmatpush3.bf16.msra.mxu1 %v8750_v33  ;;  %v12407_v33 = vmov 0 }
 0x2f2   : > { %8120 = vmatprep.subr.bf16.mxu1 %v8751_v14 }
 0x2f4   : > { %8089 = vmatmul.mubr.msk.bf16.gmra.mrb[24].mxu1 %vm10927_vm15, %v10931_v52  ;;  %vm10955_vm15 = vmpackc.low %vm2223_vm7, %vm9590_vm1  ;;  %vm2227_vm7 = vcmp.ne.s32.totalorder %v1929_v6, 15  ;;  %v3211_v6 = vld [vmem:[#allocation3 + $0xb9] sm:$0xff] }
 0x2f5   : > { %8092 = vmatprep.mubr.msk.bf16.mxu1 %vm10934_vm12, %v10941_v63  ;;  %8121 = vmatpush3.bf16.msra.mxu1 %v8751_v14  ;;  %v12406_v1 = vsel %vm10955_vm15, 4294967295, %v12405_v1  ;;  %vm10962_vm12 = vmpackc.low %vm2225_vm8, %vm9590_vm1  ;;  %v10969_v14 = vpack.c.bf16 %v3206_v31, %v3205_v58  ;;  %vm2229_vm8 = vcmp.ne.s32.totalorder %v1943_v54, 15  ;;  %v1971_v31 = vand.u32 15, %v1785_v60  ;;  %v3213_v60 = vld [vmem:[#allocation3 + $0xc9] sm:$0xff] }
 0x2f6   : > { %8122 = vmatprep.subr.bf16.mxu1 %v8752_v16  ;;  %v12408_v33 = vsel %vm10962_vm12, 4294967295, %v12407_v33  ;;  %v1787_v58 = vadd.s32 216, %v9789_v10  ;;  %v1789_v54 = vadd.s32 232, %v9789_v10 }
 0x2f9   : > { %8123 = vmatpush3.bf16.msra.mxu1 %v8752_v16  ;;  %v3210_v16 = vld [vmem:[#allocation3 + $0xb1] sm:$0xff] }
 0x2fa   : > { %8124 = vmatprep.subr.bf16.mxu1 %v8753_v26 }
 0x2fc   : > { %8093 = vmatmul.mubr.msk.bf16.gmra.mrb[28].mxu1 %vm10955_vm15, %v10959_v48  ;;  %vm10985_vm15 = vmpackc.low %vm2227_vm7, %vm9590_vm1  ;;  %vm2231_vm7 = vcmp.ne.s32.totalorder %v1957_v44, 15  ;;  %v11019_v44 = vpack.c.bf16 %v3214_v56, %v3213_v60  ;;  %v3217_v56 = vld [vmem:[#allocation3 + $0xe9] sm:$0xff]  ;;  %v12419_v60 = vmov 0 }
 0x2fd   : > { %8096 = vmatprep.mubr.msk.bf16.mxu1 %vm10962_vm12, %v10969_v14  ;;  %8125 = vmatpush3.bf16.msra.mxu1 %v8753_v26  ;;  %v12410_v0 = vsel %vm10985_vm15, 4294967295, %v12409_v0  ;;  %v3209_v26 = vld [vmem:[#allocation3 + $0xa9] sm:$0xff]  ;;  %vm10992_vm12 = vmpackc.low %vm2229_vm8, %vm9590_vm1  ;;  %vm2233_vm8 = vcmp.ne.s32.totalorder %v1971_v31, 15  ;;  %v1999_v31 = vand.u32 15, %v1789_v54  ;;  %v11040_v27 = vpack.c.bf16 %v3218_v28, %v3217_v56  ;;  %v3591_v28 = vld [vmem:[#allocation3 + $0x17] sm:$0xff] }
 0x2fe   : > { %8126 = vmatprep.subr.bf16.mxu1 %v8754_v51  ;;  %v12412_v32 = vsel %vm10992_vm12, 4294967295, %v12411_v32  ;;  %v10997_v8 = vpack.c.bf16 %v3210_v16, %v3209_v26  ;;  %vm11008_vm0 = vmpackc.low %vm2231_vm7, %vm9590_vm1  ;;  %v1985_v26 = vand.u32 15, %v1787_v58  ;;  %v8788_v16 = vld [vmem:[%s12174_s7 + $0x8] sm:$0xff]   ;;  %v8789_v58 = vld [vmem:[%s12174_s7 + $0x10] sm:$0xff]  }
 0x2ff   : > { %v12414_v53 = vsel %vm11008_vm0, 4294967295, %v12413_v53 }
 0x300   : > { %vm2235_vm7 = vcmp.ne.s32.totalorder %v1985_v26, 15 }
 0x301   : > { %8127 = vmatpush3.bf16.msra.mxu1 %v8754_v51  ;;  %v3212_v51 = vld [vmem:[#allocation3 + $0xc1] sm:$0xff] }
 0x302   : > { %8160 = vmatprep.subr.bf16.mxu1 %v10981_v3  ;;  %v11012_v42 = vpack.c.bf16 %v3212_v51, %v3211_v6  ;;  %v1791_v6 = vadd.s32 248, %v9789_v10  ;;  %v3215_v51 = vld [vmem:[#allocation3 + $0xd9] sm:$0xff] }
 0x303   : > { %v11033_v54 = vpack.c.bf16 %v3216_v41, %v3215_v51  ;;  %v3219_v10 = vld [vmem:[#allocation3 + $0xf9] sm:$0xff]  ;;  %v3220_v41 = vld [vmem:[#allocation3 + $0x101] sm:$0xff] }
 0x304   : > { %8097 = vmatmul.mubr.msk.bf16.gmra.mrb[0].mxu1 %vm10985_vm15, %v10989_v49  ;;  %vm11015_vm15 = vmpackc.low %vm2233_vm8, %vm9590_vm1  ;;  %vm2237_vm8 = vcmp.ne.s32.totalorder %v1999_v31, 15  ;;  %v2013_v26 = vand.u32 15, %v1791_v6  ;;  %v3592_v31 = vld [vmem:[#allocation3 + $0x1f] sm:$0xff]  ;;  %v11053_v6 = vpack.c.bf16 %v3220_v41, %v3219_v10  ;;  %v8756_v10 = vld [vmem:[%s12172_s5 + $0x148] sm:$0xff]  }
 0x305   : > { %8100 = vmatprep.mubr.msk.bf16.mxu1 %vm10992_vm12, %v10997_v8  ;;  %vm11029_vm12 = vmpackc.low %vm2235_vm7, %vm9590_vm1  ;;  %v7082_v56 = vpack.c.bf16 %v3592_v31, %v3591_v28  ;;  %v3597_v31 = vld [vmem:[#allocation3 + $0x47] sm:$0xff]  ;;  %v3598_v28 = vld [vmem:[#allocation3 + $0x4f] sm:$0xff] }
 0x306   : > { %vm2239_vm7 = vcmp.ne.s32.totalorder %v2013_v26, 15  ;;  %v3593_v26 = vld [vmem:[#allocation3 + $0x27] sm:$0xff]  ;;  %v8790_v51 = vld [vmem:[%s12174_s7 + $0x18] sm:$0xff]  }
 0x307   : > { %v11060_v45 = vpack.c.bf16 %v3594_v62, %v3593_v26  ;;  %v8757_v62 = vld [vmem:[%s12172_s5 + $0x150] sm:$0xff]  }
 0x30c   : > { %8101 = vmatmul.mubr.msk.bf16.gmra.mrb[4].mxu1 %vm11008_vm0, %v11012_v42  ;;  %vm11036_vm0 = vmpackc.low %vm2237_vm8, %vm9590_vm1 }
 0x30d   : > { %8104 = vmatprep.mubr.msk.bf16.mxu1 %vm11015_vm15, %v11019_v44  ;;  %v12420_v60 = vsel %vm11036_vm0, 4294967295, %v12419_v60  ;;  %vm11049_vm8 = vmpackc.low %vm2239_vm7, %vm9590_vm1  ;;  %vm12424_vm1 = vnez %v12375_v36  ;;  %vm12426_vm7 = vnez %v12377_v38 }
 0x30e   : > { %12421 = vst [vmem:[#allocation72_spill] sm:$0xff] %v12420_v60  ;;  %v3595_v60 = vld [vmem:[#allocation3 + $0x37] sm:$0xff] }
 0x30f   : > { %v11065_v41 = vpack.c.bf16 %v3596_v61, %v3595_v60  ;;  %v11077_v61 = vpack.c.bf16 %v3598_v28, %v3597_v31  ;;  %v3599_v60 = vld [vmem:[#allocation3 + $0x57] sm:$0xff]  ;;  %v3601_v31 = vld [vmem:[#allocation3 + $0x67] sm:$0xff]  ;;  %v3602_v28 = vld [vmem:[#allocation3 + $0x6f] sm:$0xff] }
 0x314   : > { %8105 = vmatmul.mubr.msk.bf16.gmra.mrb[8].mxu1 %vm11029_vm12, %v11033_v54 }
 0x315   : > { %8108 = vmatprep.mubr.msk.bf16.mxu1 %vm11036_vm0, %v11040_v27 }
 0x31c   : > { %8109 = vmatmul.mubr.msk.bf16.gmra.mrb[12].mxu1 %vm11049_vm8, %v11053_v6 }
 0x31d   : > { %8128 = vmatprep.mubr.msk.bf16.mxu1 %vm10338_vm2, %v7082_v56  ;;  %v3600_v56 = vld [vmem:[#allocation3 + $0x5f] sm:$0xff] }
 0x31e   : > { %v11082_v26 = vpack.c.bf16 %v3600_v56, %v3599_v60  ;;  %v11093_v56 = vpack.c.bf16 %v3602_v28, %v3601_v31  ;;  %v3603_v60 = vld [vmem:[#allocation3 + $0x77] sm:$0xff]  ;;  %v3606_v31 = vld [vmem:[#allocation3 + $0x8f] sm:$0xff] }
 0x31f   : > { %v11098_v17 = vpack.c.bf16 %v3604_v57, %v3603_v60  ;;  %v8762_v57 = vld [vmem:[%s12172_s5 + $0x178] sm:$0xff]  }
 0x324   : > { %8129 = vmatmul.mubr.msk.bf16.vlgmr.msra.gmra.mrb[16].mxu1 %vm10465_vm5, %v11060_v45 }
 0x325   : > { %8161 = vmatpush3.bf16.msra.mxu1 %v10981_v3  ;;  %8132 = vmatprep.mubr.msk.bf16.mxu1 %vm10472_vm6, %v11065_v41  ;;  %v8758_v3 = vld [vmem:[%s12172_s5 + $0x158] sm:$0xff]  }
 0x326   : > { %8162 = vmatprep.subr.bf16.mxu1 %v8756_v10 }
 0x329   : > { %8163 = vmatpush3.bf16.msra.mxu1 %v8756_v10  ;;  %v8759_v10 = vld [vmem:[%s12172_s5 + $0x160] sm:$0xff]  }
 0x32a   : > { %8164 = vmatprep.subr.bf16.mxu1 %v8757_v62 }
 0x32c   : > { %8133 = vmatmul.mubr.msk.bf16.gmra.mrb[20].mxu1 %vm10524_vm9, %v11077_v61 }
 0x32d   : > { %8136 = vmatprep.mubr.msk.bf16.mxu1 %vm10532_vm10, %v11082_v26  ;;  %8165 = vmatpush3.bf16.msra.mxu1 %v8757_v62  ;;  %v8761_v62 = vld [vmem:[%s12172_s5 + $0x170] sm:$0xff]  }
 0x32e   : > { %8166 = vmatprep.subr.bf16.mxu1 %v8758_v3 }
 0x331   : > { %8167 = vmatpush3.bf16.msra.mxu1 %v8758_v3  ;;  %v3605_v3 = vld [vmem:[#allocation3 + $0x87] sm:$0xff] }
 0x332   : > { %8168 = vmatprep.subr.bf16.mxu1 %v8759_v10  ;;  %v11109_v28 = vpack.c.bf16 %v3606_v31, %v3605_v3 }
 0x334   : > { %8137 = vmatmul.mubr.msk.bf16.gmra.mrb[24].mxu1 %vm10574_vm13, %v11093_v56 }
 0x335   : > { %8140 = vmatprep.mubr.msk.bf16.mxu1 %vm10579_vm14, %v11098_v17  ;;  %8169 = vmatpush3.bf16.msra.mxu1 %v8759_v10 }
 0x336   : > { %8170 = vmatprep.subr.bf16.mxu1 %v8760_v5 }
 0x339   : > { %8171 = vmatpush3.bf16.msra.mxu1 %v8760_v5  ;;  %v8763_v5 = vld [vmem:[%s12172_s5 + $0x180] sm:$0xff]  }
 0x33a   : > { %8172 = vmatprep.subr.bf16.mxu1 %v8761_v62 }
 0x33c   : > { %8141 = vmatmul.mubr.msk.bf16.gmra.mrb[28].mxu1 %vm10614_vm3, %v11109_v28 }
 0x33d   : > { %8144 = vmatprep.mubr.msk.bf16.mxu1 %vm10619_vm4, %v10667_v40  ;;  %8173 = vmatpush3.bf16.msra.mxu1 %v8761_v62  ;;  %vm12427_vm4 = vnez %v12379_v24 }
 0x33e   : > { %8174 = vmatprep.subr.bf16.mxu1 %v8762_v57 }
 0x341   : > { %8175 = vmatpush3.bf16.msra.mxu1 %v8762_v57  ;;  %v3622_v57 = vld [vmem:[#allocation3 + $0x10f] sm:$0xff] }
 0x342   : > { %8208 = vmatprep.subr.bf16.mxu1 %v8763_v5 }
 0x343   : > { %v11123_v10 = vpop.f32.mrb[112].mxu0 }
 0x344   : > { %8145 = vmatmul.mubr.msk.bf16.gmra.mrb[0].mxu1 %vm10663_vm11, %v10674_v12  ;;  %v11128_v60 = vpop.f32.mrb[113].mxu0  ;;  %vm12428_vm11 = vnez %v12381_v34 }
 0x345   : > { %8148 = vmatprep.mubr.msk.bf16.mxu1 %vm12424_vm1, %v10727_v39  ;;  %v11133_v40 = vpop.f32.mrb[114].mxu0  ;;  %vm12429_vm1 = vnez %v12383_v21 }
 0x346   : > { %v11135_v62 = vpop.f32.mrb[115].mxu0 }
 0x347   : > { %12425 = vst [vmem:[#allocation73_spill] sm:$0xff] %v11135_v62 }
 0x34c   : > { %8149 = vmatmul.mubr.msk.bf16.gmra.mrb[4].mxu1 %vm12426_vm7, %v10734_v35  ;;  %v3621_v35 = vld [vmem:[#allocation3 + $0x107] sm:$0xff]  ;;  %vm12435_vm7 = vnez %v12396_v4 }
 0x34d   : > { %8152 = vmatprep.mubr.msk.bf16.mxu1 %vm12427_vm4, %v10768_v29  ;;  %v11157_v62 = vpack.c.bf16 %v3622_v57, %v3621_v35  ;;  %vm12432_vm4 = vnez %v12386_v37  ;;  %v8764_v29 = vld [vmem:[%s12172_s5 + $0x188] sm:$0xff]   ;;  %v8781_v37 = vld [vmem:[%s12172_s5 + $0x210] sm:$0xff]  }
 0x354   : > { %8153 = vmatmul.mubr.msk.bf16.gmra.mrb[8].mxu1 %vm12428_vm11, %v10775_v13  ;;  %v11146_v12 = vpop.f32.mrb[116].mxu0  ;;  %vm12433_vm11 = vnez %v12392_v59 }
 0x355   : > { %8156 = vmatprep.mubr.msk.bf16.mxu1 %vm12429_vm1, %v10799_v15  ;;  %v11151_v39 = vpop.f32.mrb[117].mxu0  ;;  %vm12434_vm1 = vnez %v12394_v43 }
 0x356   : > { %v11153_v3 = vpop.f32.mrb[118].mxu0 }
 0x357   : > { %12430 = vst [vmem:[#allocation74_spill] sm:$0xff] %v11153_v3  ;;  %v11155_v31 = vpop.f32.mrb[119].mxu0 }
 0x358   : > { %12431 = vst [vmem:[#allocation75_spill] sm:$0xff] %v11155_v31 }
 0x35c   : > { %8157 = vmatmul.mubr.msk.bf16.gmra.mrb[12].mxu1 %vm12432_vm4, %v11157_v62 }
 0x35d   : > { %8176 = vmatprep.mubr.msk.bf16.mxu1 %vm12433_vm11, %v10875_v7  ;;  %v8765_v7 = vld [vmem:[%s12172_s5 + $0x190] sm:$0xff]   ;;  %vm12442_vm11 = vnez %v12402_v23 }
 0x364   : > { %8177 = vmatmul.mubr.msk.bf16.vlgmr.msra.gmra.mrb[16].mxu1 %vm12434_vm1, %v10885_v20  ;;  %v8766_v20 = vld [vmem:[%s12172_s5 + $0x198] sm:$0xff]   ;;  %vm12441_vm1 = vnez %v12400_v9 }
 0x365   : > { %8209 = vmatpush3.bf16.msra.mxu1 %v8763_v5  ;;  %8180 = vmatprep.mubr.msk.bf16.mxu1 %vm12435_vm7, %v10903_v19  ;;  %v11174_v13 = vpop.f32.mrb[120].mxu0  ;;  %vm12440_vm7 = vnez %v12398_v46  ;;  %v8767_v19 = vld [vmem:[%s12172_s5 + $0x1a0] sm:$0xff]   ;;  %v8768_v5 = vld [vmem:[%s12172_s5 + $0x1a8] sm:$0xff]  }
 0x366   : > { %12436 = vst [vmem:[#allocation76_spill] sm:$0xff] %v11174_v13  ;;  %v11176_v15 = vpop.f32.mrb[121].mxu0  ;;  %8210 = vmatprep.subr.bf16.mxu1 %v8764_v29 }
 0x367   : > { %12437 = vst [vmem:[#allocation77_spill] sm:$0xff] %v11176_v15  ;;  %v11181_v35 = vpop.f32.mrb[122].mxu0  ;;  %v3960_v15 = vld [vmem:[#allocation3 + $0x111] sm:$0xff] }
 0x368   : > { %12438 = vst [vmem:[#allocation78_spill] sm:$0xff] %v11181_v35  ;;  %v11183_v57 = vpop.f32.mrb[123].mxu0 }
 0x369   : > { %12439 = vst [vmem:[#allocation79_spill] sm:$0xff] %v11183_v57  ;;  %8211 = vmatpush3.bf16.msra.mxu1 %v8764_v29  ;;  %v8793_v57 = vld [vmem:[%s12174_s7 + $0x30] sm:$0xff]  }
 0x36a   : > { %8212 = vmatprep.subr.bf16.mxu1 %v8765_v7 }
 0x36c   : > { %8181 = vmatmul.mubr.msk.bf16.gmra.mrb[20].mxu1 %vm12440_vm7, %v10913_v11  ;;  %vm12443_vm7 = vnez %v12404_v30 }
 0x36d   : > { %8184 = vmatprep.mubr.msk.bf16.mxu1 %vm12441_vm1, %v10931_v52  ;;  %8213 = vmatpush3.bf16.msra.mxu1 %v8765_v7  ;;  %v8769_v52 = vld [vmem:[%s12172_s5 + $0x1b0] sm:$0xff]   ;;  %vm12452_vm1 = vnez %v12414_v53  ;;  %v8787_v53 = vld [vmem:[%s12174_s7] sm:$0xff]  }
 0x36e   : > { %8214 = vmatprep.subr.bf16.mxu1 %v8766_v20  ;;  %8352 = vmatprep.subr.bf16.mxu0 %v8787_v53 }
 0x36f   : > { %8353 = vmatpush3.bf16.msra.mxu0 %v8787_v53 }
 0x370   : > { %8354 = vmatprep.subr.bf16.mxu0 %v8788_v16 }
 0x371   : > { %8215 = vmatpush3.bf16.msra.mxu1 %v8766_v20 }
 0x372   : > { %8216 = vmatprep.subr.bf16.mxu1 %v8767_v19 }
 0x373   : > { %8355 = vmatpush3.bf16.msra.mxu0 %v8788_v16 }
 0x374   : > { %8185 = vmatmul.mubr.msk.bf16.gmra.mrb[24].mxu1 %vm12442_vm11, %v10941_v63  ;;  %v8770_v63 = vld [vmem:[%s12172_s5 + $0x1b8] sm:$0xff]   ;;  %vm12449_vm11 = vnez %v12408_v33  ;;  %8356 = vmatprep.subr.bf16.mxu0 %v8789_v58 }
 0x375   : > { %8188 = vmatprep.mubr.msk.bf16.mxu1 %vm12443_vm7, %v10959_v48  ;;  %8217 = vmatpush3.bf16.msra.mxu1 %v8767_v19  ;;  %vm12448_vm7 = vnez %v12406_v1  ;;  %v8771_v19 = vld [vmem:[%s12172_s5 + $0x1c0] sm:$0xff]  }
 0x376   : > { %v11206_v11 = vpop.f32.mrb[124].mxu0  ;;  %8218 = vmatprep.subr.bf16.mxu1 %v8768_v5 }
 0x377   : > { %12444 = vst [vmem:[#allocation80_spill] sm:$0xff] %v11206_v11  ;;  %v11211_v29 = vpop.f32.mrb[125].mxu0  ;;  %8357 = vmatpush3.bf16.msra.mxu0 %v8789_v58 }
 0x378   : > { %12445 = vst [vmem:[#allocation81_spill] sm:$0xff] %v11211_v29  ;;  %v11213_v7 = vpop.f32.mrb[126].mxu0  ;;  %8358 = vmatprep.subr.bf16.mxu0 %v8790_v51 }
 0x379   : > { %12446 = vst [vmem:[#allocation82_spill] sm:$0xff] %v11213_v7  ;;  %v11215_v20 = vpop.f32.mrb[127].mxu0  ;;  %8219 = vmatpush3.bf16.msra.mxu1 %v8768_v5 }
 0x37a   : > { %12447 = vst [vmem:[#allocation83_spill] sm:$0xff] %v11215_v20  ;;  %8220 = vmatprep.subr.bf16.mxu1 %v8769_v52 }
 0x37b   : > { %8359 = vmatpush3.bf16.msra.mxu0 %v8790_v51 }
 0x37c   : > { %8189 = vmatmul.mubr.msk.bf16.gmra.mrb[28].mxu1 %vm12448_vm7, %v10969_v14  ;;  %vm12450_vm7 = vnez %v12410_v0  ;;  %v4942_v0 = vld [vmem:[#allocation3 + $0x121] sm:$0xff] }
 0x37d   : > { %8192 = vmatprep.mubr.msk.bf16.mxu1 %vm12449_vm11, %v10989_v49  ;;  %8221 = vmatpush3.bf16.msra.mxu1 %v8769_v52  ;;  %vm12451_vm11 = vnez %v12412_v32 }
 0x37e   : > { %v11226_v48 = vpop.f32.mrb[96].mxu0  ;;  %8222 = vmatprep.subr.bf16.mxu1 %v8770_v63 }
 0x37f   : > { %v11231_v5 = vpop.f32.mrb[97].mxu0 }
 0x380   : > { %v11233_v20 = vpop.f32.mrb[98].mxu0 }
 0x381   : > { %v11235_v7 = vpop.f32.mrb[99].mxu0  ;;  %8223 = vmatpush3.bf16.msra.mxu1 %v8770_v63 }
 0x382   : > { %8256 = vmatprep.subr.bf16.mxu1 %v8771_v19 }
 0x384   : > { %8193 = vmatmul.mubr.msk.bf16.gmra.mrb[0].mxu1 %vm12450_vm7, %v10997_v8 }
 0x385   : > { %8196 = vmatprep.mubr.msk.bf16.mxu1 %vm12451_vm11, %v11012_v42 }
 0x386   : > { %v11243_v14 = vpop.f32.mrb[100].mxu0 }
 0x387   : > { %v11245_v49 = vpop.f32.mrb[101].mxu0 }
 0x388   : > { %v11247_v52 = vpop.f32.mrb[102].mxu0 }
 0x389   : > { %v11249_v29 = vpop.f32.mrb[103].mxu0 }
 0x38c   : > { %8197 = vmatmul.mubr.msk.bf16.gmra.mrb[4].mxu1 %vm12452_vm1, %v11019_v44 }
 0x38d   : > { %8200 = vmatprep.mubr.msk.bf16.mxu1 %vm11015_vm15, %v11033_v54  ;;  %v3959_v54 = vld [vmem:[#allocation3 + $0x109] sm:$0xff] }
 0x38e   : > { %v11257_v8 = vpop.f32.mrb[104].mxu0  ;;  %v11279_v3 = vpack.c.bf16 %v3960_v15, %v3959_v54  ;;  %v8773_v54 = vld [vmem:[%s12172_s5 + $0x1d0] sm:$0xff]  }
 0x38f   : > { %v11259_v63 = vpop.f32.mrb[105].mxu0  ;;  %v4281_v15 = vld [vmem:[#allocation3 + $0x97] sm:$0xff] }
 0x390   : > { %v11261_v42 = vpop.f32.mrb[106].mxu0 }
 0x391   : > { %v11263_v11 = vpop.f32.mrb[107].mxu0 }
 0x394   : > { %8201 = vmatmul.mubr.msk.bf16.gmra.mrb[8].mxu1 %vm11029_vm12, %v11040_v27  ;;  %v8772_v27 = vld [vmem:[%s12172_s5 + $0x1c8] sm:$0xff]  }
 0x395   : > { %8204 = vmatprep.mubr.msk.bf16.mxu1 %vm11036_vm0, %v11053_v6 }
 0x396   : > { %v11271_v44 = vpop.f32.mrb[108].mxu0 }
 0x397   : > { %v11273_v35 = vpop.f32.mrb[109].mxu0 }
 0x398   : > { %v11275_v13 = vpop.f32.mrb[110].mxu0 }
 0x399   : > { %v11277_v31 = vpop.f32.mrb[111].mxu0 }
 0x39c   : > { %8205 = vmatmul.mubr.msk.bf16.gmra.mrb[12].mxu1 %vm11049_vm8, %v11279_v3 }
 0x39d   : > { %8224 = vmatprep.mubr.msk.bf16.mxu1 %vm10338_vm2, %v11060_v45  ;;  %vm12457_vm2 = vnez %v12371_v50  ;;  %v4288_v45 = vld [vmem:[#allocation3 + $0xcf] sm:$0xff]  ;;  %v4291_v50 = vld [vmem:[#allocation3 + $0xe7] sm:$0xff] }
 0x3a4   : > { %8225 = vmatmul.mubr.msk.bf16.vlgmr.msra.gmra.mrb[16].mxu1 %vm10465_vm5, %v11065_v41  ;;  %v8775_v41 = vld [vmem:[%s12172_s5 + $0x1e0] sm:$0xff]   ;;  %vm12458_vm5 = vnez %v12373_v55  ;;  %v4297_v55 = vld [vmem:[#allocation3 + $0x117] sm:$0xff] }
 0x3a5   : > { %8257 = vmatpush3.bf16.msra.mxu1 %v8771_v19  ;;  %8228 = vmatprep.mubr.msk.bf16.mxu1 %vm10472_vm6, %v11077_v61  ;;  %v8776_v61 = vld [vmem:[%s12172_s5 + $0x1e8] sm:$0xff]   ;;  %vm12459_vm6 = vnez %v12375_v36  ;;  %v4298_v36 = vld [vmem:[#allocation3 + $0x11f] sm:$0xff] }
 0x3a6   : > { %8258 = vmatprep.subr.bf16.mxu1 %v8772_v27  ;;  %v4283_v19 = vld [vmem:[#allocation3 + $0xa7] sm:$0xff] }
 0x3a9   : > { %8259 = vmatpush3.bf16.msra.mxu1 %v8772_v27  ;;  %v4284_v27 = vld [vmem:[#allocation3 + $0xaf] sm:$0xff] }
 0x3aa   : > { %8260 = vmatprep.subr.bf16.mxu1 %v8773_v54  ;;  %v7250_v25 = vpack.c.bf16 %v4284_v27, %v4283_v19 }
 0x3ac   : > { %8229 = vmatmul.mubr.msk.bf16.gmra.mrb[20].mxu1 %vm10524_vm9, %v11082_v26  ;;  %v8777_v26 = vld [vmem:[%s12172_s5 + $0x1f0] sm:$0xff]   ;;  %vm12460_vm9 = vnez %v12377_v38 }
 0x3ad   : > { %8232 = vmatprep.mubr.msk.bf16.mxu1 %vm10532_vm10, %v11093_v56  ;;  %8261 = vmatpush3.bf16.msra.mxu1 %v8773_v54  ;;  %v4282_v56 = vld [vmem:[#allocation3 + $0x9f] sm:$0xff]  ;;  %vm12461_vm10 = vnez %v12379_v24 }
 0x3ae   : > { %8262 = vmatprep.subr.bf16.mxu1 %v8774_v22  ;;  %v7247_v54 = vpack.c.bf16 %v4282_v56, %v4281_v15  ;;  %v4289_v56 = vld [vmem:[#allocation3 + $0xd7] sm:$0xff]  ;;  %v4294_v15 = vld [vmem:[#allocation3 + $0xff] sm:$0xff] }
 0x3af   : > { %v7259_v19 = vpack.c.bf16 %v4290_v18, %v4289_v56  ;;  %v4608_v24 = vld [vmem:[#allocation3 + $0x40] sm:$0xff]  ;;  %v4614_v18 = vld [vmem:[#allocation3 + $0x70] sm:$0xff]  ;;  %v4613_v56 = vld [vmem:[#allocation3 + $0x68] sm:$0xff] }
 0x3b1   : > { %8263 = vmatpush3.bf16.msra.mxu1 %v8774_v22  ;;  %v4287_v22 = vld [vmem:[#allocation3 + $0xc7] sm:$0xff] }
 0x3b2   : > { %8264 = vmatprep.subr.bf16.mxu1 %v8775_v41 }
 0x3b4   : > { %8233 = vmatmul.mubr.msk.bf16.gmra.mrb[24].mxu1 %vm10574_vm13, %v11098_v17  ;;  %v8778_v17 = vld [vmem:[%s12172_s5 + $0x1f8] sm:$0xff]   ;;  %vm12462_vm13 = vnez %v12381_v34  ;;  %v4609_v34 = vld [vmem:[#allocation3 + $0x48] sm:$0xff] }
 0x3b5   : > { %8236 = vmatprep.mubr.msk.bf16.mxu1 %vm10579_vm14, %v11109_v28  ;;  %8265 = vmatpush3.bf16.msra.mxu1 %v8775_v41  ;;  %v4286_v28 = vld [vmem:[#allocation3 + $0xbf] sm:$0xff]  ;;  %vm12463_vm14 = vnez %v12383_v21  ;;  %v8780_v21 = vld [vmem:[%s12172_s5 + $0x208] sm:$0xff]  }
 0x3b6   : > { %8266 = vmatprep.subr.bf16.mxu1 %v8776_v61  ;;  %v7253_v41 = vpack.c.bf16 %v4286_v28, %v4285_v2  ;;  %v7271_v28 = vpack.c.bf16 %v4298_v36, %v4297_v55  ;;  %v4607_v2 = vld [vmem:[#allocation3 + $0x38] sm:$0xff]  ;;  %v4617_v36 = vld [vmem:[#allocation3 + $0x88] sm:$0xff] }
 0x3b9   : > { %8267 = vmatpush3.bf16.msra.mxu1 %v8776_v61  ;;  %v7256_v61 = vpack.c.bf16 %v4288_v45, %v4287_v22  ;;  %v4605_v22 = vld [vmem:[#allocation3 + $0x28] sm:$0xff]  ;;  %v4610_v45 = vld [vmem:[#allocation3 + $0x50] sm:$0xff] }
 0x3ba   : > { %8268 = vmatprep.subr.bf16.mxu1 %v8777_v26 }
 0x3bc   : > { %8237 = vmatmul.mubr.msk.bf16.gmra.mrb[28].mxu1 %vm10614_vm3, %v7247_v54  ;;  %v4293_v54 = vld [vmem:[#allocation3 + $0xf7] sm:$0xff]  ;;  %vm12465_vm3 = vnez %v12392_v59 }
 0x3bd   : > { %8240 = vmatprep.mubr.msk.bf16.mxu1 %vm12457_vm2, %v7250_v25  ;;  %8269 = vmatpush3.bf16.msra.mxu1 %v8777_v26  ;;  %v4292_v26 = vld [vmem:[#allocation3 + $0xef] sm:$0xff]  ;;  %vm12467_vm2 = vnez %v12396_v4  ;;  %v4921_v59 = vld [vmem:[#allocation3 + $0x79] sm:$0xff] }
 0x3be   : > { %8270 = vmatprep.subr.bf16.mxu1 %v8778_v17  ;;  %v7262_v27 = vpack.c.bf16 %v4292_v26, %v4291_v50  ;;  %v4606_v25 = vld [vmem:[#allocation3 + $0x30] sm:$0xff]  ;;  %v4611_v50 = vld [vmem:[#allocation3 + $0x58] sm:$0xff] }
 0x3bf   : > { %v4654_v38 = vpack.c.bf16 %v4606_v25, %v4605_v22  ;;  %v8784_v25 = vld [vmem:[%s12172_s5 + $0x228] sm:$0xff]   ;;  %v8785_v22 = vld [vmem:[%s12172_s5 + $0x230] sm:$0xff]   ;;  %v4925_v4 = vld [vmem:[#allocation3 + $0x99] sm:$0xff] }
 0x3c1   : > { %8271 = vmatpush3.bf16.msra.mxu1 %v8778_v17  ;;  %v7265_v17 = vpack.c.bf16 %v4294_v15, %v4293_v54  ;;  %v4616_v15 = vld [vmem:[#allocation3 + $0x80] sm:$0xff]  ;;  %v4618_v54 = vld [vmem:[#allocation3 + $0x90] sm:$0xff] }
 0x3c2   : > { %8304 = vmatprep.subr.bf16.mxu1 %v8779_v47 }
 0x3c4   : > { %8241 = vmatmul.mubr.msk.bf16.gmra.mrb[0].mxu1 %vm12458_vm5, %v7253_v41  ;;  %v4655_v41 = vpack.c.bf16 %v4608_v24, %v4607_v2  ;;  %v4622_v24 = vld [vmem:[#allocation3 + $0xb0] sm:$0xff]  ;;  %vm12468_vm5 = vnez %v12398_v46 }
 0x3c5   : > { %8244 = vmatprep.mubr.msk.bf16.mxu1 %vm12459_vm6, %v7256_v61  ;;  %v4612_v61 = vld [vmem:[#allocation3 + $0x60] sm:$0xff]  ;;  %vm12469_vm6 = vnez %v12400_v9 }
 0x3c6   : > { %v4657_v26 = vpack.c.bf16 %v4612_v61, %v4611_v50  ;;  %v4623_v61 = vld [vmem:[#allocation3 + $0xb8] sm:$0xff]  ;;  %v4625_v50 = vld [vmem:[#allocation3 + $0xc8] sm:$0xff] }
 0x3c7   : > { %v4929_v9 = vld [vmem:[#allocation3 + $0xb9] sm:$0xff] }
 0x3cc   : > { %8245 = vmatmul.mubr.msk.bf16.gmra.mrb[4].mxu1 %vm12460_vm9, %v7259_v19  ;;  %v8782_v19 = vld [vmem:[%s12172_s5 + $0x218] sm:$0xff]   ;;  %vm12470_vm9 = vnez %v12402_v23 }
 0x3cd   : > { %8248 = vmatprep.mubr.msk.bf16.mxu1 %vm12461_vm10, %v7262_v27  ;;  %v4658_v27 = vpack.c.bf16 %v4614_v18, %v4613_v56  ;;  %v4628_v56 = vld [vmem:[#allocation3 + $0xe0] sm:$0xff]  ;;  %vm12471_vm10 = vnez %v12404_v30 }
 0x3ce   : > { %v4933_v30 = vld [vmem:[#allocation3 + $0xd9] sm:$0xff] }
 0x3d4   : > { %8249 = vmatmul.mubr.msk.bf16.gmra.mrb[8].mxu1 %vm12462_vm13, %v7265_v17  ;;  %v4615_v17 = vld [vmem:[#allocation3 + $0x78] sm:$0xff]  ;;  %vm12472_vm13 = vnez %v12406_v1 }
 0x3d5   : > { %8252 = vmatprep.mubr.msk.bf16.mxu1 %vm12463_vm14, %v11157_v62  ;;  %v4656_v62 = vpack.c.bf16 %v4610_v45, %v4609_v34  ;;  %v4659_v55 = vpack.c.bf16 %v4616_v15, %v4615_v17  ;;  %v4619_v45 = vld [vmem:[#allocation3 + $0x98] sm:$0xff]  ;;  %v4629_v15 = vld [vmem:[#allocation3 + $0xe8] sm:$0xff]  ;;  %v4632_v17 = vld [vmem:[#allocation3 + $0x100] sm:$0xff]  ;;  %vm12473_vm14 = vnez %v12408_v33 }
 0x3d6   : > { %v8786_v34 = vld [vmem:[%s12172_s5 + $0x238] sm:$0xff]  }
 0x3d7   : > { %v4941_v33 = vld [vmem:[#allocation3 + $0x119] sm:$0xff] }
 0x3d8   : > { %v7367_v32 = vpack.c.bf16 %v4942_v0, %v4941_v33 }
 0x3dc   : > { %8253 = vmatmul.mubr.msk.bf16.gmra.mrb[12].mxu1 %vm12432_vm4, %v7271_v28  ;;  %v4660_v28 = vpack.c.bf16 %v4618_v54, %v4617_v36  ;;  %v4631_v36 = vld [vmem:[#allocation3 + $0xf8] sm:$0xff]  ;;  %vm12466_vm4 = vnez %v12394_v43 }
 0x3dd   : > { %8272 = vmatprep.mubr.bf16.mxu1 %v4654_v38  ;;  %v4620_v38 = vld [vmem:[#allocation3 + $0xa0] sm:$0xff] }
 0x3de   : > { %v4661_v2 = vpack.c.bf16 %v4620_v38, %v4619_v45  ;;  %v4912_v38 = vld [vmem:[#allocation3 + $0x31] sm:$0xff] }
 0x3e4   : > { %8273 = vmatmul.mubr.bf16.vlgmr.msra.gmra.mrb[16].mxu1 %v4655_v41  ;;  %v4621_v41 = vld [vmem:[#allocation3 + $0xa8] sm:$0xff] }
 0x3e5   : > { %8305 = vmatpush3.bf16.msra.mxu1 %v8779_v47  ;;  %8276 = vmatprep.mubr.bf16.mxu1 %v4656_v62  ;;  %v8783_v47 = vld [vmem:[%s12172_s5 + $0x220] sm:$0xff]  }
 0x3e6   : > { %8306 = vmatprep.subr.bf16.mxu1 %v8780_v21  ;;  %v4624_v62 = vld [vmem:[#allocation3 + $0xc0] sm:$0xff] }
 0x3e7   : > { %v4663_v18 = vpack.c.bf16 %v4624_v62, %v4623_v61 }
 0x3e9   : > { %8307 = vmatpush3.bf16.msra.mxu1 %v8780_v21  ;;  %v4662_v21 = vpack.c.bf16 %v4622_v24, %v4621_v41  ;;  %v4911_v24 = vld [vmem:[#allocation3 + $0x29] sm:$0xff]  ;;  %v4913_v41 = vld [vmem:[#allocation3 + $0x39] sm:$0xff] }
 0x3ea   : > { %8308 = vmatprep.subr.bf16.mxu1 %v8781_v37  ;;  %v7322_v45 = vpack.c.bf16 %v4912_v38, %v4911_v24  ;;  %v4932_v38 = vld [vmem:[#allocation3 + $0xd1] sm:$0xff]  ;;  %v4931_v24 = vld [vmem:[#allocation3 + $0xc9] sm:$0xff] }
 0x3ec   : > { %8277 = vmatmul.mubr.bf16.gmra.mrb[20].mxu1 %v4657_v26 }
 0x3ed   : > { %8280 = vmatprep.mubr.bf16.mxu1 %v4658_v27  ;;  %8309 = vmatpush3.bf16.msra.mxu1 %v8781_v37  ;;  %v4626_v37 = vld [vmem:[#allocation3 + $0xd0] sm:$0xff]  ;;  %v4627_v27 = vld [vmem:[#allocation3 + $0xd8] sm:$0xff] }
 0x3ee   : > { %8310 = vmatprep.subr.bf16.mxu1 %v8782_v19  ;;  %v4664_v26 = vpack.c.bf16 %v4626_v37, %v4625_v50  ;;  %v4915_v37 = vld [vmem:[#allocation3 + $0x49] sm:$0xff]  ;;  %v4918_v50 = vld [vmem:[#allocation3 + $0x61] sm:$0xff] }
 0x3f1   : > { %8311 = vmatpush3.bf16.msra.mxu1 %v8782_v19  ;;  %v4630_v19 = vld [vmem:[#allocation3 + $0xf0] sm:$0xff] }
 0x3f2   : > { %8312 = vmatprep.subr.bf16.mxu1 %v8783_v47  ;;  %v4666_v54 = vpack.c.bf16 %v4630_v19, %v4629_v15  ;;  %v4919_v19 = vld [vmem:[#allocation3 + $0x69] sm:$0xff]  ;;  %v4924_v15 = vld [vmem:[#allocation3 + $0x91] sm:$0xff] }
 0x3f4   : > { %8281 = vmatmul.mubr.bf16.gmra.mrb[24].mxu1 %v4659_v55  ;;  %v4634_v55 = vld [vmem:[#allocation3 + $0x110] sm:$0xff] }
 0x3f5   : > { %8284 = vmatprep.mubr.bf16.mxu1 %v4660_v28  ;;  %8313 = vmatpush3.bf16.msra.mxu1 %v8783_v47  ;;  %v4665_v47 = vpack.c.bf16 %v4628_v56, %v4627_v27  ;;  %v4633_v28 = vld [vmem:[#allocation3 + $0x108] sm:$0xff] }
 0x3f6   : > { %8314 = vmatprep.subr.bf16.mxu1 %v8784_v25 }
 0x3f9   : > { %8315 = vmatpush3.bf16.msra.mxu1 %v8784_v25  ;;  %v4667_v25 = vpack.c.bf16 %v4632_v17, %v4631_v36  ;;  %v4928_v36 = vld [vmem:[#allocation3 + $0xb1] sm:$0xff] }
 0x3fa   : > { %8316 = vmatprep.subr.bf16.mxu1 %v8785_v22 }
 0x3fc   : > { %8285 = vmatmul.mubr.bf16.gmra.mrb[28].mxu1 %v4661_v2  ;;  %v12464_v2 = vld [vmem:[#allocation71_spill] sm:$0xff] }
 0x3fd   : > { %8288 = vmatprep.mubr.bf16.mxu1 %v4662_v21  ;;  %8317 = vmatpush3.bf16.msra.mxu1 %v8785_v22  ;;  %v4668_v22 = vpack.c.bf16 %v4634_v55, %v4633_v28  ;;  %v4916_v21 = vld [vmem:[#allocation3 + $0x51] sm:$0xff]  ;;  %v4926_v55 = vld [vmem:[#allocation3 + $0xa1] sm:$0xff] }
 0x3fe   : > { %8318 = vmatprep.subr.bf16.mxu1 %v8786_v34  ;;  %v7328_v61 = vpack.c.bf16 %v4916_v21, %v4915_v37  ;;  %v7343_v46 = vpack.c.bf16 %v4926_v55, %v4925_v4  ;;  %v8795_v37 = vld [vmem:[%s12176_s9 + $0x40] sm:$0xff]  }
 0x401   : > { %8319 = vmatpush3.bf16.msra.mxu1 %v8786_v34  ;;  %v4914_v34 = vld [vmem:[#allocation3 + $0x41] sm:$0xff] }
 0x402   : > { %v7325_v62 = vpack.c.bf16 %v4914_v34, %v4913_v41  ;;  %v4936_v41 = vld [vmem:[#allocation3 + $0xf1] sm:$0xff]  ;;  %v4935_v34 = vld [vmem:[#allocation3 + $0xe9] sm:$0xff] }
 0x403   : > { %v7358_v21 = vpack.c.bf16 %v4936_v41, %v4935_v34 }
 0x404   : > { %8289 = vmatmul.mubr.bf16.gmra.mrb[0].mxu1 %v4663_v18  ;;  %v4917_v18 = vld [vmem:[#allocation3 + $0x59] sm:$0xff] }
 0x405   : > { %8292 = vmatprep.mubr.bf16.mxu1 %v4664_v26  ;;  %v4920_v26 = vld [vmem:[#allocation3 + $0x71] sm:$0xff]  ;;  %v7331_v56 = vpack.c.bf16 %v4918_v50, %v4917_v18  ;;  %v11434_v18 = vld [vmem:[%s12173_s6] ss:$0 sm:$0xff] }
 0x406   : > { %v7334_v27 = vpack.c.bf16 %v4920_v26, %v4919_v19 }
 0x40c   : > { %8293 = vmatmul.mubr.bf16.gmra.mrb[4].mxu1 %v4665_v47  ;;  %v4922_v47 = vld [vmem:[#allocation3 + $0x81] sm:$0xff] }
 0x40d   : > { %8296 = vmatprep.mubr.bf16.mxu1 %v4666_v54  ;;  %v7337_v43 = vpack.c.bf16 %v4922_v47, %v4921_v59  ;;  %v4923_v54 = vld [vmem:[#allocation3 + $0x89] sm:$0xff] }
 0x40e   : > { %v7340_v17 = vpack.c.bf16 %v4924_v15, %v4923_v54 }
 0x414   : > { %8297 = vmatmul.mubr.bf16.gmra.mrb[8].mxu1 %v4667_v25  ;;  %v4927_v25 = vld [vmem:[#allocation3 + $0xa9] sm:$0xff] }
 0x415   : > { %8300 = vmatprep.mubr.bf16.mxu1 %v4668_v22  ;;  %v7346_v28 = vpack.c.bf16 %v4928_v36, %v4927_v25  ;;  %v4930_v22 = vld [vmem:[#allocation3 + $0xc1] sm:$0xff] }
 0x416   : > { %v7349_v23 = vpack.c.bf16 %v4930_v22, %v4929_v9 }
 0x41c   : > { %8301 = vmatmul.mubr.bf16.gmra.mrb[12].mxu1 %v12464_v2  ;;  %v4934_v2 = vld [vmem:[#allocation3 + $0xe1] sm:$0xff] }
 0x41d   : > { %8320 = vmatprep.mubr.msk.bf16.mxu1 %vm12465_vm3, %v7322_v45  ;;  %v7352_v45 = vpack.c.bf16 %v4932_v38, %v4931_v24  ;;  %v7355_v1 = vpack.c.bf16 %v4934_v2, %v4933_v30 }
 0x424   : > { %8321 = vmatmul.mubr.msk.bf16.vlgmr.msra.gmra.mrb[16].mxu1 %vm12466_vm4, %v7325_v62  ;;  %v8794_v62 = vld [vmem:[%s12174_s7 + $0x38] sm:$0xff]  }
 0x425   : > { %8324 = vmatprep.mubr.msk.bf16.mxu1 %vm12467_vm2, %v7328_v61 }
 0x42c   : > { %8325 = vmatmul.mubr.msk.bf16.gmra.mrb[20].mxu1 %vm12468_vm5, %v7331_v56 }
 0x42d   : > { %8328 = vmatprep.mubr.msk.bf16.mxu1 %vm12469_vm6, %v7334_v27 }
 0x434   : > { %8329 = vmatmul.mubr.msk.bf16.gmra.mrb[24].mxu1 %vm12470_vm9, %v7337_v43 }
 0x435   : > { %8332 = vmatprep.mubr.msk.bf16.mxu1 %vm12471_vm10, %v7340_v17 }
 0x43c   : > { %8333 = vmatmul.mubr.msk.bf16.gmra.mrb[28].mxu1 %vm12472_vm13, %v7343_v46 }
 0x43d   : > { %8336 = vmatprep.mubr.msk.bf16.mxu1 %vm12473_vm14, %v7346_v28 }
 0x444   : > { %8337 = vmatmul.mubr.msk.bf16.gmra.mrb[0].mxu1 %vm12450_vm7, %v7349_v23 }
 0x445   : > { %8340 = vmatprep.mubr.msk.bf16.mxu1 %vm12451_vm11, %v7352_v45 }
 0x44c   : > { %8341 = vmatmul.mubr.msk.bf16.gmra.mrb[4].mxu1 %vm12452_vm1, %v7355_v1 }
 0x44d   : > { %8344 = vmatprep.mubr.msk.bf16.mxu1 %vm11015_vm15, %v7358_v21 }
 0x454   : > { %8345 = vmatmul.mubr.msk.bf16.gmra.mrb[8].mxu1 %vm11029_vm12, %v11053_v6  ;;  %v8791_v6 = vld [vmem:[%s12174_s7 + $0x20] sm:$0xff]  }
 0x455   : > { %8348 = vmatprep.mubr.msk.bf16.mxu1 %vm11036_vm0, %v11279_v3  ;;  %8360 = vmatprep.subr.bf16.mxu0 %v8791_v6  ;;  %v8792_v3 = vld [vmem:[%s12174_s7 + $0x28] sm:$0xff]  }
 0x456   : > { %8361 = vmatpush3.bf16.msra.mxu0 %v8791_v6 }
 0x457   : > { %8362 = vmatprep.subr.bf16.mxu0 %v8792_v3 }
 0x45a   : > { %8363 = vmatpush3.bf16.msra.mxu0 %v8792_v3 }
 0x45b   : > { %8364 = vmatprep.subr.bf16.mxu0 %v8793_v57 }
 0x45c   : > { %8349 = vmatmul.mubr.msk.bf16.gmra.mrb[12].mxu1 %vm11049_vm8, %v7367_v32 }
 0x45e   : > { %8365 = vmatpush3.bf16.msra.mxu0 %v8793_v57 }
 0x45f   : > { %8366 = vmatprep.subr.bf16.mxu0 %v8794_v62 }
 0x462   : > { %8367 = vmatpush3.bf16.msra.mxu0 %v8794_v62 }
 0x463   : > { %7760 = vmatprep.subr.bf16.mxu0 %v8795_v37 }
 0x4f7   : > { %v8322_v61 = vpop.f32.mrb[16].mxu1 }
 0x4f8   : > { %v8416_v50 = vadd.f32 %v8322_v61, %v11226_v48  ;;  %v5090_v26 = vpop.f32.mrb[17].mxu1 }
 0x4f9   : > { %v8417_v56 = vadd.f32 %v5090_v26, %v11231_v5  ;;  %v8323_v19 = vpop.f32.mrb[18].mxu1 }
 0x4fa   : > { %v11439_v27 = vadd.f32 %v8416_v50, %v11434_v18  ;;  %v8418_v59 = vadd.f32 %v8323_v19, %v11233_v20  ;;  %v5093_v47 = vpop.f32.mrb[19].mxu1 }
 0x4fb   : > { %v11443_v15 = vadd.f32 %v8417_v56, %v11434_v18  ;;  %v8419_v43 = vadd.f32 %v5093_v47, %v11235_v7 }
 0x4fc   : > { %v7372_v54 = vmul.f32 -1.442695, %v11439_v27  ;;  %v11448_v17 = vadd.f32 %v8418_v59, %v11434_v18 }
 0x4fd   : > { %v7370_v48 = vmul.f32 -1.442695, %v11443_v15  ;;  %v11452_v5 = vadd.f32 %v8419_v43, %v11434_v18 }
 0x4fe   : > { %9195 = vpow2.f32 %v7372_v54  ;;  %v7373_v4 = vmul.f32 -1.442695, %v11448_v17 }
 0x4ff   : > { %9197 = vpow2.f32 %v7370_v48  ;;  %v7371_v20 = vmul.f32 -1.442695, %v11452_v5  ;;  %v8326_v55 = vpop.f32.mrb[20].mxu1 }
 0x500   : > { %9199 = vpow2.f32 %v7373_v4  ;;  %v8420_v7 = vadd.f32 %v8326_v55, %v11243_v14  ;;  %v5106_v36 = vpop.f32.mrb[21].mxu1 }
 0x501   : > { %9201 = vpow2.f32 %v7371_v20  ;;  %v8421_v46 = vadd.f32 %v5106_v36, %v11245_v49  ;;  %v8327_v25 = vpop.f32.mrb[22].mxu1 }
 0x502   : > { %v11459_v28 = vadd.f32 %v8420_v7, %v11434_v18  ;;  %v8422_v9 = vadd.f32 %v8327_v25, %v11247_v52  ;;  %v5109_v22 = vpop.f32.mrb[23].mxu1 }
 0x503   : > { %v11463_v38 = vadd.f32 %v8421_v46, %v11434_v18  ;;  %v8423_v23 = vadd.f32 %v5109_v22, %v11249_v29 }
 0x504   : > { %v7376_v24 = vmul.f32 -1.442695, %v11459_v28  ;;  %v11468_v14 = vadd.f32 %v8422_v9, %v11434_v18 }
 0x505   : > { %v7374_v45 = vmul.f32 -1.442695, %v11463_v38  ;;  %v11472_v49 = vadd.f32 %v8423_v23, %v11434_v18 }
 0x506   : > { %9203 = vpow2.f32 %v7376_v24  ;;  %v7377_v30 = vmul.f32 -1.442695, %v11468_v14 }
 0x507   : > { %9205 = vpow2.f32 %v7374_v45  ;;  %v7375_v52 = vmul.f32 -1.442695, %v11472_v49  ;;  %v8330_v2 = vpop.f32.mrb[24].mxu1 }
 0x508   : > { %v9196_v41 = vpop.eup %9195  ;;  %9207 = vpow2.f32 %v7377_v30  ;;  %v8424_v29 = vadd.f32 %v8330_v2, %v11257_v8  ;;  %v5122_v1 = vpop.f32.mrb[25].mxu1 }
 0x509   : > { %v9198_v34 = vpop.eup %9197  ;;  %v5386_v21 = vadd.f32 1.0, %v9196_v41  ;;  %9209 = vpow2.f32 %v7375_v52  ;;  %v8425_v33 = vadd.f32 %v5122_v1, %v11259_v63  ;;  %v8331_v0 = vpop.f32.mrb[26].mxu1 }
 0x50a   : > { %v9200_v32 = vpop.eup %9199  ;;  %v5384_v53 = vadd.f32 1.0, %v9198_v34  ;;  %v11479_v16 = vadd.f32 %v8424_v29, %v11434_v18  ;;  %v8426_v58 = vadd.f32 %v8331_v0, %v11261_v42  ;;  %v5125_v51 = vpop.f32.mrb[27].mxu1 }
 0x50b   : > { %v9202_v6 = vpop.eup %9201  ;;  %9211 = vrcp.f32 %v5386_v21  ;;  %v5387_v3 = vadd.f32 1.0, %v9200_v32  ;;  %v11483_v8 = vadd.f32 %v8425_v33, %v11434_v18  ;;  %v8427_v57 = vadd.f32 %v5125_v51, %v11263_v11 }
 0x50c   : > { %9213 = vrcp.f32 %v5384_v53  ;;  %v5385_v62 = vadd.f32 1.0, %v9202_v6  ;;  %v7380_v63 = vmul.f32 -1.442695, %v11479_v16  ;;  %v11488_v37 = vadd.f32 %v8426_v58, %v11434_v18  ;;  %v12474_v53 = vld [vmem:[#allocation8_spill] sm:$0xff] }
 0x50d   : > { %9215 = vrcp.f32 %v5387_v3  ;;  %v7378_v61 = vmul.f32 -1.442695, %v11483_v8  ;;  %v11492_v42 = vadd.f32 %v8427_v57, %v11434_v18  ;;  %v12475_v57 = vld [vmem:[#allocation9_spill] sm:$0xff] }
 0x50e   : > { %9217 = vrcp.f32 %v5385_v62  ;;  %v7381_v50 = vmul.f32 -1.442695, %v11488_v37 }
 0x50f   : > { %9219 = vpow2.f32 %v7380_v63  ;;  %v7379_v26 = vmul.f32 -1.442695, %v11492_v42  ;;  %v8334_v11 = vpop.f32.mrb[28].mxu1 }
 0x510   : > { %v9204_v56 = vpop.eup %9203  ;;  %9221 = vpow2.f32 %v7378_v61  ;;  %v8428_v19 = vadd.f32 %v8334_v11, %v11271_v44  ;;  %v5138_v59 = vpop.f32.mrb[29].mxu1 }
 0x511   : > { %v9206_v47 = vpop.eup %9205  ;;  %v5390_v43 = vadd.f32 1.0, %v9204_v56  ;;  %9223 = vpow2.f32 %v7381_v50  ;;  %v8429_v54 = vadd.f32 %v5138_v59, %v11273_v35  ;;  %v8335_v48 = vpop.f32.mrb[30].mxu1 }
 0x512   : > { %v9208_v4 = vpop.eup %9207  ;;  %v5388_v20 = vadd.f32 1.0, %v9206_v47  ;;  %9225 = vpow2.f32 %v7379_v26  ;;  %v11499_v55 = vadd.f32 %v8428_v19, %v11434_v18  ;;  %v8430_v7 = vadd.f32 %v8335_v48, %v11275_v13  ;;  %v5141_v36 = vpop.f32.mrb[31].mxu1  ;;  %v12476_v26 = vld [vmem:[#allocation73_spill] sm:$0xff] }
 0x513   : > { %v9210_v46 = vpop.eup %9209  ;;  %9227 = vrcp.f32 %v5390_v43  ;;  %v5391_v25 = vadd.f32 1.0, %v9208_v4  ;;  %v11503_v44 = vadd.f32 %v8429_v54, %v11434_v18  ;;  %v8431_v9 = vadd.f32 %v5141_v36, %v11277_v31  ;;  %v12478_v36 = vld [vmem:[#allocation5_spill] sm:$0xff] }
 0x514   : > { %9229 = vrcp.f32 %v5388_v20  ;;  %v5389_v35 = vadd.f32 1.0, %v9210_v46  ;;  %v7384_v22 = vmul.f32 -1.442695, %v11499_v55  ;;  %v11508_v23 = vadd.f32 %v8430_v7, %v11434_v18  ;;  %v12477_v20 = vld [vmem:[#allocation4_spill] sm:$0xff] }
 0x515   : > { %v9212_v24 = vpop.eup %9211  ;;  %9231 = vrcp.f32 %v5391_v25  ;;  %v7382_v13 = vmul.f32 -1.442695, %v11503_v44  ;;  %v11512_v45 = vadd.f32 %v8431_v9, %v11434_v18 }
 0x516   : > { %v9214_v30 = vpop.eup %9213  ;;  %v5482_v52 = vmul.f32 %v9212_v24, %v11439_v27  ;;  %9233 = vrcp.f32 %v5389_v35  ;;  %v7385_v31 = vmul.f32 -1.442695, %v11508_v23 }
 0x517   : > { %v9216_v2 = vpop.eup %9215  ;;  %9235 = vpow2.f32 %v7384_v22  ;;  %v7383_v41 = vmul.f32 -1.442695, %v11512_v45  ;;  %v8338_v29 = vpop.f32.mrb[0].mxu1  ;;  %v5480_v34 = vmul.f32 %v9214_v30, %v11443_v15 }
 0x518   : > { %v9218_v1 = vpop.eup %9217  ;;  %v5483_v21 = vmul.f32 %v9216_v2, %v11448_v17  ;;  %9237 = vpow2.f32 %v7382_v13  ;;  %v8432_v33 = vadd.f32 %v8338_v29, %v11123_v10  ;;  %v5154_v0 = vpop.f32.mrb[1].mxu1  ;;  %v11521_v27 = vadd.f32 %v5482_v52, %v12474_v53 }
 0x519   : > { %v9220_v32 = vpop.eup %9219  ;;  %v5481_v58 = vmul.f32 %v9218_v1, %v11452_v5  ;;  %9239 = vpow2.f32 %v7385_v31  ;;  %v8433_v51 = vadd.f32 %v5154_v0, %v11128_v60  ;;  %v8339_v6 = vpop.f32.mrb[2].mxu1  ;;  %v5512_v7 = vadd.f32 %v5480_v34, %v12477_v20  ;;  %v8796_v34 = vld [vmem:[%s12176_s9] sm:$0xff]   ;;  %v12483_v20 = vld [vmem:[#allocation16_spill] sm:$0xff] }
 0x51a   : > { %v9222_v3 = vpop.eup %9221  ;;  %v5515_v62 = vadd.f32 %v5483_v21, %v12475_v57  ;;  %v5394_v15 = vadd.f32 1.0, %v9220_v32  ;;  %9241 = vpow2.f32 %v7383_v41  ;;  %v11527_v17 = vadd.f32 %v8432_v33, %v11434_v18  ;;  %v5157_v10 = vpop.f32.mrb[3].mxu1 }
 0x51b   : > { %v9224_v63 = vpop.eup %9223  ;;  %v5392_v61 = vadd.f32 1.0, %v9222_v3  ;;  %v11530_v50 = vadd.f32 %v8433_v51, %v11434_v18  ;;  %v8434_v5 = vadd.f32 %v8339_v6, %v11133_v40  ;;  %v8435_v11 = vadd.f32 %v5157_v10, %v12476_v26 }
 0x51c   : > { %v9226_v60 = vpop.eup %9225  ;;  %v5561_v56 = vpack.c.bf16 %v5515_v62, %v11521_v27  ;;  %9243 = vrcp.f32 %v5394_v15  ;;  %v5395_v19 = vadd.f32 1.0, %v9224_v63  ;;  %v7388_v59 = vmul.f32 -1.442695, %v11527_v17 }
 0x51d   : > { %v9228_v47 = vpop.eup %9227  ;;  %9245 = vrcp.f32 %v5392_v61  ;;  %v5393_v43 = vadd.f32 1.0, %v9226_v60  ;;  %v7386_v54 = vmul.f32 -1.442695, %v11530_v50  ;;  %v11538_v48 = vadd.f32 %v8434_v5, %v11434_v18  ;;  %v8798_v61 = vld [vmem:[%s12176_s9 + $0x8] sm:$0xff]  }
 0x51e   : > { %v9230_v4 = vpop.eup %9229  ;;  %9247 = vrcp.f32 %v5395_v19  ;;  %v11541_v40 = vadd.f32 %v8435_v11, %v11434_v18  ;;  %v5513_v46 = vadd.f32 %v5481_v58, %v12478_v36  ;;  %v5486_v9 = vmul.f32 %v9228_v47, %v11459_v28  ;;  %v12480_v58 = vld [vmem:[#allocation75_spill] sm:$0xff]  ;;  %v12481_v11 = vld [vmem:[#allocation12_spill] sm:$0xff] }
 0x51f   : > { %v9232_v25 = vpop.eup %9231  ;;  %v5484_v35 = vmul.f32 %v9230_v4, %v11463_v38  ;;  %9249 = vrcp.f32 %v5393_v43  ;;  %v7389_v22 = vmul.f32 -1.442695, %v11538_v48  ;;  %v8342_v24 = vpop.f32.mrb[4].mxu1 }
 0x520   : > { %v9234_v13 = vpop.eup %9233  ;;  %v5487_v30 = vmul.f32 %v9232_v25, %v11468_v14  ;;  %9251 = vpow2.f32 %v7388_v59  ;;  %v7387_v52 = vmul.f32 -1.442695, %v11541_v40  ;;  %v8436_v31 = vadd.f32 %v8342_v24, %v11146_v12  ;;  %v5170_v2 = vpop.f32.mrb[5].mxu1  ;;  %v12479_v12 = vld [vmem:[#allocation74_spill] sm:$0xff]  ;;  %v8799_v59 = vld [vmem:[%s12176_s9 + $0x50] sm:$0xff]  }
 0x521   : > { %v9236_v41 = vpop.eup %9235  ;;  %v5485_v29 = vmul.f32 %v9234_v13, %v11472_v49  ;;  %9253 = vpow2.f32 %v7386_v54  ;;  %v5560_v28 = vpack.c.bf16 %v5513_v46, %v5512_v7  ;;  %v8437_v38 = vadd.f32 %v5170_v2, %v11151_v39  ;;  %v8343_v1 = vpop.f32.mrb[6].mxu1  ;;  %v8797_v49 = vld [vmem:[%s12176_s9 + $0x48] sm:$0xff]   ;;  %v12484_v25 = vld [vmem:[#allocation76_spill] sm:$0xff]  ;;  %v12486_v2 = vld [vmem:[#allocation17_spill] sm:$0xff] }
 0x522   : > { %v9238_v21 = vpop.eup %9237  ;;  %v5398_v14 = vadd.f32 1.0, %v9236_v41  ;;  %9255 = vpow2.f32 %v7389_v22  ;;  %v11557_v33 = vadd.f32 %v8436_v31, %v11434_v18  ;;  %v8438_v0 = vadd.f32 %v8343_v1, %v12479_v12  ;;  %v5173_v32 = vpop.f32.mrb[7].mxu1  ;;  %v12485_v31 = vld [vmem:[#allocation77_spill] sm:$0xff] }
 0x523   : > { %v9240_v53 = vpop.eup %9239  ;;  %v5396_v39 = vadd.f32 1.0, %v9238_v21  ;;  %9257 = vpow2.f32 %v7387_v52  ;;  %8368 = vmatprep.mubr.bf16.mxu0 %v5560_v28  ;;  %v11564_v27 = vadd.f32 %v8437_v38, %v11434_v18  ;;  %v8439_v51 = vadd.f32 %v5173_v32, %v12480_v58  ;;  %v12487_v38 = vld [vmem:[#allocation78_spill] sm:$0xff]  ;;  %v8801_v12 = vld [vmem:[%s12176_s9 + $0x58] sm:$0xff]  }
 0x524   : > { %v9242_v6 = vpop.eup %9241  ;;  %9259 = vrcp.f32 %v5398_v14  ;;  %v5399_v3 = vadd.f32 1.0, %v9240_v53  ;;  %v7392_v57 = vmul.f32 -1.442695, %v11557_v33  ;;  %8369 = vmatmul.mubr.bf16.vlgmr.msra.gmra.mrb[128].mxu0 %v5561_v56  ;;  %v11569_v62 = vadd.f32 %v8438_v0, %v11434_v18  ;;  %v12482_v56 = vld [vmem:[#allocation13_spill] sm:$0xff] }
 0x525   : > { %9261 = vrcp.f32 %v5396_v39  ;;  %v5397_v15 = vadd.f32 1.0, %v9242_v6  ;;  %v7390_v10 = vmul.f32 -1.442695, %v11564_v27  ;;  %v11573_v63 = vadd.f32 %v8439_v51, %v11434_v18  ;;  %7761 = vmatpush3.bf16.msra.mxu0 %v8796_v34  ;;  %v12488_v39 = vld [vmem:[#allocation79_spill] sm:$0xff] }
 0x526   : > { %v9244_v5 = vpop.eup %9243  ;;  %9263 = vrcp.f32 %v5399_v3  ;;  %v7393_v26 = vmul.f32 -1.442695, %v11569_v62  ;;  %v5516_v60 = vadd.f32 %v5484_v35, %v12481_v11  ;;  %v5517_v19 = vadd.f32 %v5485_v29, %v12482_v56  ;;  %7762 = vmatprep.subr.bf16.mxu0 %v8797_v49  ;;  %v8802_v11 = vld [vmem:[%s12176_s9 + $0x18] sm:$0xff]  }
 0x527   : > { %v9246_v47 = vpop.eup %9245  ;;  %v5490_v43 = vmul.f32 %v9244_v5, %v11479_v16  ;;  %9265 = vrcp.f32 %v5397_v15  ;;  %v7391_v54 = vmul.f32 -1.442695, %v11573_v63  ;;  %v8346_v4 = vpop.f32.mrb[8].mxu1  ;;  %v5518_v7 = vadd.f32 %v5486_v9, %v12483_v20 }
 0x528   : > { %v9248_v36 = vpop.eup %9247  ;;  %v5488_v46 = vmul.f32 %v9246_v47, %v11483_v8  ;;  %9267 = vpow2.f32 %v7392_v57  ;;  %v8440_v35 = vadd.f32 %v8346_v4, %v12484_v25  ;;  %v5562_v22 = vpack.c.bf16 %v5517_v19, %v5516_v60  ;;  %v5186_v24 = vpop.f32.mrb[9].mxu1  ;;  %v12489_v57 = vld [vmem:[#allocation21_spill] sm:$0xff] }
 0x529   : > { %v9250_v13 = vpop.eup %9249  ;;  %v5491_v52 = vmul.f32 %v9248_v36, %v11488_v37  ;;  %9269 = vpow2.f32 %v7390_v10  ;;  %v8441_v16 = vadd.f32 %v5186_v24, %v12485_v31  ;;  %v5519_v41 = vadd.f32 %v5487_v30, %v12486_v2  ;;  %v8347_v29 = vpop.f32.mrb[10].mxu1  ;;  %7763 = vmatpush3.bf16.msra.mxu0 %v8798_v61  ;;  %v8800_v37 = vld [vmem:[%s12176_s9 + $0x10] sm:$0xff]  }
 0x52a   : > { %v9252_v28 = vpop.eup %9251  ;;  %v5489_v9 = vmul.f32 %v9250_v13, %v11492_v42  ;;  %9271 = vpow2.f32 %v7393_v26  ;;  %v11594_v8 = vadd.f32 %v8440_v35, %v11434_v18  ;;  %8372 = vmatprep.mubr.bf16.mxu0 %v5562_v22  ;;  %v8442_v1 = vadd.f32 %v8347_v29, %v12487_v38  ;;  %v5189_v34 = vpop.f32.mrb[11].mxu1  ;;  %7764 = vmatprep.subr.bf16.mxu0 %v8799_v59  ;;  %v12490_v59 = vld [vmem:[#allocation20_spill] sm:$0xff]  ;;  %v12493_v13 = vld [vmem:[#allocation81_spill] sm:$0xff] }
 0x52b   : > { %v9254_v21 = vpop.eup %9253  ;;  %v5402_v30 = vadd.f32 1.0, %v9252_v28  ;;  %9273 = vpow2.f32 %v7391_v54  ;;  %v11601_v14 = vadd.f32 %v8441_v16, %v11434_v18  ;;  %v5563_v42 = vpack.c.bf16 %v5519_v41, %v5518_v7  ;;  %v12491_v54 = vld [vmem:[#allocation26_spill] sm:$0xff]  ;;  %v12494_v41 = vld [vmem:[#allocation24_spill] sm:$0xff] }
 0x52c   : > { %v9256_v0 = vpop.eup %9255  ;;  %v5400_v32 = vadd.f32 1.0, %v9254_v21  ;;  %v7396_v49 = vmul.f32 -1.442695, %v11594_v8  ;;  %v11608_v53 = vadd.f32 %v8442_v1, %v11434_v18  ;;  %v8443_v58 = vadd.f32 %v5189_v34, %v12488_v39  ;;  %v12495_v1 = vld [vmem:[#allocation82_spill] sm:$0xff] }
 0x52d   : > { %v9258_v51 = vpop.eup %9257  ;;  %9275 = vrcp.f32 %v5402_v30  ;;  %v5403_v6 = vadd.f32 1.0, %v9256_v0  ;;  %v7394_v3 = vmul.f32 -1.442695, %v11601_v14  ;;  %8373 = vmatmul.mubr.bf16.gmra.mrb[132].mxu0 %v5563_v42  ;;  %v5520_v15 = vadd.f32 %v5488_v46, %v12489_v57  ;;  %v12492_v46 = vld [vmem:[#allocation80_spill] sm:$0xff]  ;;  %v12498_v57 = vld [vmem:[#allocation29_spill] sm:$0xff] }
 0x52e   : > { %v9260_v10 = vpop.eup %9259  ;;  %9277 = vrcp.f32 %v5400_v32  ;;  %v5401_v61 = vadd.f32 1.0, %v9258_v51  ;;  %v7397_v5 = vmul.f32 -1.442695, %v11608_v53  ;;  %v11615_v26 = vadd.f32 %v8443_v58, %v11434_v18  ;;  %7765 = vmatpush3.bf16.msra.mxu0 %v8800_v37  ;;  %v12497_v58 = vld [vmem:[#allocation28_spill] sm:$0xff] }
 0x52f   : > { %v9262_v60 = vpop.eup %9261  ;;  %v5494_v56 = vmul.f32 %v9260_v10, %v11499_v55  ;;  %9279 = vrcp.f32 %v5403_v6  ;;  %v8350_v19 = vpop.f32.mrb[12].mxu1  ;;  %v5521_v47 = vadd.f32 %v5489_v9, %v12490_v59  ;;  %v5522_v4 = vadd.f32 %v5490_v43, %v12491_v54  ;;  %7766 = vmatprep.subr.bf16.mxu0 %v8801_v12  ;;  %v12499_v10 = vld [vmem:[#allocation32_spill] sm:$0xff] }
 0x530   : > { %v9264_v20 = vpop.eup %9263  ;;  %v5492_v7 = vmul.f32 %v9262_v60, %v11503_v44  ;;  %9281 = vrcp.f32 %v5401_v61  ;;  %v7395_v36 = vmul.f32 -1.442695, %v11615_v26  ;;  %v8444_v25 = vadd.f32 %v8350_v19, %v12492_v46  ;;  %v5202_v35 = vpop.f32.mrb[13].mxu1  ;;  %v12500_v19 = vld [vmem:[#allocation33_spill] sm:$0xff] }
 0x531   : > { %v9266_v22 = vpop.eup %9265  ;;  %v5495_v24 = vmul.f32 %v9264_v20, %v11508_v23  ;;  %9283 = vpow2.f32 %v7396_v49  ;;  %v5564_v55 = vpack.c.bf16 %v5521_v47, %v5520_v15  ;;  %v8445_v31 = vadd.f32 %v5202_v35, %v12493_v13  ;;  %v8351_v16 = vpop.f32.mrb[14].mxu1  ;;  %v12496_v49 = vld [vmem:[#allocation83_spill] sm:$0xff]  ;;  %v12501_v35 = vld [vmem:[#allocation40_spill] sm:$0xff] }
 0x532   : > { %v9268_v2 = vpop.eup %9267  ;;  %v5493_v43 = vmul.f32 %v9266_v22, %v11512_v45  ;;  %9285 = vpow2.f32 %v7394_v3  ;;  %v11630_v44 = vadd.f32 %v8444_v25, %v11434_v18  ;;  %v5523_v29 = vadd.f32 %v5491_v52, %v12494_v41  ;;  %v5205_v28 = vpop.f32.mrb[15].mxu1  ;;  %7767 = vmatpush3.bf16.msra.mxu0 %v8802_v11 }
 0x533   : > { %v9270_v9 = vpop.eup %9269  ;;  %v5406_v38 = vadd.f32 1.0, %v9268_v2  ;;  %9287 = vpow2.f32 %v7397_v5  ;;  %8376 = vmatprep.mubr.bf16.mxu0 %v5564_v55  ;;  %v11634_v23 = vadd.f32 %v8445_v31, %v11434_v18  ;;  %v8446_v34 = vadd.f32 %v8351_v16, %v12495_v1  ;;  %v12503_v31 = vld [vmem:[#allocation36_spill] sm:$0xff]  ;;  %v12504_v16 = vld [vmem:[#allocation37_spill] sm:$0xff] }
 0x534   : > { %v9272_v37 = vpop.eup %9271  ;;  %v5404_v21 = vadd.f32 1.0, %v9270_v9  ;;  %9289 = vpow2.f32 %v7395_v36  ;;  %v7400_v45 = vmul.f32 -1.442695, %v11630_v44  ;;  %v5565_v30 = vpack.c.bf16 %v5523_v29, %v5522_v4 }
 0x535   : > { %v9274_v42 = vpop.eup %9273  ;;  %9291 = vrcp.f32 %v5406_v38  ;;  %v5407_v52 = vadd.f32 1.0, %v9272_v37  ;;  %v7398_v12 = vmul.f32 -1.442695, %v11634_v23  ;;  %v11640_v0 = vadd.f32 %v8446_v34, %v11434_v18 }
 0x536   : > { %9293 = vrcp.f32 %v5404_v21  ;;  %v5405_v32 = vadd.f32 1.0, %v9274_v42  ;;  %8377 = vmatmul.mubr.bf16.gmra.mrb[136].mxu0 %v5565_v30  ;;  %v8447_v39 = vadd.f32 %v5205_v28, %v12496_v49  ;;  %v5524_v51 = vadd.f32 %v5492_v7, %v12497_v58 }
 0x537   : > { %v9276_v6 = vpop.eup %9275  ;;  %9295 = vrcp.f32 %v5407_v52  ;;  %v7401_v3 = vmul.f32 -1.442695, %v11640_v0  ;;  %v5525_v15 = vadd.f32 %v5493_v43, %v12498_v57  ;;  %v5526_v61 = vadd.f32 %v5494_v56, %v12499_v10  ;;  %v12508_v57 = vld [vmem:[#allocation45_spill] sm:$0xff] }
 0x538   : > { %v9278_v5 = vpop.eup %9277  ;;  %v5498_v11 = vmul.f32 %v9276_v6, %v11527_v17  ;;  %9297 = vrcp.f32 %v5405_v32  ;;  %v11649_v60 = vadd.f32 %v8447_v39, %v11434_v18  ;;  %v5527_v59 = vadd.f32 %v5495_v24, %v12500_v19  ;;  %v12505_v32 = vld [vmem:[#allocation48_spill] sm:$0xff]  ;;  %v12506_v39 = vld [vmem:[#allocation49_spill] sm:$0xff] }
 0x539   : > { %v9280_v47 = vpop.eup %9279  ;;  %v5496_v54 = vmul.f32 %v9278_v5, %v11530_v50  ;;  %9299 = vpow2.f32 %v7400_v45  ;;  %v5566_v4 = vpack.c.bf16 %v5525_v15, %v5524_v51  ;;  %v12502_v50 = vld [vmem:[#allocation42_spill] sm:$0xff]  ;;  %v12507_v6 = vld [vmem:[#allocation44_spill] sm:$0xff] }
 0x53a   : > { %v9282_v20 = vpop.eup %9281  ;;  %v5499_v7 = vmul.f32 %v9280_v47, %v11538_v48  ;;  %9301 = vpow2.f32 %v7398_v12  ;;  %v7399_v56 = vmul.f32 -1.442695, %v11649_v60  ;;  %v5567_v36 = vpack.c.bf16 %v5527_v59, %v5526_v61 }
 0x53b   : > { %v9284_v46 = vpop.eup %9283  ;;  %v5497_v17 = vmul.f32 %v9282_v20, %v11541_v40  ;;  %9303 = vpow2.f32 %v7401_v3  ;;  %8380 = vmatprep.mubr.bf16.mxu0 %v5566_v4  ;;  %v5530_v22 = vadd.f32 %v5498_v11, %v12501_v35  ;;  %v5528_v48 = vadd.f32 %v5496_v54, %v12503_v31 }
 0x53c   : > { %v9286_v18 = vpop.eup %9285  ;;  %v5410_v25 = vadd.f32 1.0, %v9284_v46  ;;  %9305 = vpow2.f32 %v7399_v56  ;;  %v5531_v24 = vadd.f32 %v5499_v7, %v12502_v50  ;;  %v12509_v7 = vld [vmem:[#allocation56_spill] sm:$0xff] }
 0x53d   : > { %v9288_v55 = vpop.eup %9287  ;;  %v5408_v13 = vadd.f32 1.0, %v9286_v18  ;;  %v5529_v2 = vadd.f32 %v5497_v17, %v12504_v16  ;;  %v12511_v17 = vld [vmem:[#allocation52_spill] sm:$0xff] }
 0x53e   : > { %v9290_v43 = vpop.eup %9289  ;;  %9307 = vrcp.f32 %v5410_v25  ;;  %v5411_v41 = vadd.f32 1.0, %v9288_v55  ;;  %8381 = vmatmul.mubr.bf16.gmra.mrb[140].mxu0 %v5567_v36  ;;  %v5569_v40 = vpack.c.bf16 %v5531_v24, %v5530_v22  ;;  %v12510_v36 = vld [vmem:[#allocation57_spill] sm:$0xff] }
 0x53f   : > { %v9292_v29 = vpop.eup %9291  ;;  %9309 = vrcp.f32 %v5408_v13  ;;  %v5409_v28 = vadd.f32 1.0, %v9290_v43  ;;  %v5568_v9 = vpack.c.bf16 %v5529_v2, %v5528_v48  ;;  %v12512_v25 = vld [vmem:[#allocation53_spill] sm:$0xff]  ;;  %v12513_v48 = vld [vmem:[#allocation64_spill] sm:$0xff] }
 0x540   : > { %v9294_v38 = vpop.eup %9293  ;;  %v5502_v1 = vmul.f32 %v9292_v29, %v11557_v33  ;;  %9311 = vrcp.f32 %v5411_v41  ;;  %v12514_v2 = vld [vmem:[#allocation65_spill] sm:$0xff]  ;;  %v12515_v41 = vld [vmem:[#allocation60_spill] sm:$0xff] }
 0x541   : > { %v9296_v34 = vpop.eup %9295  ;;  %v5500_v37 = vmul.f32 %v9294_v38, %v11564_v27  ;;  %9313 = vrcp.f32 %v5409_v28  ;;  %8384 = vmatprep.mubr.bf16.mxu0 %v5568_v9  ;;  %v12516_v29 = vld [vmem:[#allocation61_spill] sm:$0xff]  ;;  %v12518_v38 = vld [vmem:[#allocation6_spill] sm:$0xff] }
 0x542   : > { %v9298_v21 = vpop.eup %9297  ;;  %v5503_v45 = vmul.f32 %v9296_v34, %v11569_v62  ;;  %v5534_v49 = vadd.f32 %v5502_v1, %v12505_v32  ;;  %v8805_v34 = vld [vmem:[%s12176_s9 + $0x68] sm:$0xff]  }
 0x543   : > { %v9300_v30 = vpop.eup %9299  ;;  %v5501_v42 = vmul.f32 %v9298_v21, %v11573_v63  ;;  %v5532_v3 = vadd.f32 %v5500_v37, %v12507_v6  ;;  %v8806_v37 = vld [vmem:[%s12176_s9 + $0x28] sm:$0xff]   ;;  %v8807_v21 = vld [vmem:[%s12176_s9 + $0x70] sm:$0xff]  }
 0x544   : > { %v9302_v52 = vpop.eup %9301  ;;  %v5414_v12 = vadd.f32 1.0, %v9300_v30  ;;  %v5535_v58 = vadd.f32 %v5503_v45, %v12506_v39  ;;  %v8808_v45 = vld [vmem:[%s12176_s9 + $0x30] sm:$0xff]   ;;  %v8809_v30 = vld [vmem:[%s12176_s9 + $0x78] sm:$0xff]  }
 0x545   : > { %v9304_v51 = vpop.eup %9303  ;;  %v5412_v33 = vadd.f32 1.0, %v9302_v52  ;;  %v5533_v27 = vadd.f32 %v5501_v42, %v12508_v57  ;;  %v8810_v42 = vld [vmem:[%s12176_s9 + $0x38] sm:$0xff]   ;;  %v11714_v52 = vld [vmem:[%s12175_s8] ss:$0 sm:$0xff] }
 0x546   : > { %v9306_v15 = vpop.eup %9305  ;;  %9315 = vrcp.f32 %v5414_v12  ;;  %v5415_v10 = vadd.f32 1.0, %v9304_v51  ;;  %8385 = vmatmul.mubr.bf16.gmra.mrb[144].mxu0 %v5569_v40  ;;  %v5571_v62 = vpack.c.bf16 %v5535_v58, %v5534_v49 }
 0x547   : > { %9317 = vrcp.f32 %v5412_v33  ;;  %v5413_v61 = vadd.f32 1.0, %v9306_v15  ;;  %v5570_v63 = vpack.c.bf16 %v5533_v27, %v5532_v3 }
 0x548   : > { %v9308_v5 = vpop.eup %9307  ;;  %9319 = vrcp.f32 %v5415_v10 }
 0x549   : > { %v9310_v11 = vpop.eup %9309  ;;  %v5506_v19 = vmul.f32 %v9308_v5, %v11594_v8  ;;  %9321 = vrcp.f32 %v5413_v61  ;;  %8388 = vmatprep.mubr.bf16.mxu0 %v5570_v63 }
 0x54a   : > { %v9312_v59 = vpop.eup %9311  ;;  %v5504_v47 = vmul.f32 %v9310_v11, %v11601_v14 }
 0x54b   : > { %v9314_v54 = vpop.eup %9313  ;;  %v5507_v4 = vmul.f32 %v9312_v59, %v11608_v53  ;;  %v5538_v56 = vadd.f32 %v5506_v19, %v12509_v7 }
 0x54c   : > { %v5505_v20 = vmul.f32 %v9314_v54, %v11615_v26  ;;  %v5536_v18 = vadd.f32 %v5504_v47, %v12511_v17 }
 0x54d   : > { %v5539_v46 = vadd.f32 %v5507_v4, %v12510_v36 }
 0x54e   : > { %8389 = vmatmul.mubr.bf16.gmra.mrb[148].mxu0 %v5571_v62  ;;  %v5537_v35 = vadd.f32 %v5505_v20, %v12512_v25 }
 0x54f   : > { %v5573_v8 = vpack.c.bf16 %v5539_v46, %v5538_v56 }
 0x550   : > { %v9316_v22 = vpop.eup %9315  ;;  %v5572_v50 = vpack.c.bf16 %v5537_v35, %v5536_v18 }
 0x551   : > { %v9318_v24 = vpop.eup %9317  ;;  %v5510_v14 = vmul.f32 %v9316_v22, %v11630_v44 }
 0x552   : > { %v9320_v55 = vpop.eup %9319  ;;  %v5508_v53 = vmul.f32 %v9318_v24, %v11634_v23  ;;  %8392 = vmatprep.mubr.bf16.mxu0 %v5572_v50  ;;  %v12517_v23 = vld [vmem:[#allocation7_spill] sm:$0xff] }
 0x553   : > { %v9322_v26 = vpop.eup %9321  ;;  %v5511_v13 = vmul.f32 %v9320_v55, %v11640_v0  ;;  %v5542_v16 = vadd.f32 %v5510_v14, %v12513_v48  ;;  %v12519_v1 = vpack.c.bf16 %v12517_v23, %v12518_v38  ;;  %v8803_v0 = vld [vmem:[%s12176_s9 + $0x60] sm:$0xff]  }
 0x554   : > { %v5509_v31 = vmul.f32 %v9322_v26, %v11649_v60  ;;  %v5540_v40 = vadd.f32 %v5508_v53, %v12515_v41  ;;  %v8804_v60 = vld [vmem:[%s12176_s9 + $0x20] sm:$0xff]   ;;  %7768 = vmatprep.subr.bf16.mxu0 %v8803_v0 }
 0x555   : > { %v5543_v43 = vadd.f32 %v5511_v13, %v12514_v2  ;;  %7769 = vmatpush3.bf16.msra.mxu0 %v8804_v60 }
 0x556   : > { %8393 = vmatmul.mubr.bf16.gmra.mrb[152].mxu0 %v5573_v8  ;;  %v5541_v28 = vadd.f32 %v5509_v31, %v12516_v29  ;;  %7770 = vmatprep.subr.bf16.mxu0 %v8805_v34 }
 0x557   : > { %v5575_v9 = vpack.c.bf16 %v5543_v43, %v5542_v16 }
 0x558   : > { %v5574_v44 = vpack.c.bf16 %v5541_v28, %v5540_v40 }
 0x559   : > { %7771 = vmatpush3.bf16.msra.mxu0 %v8806_v37 }
 0x55a   : > { %8396 = vmatprep.mubr.bf16.mxu0 %v5574_v44  ;;  %7772 = vmatprep.subr.bf16.mxu0 %v8807_v21 }
 0x55d   : > { %7773 = vmatpush3.bf16.msra.mxu0 %v8808_v45 }
 0x55e   : > { %8397 = vmatmul.mubr.bf16.gmra.mrb[156].mxu0 %v5575_v9  ;;  %7774 = vmatprep.subr.bf16.mxu0 %v8809_v30 }
 0x55f   : > { %6311 = vmatprep.mubr.bf16.mxu0 %v12519_v1 }
 0x561   : > { %7775 = vmatpush3.bf16.msra.mxu0 %v8810_v42 }
 0x5f7   : > { %v8370_v12 = vpop.f32.mrb[128].mxu0 }
 0x5f8   : > { %v11717_v32 = vadd.f32 %v8370_v12, %v11714_v52  ;;  %v5665_v49 = vpop.f32.mrb[129].mxu0 }
 0x5f9   : > { %v11720_v39 = vadd.f32 %v11714_v52, %v5665_v49  ;;  %v8371_v58 = vpop.f32.mrb[130].mxu0 }
 0x5fa   : > { %v7413_v51 = vmul.f32 -1.442695, %v11717_v32  ;;  %v11724_v33 = vadd.f32 %v8371_v58, %v11714_v52  ;;  %v5668_v6 = vpop.f32.mrb[131].mxu0 }
 0x5fb   : > { %v7411_v3 = vmul.f32 -1.442695, %v11720_v39  ;;  %v11728_v57 = vadd.f32 %v11714_v52, %v5668_v6 }
 0x5fc   : > { %9323 = vpow2.f32 %v7413_v51  ;;  %v7414_v27 = vmul.f32 -1.442695, %v11724_v33 }
 0x5fd   : > { %9325 = vpow2.f32 %v7411_v3  ;;  %v7412_v15 = vmul.f32 -1.442695, %v11728_v57 }
 0x5fe   : > { %9327 = vpow2.f32 %v7414_v27 }
 0x5ff   : > { %9329 = vpow2.f32 %v7412_v15 }
 0x600   : > { %v8374_v10 = vpop.f32.mrb[132].mxu0 }
 0x601   : > { %v11733_v62 = vadd.f32 %v8374_v10, %v11714_v52  ;;  %v5681_v61 = vpop.f32.mrb[133].mxu0 }
 0x602   : > { %v11736_v63 = vadd.f32 %v11714_v52, %v5681_v61  ;;  %v8375_v5 = vpop.f32.mrb[134].mxu0 }
 0x603   : > { %v7417_v11 = vmul.f32 -1.442695, %v11733_v62  ;;  %v11740_v19 = vadd.f32 %v8375_v5, %v11714_v52  ;;  %v5684_v59 = vpop.f32.mrb[135].mxu0 }
 0x604   : > { %v7415_v47 = vmul.f32 -1.442695, %v11736_v63  ;;  %v11744_v54 = vadd.f32 %v11714_v52, %v5684_v59 }
 0x605   : > { %9331 = vpow2.f32 %v7417_v11  ;;  %v7418_v4 = vmul.f32 -1.442695, %v11740_v19 }
 0x606   : > { %v9324_v20 = vpop.eup %9323  ;;  %9333 = vpow2.f32 %v7415_v47  ;;  %v7416_v7 = vmul.f32 -1.442695, %v11744_v54 }
 0x607   : > { %v9326_v56 = vpop.eup %9325  ;;  %v5890_v36 = vadd.f32 1.0, %v9324_v20  ;;  %9335 = vpow2.f32 %v7418_v4 }
 0x608   : > { %v9328_v46 = vpop.eup %9327  ;;  %v5888_v17 = vadd.f32 1.0, %v9326_v56  ;;  %9337 = vpow2.f32 %v7416_v7 }
 0x609   : > { %v9330_v18 = vpop.eup %9329  ;;  %9339 = vrcp.f32 %v5890_v36  ;;  %v5891_v25 = vadd.f32 1.0, %v9328_v46  ;;  %v8378_v35 = vpop.f32.mrb[136].mxu0 }
 0x60a   : > { %9341 = vrcp.f32 %v5888_v17  ;;  %v5889_v8 = vadd.f32 1.0, %v9330_v18  ;;  %v11749_v22 = vadd.f32 %v8378_v35, %v11714_v52  ;;  %v5697_v50 = vpop.f32.mrb[137].mxu0 }
 0x60b   : > { %9343 = vrcp.f32 %v5891_v25  ;;  %v11752_v24 = vadd.f32 %v11714_v52, %v5697_v50  ;;  %v8379_v14 = vpop.f32.mrb[138].mxu0  ;;  %v12521_v50 = vld [vmem:[#allocation10_spill] sm:$0xff] }
 0x60c   : > { %9345 = vrcp.f32 %v5889_v8  ;;  %v7421_v55 = vmul.f32 -1.442695, %v11749_v22  ;;  %v11756_v53 = vadd.f32 %v8379_v14, %v11714_v52  ;;  %v5700_v26 = vpop.f32.mrb[139].mxu0  ;;  %v12520_v8 = vld [vmem:[#allocation11_spill] sm:$0xff] }
 0x60d   : > { %v7419_v13 = vmul.f32 -1.442695, %v11752_v24  ;;  %v11760_v31 = vadd.f32 %v11714_v52, %v5700_v26  ;;  %v12522_v14 = vpack.c.bf16 %v12520_v8, %v12521_v50 }
 0x60e   : > { %9347 = vpow2.f32 %v7421_v55  ;;  %v7422_v48 = vmul.f32 -1.442695, %v11756_v53 }
 0x60f   : > { %v9332_v16 = vpop.eup %9331  ;;  %9349 = vpow2.f32 %v7419_v13  ;;  %v7420_v2 = vmul.f32 -1.442695, %v11760_v31 }
 0x610   : > { %v9334_v43 = vpop.eup %9333  ;;  %v5894_v41 = vadd.f32 1.0, %v9332_v16  ;;  %9351 = vpow2.f32 %v7422_v48 }
 0x611   : > { %v9336_v40 = vpop.eup %9335  ;;  %v5892_v29 = vadd.f32 1.0, %v9334_v43  ;;  %9353 = vpow2.f32 %v7420_v2  ;;  %v8382_v28 = vpop.f32.mrb[140].mxu0 }
 0x612   : > { %v9338_v9 = vpop.eup %9337  ;;  %9355 = vrcp.f32 %v5894_v41  ;;  %v5895_v44 = vadd.f32 1.0, %v9336_v40  ;;  %v11765_v23 = vadd.f32 %v8382_v28, %v11714_v52  ;;  %v5713_v38 = vpop.f32.mrb[141].mxu0 }
 0x613   : > { %v9340_v1 = vpop.eup %9339  ;;  %9357 = vrcp.f32 %v5892_v29  ;;  %v5893_v0 = vadd.f32 1.0, %v9338_v9  ;;  %v11768_v60 = vadd.f32 %v11714_v52, %v5713_v38  ;;  %v8383_v34 = vpop.f32.mrb[142].mxu0 }
 0x614   : > { %v9342_v37 = vpop.eup %9341  ;;  %9359 = vrcp.f32 %v5895_v44  ;;  %v7425_v21 = vmul.f32 -1.442695, %v11765_v23  ;;  %v11772_v45 = vadd.f32 %v8383_v34, %v11714_v52  ;;  %v5716_v30 = vpop.f32.mrb[143].mxu0  ;;  %v11779_v51 = vmul.f32 %v9340_v1, %v11717_v32 }
 0x615   : > { %v9344_v42 = vpop.eup %9343  ;;  %9361 = vrcp.f32 %v5893_v0  ;;  %v7423_v12 = vmul.f32 -1.442695, %v11768_v60  ;;  %v11776_v49 = vadd.f32 %v11714_v52, %v5716_v30  ;;  %v5984_v27 = vmul.f32 %v9342_v37, %v11720_v39 }
 0x616   : > { %v9346_v58 = vpop.eup %9345  ;;  %v11782_v6 = vmul.f32 %v9344_v42, %v11724_v33  ;;  %9363 = vpow2.f32 %v7425_v21  ;;  %v7426_v3 = vmul.f32 -1.442695, %v11772_v45 }
 0x617   : > { %v5985_v15 = vmul.f32 %v9346_v58, %v11728_v57  ;;  %9365 = vpow2.f32 %v7423_v12  ;;  %v7424_v10 = vmul.f32 -1.442695, %v11776_v49 }
 0x618   : > { %v9348_v61 = vpop.eup %9347  ;;  %9367 = vpow2.f32 %v7426_v3  ;;  %v6146_v5 = vpack.c.bf16 %v11782_v6, %v11779_v51  ;;  %v12523_v3 = vld [vmem:[#allocation15_spill] sm:$0xff] }
 0x619   : > { %v9350_v32 = vpop.eup %9349  ;;  %v6144_v11 = vpack.c.bf16 %v5985_v15, %v5984_v27  ;;  %v5898_v59 = vadd.f32 1.0, %v9348_v61  ;;  %9369 = vpow2.f32 %v7424_v10  ;;  %v8386_v33 = vpop.f32.mrb[144].mxu0  ;;  %v12524_v27 = vld [vmem:[#allocation14_spill] sm:$0xff] }
 0x61a   : > { %v9352_v47 = vpop.eup %9351  ;;  %v5896_v4 = vadd.f32 1.0, %v9350_v32  ;;  %v11791_v20 = vadd.f32 %v8386_v33, %v11714_v52  ;;  %v5729_v39 = vpop.f32.mrb[145].mxu0  ;;  %v12525_v15 = vpack.c.bf16 %v12523_v3, %v12524_v27 }
 0x61b   : > { %v9354_v57 = vpop.eup %9353  ;;  %9371 = vrcp.f32 %v5898_v59  ;;  %v5899_v7 = vadd.f32 1.0, %v9352_v47  ;;  %v11794_v56 = vadd.f32 %v11714_v52, %v5729_v39  ;;  %v8387_v36 = vpop.f32.mrb[146].mxu0  ;;  %6312 = vmatmul.mubr.bf16.vlgmr.msra.gmra.mrb[160].mxu0 %v6144_v11 }
 0x61c   : > { %v9356_v46 = vpop.eup %9355  ;;  %9373 = vrcp.f32 %v5896_v4  ;;  %v5897_v17 = vadd.f32 1.0, %v9354_v57  ;;  %v7429_v18 = vmul.f32 -1.442695, %v11791_v20  ;;  %v11798_v25 = vadd.f32 %v8387_v36, %v11714_v52  ;;  %v5732_v35 = vpop.f32.mrb[147].mxu0  ;;  %6319 = vmatprep.mubr.bf16.mxu0 %v12522_v14 }
 0x61d   : > { %v9358_v55 = vpop.eup %9357  ;;  %9375 = vrcp.f32 %v5899_v7  ;;  %v7427_v26 = vmul.f32 -1.442695, %v11794_v56  ;;  %v11805_v13 = vadd.f32 %v11714_v52, %v5732_v35  ;;  %v11809_v43 = vmul.f32 %v9356_v46, %v11733_v62 }
 0x61e   : > { %v9360_v48 = vpop.eup %9359  ;;  %9377 = vrcp.f32 %v5897_v17  ;;  %v7430_v16 = vmul.f32 -1.442695, %v11798_v25  ;;  %v5988_v28 = vmul.f32 %v9358_v55, %v11736_v63 }
 0x61f   : > { %v9362_v2 = vpop.eup %9361  ;;  %v11812_v41 = vmul.f32 %v9360_v48, %v11740_v19  ;;  %9379 = vpow2.f32 %v7429_v18  ;;  %v7428_v40 = vmul.f32 -1.442695, %v11805_v13 }
 0x620   : > { %v9364_v29 = vpop.eup %9363  ;;  %v5989_v9 = vmul.f32 %v9362_v2, %v11744_v54  ;;  %9381 = vpow2.f32 %v7427_v26 }
 0x621   : > { %v9366_v44 = vpop.eup %9365  ;;  %v5902_v38 = vadd.f32 1.0, %v9364_v29  ;;  %9383 = vpow2.f32 %v7430_v16  ;;  %v8390_v1 = vpop.f32.mrb[148].mxu0  ;;  %v6150_v62 = vpack.c.bf16 %v11812_v41, %v11809_v43  ;;  %v12527_v29 = vld [vmem:[#allocation19_spill] sm:$0xff] }
 0x622   : > { %v9368_v0 = vpop.eup %9367  ;;  %v5900_v34 = vadd.f32 1.0, %v9366_v44  ;;  %9385 = vpow2.f32 %v7428_v40  ;;  %v11820_v19 = vadd.f32 %v8390_v1, %v11714_v52  ;;  %v5745_v37 = vpop.f32.mrb[149].mxu0  ;;  %v6148_v21 = vpack.c.bf16 %v5989_v9, %v5988_v28  ;;  %v12526_v40 = vld [vmem:[#allocation18_spill] sm:$0xff] }
 0x623   : > { %v9370_v30 = vpop.eup %9369  ;;  %9387 = vrcp.f32 %v5902_v38  ;;  %v5903_v63 = vadd.f32 1.0, %v9368_v0  ;;  %v11823_v54 = vadd.f32 %v11714_v52, %v5745_v37  ;;  %v8391_v42 = vpop.f32.mrb[150].mxu0  ;;  %6320 = vmatmul.mubr.bf16.gmra.mrb[164].mxu0 %v6146_v5  ;;  %v12528_v28 = vpack.c.bf16 %v12526_v40, %v12527_v29 }
 0x624   : > { %9389 = vrcp.f32 %v5900_v34  ;;  %v5901_v12 = vadd.f32 1.0, %v9370_v30  ;;  %v7433_v58 = vmul.f32 -1.442695, %v11820_v19  ;;  %v11827_v51 = vadd.f32 %v8391_v42, %v11714_v52  ;;  %v5748_v6 = vpop.f32.mrb[151].mxu0  ;;  %6327 = vmatprep.mubr.bf16.mxu0 %v12525_v15 }
 0x625   : > { %v9372_v10 = vpop.eup %9371  ;;  %9391 = vrcp.f32 %v5903_v63  ;;  %v7431_v61 = vmul.f32 -1.442695, %v11823_v54  ;;  %v11834_v32 = vadd.f32 %v11714_v52, %v5748_v6 }
 0x626   : > { %v9374_v5 = vpop.eup %9373  ;;  %9393 = vrcp.f32 %v5901_v12  ;;  %v7434_v11 = vmul.f32 -1.442695, %v11827_v51  ;;  %v11839_v4 = vmul.f32 %v9372_v10, %v11749_v22 }
 0x627   : > { %v9376_v59 = vpop.eup %9375  ;;  %9395 = vpow2.f32 %v7433_v58  ;;  %v7432_v33 = vmul.f32 -1.442695, %v11834_v32  ;;  %v11845_v7 = vmul.f32 %v9374_v5, %v11752_v24 }
 0x628   : > { %v9378_v47 = vpop.eup %9377  ;;  %v11842_v39 = vmul.f32 %v9376_v59, %v11756_v53  ;;  %9397 = vpow2.f32 %v7431_v61 }
 0x629   : > { %v9380_v57 = vpop.eup %9379  ;;  %v11848_v36 = vmul.f32 %v9378_v47, %v11760_v31  ;;  %9399 = vpow2.f32 %v7434_v11  ;;  %v8394_v46 = vpop.f32.mrb[152].mxu0 }
 0x62a   : > { %v9382_v17 = vpop.eup %9381  ;;  %v5906_v18 = vadd.f32 1.0, %v9380_v57  ;;  %9401 = vpow2.f32 %v7432_v33  ;;  %v11851_v35 = vadd.f32 %v8394_v46, %v11714_v52  ;;  %v5761_v22 = vpop.f32.mrb[153].mxu0  ;;  %v6154_v53 = vpack.c.bf16 %v11842_v39, %v11839_v4 }
 0x62b   : > { %v9384_v8 = vpop.eup %9383  ;;  %v5904_v50 = vadd.f32 1.0, %v9382_v17  ;;  %v11856_v24 = vadd.f32 %v11714_v52, %v5761_v22  ;;  %v8395_v14 = vpop.f32.mrb[154].mxu0  ;;  %6328 = vmatmul.mubr.bf16.gmra.mrb[168].mxu0 %v6148_v21  ;;  %v6152_v31 = vpack.c.bf16 %v11848_v36, %v11845_v7  ;;  %v12529_v17 = vld [vmem:[#allocation22_spill] sm:$0xff] }
 0x62c   : > { %v9386_v55 = vpop.eup %9385  ;;  %9403 = vrcp.f32 %v5906_v18  ;;  %v5907_v26 = vadd.f32 1.0, %v9384_v8  ;;  %v7437_v48 = vmul.f32 -1.442695, %v11851_v35  ;;  %v11862_v16 = vadd.f32 %v8395_v14, %v11714_v52  ;;  %v5764_v2 = vpop.f32.mrb[155].mxu0  ;;  %6335 = vmatprep.mubr.bf16.mxu0 %v12528_v28  ;;  %v12530_v18 = vld [vmem:[#allocation23_spill] sm:$0xff] }
 0x62d   : > { %v9388_v9 = vpop.eup %9387  ;;  %9405 = vrcp.f32 %v5904_v50  ;;  %v5905_v44 = vadd.f32 1.0, %v9386_v55  ;;  %v7435_v38 = vmul.f32 -1.442695, %v11856_v24  ;;  %v11869_v1 = vadd.f32 %v11714_v52, %v5764_v2 }
 0x62e   : > { %v9390_v0 = vpop.eup %9389  ;;  %9407 = vrcp.f32 %v5907_v26  ;;  %v7438_v34 = vmul.f32 -1.442695, %v11862_v16  ;;  %v11874_v63 = vmul.f32 %v9388_v9, %v11765_v23  ;;  %v12531_v22 = vpack.c.bf16 %v12529_v17, %v12530_v18  ;;  %v12536_v17 = vld [vmem:[#allocation31_spill] sm:$0xff] }
 0x62f   : > { %v9392_v37 = vpop.eup %9391  ;;  %9409 = vrcp.f32 %v5905_v44  ;;  %v7436_v21 = vmul.f32 -1.442695, %v11869_v1  ;;  %v11880_v58 = vmul.f32 %v9390_v0, %v11768_v60  ;;  %v12532_v0 = vld [vmem:[#allocation25_spill] sm:$0xff] }
 0x630   : > { %v9394_v30 = vpop.eup %9393  ;;  %v11877_v42 = vmul.f32 %v9392_v37, %v11772_v45  ;;  %9411 = vpow2.f32 %v7437_v48 }
 0x631   : > { %v9396_v12 = vpop.eup %9395  ;;  %v11883_v6 = vmul.f32 %v9394_v30, %v11776_v49  ;;  %9413 = vpow2.f32 %v7435_v38  ;;  %v8398_v3 = vpop.f32.mrb[156].mxu0 }
 0x632   : > { %v9398_v27 = vpop.eup %9397  ;;  %v5910_v15 = vadd.f32 1.0, %v9396_v12  ;;  %9415 = vpow2.f32 %v7438_v34  ;;  %v11886_v10 = vadd.f32 %v8398_v3, %v11714_v52  ;;  %v5777_v23 = vpop.f32.mrb[157].mxu0  ;;  %v6158_v45 = vpack.c.bf16 %v11877_v42, %v11874_v63  ;;  %v12533_v34 = vld [vmem:[#allocation27_spill] sm:$0xff]  ;;  %v12551_v63 = vld [vmem:[#allocation50_spill] sm:$0xff] }
 0x633   : > { %v9400_v61 = vpop.eup %9399  ;;  %v5908_v5 = vadd.f32 1.0, %v9398_v27  ;;  %9417 = vpow2.f32 %v7436_v21  ;;  %v11891_v60 = vadd.f32 %v11714_v52, %v5777_v23  ;;  %v8399_v49 = vpop.f32.mrb[158].mxu0  ;;  %6336 = vmatmul.mubr.bf16.gmra.mrb[172].mxu0 %v6150_v62  ;;  %v6156_v11 = vpack.c.bf16 %v11883_v6, %v11880_v58  ;;  %v12541_v58 = vld [vmem:[#allocation39_spill] sm:$0xff]  ;;  %v12542_v6 = vld [vmem:[#allocation38_spill] sm:$0xff] }
 0x634   : > { %v9402_v59 = vpop.eup %9401  ;;  %9419 = vrcp.f32 %v5910_v15  ;;  %v5911_v33 = vadd.f32 1.0, %v9400_v61  ;;  %v7441_v47 = vmul.f32 -1.442695, %v11886_v10  ;;  %v11900_v57 = vadd.f32 %v8399_v49, %v11714_v52  ;;  %v5780_v46 = vpop.f32.mrb[159].mxu0  ;;  %6343 = vmatprep.mubr.bf16.mxu0 %v12531_v22 }
 0x635   : > { %9421 = vrcp.f32 %v5908_v5  ;;  %v5909_v8 = vadd.f32 1.0, %v9402_v59  ;;  %v7439_v43 = vmul.f32 -1.442695, %v11891_v60  ;;  %v11907_v41 = vadd.f32 %v11714_v52, %v5780_v46  ;;  %v12535_v46 = vld [vmem:[#allocation30_spill] sm:$0xff] }
 0x636   : > { %v9404_v62 = vpop.eup %9403  ;;  %9423 = vrcp.f32 %v5911_v33  ;;  %v7442_v50 = vmul.f32 -1.442695, %v11900_v57  ;;  %v12537_v18 = vpack.c.bf16 %v12535_v46, %v12536_v17 }
 0x637   : > { %v9406_v14 = vpop.eup %9405  ;;  %9425 = vrcp.f32 %v5909_v8  ;;  %v7440_v55 = vmul.f32 -1.442695, %v11907_v41  ;;  %v11912_v2 = vmul.f32 %v9404_v62, %v11791_v20 }
 0x638   : > { %v9408_v26 = vpop.eup %9407  ;;  %9427 = vpow2.f32 %v7441_v47  ;;  %v11918_v29 = vmul.f32 %v9406_v14, %v11794_v56  ;;  %v12534_v56 = vpack.c.bf16 %v12532_v0, %v12533_v34  ;;  %v12538_v14 = vld [vmem:[#allocation34_spill] sm:$0xff] }
 0x639   : > { %v9410_v48 = vpop.eup %9409  ;;  %v11915_v40 = vmul.f32 %v9408_v26, %v11798_v25  ;;  %9429 = vpow2.f32 %v7439_v43  ;;  %v12554_v34 = vld [vmem:[#allocation54_spill] sm:$0xff] }
 0x63a   : > { %v9412_v52 = vpop.eup %9411  ;;  %v11921_v28 = vmul.f32 %v9410_v48, %v11805_v13  ;;  %9431 = vpow2.f32 %v7442_v50 }
 0x63b   : > { %v9414_v9 = vpop.eup %9413  ;;  %v5914_v44 = vadd.f32 1.0, %v9412_v52  ;;  %9433 = vpow2.f32 %v7440_v55  ;;  %6344 = vmatmul.mubr.bf16.gmra.mrb[176].mxu0 %v6152_v31  ;;  %v6162_v20 = vpack.c.bf16 %v11915_v40, %v11912_v2  ;;  %v12539_v55 = vld [vmem:[#allocation35_spill] sm:$0xff] }
 0x63c   : > { %v9416_v25 = vpop.eup %9415  ;;  %v5912_v38 = vadd.f32 1.0, %v9414_v9  ;;  %6351 = vmatprep.mubr.bf16.mxu0 %v12534_v56  ;;  %v6160_v13 = vpack.c.bf16 %v11921_v28, %v11918_v29  ;;  %v12540_v26 = vpack.c.bf16 %v12538_v14, %v12539_v55 }
 0x63d   : > { %v9418_v37 = vpop.eup %9417  ;;  %9435 = vrcp.f32 %v5914_v44  ;;  %v5915_v21 = vadd.f32 1.0, %v9416_v25  ;;  %v12544_v25 = vld [vmem:[#allocation43_spill] sm:$0xff] }
 0x63e   : > { %v9420_v30 = vpop.eup %9419  ;;  %9437 = vrcp.f32 %v5912_v38  ;;  %v5913_v12 = vadd.f32 1.0, %v9418_v37  ;;  %v12545_v38 = vld [vmem:[#allocation41_spill] sm:$0xff]  ;;  %v12557_v37 = vld [vmem:[#allocation58_spill] sm:$0xff] }
 0x63f   : > { %v9422_v7 = vpop.eup %9421  ;;  %9439 = vrcp.f32 %v5915_v21  ;;  %v6006_v3 = vmul.f32 %v9420_v30, %v11820_v19  ;;  %v12560_v30 = vld [vmem:[#allocation62_spill] sm:$0xff] }
 0x640   : > { %v9424_v36 = vpop.eup %9423  ;;  %9441 = vrcp.f32 %v5913_v12  ;;  %v6004_v23 = vmul.f32 %v9422_v7, %v11823_v54  ;;  %v12562_v7 = vld [vmem:[#allocation67_spill] sm:$0xff] }
 0x641   : > { %v9426_v31 = vpop.eup %9425  ;;  %v6007_v27 = vmul.f32 %v9424_v36, %v11827_v51  ;;  %v12563_v36 = vld [vmem:[#allocation66_spill] sm:$0xff] }
 0x642   : > { %v9428_v15 = vpop.eup %9427  ;;  %v6005_v61 = vmul.f32 %v9426_v31, %v11834_v32  ;;  %v12564_v31 = vpack.c.bf16 %v12562_v7, %v12563_v36 }
 0x643   : > { %v9430_v5 = vpop.eup %9429  ;;  %v5918_v49 = vadd.f32 1.0, %v9428_v15  ;;  %6352 = vmatmul.mubr.bf16.gmra.mrb[180].mxu0 %v6154_v53  ;;  %v6166_v59 = vpack.c.bf16 %v6007_v27, %v6006_v3  ;;  %v11987_v27 = vld [vmem:[%s12177_s10] ss:$0 sm:$0xff] }
 0x644   : > { %v9432_v33 = vpop.eup %9431  ;;  %v5916_v47 = vadd.f32 1.0, %v9430_v5  ;;  %6359 = vmatprep.mubr.bf16.mxu0 %v12537_v18  ;;  %v6164_v19 = vpack.c.bf16 %v6005_v61, %v6004_v23 }
 0x645   : > { %v9434_v51 = vpop.eup %9433  ;;  %9443 = vrcp.f32 %v5918_v49  ;;  %v5919_v22 = vadd.f32 1.0, %v9432_v33 }
 0x646   : > { %9445 = vrcp.f32 %v5916_v47  ;;  %v5917_v54 = vadd.f32 1.0, %v9434_v51 }
 0x647   : > { %v9436_v32 = vpop.eup %9435  ;;  %9447 = vrcp.f32 %v5919_v22 }
 0x648   : > { %v9438_v8 = vpop.eup %9437  ;;  %9449 = vrcp.f32 %v5917_v54  ;;  %v6010_v39 = vmul.f32 %v9436_v32, %v11851_v35 }
 0x649   : > { %v9440_v43 = vpop.eup %9439  ;;  %v6008_v62 = vmul.f32 %v9438_v8, %v11856_v24 }
 0x64a   : > { %v9442_v4 = vpop.eup %9441  ;;  %v6011_v53 = vmul.f32 %v9440_v43, %v11862_v16 }
 0x64b   : > { %v6009_v50 = vmul.f32 %v9442_v4, %v11869_v1  ;;  %6360 = vmatmul.mubr.bf16.gmra.mrb[184].mxu0 %v6156_v11  ;;  %v12543_v11 = vpack.c.bf16 %v12541_v58, %v12542_v6 }
 0x64c   : > { %6367 = vmatprep.mubr.bf16.mxu0 %v12540_v26  ;;  %v6170_v48 = vpack.c.bf16 %v6011_v53, %v6010_v39 }
 0x64d   : > { %v6168_v2 = vpack.c.bf16 %v6009_v50, %v6008_v62 }
 0x64f   : > { %v9444_v40 = vpop.eup %9443 }
 0x650   : > { %v9446_v52 = vpop.eup %9445  ;;  %v6014_v16 = vmul.f32 %v9444_v40, %v11886_v10  ;;  %v12546_v10 = vpack.c.bf16 %v12544_v25, %v12545_v38 }
 0x651   : > { %v9448_v29 = vpop.eup %9447  ;;  %v6012_v1 = vmul.f32 %v9446_v52, %v11891_v60  ;;  %v12548_v60 = vld [vmem:[#allocation46_spill] sm:$0xff] }
 0x652   : > { %v9450_v35 = vpop.eup %9449  ;;  %v6015_v24 = vmul.f32 %v9448_v29, %v11900_v57  ;;  %v12547_v57 = vld [vmem:[#allocation47_spill] sm:$0xff] }
 0x653   : > { %v6013_v28 = vmul.f32 %v9450_v35, %v11907_v41  ;;  %6368 = vmatmul.mubr.bf16.gmra.mrb[188].mxu0 %v6158_v45  ;;  %v12549_v0 = vpack.c.bf16 %v12547_v57, %v12548_v60  ;;  %v12550_v41 = vld [vmem:[#allocation51_spill] sm:$0xff] }
 0x654   : > { %6375 = vmatprep.mubr.bf16.mxu0 %v12543_v11  ;;  %v6174_v9 = vpack.c.bf16 %v6015_v24, %v6014_v16  ;;  %v12552_v42 = vpack.c.bf16 %v12550_v41, %v12551_v63  ;;  %v12553_v45 = vld [vmem:[#allocation55_spill] sm:$0xff] }
 0x655   : > { %v6172_v44 = vpack.c.bf16 %v6013_v28, %v6012_v1  ;;  %v12555_v56 = vpack.c.bf16 %v12553_v45, %v12554_v34 }
 0x65b   : > { %6376 = vmatmul.mubr.bf16.gmra.mrb[192].mxu0 %v6160_v13  ;;  %v12556_v13 = vld [vmem:[#allocation59_spill] sm:$0xff] }
 0x65c   : > { %6383 = vmatprep.mubr.bf16.mxu0 %v12546_v10  ;;  %v12558_v21 = vpack.c.bf16 %v12556_v13, %v12557_v37 }
 0x663   : > { %6384 = vmatmul.mubr.bf16.gmra.mrb[196].mxu0 %v6162_v20  ;;  %v12559_v20 = vld [vmem:[#allocation63_spill] sm:$0xff] }
 0x664   : > { %6391 = vmatprep.mubr.bf16.mxu0 %v12549_v0  ;;  %v12561_v12 = vpack.c.bf16 %v12559_v20, %v12560_v30 }
 0x66b   : > { %6392 = vmatmul.mubr.bf16.gmra.mrb[200].mxu0 %v6164_v19 }
 0x66c   : > { %6399 = vmatprep.mubr.bf16.mxu0 %v12552_v42 }
 0x673   : > { %6400 = vmatmul.mubr.bf16.gmra.mrb[204].mxu0 %v6166_v59 }
 0x674   : > { %6407 = vmatprep.mubr.bf16.mxu0 %v12555_v56 }
 0x67b   : > { %6408 = vmatmul.mubr.bf16.gmra.mrb[208].mxu0 %v6168_v2 }
 0x67c   : > { %6415 = vmatprep.mubr.bf16.mxu0 %v12558_v21 }
 0x683   : > { %6416 = vmatmul.mubr.bf16.gmra.mrb[212].mxu0 %v6170_v48 }
 0x684   : > { %6423 = vmatprep.mubr.bf16.mxu0 %v12561_v12 }
 0x68b   : > { %6424 = vmatmul.mubr.bf16.gmra.mrb[216].mxu0 %v6172_v44 }
 0x68c   : > { %6431 = vmatprep.mubr.bf16.mxu0 %v12564_v31 }
 0x693   : > { %6432 = vmatmul.mubr.bf16.gmra.mrb[220].mxu0 %v6174_v9 }
 0x6ee   : > { %v7776_v3 = vpop.f32.mrb[160].mxu0 }
 0x6ef   : > { %v7777_v15 = vpop.f32.mrb[161].mxu0 }
 0x6f0   : > { %v7778_v23 = vadd.f32 %v7777_v15, %v7776_v3  ;;  %v7779_v61 = vpop.f32.mrb[162].mxu0 }
 0x6f1   : > { %v7780_v5 = vpop.f32.mrb[163].mxu0 }
 0x6f2   : > { %v6314_v49 = vadd.f32 %v7778_v23, %v11987_v27  ;;  %v7781_v59 = vadd.f32 %v7780_v5, %v7779_v61 }
 0x6f4   : > { %v7460_v33 = vmul.f32 -1.442695, %v6314_v49  ;;  %v6317_v47 = vadd.f32 %v7781_v59, %v11987_v27 }
 0x6f6   : > { %9451 = vpow2.f32 %v7460_v33  ;;  %v7461_v46 = vmul.f32 -1.442695, %v6317_v47  ;;  %v7782_v17 = vpop.f32.mrb[164].mxu0 }
 0x6f7   : > { %v7783_v18 = vpop.f32.mrb[165].mxu0 }
 0x6f8   : > { %9453 = vpow2.f32 %v7461_v46  ;;  %v7784_v19 = vadd.f32 %v7783_v18, %v7782_v17  ;;  %v7785_v51 = vpop.f32.mrb[166].mxu0 }
 0x6f9   : > { %v7786_v22 = vpop.f32.mrb[167].mxu0 }
 0x6fa   : > { %v11992_v54 = vadd.f32 %v7784_v19, %v11987_v27  ;;  %v7787_v32 = vadd.f32 %v7786_v22, %v7785_v51 }
 0x6fc   : > { %v7462_v8 = vmul.f32 -1.442695, %v11992_v54  ;;  %v11996_v43 = vadd.f32 %v7787_v32, %v11987_v27 }
 0x6fe   : > { %9455 = vpow2.f32 %v7462_v8  ;;  %v7463_v4 = vmul.f32 -1.442695, %v11996_v43  ;;  %v7788_v39 = vpop.f32.mrb[168].mxu0 }
 0x6ff   : > { %v7789_v53 = vpop.f32.mrb[169].mxu0 }
 0x700   : > { %v9452_v62 = vpop.eup %9451  ;;  %9457 = vpow2.f32 %v7463_v4  ;;  %v7790_v50 = vadd.f32 %v7789_v53, %v7788_v39  ;;  %v7791_v14 = vpop.f32.mrb[170].mxu0 }
 0x701   : > { %v6536_v55 = vadd.f32 1.0, %v9452_v62  ;;  %v7792_v26 = vpop.f32.mrb[171].mxu0 }
 0x702   : > { %v9454_v48 = vpop.eup %9453  ;;  %v12000_v2 = vadd.f32 %v7790_v50, %v11987_v27  ;;  %v7793_v40 = vadd.f32 %v7792_v26, %v7791_v14 }
 0x703   : > { %9459 = vrcp.f32 %v6536_v55  ;;  %v6537_v52 = vadd.f32 1.0, %v9454_v48 }
 0x704   : > { %v7464_v29 = vmul.f32 -1.442695, %v12000_v2  ;;  %v12004_v35 = vadd.f32 %v7793_v40, %v11987_v27 }
 0x705   : > { %9461 = vrcp.f32 %v6537_v52 }
 0x706   : > { %9463 = vpow2.f32 %v7464_v29  ;;  %v7465_v16 = vmul.f32 -1.442695, %v12004_v35  ;;  %v7794_v24 = vpop.f32.mrb[172].mxu0 }
 0x707   : > { %v7795_v1 = vpop.f32.mrb[173].mxu0 }
 0x708   : > { %v9456_v28 = vpop.eup %9455  ;;  %9465 = vpow2.f32 %v7465_v16  ;;  %v7796_v58 = vadd.f32 %v7795_v1, %v7794_v24  ;;  %v7797_v6 = vpop.f32.mrb[174].mxu0 }
 0x709   : > { %v6538_v11 = vadd.f32 1.0, %v9456_v28  ;;  %v7798_v9 = vpop.f32.mrb[175].mxu0 }
 0x70a   : > { %v9458_v44 = vpop.eup %9457  ;;  %v12008_v25 = vadd.f32 %v7796_v58, %v11987_v27  ;;  %v7799_v38 = vadd.f32 %v7798_v9, %v7797_v6 }
 0x70b   : > { %9467 = vrcp.f32 %v6538_v11  ;;  %v6539_v10 = vadd.f32 1.0, %v9458_v44 }
 0x70c   : > { %v7466_v57 = vmul.f32 -1.442695, %v12008_v25  ;;  %v12012_v60 = vadd.f32 %v7799_v38, %v11987_v27 }
 0x70d   : > { %v9460_v0 = vpop.eup %9459  ;;  %9469 = vrcp.f32 %v6539_v10 }
 0x70e   : > { %v6632_v41 = vmul.f32 %v9460_v0, %v6314_v49  ;;  %9471 = vpow2.f32 %v7466_v57  ;;  %v7467_v63 = vmul.f32 -1.442695, %v12012_v60  ;;  %v7800_v42 = vpop.f32.mrb[176].mxu0 }
 0x70f   : > { %v9462_v45 = vpop.eup %9461  ;;  %v7801_v34 = vpop.f32.mrb[177].mxu0 }
 0x710   : > { %v9464_v56 = vpop.eup %9463  ;;  %6664 = vst [vmem:[%s12019_s15] sm:$0xff] %v6632_v41  ;;  %v6633_v13 = vmul.f32 %v9462_v45, %v6317_v47  ;;  %9473 = vpow2.f32 %v7467_v63  ;;  %v7802_v37 = vadd.f32 %v7801_v34, %v7800_v42  ;;  %v7803_v21 = vpop.f32.mrb[178].mxu0 }
 0x711   : > { %v6540_v20 = vadd.f32 1.0, %v9464_v56  ;;  %v7804_v30 = vpop.f32.mrb[179].mxu0 }
 0x712   : > { %v9466_v12 = vpop.eup %9465  ;;  %6665 = vst [vmem:[%s12019_s15 + $0x8] sm:$0xff] %v6633_v13  ;;  %v12025_v7 = vadd.f32 %v7802_v37, %v11987_v27  ;;  %v7805_v36 = vadd.f32 %v7804_v30, %v7803_v21 }
 0x713   : > { %9475 = vrcp.f32 %v6540_v20  ;;  %v6541_v31 = vadd.f32 1.0, %v9466_v12 }
 0x714   : > { %v7468_v3 = vmul.f32 -1.442695, %v12025_v7  ;;  %v12029_v15 = vadd.f32 %v7805_v36, %v11987_v27 }
 0x715   : > { %v9468_v23 = vpop.eup %9467  ;;  %9477 = vrcp.f32 %v6541_v31 }
 0x716   : > { %v6634_v61 = vmul.f32 %v9468_v23, %v11992_v54  ;;  %9479 = vpow2.f32 %v7468_v3  ;;  %v7469_v5 = vmul.f32 -1.442695, %v12029_v15  ;;  %v7806_v49 = vpop.f32.mrb[180].mxu0 }
 0x717   : > { %v9470_v59 = vpop.eup %9469  ;;  %v7807_v33 = vpop.f32.mrb[181].mxu0 }
 0x718   : > { %v9472_v47 = vpop.eup %9471  ;;  %6666 = vst [vmem:[%s12019_s15 + $0x10] sm:$0xff] %v6634_v61  ;;  %v6635_v46 = vmul.f32 %v9470_v59, %v11996_v43  ;;  %9481 = vpow2.f32 %v7469_v5  ;;  %v7808_v17 = vadd.f32 %v7807_v33, %v7806_v49  ;;  %v7809_v18 = vpop.f32.mrb[182].mxu0 }
 0x719   : > { %v6542_v19 = vadd.f32 1.0, %v9472_v47  ;;  %v7810_v51 = vpop.f32.mrb[183].mxu0 }
 0x71a   : > { %v9474_v22 = vpop.eup %9473  ;;  %6667 = vst [vmem:[%s12019_s15 + $0x18] sm:$0xff] %v6635_v46  ;;  %v12037_v54 = vadd.f32 %v7808_v17, %v11987_v27  ;;  %v7811_v32 = vadd.f32 %v7810_v51, %v7809_v18 }
 0x71b   : > { %9483 = vrcp.f32 %v6542_v19  ;;  %v6543_v8 = vadd.f32 1.0, %v9474_v22 }
 0x71c   : > { %v7470_v4 = vmul.f32 -1.442695, %v12037_v54  ;;  %v12041_v39 = vadd.f32 %v7811_v32, %v11987_v27 }
 0x71d   : > { %v9476_v43 = vpop.eup %9475  ;;  %9485 = vrcp.f32 %v6543_v8 }
 0x71e   : > { %v6636_v53 = vmul.f32 %v9476_v43, %v12000_v2  ;;  %9487 = vpow2.f32 %v7470_v4  ;;  %v7471_v62 = vmul.f32 -1.442695, %v12041_v39  ;;  %v7812_v50 = vpop.f32.mrb[184].mxu0 }
 0x71f   : > { %v9478_v14 = vpop.eup %9477  ;;  %v7813_v55 = vpop.f32.mrb[185].mxu0 }
 0x720   : > { %v9480_v26 = vpop.eup %9479  ;;  %6668 = vst [vmem:[%s12019_s15 + $0x20] sm:$0xff] %v6636_v53  ;;  %v6637_v48 = vmul.f32 %v9478_v14, %v12004_v35  ;;  %9489 = vpow2.f32 %v7471_v62  ;;  %v7814_v40 = vadd.f32 %v7813_v55, %v7812_v50  ;;  %v7815_v52 = vpop.f32.mrb[186].mxu0 }
 0x721   : > { %v6544_v29 = vadd.f32 1.0, %v9480_v26  ;;  %v7816_v16 = vpop.f32.mrb[187].mxu0 }
 0x722   : > { %v9482_v24 = vpop.eup %9481  ;;  %6669 = vst [vmem:[%s12019_s15 + $0x28] sm:$0xff] %v6637_v48  ;;  %v12049_v2 = vadd.f32 %v7814_v40, %v11987_v27  ;;  %v7817_v1 = vadd.f32 %v7816_v16, %v7815_v52 }
 0x723   : > { %9491 = vrcp.f32 %v6544_v29  ;;  %v6545_v28 = vadd.f32 1.0, %v9482_v24 }
 0x724   : > { %v7472_v58 = vmul.f32 -1.442695, %v12049_v2  ;;  %v12053_v6 = vadd.f32 %v7817_v1, %v11987_v27 }
 0x725   : > { %v9484_v35 = vpop.eup %9483  ;;  %9493 = vrcp.f32 %v6545_v28 }
 0x726   : > { %v6638_v11 = vmul.f32 %v9484_v35, %v12008_v25  ;;  %9495 = vpow2.f32 %v7472_v58  ;;  %v7473_v9 = vmul.f32 -1.442695, %v12053_v6  ;;  %v7818_v44 = vpop.f32.mrb[188].mxu0 }
 0x727   : > { %v9486_v38 = vpop.eup %9485  ;;  %v7819_v10 = vpop.f32.mrb[189].mxu0 }
 0x728   : > { %v9488_v57 = vpop.eup %9487  ;;  %6670 = vst [vmem:[%s12019_s15 + $0x30] sm:$0xff] %v6638_v11  ;;  %v6639_v0 = vmul.f32 %v9486_v38, %v12012_v60  ;;  %9497 = vpow2.f32 %v7473_v9  ;;  %v7820_v41 = vadd.f32 %v7819_v10, %v7818_v44  ;;  %v7821_v63 = vpop.f32.mrb[190].mxu0 }
 0x729   : > { %v6546_v42 = vadd.f32 1.0, %v9488_v57  ;;  %v7822_v45 = vpop.f32.mrb[191].mxu0 }
 0x72a   : > { %v9490_v34 = vpop.eup %9489  ;;  %6671 = vst [vmem:[%s12019_s15 + $0x38] sm:$0xff] %v6639_v0  ;;  %v12061_v25 = vadd.f32 %v7820_v41, %v11987_v27  ;;  %v7823_v56 = vadd.f32 %v7822_v45, %v7821_v63 }
 0x72b   : > { %9499 = vrcp.f32 %v6546_v42  ;;  %v6547_v13 = vadd.f32 1.0, %v9490_v34 }
 0x72c   : > { %v7474_v37 = vmul.f32 -1.442695, %v12061_v25  ;;  %v12065_v21 = vadd.f32 %v7823_v56, %v11987_v27 }
 0x72d   : > { %v9492_v60 = vpop.eup %9491  ;;  %9501 = vrcp.f32 %v6547_v13 }
 0x72e   : > { %v6640_v20 = vmul.f32 %v9492_v60, %v12025_v7  ;;  %9503 = vpow2.f32 %v7474_v37  ;;  %v7475_v30 = vmul.f32 -1.442695, %v12065_v21  ;;  %v7824_v12 = vpop.f32.mrb[192].mxu0 }
 0x72f   : > { %v9494_v36 = vpop.eup %9493  ;;  %v7825_v31 = vpop.f32.mrb[193].mxu0 }
 0x730   : > { %v9496_v3 = vpop.eup %9495  ;;  %6672 = vst [vmem:[%s12019_s15 + $0x40] sm:$0xff] %v6640_v20  ;;  %v6641_v23 = vmul.f32 %v9494_v36, %v12029_v15  ;;  %9505 = vpow2.f32 %v7475_v30  ;;  %v7826_v61 = vadd.f32 %v7825_v31, %v7824_v12  ;;  %v7827_v5 = vpop.f32.mrb[194].mxu0 }
 0x731   : > { %v6548_v49 = vadd.f32 1.0, %v9496_v3  ;;  %v7828_v59 = vpop.f32.mrb[195].mxu0 }
 0x732   : > { %v9498_v33 = vpop.eup %9497  ;;  %6673 = vst [vmem:[%s12019_s15 + $0x48] sm:$0xff] %v6641_v23  ;;  %v12073_v7 = vadd.f32 %v7826_v61, %v11987_v27  ;;  %v7829_v47 = vadd.f32 %v7828_v59, %v7827_v5 }
 0x733   : > { %9507 = vrcp.f32 %v6548_v49  ;;  %v6549_v46 = vadd.f32 1.0, %v9498_v33 }
 0x734   : > { %v7476_v17 = vmul.f32 -1.442695, %v12073_v7  ;;  %v12077_v18 = vadd.f32 %v7829_v47, %v11987_v27 }
 0x735   : > { %v9500_v15 = vpop.eup %9499  ;;  %9509 = vrcp.f32 %v6549_v46 }
 0x736   : > { %v6642_v19 = vmul.f32 %v9500_v15, %v12037_v54  ;;  %9511 = vpow2.f32 %v7476_v17  ;;  %v7477_v51 = vmul.f32 -1.442695, %v12077_v18  ;;  %v7830_v22 = vpop.f32.mrb[196].mxu0 }
 0x737   : > { %v9502_v32 = vpop.eup %9501  ;;  %v7831_v8 = vpop.f32.mrb[197].mxu0 }
 0x738   : > { %v9504_v4 = vpop.eup %9503  ;;  %6674 = vst [vmem:[%s12019_s15 + $0x50] sm:$0xff] %v6642_v19  ;;  %v6643_v43 = vmul.f32 %v9502_v32, %v12041_v39  ;;  %9513 = vpow2.f32 %v7477_v51  ;;  %v7832_v53 = vadd.f32 %v7831_v8, %v7830_v22  ;;  %v7833_v62 = vpop.f32.mrb[198].mxu0 }
 0x739   : > { %v6550_v50 = vadd.f32 1.0, %v9504_v4  ;;  %v7834_v14 = vpop.f32.mrb[199].mxu0 }
 0x73a   : > { %v9506_v55 = vpop.eup %9505  ;;  %6675 = vst [vmem:[%s12019_s15 + $0x58] sm:$0xff] %v6643_v43  ;;  %v12085_v54 = vadd.f32 %v7832_v53, %v11987_v27  ;;  %v7835_v26 = vadd.f32 %v7834_v14, %v7833_v62 }
 0x73b   : > { %9515 = vrcp.f32 %v6550_v50  ;;  %v6551_v48 = vadd.f32 1.0, %v9506_v55 }
 0x73c   : > { %v7478_v40 = vmul.f32 -1.442695, %v12085_v54  ;;  %v12089_v52 = vadd.f32 %v7835_v26, %v11987_v27 }
 0x73d   : > { %v9508_v39 = vpop.eup %9507  ;;  %9517 = vrcp.f32 %v6551_v48 }
 0x73e   : > { %v6644_v29 = vmul.f32 %v9508_v39, %v12049_v2  ;;  %9519 = vpow2.f32 %v7478_v40  ;;  %v7479_v16 = vmul.f32 -1.442695, %v12089_v52  ;;  %v7836_v24 = vpop.f32.mrb[200].mxu0 }
 0x73f   : > { %v9510_v1 = vpop.eup %9509  ;;  %v7837_v28 = vpop.f32.mrb[201].mxu0 }
 0x740   : > { %v9512_v58 = vpop.eup %9511  ;;  %6676 = vst [vmem:[%s12019_s15 + $0x60] sm:$0xff] %v6644_v29  ;;  %v6645_v35 = vmul.f32 %v9510_v1, %v12053_v6  ;;  %9521 = vpow2.f32 %v7479_v16  ;;  %v7838_v11 = vadd.f32 %v7837_v28, %v7836_v24  ;;  %v7839_v9 = vpop.f32.mrb[202].mxu0 }
 0x741   : > { %v6552_v44 = vadd.f32 1.0, %v9512_v58  ;;  %v7840_v38 = vpop.f32.mrb[203].mxu0 }
 0x742   : > { %v9514_v10 = vpop.eup %9513  ;;  %6677 = vst [vmem:[%s12019_s15 + $0x68] sm:$0xff] %v6645_v35  ;;  %v12097_v2 = vadd.f32 %v7838_v11, %v11987_v27  ;;  %v7841_v57 = vadd.f32 %v7840_v38, %v7839_v9 }
 0x743   : > { %9523 = vrcp.f32 %v6552_v44  ;;  %v6553_v0 = vadd.f32 1.0, %v9514_v10 }
 0x744   : > { %v7480_v41 = vmul.f32 -1.442695, %v12097_v2  ;;  %v12101_v63 = vadd.f32 %v7841_v57, %v11987_v27 }
 0x745   : > { %v9516_v6 = vpop.eup %9515  ;;  %9525 = vrcp.f32 %v6553_v0 }
 0x746   : > { %v6646_v42 = vmul.f32 %v9516_v6, %v12061_v25  ;;  %9527 = vpow2.f32 %v7480_v41  ;;  %v7481_v45 = vmul.f32 -1.442695, %v12101_v63  ;;  %v7842_v34 = vpop.f32.mrb[204].mxu0 }
 0x747   : > { %v9518_v56 = vpop.eup %9517  ;;  %v7843_v13 = vpop.f32.mrb[205].mxu0 }
 0x748   : > { %v9520_v37 = vpop.eup %9519  ;;  %6678 = vst [vmem:[%s12019_s15 + $0x70] sm:$0xff] %v6646_v42  ;;  %v6647_v60 = vmul.f32 %v9518_v56, %v12065_v21  ;;  %9529 = vpow2.f32 %v7481_v45  ;;  %v7844_v20 = vadd.f32 %v7843_v13, %v7842_v34  ;;  %v7845_v30 = vpop.f32.mrb[206].mxu0 }
 0x749   : > { %v6554_v12 = vadd.f32 1.0, %v9520_v37  ;;  %v7846_v36 = vpop.f32.mrb[207].mxu0 }
 0x74a   : > { %v9522_v31 = vpop.eup %9521  ;;  %6679 = vst [vmem:[%s12019_s15 + $0x78] sm:$0xff] %v6647_v60  ;;  %v12109_v25 = vadd.f32 %v7844_v20, %v11987_v27  ;;  %v7847_v3 = vadd.f32 %v7846_v36, %v7845_v30 }
 0x74b   : > { %9531 = vrcp.f32 %v6554_v12  ;;  %v6555_v23 = vadd.f32 1.0, %v9522_v31 }
 0x74c   : > { %v7482_v61 = vmul.f32 -1.442695, %v12109_v25  ;;  %v12113_v5 = vadd.f32 %v7847_v3, %v11987_v27 }
 0x74d   : > { %v9524_v21 = vpop.eup %9523  ;;  %9533 = vrcp.f32 %v6555_v23 }
 0x74e   : > { %v6648_v49 = vmul.f32 %v9524_v21, %v12073_v7  ;;  %9535 = vpow2.f32 %v7482_v61  ;;  %v7483_v59 = vmul.f32 -1.442695, %v12113_v5  ;;  %v7848_v33 = vpop.f32.mrb[208].mxu0 }
 0x74f   : > { %v9526_v47 = vpop.eup %9525  ;;  %v7849_v46 = vpop.f32.mrb[209].mxu0 }
 0x750   : > { %v9528_v17 = vpop.eup %9527  ;;  %6680 = vst [vmem:[%s12019_s15 + $0x80] sm:$0xff] %v6648_v49  ;;  %v6649_v15 = vmul.f32 %v9526_v47, %v12077_v18  ;;  %9537 = vpow2.f32 %v7483_v59  ;;  %v7850_v19 = vadd.f32 %v7849_v46, %v7848_v33  ;;  %v7851_v51 = vpop.f32.mrb[210].mxu0 }
 0x751   : > { %v6556_v22 = vadd.f32 1.0, %v9528_v17  ;;  %v7852_v32 = vpop.f32.mrb[211].mxu0 }
 0x752   : > { %v9530_v8 = vpop.eup %9529  ;;  %6681 = vst [vmem:[%s12019_s15 + $0x88] sm:$0xff] %v6649_v15  ;;  %v12121_v7 = vadd.f32 %v7850_v19, %v11987_v27  ;;  %v7853_v4 = vadd.f32 %v7852_v32, %v7851_v51 }
 0x753   : > { %9539 = vrcp.f32 %v6556_v22  ;;  %v6557_v43 = vadd.f32 1.0, %v9530_v8 }
 0x754   : > { %v7484_v53 = vmul.f32 -1.442695, %v12121_v7  ;;  %v12125_v62 = vadd.f32 %v7853_v4, %v11987_v27 }
 0x755   : > { %v9532_v18 = vpop.eup %9531  ;;  %9541 = vrcp.f32 %v6557_v43 }
 0x756   : > { %v6650_v50 = vmul.f32 %v9532_v18, %v12085_v54  ;;  %9543 = vpow2.f32 %v7484_v53  ;;  %v7485_v14 = vmul.f32 -1.442695, %v12125_v62  ;;  %v7854_v55 = vpop.f32.mrb[212].mxu0 }
 0x757   : > { %v9534_v26 = vpop.eup %9533  ;;  %v7855_v48 = vpop.f32.mrb[213].mxu0 }
 0x758   : > { %v9536_v40 = vpop.eup %9535  ;;  %6682 = vst [vmem:[%s12019_s15 + $0x90] sm:$0xff] %v6650_v50  ;;  %v6651_v39 = vmul.f32 %v9534_v26, %v12089_v52  ;;  %9545 = vpow2.f32 %v7485_v14  ;;  %v7856_v29 = vadd.f32 %v7855_v48, %v7854_v55  ;;  %v7857_v16 = vpop.f32.mrb[214].mxu0 }
 0x759   : > { %v6558_v24 = vadd.f32 1.0, %v9536_v40  ;;  %v7858_v1 = vpop.f32.mrb[215].mxu0 }
 0x75a   : > { %v9538_v28 = vpop.eup %9537  ;;  %6683 = vst [vmem:[%s12019_s15 + $0x98] sm:$0xff] %v6651_v39  ;;  %v12133_v54 = vadd.f32 %v7856_v29, %v11987_v27  ;;  %v7859_v58 = vadd.f32 %v7858_v1, %v7857_v16 }
 0x75b   : > { %9547 = vrcp.f32 %v6558_v24  ;;  %v6559_v35 = vadd.f32 1.0, %v9538_v28 }
 0x75c   : > { %v7486_v11 = vmul.f32 -1.442695, %v12133_v54  ;;  %v12137_v9 = vadd.f32 %v7859_v58, %v11987_v27 }
 0x75d   : > { %v9540_v52 = vpop.eup %9539  ;;  %9549 = vrcp.f32 %v6559_v35 }
 0x75e   : > { %v6652_v44 = vmul.f32 %v9540_v52, %v12097_v2  ;;  %9551 = vpow2.f32 %v7486_v11  ;;  %v7487_v38 = vmul.f32 -1.442695, %v12137_v9  ;;  %v7860_v10 = vpop.f32.mrb[216].mxu0 }
 0x75f   : > { %v9542_v57 = vpop.eup %9541  ;;  %v7861_v0 = vpop.f32.mrb[217].mxu0 }
 0x760   : > { %v9544_v41 = vpop.eup %9543  ;;  %6684 = vst [vmem:[%s12019_s15 + $0xa0] sm:$0xff] %v6652_v44  ;;  %v6653_v6 = vmul.f32 %v9542_v57, %v12101_v63  ;;  %9553 = vpow2.f32 %v7487_v38  ;;  %v7862_v42 = vadd.f32 %v7861_v0, %v7860_v10  ;;  %v7863_v45 = vpop.f32.mrb[218].mxu0 }
 0x761   : > { %v6560_v34 = vadd.f32 1.0, %v9544_v41  ;;  %v7864_v56 = vpop.f32.mrb[219].mxu0 }
 0x762   : > { %v9546_v13 = vpop.eup %9545  ;;  %6685 = vst [vmem:[%s12019_s15 + $0xa8] sm:$0xff] %v6653_v6  ;;  %v6426_v2 = vadd.f32 %v7862_v42, %v11987_v27  ;;  %v7865_v37 = vadd.f32 %v7864_v56, %v7863_v45 }
 0x763   : > { %9555 = vrcp.f32 %v6560_v34  ;;  %v6561_v60 = vadd.f32 1.0, %v9546_v13 }
 0x764   : > { %v7488_v20 = vmul.f32 -1.442695, %v6426_v2  ;;  %v6429_v30 = vadd.f32 %v7865_v37, %v11987_v27 }
 0x765   : > { %v9548_v12 = vpop.eup %9547  ;;  %9557 = vrcp.f32 %v6561_v60 }
 0x766   : > { %v6654_v63 = vmul.f32 %v9548_v12, %v12109_v25  ;;  %9559 = vpow2.f32 %v7488_v20  ;;  %v7489_v36 = vmul.f32 -1.442695, %v6429_v30  ;;  %v7866_v31 = vpop.f32.mrb[220].mxu0 }
 0x767   : > { %v9550_v3 = vpop.eup %9549  ;;  %v7867_v23 = vpop.f32.mrb[221].mxu0 }
 0x768   : > { %v9552_v61 = vpop.eup %9551  ;;  %6686 = vst [vmem:[%s12019_s15 + $0xb0] sm:$0xff] %v6654_v63  ;;  %v6655_v21 = vmul.f32 %v9550_v3, %v12113_v5  ;;  %9561 = vpow2.f32 %v7489_v36  ;;  %v7868_v49 = vadd.f32 %v7867_v23, %v7866_v31  ;;  %v7869_v59 = vpop.f32.mrb[222].mxu0 }
 0x769   : > { %v6562_v33 = vadd.f32 1.0, %v9552_v61  ;;  %v7870_v47 = vpop.f32.mrb[223].mxu0 }
 0x76a   : > { %v9554_v46 = vpop.eup %9553  ;;  %6687 = vst [vmem:[%s12019_s15 + $0xb8] sm:$0xff] %v6655_v21  ;;  %v6434_v17 = vadd.f32 %v7868_v49, %v11987_v27  ;;  %v7871_v25 = vadd.f32 %v7870_v47, %v7869_v59 }
 0x76b   : > { %9563 = vrcp.f32 %v6562_v33  ;;  %v6563_v15 = vadd.f32 1.0, %v9554_v46 }
 0x76c   : > { %v7490_v19 = vmul.f32 -1.442695, %v6434_v17  ;;  %v6437_v51 = vadd.f32 %v7871_v25, %v11987_v27 }
 0x76d   : > { %v9556_v22 = vpop.eup %9555  ;;  %9565 = vrcp.f32 %v6563_v15 }
 0x76e   : > { %v6656_v5 = vmul.f32 %v9556_v22, %v12121_v7  ;;  %9567 = vpow2.f32 %v7490_v19  ;;  %v7491_v32 = vmul.f32 -1.442695, %v6437_v51 }
 0x76f   : > { %v9558_v8 = vpop.eup %9557 }
 0x770   : > { %v9560_v4 = vpop.eup %9559  ;;  %6688 = vst [vmem:[%s12019_s15 + $0xc0] sm:$0xff] %v6656_v5  ;;  %v6657_v43 = vmul.f32 %v9558_v8, %v12125_v62  ;;  %9569 = vpow2.f32 %v7491_v32 }
 0x771   : > { %v6564_v53 = vadd.f32 1.0, %v9560_v4 }
 0x772   : > { %v9562_v18 = vpop.eup %9561  ;;  %6689 = vst [vmem:[%s12019_s15 + $0xc8] sm:$0xff] %v6657_v43 }
 0x773   : > { %9571 = vrcp.f32 %v6564_v53  ;;  %v6565_v50 = vadd.f32 1.0, %v9562_v18 }
 0x775   : > { %v9564_v27 = vpop.eup %9563  ;;  %9573 = vrcp.f32 %v6565_v50 }
 0x776   : > { %v6658_v7 = vmul.f32 %v9564_v27, %v12133_v54 }
 0x777   : > { %v9566_v14 = vpop.eup %9565 }
 0x778   : > { %v9568_v55 = vpop.eup %9567  ;;  %6690 = vst [vmem:[%s12019_s15 + $0xd0] sm:$0xff] %v6658_v7  ;;  %v6659_v26 = vmul.f32 %v9566_v14, %v12137_v9 }
 0x779   : > { %v6566_v62 = vadd.f32 1.0, %v9568_v55 }
 0x77a   : > { %v9570_v48 = vpop.eup %9569  ;;  %6691 = vst [vmem:[%s12019_s15 + $0xd8] sm:$0xff] %v6659_v26 }
 0x77b   : > { %9575 = vrcp.f32 %v6566_v62  ;;  %v6567_v40 = vadd.f32 1.0, %v9570_v48 }
 0x77d   : > { %v9572_v39 = vpop.eup %9571  ;;  %9577 = vrcp.f32 %v6567_v40 }
 0x77e   : > { %v6660_v29 = vmul.f32 %v9572_v39, %v6426_v2 }
 0x77f   : > { %v9574_v16 = vpop.eup %9573 }
 0x780   : > { %6692 = vst [vmem:[%s12019_s15 + $0xe0] sm:$0xff] %v6660_v29  ;;  %v6661_v24 = vmul.f32 %v9574_v16, %v6429_v30 }
 0x782   : > { %6693 = vst [vmem:[%s12019_s15 + $0xe8] sm:$0xff] %v6661_v24 }
 0x785   : > { %v9576_v1 = vpop.eup %9575 }
 0x786   : > { %v6662_v28 = vmul.f32 %v9576_v1, %v6434_v17 }
 0x787   : > { %v9578_v54 = vpop.eup %9577 }
 0x788   : > { %6694 = vst [vmem:[%s12019_s15 + $0xf0] sm:$0xff] %v6662_v28  ;;  %v6663_v58 = vmul.f32 %v9578_v54, %v6437_v51 }
 0x78a   : > { %6695 = vst [vmem:[%s12019_s15 + $0xf8] sm:$0xff] %v6663_v58 }
 0x78b PF: > { %s21_s17 = sadd.s32 1, %s9586_s17  }
 0x78c   : > { %p18_p4 = scmp.ge.s32.totalorder %s21_s17, 4  }
 0x78e   :  { %20 = sbr.rel (!%p18_p4) target bundleno = 1 (0x1), region = 102 }

// kernel: bottleneck_csp.1
= control target key start
LH: loop header
LB: loop body
LE: loop exit
PB: predicated region body
PF: predicated region fallthrough
CT: control target
= control target key end

     0   :  { %s9651_s17 = smov 0   ;;  %s12167_s0 = inlined_call_operand.vmem [shape: f32[2,256,128], index: 0, kind: input, shape index: {}]   ;;  %s12168_s1 = inlined_call_operand.vmem [shape: bf16[128,256], index: 1, kind: input, shape index: {}]   ;;  %s12169_s2 = inlined_call_operand.vmem [shape: f32[1,256], index: 2, kind: input, shape index: {}]   ;;  %s12170_s3 = inlined_call_operand.vmem [shape: bf16[128,128], index: 3, kind: input, shape index: {}]   ;;  %s12171_s4 = inlined_call_operand.vmem [shape: f32[1,128], index: 4, kind: input, shape index: {}]   ;;  %s12172_s5 = inlined_call_operand.vmem [shape: bf16[3,3,128,128], index: 5, kind: input, shape index: {}]   ;;  %s12173_s6 = inlined_call_operand.vmem [shape: f32[1,128], index: 6, kind: input, shape index: {}]   ;;  %s12174_s7 = inlined_call_operand.vmem [shape: bf16[128,128], index: 7, kind: input, shape index: {}]   ;;  %s12175_s8 = inlined_call_operand.vmem [shape: f32[1,128], index: 8, kind: input, shape index: {}]   ;;  %s12176_s9 = inlined_call_operand.vmem [shape: bf16[256,128], index: 9, kind: input, shape index: {}]   ;;  %s12177_s10 = inlined_call_operand.vmem [shape: f32[1,128], index: 10, kind: input, shape index: {}]   ;;  %s12178_s11 = inlined_call_operand.vmem [shape: f32[2,256,128], index: 11, kind: output, shape index: {}]  }
   0x1 LB: > { %s6751_s18 = sadd.s32 4294967295, %s9586_s17   ;;  %p6755_p0 = scmp.ge.s32.totalorder %s9586_s17, 1  ;;  %s9586_s17 = sphi %s9651_s17, %s21_s17  }
   0x2   : > { %p337_p1 = scmp.lt.s32.totalorder %s9586_s17, 3 }
   0x4   : > { %p338_p2 = pnand %p6755_p0, %p337_p1 }
   0x6   : > { %341 = sbr.rel (%p338_p2) target bundleno = 1931 (0x78b), region = 64 }
   0xd   : > { %v8683_v0 = vld [vmem:[%s12168_s1 + $0x4] ss:$8 sps:$4 sm:$0xff]   ;;  %v8685_v1 = vld [vmem:[%s12168_s1] ss:$8 sps:$4 sm:$0xff]   ;;  %v9588_v2 = vmov 0   ;;  %p377_p3 = scmp.lt.s32.totalorder %s6751_s18, 1 }
   0xe   : > { %576 = vmatprep.mubr.bf16.mxu0 %v9588_v2  ;;  %544 = vmatprep.subr.bf16.mxu0 %v8683_v0  ;;  %v8686_v3 = vld [vmem:[%s12168_s1 + $0x14] ss:$8 sps:$4 sm:$0xff]   ;;  %v8688_v4 = vld [vmem:[%s12168_s1 + $0x10] ss:$8 sps:$4 sm:$0xff]   ;;  %v8689_v5 = vld [vmem:[%s12168_s1 + $0x24] ss:$8 sps:$4 sm:$0xff]  }
   0xf   : > { %545 = vmatpush1.bf16.msra.mxu0 %v8685_v1  ;;  %v8691_v6 = vld [vmem:[%s12168_s1 + $0x20] ss:$8 sps:$4 sm:$0xff]   ;;  %v8692_v7 = vld [vmem:[%s12168_s1 + $0x34] ss:$8 sps:$4 sm:$0xff]   ;;  %v8694_v8 = vld [vmem:[%s12168_s1 + $0x30] ss:$8 sps:$4 sm:$0xff]  }
  0x10   : > { %546 = vmatprep.subr.bf16.mxu0 %v8686_v3  ;;  %v8695_v9 = vld [vmem:[%s12168_s1 + $0x44] ss:$8 sps:$4 sm:$0xff]   ;;  %v8697_v10 = vld [vmem:[%s12168_s1 + $0x40] ss:$8 sps:$4 sm:$0xff]   ;;  %v8698_v11 = vld [vmem:[%s12168_s1 + $0x54] ss:$8 sps:$4 sm:$0xff]  }
  0x11   : > { %s12566_s18 = smov (!%p377_p3, %s6751_s18), 1  ;;  %v8700_v12 = vld [vmem:[%s12168_s1 + $0x50] ss:$8 sps:$4 sm:$0xff]   ;;  %v8701_v13 = vld [vmem:[%s12168_s1 + $0x64] ss:$8 sps:$4 sm:$0xff]   ;;  %vm9590_vm1 = vmmov 1  }
  0x12   : > { %s7494_s28 = sshll.u32 %s12566_s18, 8  ;;  %v8703_v14 = vld [vmem:[%s12168_s1 + $0x60] ss:$8 sps:$4 sm:$0xff]   ;;  %v8704_v15 = vld [vmem:[%s12168_s1 + $0x74] ss:$8 sps:$4 sm:$0xff]  }
  0x13   : > { %547 = vmatpush1.bf16.msra.mxu0 %v8688_v4  ;;  %s9713_s16 = scalar_lea.vmem %s12167_s0, %s7494_s28  ;;  %v8706_v16 = vld [vmem:[%s12168_s1 + $0x70] ss:$8 sps:$4 sm:$0xff]   ;;  %v8707_v19 = vld [vmem:[%s12170_s3] sm:$0xff]   ;;  %v8708_v21 = vld [vmem:[%s12170_s3 + $0x8] sm:$0xff]   ;;  %s12019_s15 = scalar_lea.vmem %s12178_s11, %s7494_s28 }
  0x14   : > { %548 = vmatprep.subr.bf16.mxu0 %v8689_v5  ;;  %v388_v17 = vld [vmem:[%s9713_s16] sm:$0xff]  ;;  %v389_v18 = vld [vmem:[%s9713_s16 + $0x8] sm:$0xff]  ;;  %v390_v22 = vld [vmem:[%s9713_s16 + $0x10] sm:$0xff] }
  0x15   : > { %v436_v20 = vpack.c.bf16 %v389_v18, %v388_v17  ;;  %v391_v23 = vld [vmem:[%s9713_s16 + $0x18] sm:$0xff]  ;;  %v392_v25 = vld [vmem:[%s9713_s16 + $0x20] sm:$0xff]  ;;  %v393_v26 = vld [vmem:[%s9713_s16 + $0x28] sm:$0xff] }
  0x16   : > { %v437_v24 = vpack.c.bf16 %v391_v23, %v390_v22  ;;  %v438_v27 = vpack.c.bf16 %v393_v26, %v392_v25  ;;  %v394_v28 = vld [vmem:[%s9713_s16 + $0x30] sm:$0xff]  ;;  %v395_v29 = vld [vmem:[%s9713_s16 + $0x38] sm:$0xff]  ;;  %v396_v31 = vld [vmem:[%s9713_s16 + $0x40] sm:$0xff] }
  0x17   : > { %549 = vmatpush1.bf16.msra.mxu0 %v8691_v6  ;;  %v439_v30 = vpack.c.bf16 %v395_v29, %v394_v28  ;;  %v397_v32 = vld [vmem:[%s9713_s16 + $0x48] sm:$0xff]  ;;  %v398_v34 = vld [vmem:[%s9713_s16 + $0x50] sm:$0xff]  ;;  %v399_v35 = vld [vmem:[%s9713_s16 + $0x58] sm:$0xff] }
  0x18   : > { %550 = vmatprep.subr.bf16.mxu0 %v8692_v7  ;;  %v440_v33 = vpack.c.bf16 %v397_v32, %v396_v31  ;;  %v441_v36 = vpack.c.bf16 %v399_v35, %v398_v34  ;;  %v400_v37 = vld [vmem:[%s9713_s16 + $0x60] sm:$0xff]  ;;  %v401_v38 = vld [vmem:[%s9713_s16 + $0x68] sm:$0xff]  ;;  %v402_v40 = vld [vmem:[%s9713_s16 + $0x70] sm:$0xff] }
  0x19   : > { %v442_v39 = vpack.c.bf16 %v401_v38, %v400_v37  ;;  %v403_v41 = vld [vmem:[%s9713_s16 + $0x78] sm:$0xff]  ;;  %v404_v43 = vld [vmem:[%s9713_s16 + $0x80] sm:$0xff]  ;;  %v405_v44 = vld [vmem:[%s9713_s16 + $0x88] sm:$0xff] }
  0x1a   : > { %v443_v42 = vpack.c.bf16 %v403_v41, %v402_v40  ;;  %v444_v45 = vpack.c.bf16 %v405_v44, %v404_v43  ;;  %v406_v46 = vld [vmem:[%s9713_s16 + $0x90] sm:$0xff]  ;;  %v407_v47 = vld [vmem:[%s9713_s16 + $0x98] sm:$0xff]  ;;  %v408_v49 = vld [vmem:[%s9713_s16 + $0xa0] sm:$0xff] }
  0x1b   : > { %551 = vmatpush1.bf16.msra.mxu0 %v8694_v8  ;;  %v445_v48 = vpack.c.bf16 %v407_v47, %v406_v46  ;;  %v409_v50 = vld [vmem:[%s9713_s16 + $0xa8] sm:$0xff]  ;;  %v410_v52 = vld [vmem:[%s9713_s16 + $0xb0] sm:$0xff]  ;;  %v411_v53 = vld [vmem:[%s9713_s16 + $0xb8] sm:$0xff] }
  0x1c   : > { %552 = vmatprep.subr.bf16.mxu0 %v8695_v9  ;;  %v446_v51 = vpack.c.bf16 %v409_v50, %v408_v49  ;;  %v447_v54 = vpack.c.bf16 %v411_v53, %v410_v52  ;;  %v412_v55 = vld [vmem:[%s9713_s16 + $0xc0] sm:$0xff]  ;;  %v413_v56 = vld [vmem:[%s9713_s16 + $0xc8] sm:$0xff]  ;;  %v414_v58 = vld [vmem:[%s9713_s16 + $0xd0] sm:$0xff]  ;;  %v454_v9 = vlaneseq }
  0x1d   : > { %v448_v57 = vpack.c.bf16 %v413_v56, %v412_v55  ;;  %v415_v59 = vld [vmem:[%s9713_s16 + $0xd8] sm:$0xff]  ;;  %v8709_v61 = vld [vmem:[%s12170_s3 + $0x10] sm:$0xff]   ;;  %v416_v62 = vld [vmem:[%s9713_s16 + $0xe0] sm:$0xff] }
  0x1e   : > { %v449_v60 = vpack.c.bf16 %v415_v59, %v414_v58  ;;  %v417_v63 = vld [vmem:[%s9713_s16 + $0xe8] sm:$0xff]  ;;  %v8710_v0 = vld [vmem:[%s12170_s3 + $0x18] sm:$0xff]   ;;  %v8711_v3 = vld [vmem:[%s12170_s3 + $0x20] sm:$0xff]  }
  0x1f   : > { %553 = vmatpush1.bf16.msra.mxu0 %v8697_v10  ;;  %v450_v1 = vpack.c.bf16 %v417_v63, %v416_v62  ;;  %v418_v4 = vld [vmem:[%s9713_s16 + $0xf0] sm:$0xff]  ;;  %v419_v5 = vld [vmem:[%s9713_s16 + $0xf8] sm:$0xff]  ;;  %v8712_v6 = vld [vmem:[%s12170_s3 + $0x28] sm:$0xff]   ;;  %v9789_v10 = vshrl.u32 %v454_v9, 7 }
  0x20   : > { %554 = vmatprep.subr.bf16.mxu0 %v8698_v11  ;;  %v451_v7 = vpack.c.bf16 %v419_v5, %v418_v4  ;;  %v8713_v8 = vld [vmem:[%s12170_s3 + $0x30] sm:$0xff]  }
  0x21   : > { %v456_v11 = vsub.s32 0, %v9789_v10 }
  0x23   : > { %555 = vmatpush1.bf16.msra.mxu0 %v8700_v12  ;;  %v452_v12 = vld [vmem:[%s12169_s2] sm:$0x3] }
  0x24   : > { %556 = vmatprep.subr.bf16.mxu0 %v8701_v13  ;;  %v460_v13 = vsub.s32 1, %v9789_v10 }
  0x27   : > { %557 = vmatpush1.bf16.msra.mxu0 %v8703_v14  ;;  %v9796_v14 = vrot.slane %v452_v12, %v456_v11 }
  0x28   : > { %558 = vmatprep.subr.bf16.mxu0 %v8704_v15  ;;  %v9798_v15 = vrot.slane %v452_v12, %v460_v13 }
  0x2b   : > { %559 = vmatpush1.bf16.msra.mxu0 %v8706_v16 }
  0x2c   : > { %7872 = vmatprep.subr.bf16.mxu0 %v8707_v19 }
  0x2e   : > { %577 = vmatmul.mubr.bf16.vlgmr.msra.gmra.mrb[0].mxu0 %v436_v20 }
  0x2f   : > { %586 = vmatprep.mubr.bf16.mxu0 %v9588_v2  ;;  %7873 = vmatpush3.bf16.msra.mxu0 %v8707_v19 }
  0x30   : > { %7874 = vmatprep.subr.bf16.mxu0 %v8708_v21 }
  0x33   : > { %7875 = vmatpush3.bf16.msra.mxu0 %v8708_v21 }
  0x34   : > { %7876 = vmatprep.subr.bf16.mxu0 %v8709_v61 }
  0x36   : > { %587 = vmatmul.mubr.bf16.gmra.mrb[4].mxu0 %v437_v24 }
  0x37   : > { %596 = vmatprep.mubr.bf16.mxu0 %v9588_v2  ;;  %7877 = vmatpush3.bf16.msra.mxu0 %v8709_v61 }
  0x38   : > { %7878 = vmatprep.subr.bf16.mxu0 %v8710_v0 }
  0x3b   : > { %7879 = vmatpush3.bf16.msra.mxu0 %v8710_v0 }
  0x3c   : > { %7880 = vmatprep.subr.bf16.mxu0 %v8711_v3 }
  0x3e   : > { %597 = vmatmul.mubr.bf16.gmra.mrb[8].mxu0 %v438_v27 }
  0x3f   : > { %606 = vmatprep.mubr.bf16.mxu0 %v9588_v2  ;;  %7881 = vmatpush3.bf16.msra.mxu0 %v8711_v3 }
  0x40   : > { %7882 = vmatprep.subr.bf16.mxu0 %v8712_v6 }
  0x43   : > { %7883 = vmatpush3.bf16.msra.mxu0 %v8712_v6 }
  0x44   : > { %7884 = vmatprep.subr.bf16.mxu0 %v8713_v8 }
  0x46   : > { %607 = vmatmul.mubr.bf16.gmra.mrb[12].mxu0 %v439_v30 }
  0x47   : > { %616 = vmatprep.mubr.bf16.mxu0 %v9588_v2  ;;  %7885 = vmatpush3.bf16.msra.mxu0 %v8713_v8 }
  0x4e   : > { %617 = vmatmul.mubr.bf16.gmra.mrb[16].mxu0 %v440_v33 }
  0x4f   : > { %626 = vmatprep.mubr.bf16.mxu0 %v9588_v2 }
  0x56   : > { %627 = vmatmul.mubr.bf16.gmra.mrb[20].mxu0 %v441_v36 }
  0x57   : > { %636 = vmatprep.mubr.bf16.mxu0 %v9588_v2 }
  0x5e   : > { %637 = vmatmul.mubr.bf16.gmra.mrb[24].mxu0 %v442_v39 }
  0x5f   : > { %646 = vmatprep.mubr.bf16.mxu0 %v9588_v2 }
  0x66   : > { %647 = vmatmul.mubr.bf16.gmra.mrb[28].mxu0 %v443_v42 }
  0x67   : > { %656 = vmatprep.mubr.bf16.mxu0 %v9588_v2 }
  0x6e   : > { %657 = vmatmul.mubr.bf16.gmra.mrb[32].mxu0 %v444_v45 }
  0x6f   : > { %666 = vmatprep.mubr.bf16.mxu0 %v9588_v2 }
  0x76   : > { %667 = vmatmul.mubr.bf16.gmra.mrb[36].mxu0 %v445_v48 }
  0x77   : > { %676 = vmatprep.mubr.bf16.mxu0 %v9588_v2 }
  0x7e   : > { %677 = vmatmul.mubr.bf16.gmra.mrb[40].mxu0 %v446_v51 }
  0x7f   : > { %686 = vmatprep.mubr.bf16.mxu0 %v9588_v2 }
  0x86   : > { %687 = vmatmul.mubr.bf16.gmra.mrb[44].mxu0 %v447_v54 }
  0x87   : > { %696 = vmatprep.mubr.bf16.mxu0 %v9588_v2 }
  0x8e   : > { %697 = vmatmul.mubr.bf16.gmra.mrb[48].mxu0 %v448_v57 }
  0x8f   : > { %706 = vmatprep.mubr.bf16.mxu0 %v9588_v2 }
  0x96   : > { %707 = vmatmul.mubr.bf16.gmra.mrb[52].mxu0 %v449_v60 }
  0x97   : > { %716 = vmatprep.mubr.bf16.mxu0 %v9588_v2 }
  0x9e   : > { %717 = vmatmul.mubr.bf16.gmra.mrb[56].mxu0 %v450_v1 }
  0x9f   : > { %726 = vmatprep.mubr.bf16.mxu0 %v9588_v2  ;;  %v8714_v2 = vld [vmem:[%s12170_s3 + $0x38] sm:$0xff]  }
  0xa0   : > { %7886 = vmatprep.subr.bf16.mxu0 %v8714_v2 }
  0xa1   : > { %7887 = vmatpush3.bf16.msra.mxu0 %v8714_v2 }
  0xa6   : > { %727 = vmatmul.mubr.bf16.gmra.mrb[60].mxu0 %v451_v7 }
 0x101   : > { %v578_v16 = vpop.f32.mrb[0].mxu0 }
 0x102   : > { %v9801_v17 = vadd.f32 %v578_v16, %v9796_v14  ;;  %v580_v18 = vpop.f32.mrb[1].mxu0 }
 0x103   : > { %v9804_v19 = vadd.f32 %v580_v18, %v9798_v15  ;;  %v582_v20 = vpop.f32.mrb[2].mxu0 }
 0x104   : > { %v6776_v21 = vmul.f32 -1.442695, %v9801_v17  ;;  %v9808_v22 = vadd.f32 %v582_v20, %v9796_v14  ;;  %v584_v23 = vpop.f32.mrb[3].mxu0 }
 0x105   : > { %v6777_v24 = vmul.f32 -1.442695, %v9804_v19  ;;  %v9812_v25 = vadd.f32 %v584_v23, %v9798_v15 }
 0x106   : > { %8811 = vpow2.f32 %v6776_v21  ;;  %v6778_v26 = vmul.f32 -1.442695, %v9808_v22 }
 0x107   : > { %8813 = vpow2.f32 %v6777_v24  ;;  %v6779_v27 = vmul.f32 -1.442695, %v9812_v25 }
 0x108   : > { %8815 = vpow2.f32 %v6778_v26 }
 0x109   : > { %8817 = vpow2.f32 %v6779_v27  ;;  %v588_v28 = vpop.f32.mrb[4].mxu0 }
 0x10a   : > { %v9817_v29 = vadd.f32 %v588_v28, %v9796_v14  ;;  %v590_v30 = vpop.f32.mrb[5].mxu0 }
 0x10b   : > { %v9820_v31 = vadd.f32 %v590_v30, %v9798_v15  ;;  %v592_v32 = vpop.f32.mrb[6].mxu0 }
 0x10c   : > { %v6780_v33 = vmul.f32 -1.442695, %v9817_v29  ;;  %v9824_v34 = vadd.f32 %v592_v32, %v9796_v14  ;;  %v594_v35 = vpop.f32.mrb[7].mxu0 }
 0x10d   : > { %v6781_v36 = vmul.f32 -1.442695, %v9820_v31  ;;  %v9828_v37 = vadd.f32 %v594_v35, %v9798_v15 }
 0x10e   : > { %8819 = vpow2.f32 %v6780_v33  ;;  %v6782_v38 = vmul.f32 -1.442695, %v9824_v34 }
 0x10f   : > { %8821 = vpow2.f32 %v6781_v36  ;;  %v6783_v39 = vmul.f32 -1.442695, %v9828_v37 }
 0x110   : > { %v8812_v40 = vpop.eup %8811  ;;  %8823 = vpow2.f32 %v6782_v38 }
 0x111   : > { %v8814_v41 = vpop.eup %8813  ;;  %v929_v42 = vadd.f32 1.0, %v8812_v40  ;;  %8825 = vpow2.f32 %v6783_v39  ;;  %v598_v43 = vpop.f32.mrb[8].mxu0 }
 0x112   : > { %v8816_v44 = vpop.eup %8815  ;;  %v930_v45 = vadd.f32 1.0, %v8814_v41  ;;  %v9833_v46 = vadd.f32 %v598_v43, %v9796_v14  ;;  %v600_v47 = vpop.f32.mrb[9].mxu0 }
 0x113   : > { %v8818_v48 = vpop.eup %8817  ;;  %8827 = vrcp.f32 %v929_v42  ;;  %v931_v49 = vadd.f32 1.0, %v8816_v44  ;;  %v9836_v50 = vadd.f32 %v600_v47, %v9798_v15  ;;  %v602_v51 = vpop.f32.mrb[10].mxu0 }
 0x114   : > { %8829 = vrcp.f32 %v930_v45  ;;  %v932_v52 = vadd.f32 1.0, %v8818_v48  ;;  %v6784_v53 = vmul.f32 -1.442695, %v9833_v46  ;;  %v9840_v54 = vadd.f32 %v602_v51, %v9796_v14  ;;  %v604_v55 = vpop.f32.mrb[11].mxu0 }
 0x115   : > { %8831 = vrcp.f32 %v931_v49  ;;  %v6785_v56 = vmul.f32 -1.442695, %v9836_v50  ;;  %v9844_v57 = vadd.f32 %v604_v55, %v9798_v15 }
 0x116   : > { %8833 = vrcp.f32 %v932_v52  ;;  %v6786_v58 = vmul.f32 -1.442695, %v9840_v54 }
 0x117   : > { %8835 = vpow2.f32 %v6784_v53  ;;  %v6787_v59 = vmul.f32 -1.442695, %v9844_v57 }
 0x118   : > { %v8820_v60 = vpop.eup %8819  ;;  %8837 = vpow2.f32 %v6785_v56 }
 0x119   : > { %v8822_v61 = vpop.eup %8821  ;;  %v933_v62 = vadd.f32 1.0, %v8820_v60  ;;  %8839 = vpow2.f32 %v6786_v58  ;;  %v608_v63 = vpop.f32.mrb[12].mxu0 }
 0x11a   : > { %v8824_v0 = vpop.eup %8823  ;;  %v934_v1 = vadd.f32 1.0, %v8822_v61  ;;  %8841 = vpow2.f32 %v6787_v59  ;;  %v9849_v3 = vadd.f32 %v608_v63, %v9796_v14  ;;  %v610_v4 = vpop.f32.mrb[13].mxu0 }
 0x11b   : > { %v8826_v5 = vpop.eup %8825  ;;  %8843 = vrcp.f32 %v933_v62  ;;  %v935_v6 = vadd.f32 1.0, %v8824_v0  ;;  %v9852_v7 = vadd.f32 %v610_v4, %v9798_v15  ;;  %v612_v8 = vpop.f32.mrb[14].mxu0 }
 0x11c   : > { %8845 = vrcp.f32 %v934_v1  ;;  %v936_v2 = vadd.f32 1.0, %v8826_v5  ;;  %v6788_v9 = vmul.f32 -1.442695, %v9849_v3  ;;  %v9856_v11 = vadd.f32 %v612_v8, %v9796_v14  ;;  %v614_v12 = vpop.f32.mrb[15].mxu0 }
 0x11d   : > { %v8828_v13 = vpop.eup %8827  ;;  %8847 = vrcp.f32 %v935_v6  ;;  %v6789_v16 = vmul.f32 -1.442695, %v9852_v7  ;;  %v9860_v18 = vadd.f32 %v614_v12, %v9798_v15 }
 0x11e   : > { %v8830_v20 = vpop.eup %8829  ;;  %8849 = vrcp.f32 %v936_v2  ;;  %v6790_v21 = vmul.f32 -1.442695, %v9856_v11  ;;  %v9865_v27 = vmul.f32 %v8828_v13, %v9801_v17 }
 0x11f   : > { %v8832_v23 = vpop.eup %8831  ;;  %8851 = vpow2.f32 %v6788_v9  ;;  %v6791_v24 = vmul.f32 -1.442695, %v9860_v18  ;;  %v9871_v32 = vmul.f32 %v8830_v20, %v9804_v19 }
 0x120   : > { %v8834_v26 = vpop.eup %8833  ;;  %12287 = vst [vmem:[#allocation4_spill] sm:$0xff] %v9865_v27  ;;  %v9868_v28 = vmul.f32 %v8832_v23, %v9808_v22  ;;  %8853 = vpow2.f32 %v6789_v16 }
 0x121   : > { %v8836_v30 = vpop.eup %8835  ;;  %12289 = vst [vmem:[#allocation6_spill] sm:$0xff] %v9871_v32  ;;  %v9874_v33 = vmul.f32 %v8834_v26, %v9812_v25  ;;  %8855 = vpow2.f32 %v6790_v21  ;;  %v618_v35 = vpop.f32.mrb[16].mxu0 }
 0x122   : > { %12288 = vst [vmem:[#allocation5_spill] sm:$0xff] %v9868_v28  ;;  %v8838_v36 = vpop.eup %8837  ;;  %v937_v38 = vadd.f32 1.0, %v8836_v30  ;;  %8857 = vpow2.f32 %v6791_v24  ;;  %v9877_v39 = vadd.f32 %v618_v35, %v9796_v14  ;;  %v620_v17 = vpop.f32.mrb[17].mxu0  ;;  %v1297_v22 = vpack.c.bf16 %v9868_v28, %v9865_v27 }
 0x123   : > { %12290 = vst [vmem:[#allocation7_spill] sm:$0xff] %v9874_v33  ;;  %v8840_v40 = vpop.eup %8839  ;;  %v938_v41 = vadd.f32 1.0, %v8838_v36  ;;  %v9882_v19 = vadd.f32 %v620_v17, %v9798_v15  ;;  %v622_v42 = vpop.f32.mrb[18].mxu0 }
 0x124   : > { %v8842_v43 = vpop.eup %8841  ;;  %8859 = vrcp.f32 %v937_v38  ;;  %v939_v44 = vadd.f32 1.0, %v8840_v40  ;;  %v6792_v45 = vmul.f32 -1.442695, %v9877_v39  ;;  %v9888_v47 = vadd.f32 %v622_v42, %v9796_v14  ;;  %v624_v48 = vpop.f32.mrb[19].mxu0  ;;  %7888 = vmatprep.mubr.bf16.mxu0 %v1297_v22 }
 0x125   : > { %v8844_v49 = vpop.eup %8843  ;;  %8861 = vrcp.f32 %v938_v41  ;;  %v940_v51 = vadd.f32 1.0, %v8842_v43  ;;  %v6793_v52 = vmul.f32 -1.442695, %v9882_v19  ;;  %v9892_v53 = vadd.f32 %v624_v48, %v9798_v15 }
 0x126   : > { %v8846_v55 = vpop.eup %8845  ;;  %8863 = vrcp.f32 %v939_v44  ;;  %v6794_v56 = vmul.f32 -1.442695, %v9888_v47  ;;  %v9897_v61 = vmul.f32 %v8844_v49, %v9817_v29 }
 0x127   : > { %v8848_v58 = vpop.eup %8847  ;;  %8865 = vrcp.f32 %v940_v51  ;;  %v6795_v59 = vmul.f32 -1.442695, %v9892_v53  ;;  %v9903_v0 = vmul.f32 %v8846_v55, %v9820_v31 }
 0x128   : > { %v8850_v60 = vpop.eup %8849  ;;  %12291 = vst [vmem:[#allocation8_spill] sm:$0xff] %v9897_v61  ;;  %v9900_v62 = vmul.f32 %v8848_v58, %v9824_v34  ;;  %8867 = vpow2.f32 %v6792_v45 }
 0x129   : > { %v8852_v63 = vpop.eup %8851  ;;  %12293 = vst [vmem:[#allocation10_spill] sm:$0xff] %v9903_v0  ;;  %v9906_v1 = vmul.f32 %v8850_v60, %v9828_v37  ;;  %8869 = vpow2.f32 %v6793_v52  ;;  %v628_v4 = vpop.f32.mrb[20].mxu0 }
 0x12a   : > { %12292 = vst [vmem:[#allocation9_spill] sm:$0xff] %v9900_v62  ;;  %v8854_v5 = vpop.eup %8853  ;;  %v1298_v6 = vpack.c.bf16 %v9900_v62, %v9897_v61  ;;  %v941_v8 = vadd.f32 1.0, %v8852_v63  ;;  %8871 = vpow2.f32 %v6794_v56  ;;  %v9911_v29 = vadd.f32 %v628_v4, %v9796_v14  ;;  %v630_v34 = vpop.f32.mrb[21].mxu0 }
 0x12b   : > { %12294 = vst [vmem:[#allocation11_spill] sm:$0xff] %v9906_v1  ;;  %v8856_v2 = vpop.eup %8855  ;;  %v942_v9 = vadd.f32 1.0, %v8854_v5  ;;  %8873 = vpow2.f32 %v6795_v59  ;;  %v9914_v31 = vadd.f32 %v630_v34, %v9798_v15  ;;  %v632_v37 = vpop.f32.mrb[22].mxu0 }
 0x12c   : > { %v8858_v13 = vpop.eup %8857  ;;  %8875 = vrcp.f32 %v941_v8  ;;  %v943_v16 = vadd.f32 1.0, %v8856_v2  ;;  %v6796_v20 = vmul.f32 -1.442695, %v9911_v29  ;;  %v9920_v21 = vadd.f32 %v632_v37, %v9796_v14  ;;  %v634_v23 = vpop.f32.mrb[23].mxu0  ;;  %7889 = vmatmul.mubr.bf16.vlgmr.msra.gmra.mrb[64].mxu0 %v1298_v6 }
 0x12d   : > { %8877 = vrcp.f32 %v942_v9  ;;  %v944_v24 = vadd.f32 1.0, %v8858_v13  ;;  %v6797_v26 = vmul.f32 -1.442695, %v9914_v31  ;;  %v9924_v30 = vadd.f32 %v634_v23, %v9798_v15 }
 0x12e   : > { %v8860_v35 = vpop.eup %8859  ;;  %8879 = vrcp.f32 %v943_v16  ;;  %v6798_v36 = vmul.f32 -1.442695, %v9920_v21 }
 0x12f   : > { %v8862_v38 = vpop.eup %8861  ;;  %8881 = vrcp.f32 %v944_v24  ;;  %v6799_v17 = vmul.f32 -1.442695, %v9924_v30  ;;  %v9929_v41 = vmul.f32 %v8860_v35, %v9833_v46 }
 0x130   : > { %v8864_v22 = vpop.eup %8863  ;;  %8883 = vpow2.f32 %v6796_v20  ;;  %v9935_v45 = vmul.f32 %v8862_v38, %v9836_v50 }
 0x131   : > { %v8866_v40 = vpop.eup %8865  ;;  %12295 = vst [vmem:[#allocation12_spill] sm:$0xff] %v9929_v41  ;;  %v9932_v42 = vmul.f32 %v8864_v22, %v9840_v54  ;;  %8885 = vpow2.f32 %v6797_v26  ;;  %v638_v43 = vpop.f32.mrb[24].mxu0 }
 0x132   : > { %v8868_v44 = vpop.eup %8867  ;;  %12297 = vst [vmem:[#allocation14_spill] sm:$0xff] %v9935_v45  ;;  %v9938_v48 = vmul.f32 %v8866_v40, %v9844_v57  ;;  %8887 = vpow2.f32 %v6798_v36  ;;  %v9941_v49 = vadd.f32 %v638_v43, %v9796_v14  ;;  %v640_v51 = vpop.f32.mrb[25].mxu0 }
 0x133   : > { %12296 = vst [vmem:[#allocation13_spill] sm:$0xff] %v9932_v42  ;;  %v8870_v52 = vpop.eup %8869  ;;  %v945_v46 = vadd.f32 1.0, %v8868_v44  ;;  %8889 = vpow2.f32 %v6799_v17  ;;  %v9944_v54 = vadd.f32 %v640_v51, %v9798_v15  ;;  %v642_v55 = vpop.f32.mrb[26].mxu0  ;;  %v1299_v56 = vpack.c.bf16 %v9932_v42, %v9929_v41 }
 0x134   : > { %12298 = vst [vmem:[#allocation15_spill] sm:$0xff] %v9938_v48  ;;  %v8872_v50 = vpop.eup %8871  ;;  %v946_v58 = vadd.f32 1.0, %v8870_v52  ;;  %v9949_v57 = vadd.f32 %v642_v55, %v9796_v14  ;;  %v644_v59 = vpop.f32.mrb[27].mxu0  ;;  %v6800_v5 = vmul.f32 -1.442695, %v9941_v49 }
 0x135   : > { %v8874_v63 = vpop.eup %8873  ;;  %8891 = vrcp.f32 %v945_v46  ;;  %v947_v4 = vadd.f32 1.0, %v8872_v50  ;;  %v9955_v6 = vadd.f32 %v644_v59, %v9798_v15  ;;  %7892 = vmatprep.mubr.bf16.mxu0 %v1299_v56  ;;  %v6801_v2 = vmul.f32 -1.442695, %v9944_v54 }
 0x136   : > { %v8876_v8 = vpop.eup %8875  ;;  %8893 = vrcp.f32 %v946_v58  ;;  %v948_v34 = vadd.f32 1.0, %v8874_v63  ;;  %v6802_v37 = vmul.f32 -1.442695, %v9949_v57 }
 0x137   : > { %v8878_v9 = vpop.eup %8877  ;;  %8895 = vrcp.f32 %v947_v4  ;;  %v6803_v16 = vmul.f32 -1.442695, %v9955_v6  ;;  %v9961_v23 = vmul.f32 %v8876_v8, %v9849_v3 }
 0x138   : > { %v8880_v13 = vpop.eup %8879  ;;  %8897 = vrcp.f32 %v948_v34  ;;  %v9978_v51 = vmul.f32 %v8878_v9, %v9852_v7 }
 0x139   : > { %v8882_v20 = vpop.eup %8881  ;;  %12299 = vst [vmem:[#allocation16_spill] sm:$0xff] %v9961_v23  ;;  %v9964_v24 = vmul.f32 %v8880_v13, %v9856_v11  ;;  %8899 = vpow2.f32 %v6800_v5  ;;  %v648_v26 = vpop.f32.mrb[28].mxu0 }
 0x13a   : > { %v8884_v35 = vpop.eup %8883  ;;  %v9967_v36 = vmul.f32 %v8882_v20, %v9860_v18  ;;  %8901 = vpow2.f32 %v6801_v2  ;;  %v9970_v38 = vadd.f32 %v648_v26, %v9796_v14  ;;  %v650_v17 = vpop.f32.mrb[29].mxu0  ;;  %12302 = vst [vmem:[#allocation19_spill] sm:$0xff] %v9978_v51 }
 0x13b   : > { %12300 = vst [vmem:[#allocation17_spill] sm:$0xff] %v9964_v24  ;;  %v8886_v22 = vpop.eup %8885  ;;  %v949_v40 = vadd.f32 1.0, %v8884_v35  ;;  %8903 = vpow2.f32 %v6802_v37  ;;  %v9973_v3 = vadd.f32 %v650_v17, %v9798_v15  ;;  %v652_v43 = vpop.f32.mrb[30].mxu0  ;;  %v1300_v11 = vpack.c.bf16 %v9964_v24, %v9961_v23 }
 0x13c   : > { %12301 = vst [vmem:[#allocation18_spill] sm:$0xff] %v9967_v36  ;;  %v8888_v44 = vpop.eup %8887  ;;  %v950_v18 = vadd.f32 1.0, %v8886_v22  ;;  %8905 = vpow2.f32 %v6803_v16  ;;  %v9981_v52 = vadd.f32 %v652_v43, %v9796_v14  ;;  %v654_v46 = vpop.f32.mrb[31].mxu0  ;;  %v6804_v50 = vmul.f32 -1.442695, %v9970_v38 }
 0x13d   : > { %v8890_v55 = vpop.eup %8889  ;;  %8907 = vrcp.f32 %v949_v40  ;;  %v951_v56 = vadd.f32 1.0, %v8888_v44  ;;  %v9985_v58 = vadd.f32 %v654_v46, %v9798_v15  ;;  %7893 = vmatmul.mubr.bf16.gmra.mrb[68].mxu0 %v1300_v11  ;;  %v6805_v7 = vmul.f32 -1.442695, %v9973_v3 }
 0x13e   : > { %8909 = vrcp.f32 %v950_v18  ;;  %v952_v59 = vadd.f32 1.0, %v8890_v55  ;;  %v6806_v5 = vmul.f32 -1.442695, %v9981_v52 }
 0x13f   : > { %v8892_v4 = vpop.eup %8891  ;;  %8911 = vrcp.f32 %v951_v56  ;;  %v6807_v34 = vmul.f32 -1.442695, %v9985_v58 }
 0x140   : > { %v8894_v8 = vpop.eup %8893  ;;  %8913 = vrcp.f32 %v952_v59  ;;  %v9999_v35 = vmul.f32 %v8892_v4, %v9877_v39 }
 0x141   : > { %v8896_v2 = vpop.eup %8895  ;;  %8915 = vpow2.f32 %v6804_v50  ;;  %v658_v9 = vpop.f32.mrb[32].mxu0 }
 0x142   : > { %v8898_v37 = vpop.eup %8897  ;;  %v9993_v13 = vmul.f32 %v8896_v2, %v9888_v47  ;;  %8917 = vpow2.f32 %v6805_v7  ;;  %v9996_v16 = vadd.f32 %v658_v9, %v9796_v14  ;;  %v660_v20 = vpop.f32.mrb[33].mxu0  ;;  %12304 = vst [vmem:[#allocation21_spill] sm:$0xff] %v9999_v35  ;;  %v10008_v47 = vmul.f32 %v8894_v8, %v9882_v19 }
 0x143   : > { %v8900_v26 = vpop.eup %8899  ;;  %v10002_v17 = vmul.f32 %v8898_v37, %v9892_v53  ;;  %8919 = vpow2.f32 %v6806_v5  ;;  %v10005_v22 = vadd.f32 %v660_v20, %v9798_v15  ;;  %v662_v40 = vpop.f32.mrb[34].mxu0 }
 0x144   : > { %12303 = vst [vmem:[#allocation20_spill] sm:$0xff] %v9993_v13  ;;  %v8902_v43 = vpop.eup %8901  ;;  %12306 = vst [vmem:[#allocation23_spill] sm:$0xff] %v10008_v47  ;;  %v953_v11 = vadd.f32 1.0, %v8900_v26  ;;  %8921 = vpow2.f32 %v6807_v34  ;;  %v10011_v44 = vadd.f32 %v662_v40, %v9796_v14  ;;  %v664_v18 = vpop.f32.mrb[35].mxu0  ;;  %v1301_v55 = vpack.c.bf16 %v9993_v13, %v9999_v35 }
 0x145   : > { %12305 = vst [vmem:[#allocation22_spill] sm:$0xff] %v10002_v17  ;;  %v8904_v39 = vpop.eup %8903  ;;  %v954_v46 = vadd.f32 1.0, %v8902_v43  ;;  %v10014_v53 = vadd.f32 %v664_v18, %v9798_v15  ;;  %v6808_v19 = vmul.f32 -1.442695, %v9996_v16  ;;  %v6809_v5 = vmul.f32 -1.442695, %v10005_v22 }
 0x146   : > { %v8906_v56 = vpop.eup %8905  ;;  %8923 = vrcp.f32 %v953_v11  ;;  %v955_v50 = vadd.f32 1.0, %v8904_v39  ;;  %7896 = vmatprep.mubr.bf16.mxu0 %v1301_v55  ;;  %v6810_v34 = vmul.f32 -1.442695, %v10011_v44 }
 0x147   : > { %v8908_v7 = vpop.eup %8907  ;;  %8925 = vrcp.f32 %v954_v46  ;;  %v956_v4 = vadd.f32 1.0, %v8906_v56  ;;  %v6811_v9 = vmul.f32 -1.442695, %v10014_v53 }
 0x148   : > { %v8910_v8 = vpop.eup %8909  ;;  %8927 = vrcp.f32 %v955_v50  ;;  %v10037_v56 = vmul.f32 %v8908_v7, %v9911_v29 }
 0x149   : > { %v8912_v2 = vpop.eup %8911  ;;  %8929 = vrcp.f32 %v956_v4  ;;  %v668_v37 = vpop.f32.mrb[36].mxu0 }
 0x14a   : > { %v8914_v20 = vpop.eup %8913  ;;  %v10025_v26 = vmul.f32 %v8912_v2, %v9920_v21  ;;  %8931 = vpow2.f32 %v6808_v19  ;;  %v10028_v40 = vadd.f32 %v668_v37, %v9796_v14  ;;  %v670_v43 = vpop.f32.mrb[37].mxu0  ;;  %12309 = vst [vmem:[#allocation26_spill] sm:$0xff] %v10037_v56  ;;  %v10043_v2 = vmul.f32 %v8910_v8, %v9914_v31 }
 0x14b   : > { %v8916_v11 = vpop.eup %8915  ;;  %v10031_v18 = vmul.f32 %v8914_v20, %v9924_v30  ;;  %8933 = vpow2.f32 %v6809_v5  ;;  %v10034_v39 = vadd.f32 %v670_v43, %v9798_v15  ;;  %v672_v46 = vpop.f32.mrb[38].mxu0 }
 0x14c   : > { %12307 = vst [vmem:[#allocation24_spill] sm:$0xff] %v10025_v26  ;;  %v8918_v55 = vpop.eup %8917  ;;  %v957_v21 = vadd.f32 1.0, %v8916_v11  ;;  %8935 = vpow2.f32 %v6810_v34  ;;  %v10040_v50 = vadd.f32 %v672_v46, %v9796_v14  ;;  %v674_v19 = vpop.f32.mrb[39].mxu0  ;;  %12310 = vst [vmem:[#allocation27_spill] sm:$0xff] %v10043_v2  ;;  %v6812_v29 = vmul.f32 -1.442695, %v10028_v40 }
 0x14d   : > { %12308 = vst [vmem:[#allocation25_spill] sm:$0xff] %v10031_v18  ;;  %v8920_v4 = vpop.eup %8919  ;;  %v958_v30 = vadd.f32 1.0, %v8918_v55  ;;  %8937 = vpow2.f32 %v6811_v9  ;;  %v10046_v5 = vadd.f32 %v674_v19, %v9798_v15  ;;  %v1302_v7 = vpack.c.bf16 %v10025_v26, %v10037_v56 }
 0x14e   : > { %v8922_v37 = vpop.eup %8921  ;;  %8939 = vrcp.f32 %v957_v21  ;;  %v959_v20 = vadd.f32 1.0, %v8920_v4  ;;  %v6813_v43 = vmul.f32 -1.442695, %v10034_v39  ;;  %v6814_v9 = vmul.f32 -1.442695, %v10040_v50 }
 0x14f   : > { %8941 = vrcp.f32 %v958_v30  ;;  %v960_v34 = vadd.f32 1.0, %v8922_v37  ;;  %7897 = vmatmul.mubr.bf16.gmra.mrb[72].mxu0 %v1302_v7  ;;  %v6815_v46 = vmul.f32 -1.442695, %v10046_v5 }
 0x150   : > { %v8924_v8 = vpop.eup %8923  ;;  %8943 = vrcp.f32 %v959_v20 }
 0x151   : > { %v8926_v11 = vpop.eup %8925  ;;  %8945 = vrcp.f32 %v960_v34  ;;  %v678_v55 = vpop.f32.mrb[40].mxu0  ;;  %v10060_v37 = vmul.f32 %v8924_v8, %v9941_v49 }
 0x152   : > { %v8928_v21 = vpop.eup %8927  ;;  %8947 = vpow2.f32 %v6812_v29  ;;  %v10057_v19 = vadd.f32 %v678_v55, %v9796_v14  ;;  %v680_v4 = vpop.f32.mrb[41].mxu0 }
 0x153   : > { %v8930_v30 = vpop.eup %8929  ;;  %12311 = vst [vmem:[#allocation28_spill] sm:$0xff] %v10060_v37  ;;  %v10063_v20 = vmul.f32 %v8928_v21, %v9949_v57  ;;  %8949 = vpow2.f32 %v6813_v43  ;;  %v10066_v7 = vadd.f32 %v680_v4, %v9798_v15  ;;  %v682_v34 = vpop.f32.mrb[42].mxu0  ;;  %v10076_v57 = vmul.f32 %v8926_v11, %v9944_v54 }
 0x154   : > { %v8932_v31 = vpop.eup %8931  ;;  %v10069_v59 = vmul.f32 %v8930_v30, %v9955_v6  ;;  %8951 = vpow2.f32 %v6814_v9  ;;  %v6816_v29 = vmul.f32 -1.442695, %v10057_v19  ;;  %v10073_v55 = vadd.f32 %v682_v34, %v9796_v14  ;;  %v684_v49 = vpop.f32.mrb[43].mxu0 }
 0x155   : > { %12312 = vst [vmem:[#allocation29_spill] sm:$0xff] %v10063_v20  ;;  %v8934_v8 = vpop.eup %8933  ;;  %12314 = vst [vmem:[#allocation31_spill] sm:$0xff] %v10076_v57  ;;  %v961_v43 = vadd.f32 1.0, %v8932_v31  ;;  %8953 = vpow2.f32 %v6815_v46  ;;  %v10079_v21 = vadd.f32 %v684_v49, %v9798_v15  ;;  %v1303_v6 = vpack.c.bf16 %v10063_v20, %v10060_v37 }
 0x156   : > { %12313 = vst [vmem:[#allocation30_spill] sm:$0xff] %v10069_v59  ;;  %v8936_v4 = vpop.eup %8935  ;;  %v962_v63 = vadd.f32 1.0, %v8934_v8  ;;  %8955 = vpow2.f32 %v6816_v29  ;;  %v6817_v34 = vmul.f32 -1.442695, %v10066_v7  ;;  %v6818_v46 = vmul.f32 -1.442695, %v10073_v55 }
 0x157   : > { %v8938_v9 = vpop.eup %8937  ;;  %8957 = vrcp.f32 %v961_v43  ;;  %v963_v30 = vadd.f32 1.0, %v8936_v4  ;;  %7900 = vmatprep.mubr.bf16.mxu0 %v1303_v6  ;;  %v6819_v29 = vmul.f32 -1.442695, %v10079_v21 }
 0x158   : > { %v8940_v11 = vpop.eup %8939  ;;  %8959 = vrcp.f32 %v962_v63  ;;  %v964_v31 = vadd.f32 1.0, %v8938_v9 }
 0x159   : > { %v8942_v49 = vpop.eup %8941  ;;  %8961 = vrcp.f32 %v963_v30  ;;  %v688_v8 = vpop.f32.mrb[44].mxu0  ;;  %v10092_v54 = vmul.f32 %v8940_v11, %v9970_v38 }
 0x15a   : > { %v8944_v60 = vpop.eup %8943  ;;  %8963 = vrcp.f32 %v964_v31  ;;  %v10089_v43 = vadd.f32 %v688_v8, %v9796_v14  ;;  %v690_v4 = vpop.f32.mrb[45].mxu0  ;;  %v10105_v38 = vmul.f32 %v8942_v49, %v9973_v3 }
 0x15b   : > { %v8946_v12 = vpop.eup %8945  ;;  %12315 = vst [vmem:[#allocation32_spill] sm:$0xff] %v10092_v54  ;;  %v10095_v63 = vmul.f32 %v8944_v60, %v9981_v52  ;;  %8965 = vpow2.f32 %v6817_v34  ;;  %v692_v6 = vpop.f32.mrb[46].mxu0  ;;  %v10102_v8 = vadd.f32 %v690_v4, %v9798_v15 }
 0x15c   : > { %v8948_v9 = vpop.eup %8947  ;;  %v10098_v30 = vmul.f32 %v8946_v12, %v9985_v58  ;;  %8967 = vpow2.f32 %v6818_v46  ;;  %v6820_v31 = vmul.f32 -1.442695, %v10089_v43  ;;  %v694_v25 = vpop.f32.mrb[47].mxu0  ;;  %12318 = vst [vmem:[#allocation35_spill] sm:$0xff] %v10105_v38  ;;  %v10108_v60 = vadd.f32 %v692_v6, %v9796_v14 }
 0x15d   : > { %12316 = vst [vmem:[#allocation33_spill] sm:$0xff] %v10095_v63  ;;  %v8950_v57 = vpop.eup %8949  ;;  %v965_v11 = vadd.f32 1.0, %v8948_v9  ;;  %8969 = vpow2.f32 %v6819_v29  ;;  %v10111_v12 = vadd.f32 %v694_v25, %v9798_v15  ;;  %v1304_v58 = vpack.c.bf16 %v10095_v63, %v10092_v54 }
 0x15e   : > { %12317 = vst [vmem:[#allocation34_spill] sm:$0xff] %v10098_v30  ;;  %v8952_v52 = vpop.eup %8951  ;;  %v966_v34 = vadd.f32 1.0, %v8950_v57  ;;  %8971 = vpow2.f32 %v6820_v31  ;;  %v6821_v6 = vmul.f32 -1.442695, %v10102_v8  ;;  %v6822_v25 = vmul.f32 -1.442695, %v10108_v60 }
 0x15f   : > { %v8954_v46 = vpop.eup %8953  ;;  %8973 = vrcp.f32 %v965_v11  ;;  %v967_v4 = vadd.f32 1.0, %v8952_v52  ;;  %7901 = vmatmul.mubr.bf16.gmra.mrb[76].mxu0 %v1304_v58  ;;  %v6823_v11 = vmul.f32 -1.442695, %v10111_v12 }
 0x160   : > { %v8956_v49 = vpop.eup %8955  ;;  %8975 = vrcp.f32 %v966_v34  ;;  %v968_v29 = vadd.f32 1.0, %v8954_v46 }
 0x161   : > { %v8958_v57 = vpop.eup %8957  ;;  %8977 = vrcp.f32 %v967_v4  ;;  %v969_v9 = vadd.f32 1.0, %v8956_v49  ;;  %v698_v31 = vpop.f32.mrb[48].mxu0 }
 0x162   : > { %v8960_v59 = vpop.eup %8959  ;;  %8979 = vrcp.f32 %v968_v29  ;;  %v10121_v52 = vadd.f32 %v698_v31, %v9796_v14  ;;  %v700_v3 = vpop.f32.mrb[49].mxu0  ;;  %v10124_v34 = vmul.f32 %v8958_v57, %v9996_v16 }
 0x163   : > { %v8962_v38 = vpop.eup %8961  ;;  %8981 = vrcp.f32 %v969_v9  ;;  %v702_v58 = vpop.f32.mrb[50].mxu0  ;;  %v10131_v29 = vadd.f32 %v700_v3, %v9798_v15  ;;  %v10134_v2 = vmul.f32 %v8960_v59, %v10005_v22 }
 0x164   : > { %12319 = vst [vmem:[#allocation36_spill] sm:$0xff] %v10124_v34  ;;  %v8964_v46 = vpop.eup %8963  ;;  %v10127_v4 = vmul.f32 %v8962_v38, %v10011_v44  ;;  %8983 = vpow2.f32 %v6821_v6  ;;  %v6824_v49 = vmul.f32 -1.442695, %v10121_v52  ;;  %v704_v30 = vpop.f32.mrb[51].mxu0  ;;  %v10140_v57 = vadd.f32 %v702_v58, %v9796_v14 }
 0x165   : > { %v8966_v31 = vpop.eup %8965  ;;  %12321 = vst [vmem:[#allocation38_spill] sm:$0xff] %v10134_v2  ;;  %v10137_v16 = vmul.f32 %v8964_v46, %v10014_v53  ;;  %8985 = vpow2.f32 %v6822_v25  ;;  %v10143_v6 = vadd.f32 %v704_v30, %v9798_v15  ;;  %v6825_v25 = vmul.f32 -1.442695, %v10131_v29 }
 0x166   : > { %12320 = vst [vmem:[#allocation37_spill] sm:$0xff] %v10127_v4  ;;  %v8968_v44 = vpop.eup %8967  ;;  %v970_v38 = vadd.f32 1.0, %v8966_v31  ;;  %8987 = vpow2.f32 %v6823_v11  ;;  %v1305_v3 = vpack.c.bf16 %v10127_v4, %v10124_v34  ;;  %v6826_v30 = vmul.f32 -1.442695, %v10140_v57 }
 0x167   : > { %12322 = vst [vmem:[#allocation39_spill] sm:$0xff] %v10137_v16  ;;  %v8970_v9 = vpop.eup %8969  ;;  %v971_v18 = vadd.f32 1.0, %v8968_v44  ;;  %8989 = vpow2.f32 %v6824_v49  ;;  %v6827_v44 = vmul.f32 -1.442695, %v10143_v6 }
 0x168   : > { %v8972_v53 = vpop.eup %8971  ;;  %8991 = vrcp.f32 %v970_v38  ;;  %v972_v59 = vadd.f32 1.0, %v8970_v9  ;;  %7904 = vmatprep.mubr.bf16.mxu0 %v1305_v3 }
 0x169   : > { %v8974_v58 = vpop.eup %8973  ;;  %8993 = vrcp.f32 %v971_v18  ;;  %v973_v11 = vadd.f32 1.0, %v8972_v53  ;;  %v708_v46 = vpop.f32.mrb[52].mxu0 }
 0x16a   : > { %v8976_v31 = vpop.eup %8975  ;;  %8995 = vrcp.f32 %v972_v59  ;;  %v10153_v49 = vadd.f32 %v708_v46, %v9796_v14  ;;  %v710_v22 = vpop.f32.mrb[53].mxu0  ;;  %v10156_v38 = vmul.f32 %v8974_v58, %v10028_v40 }
 0x16b   : > { %v8978_v2 = vpop.eup %8977  ;;  %8997 = vrcp.f32 %v973_v11  ;;  %v10159_v3 = vadd.f32 %v710_v22, %v9798_v15  ;;  %v712_v18 = vpop.f32.mrb[54].mxu0  ;;  %v10162_v53 = vmul.f32 %v8976_v31, %v10034_v39 }
 0x16c   : > { %12323 = vst [vmem:[#allocation40_spill] sm:$0xff] %v10156_v38  ;;  %v8980_v9 = vpop.eup %8979  ;;  %v10165_v59 = vmul.f32 %v8978_v2, %v10040_v50  ;;  %8999 = vpow2.f32 %v6825_v25  ;;  %v6828_v46 = vmul.f32 -1.442695, %v10153_v49  ;;  %v714_v16 = vpop.f32.mrb[55].mxu0  ;;  %v10173_v58 = vadd.f32 %v712_v18, %v9796_v14 }
 0x16d   : > { %12324 = vst [vmem:[#allocation41_spill] sm:$0xff] %v10162_v53  ;;  %v8982_v47 = vpop.eup %8981  ;;  %v10169_v40 = vmul.f32 %v8980_v9, %v10046_v5  ;;  %9001 = vpow2.f32 %v6826_v30  ;;  %v6829_v22 = vmul.f32 -1.442695, %v10159_v3  ;;  %v10176_v39 = vadd.f32 %v714_v16, %v9798_v15 }
 0x16e   : > { %12325 = vst [vmem:[#allocation42_spill] sm:$0xff] %v10165_v59  ;;  %v8984_v11 = vpop.eup %8983  ;;  %9003 = vpow2.f32 %v6827_v44  ;;  %v1306_v50 = vpack.c.bf16 %v10165_v59, %v10156_v38  ;;  %v6830_v44 = vmul.f32 -1.442695, %v10173_v58 }
 0x16f   : > { %12326 = vst [vmem:[#allocation43_spill] sm:$0xff] %v10169_v40  ;;  %v8986_v2 = vpop.eup %8985  ;;  %v974_v25 = vadd.f32 1.0, %v8984_v11  ;;  %9005 = vpow2.f32 %v6828_v46  ;;  %v6831_v36 = vmul.f32 -1.442695, %v10176_v39 }
 0x170   : > { %v8988_v30 = vpop.eup %8987  ;;  %v975_v31 = vadd.f32 1.0, %v8986_v2  ;;  %9007 = vpow2.f32 %v6829_v22  ;;  %7905 = vmatmul.mubr.bf16.gmra.mrb[80].mxu0 %v1306_v50 }
 0x171   : > { %v8990_v18 = vpop.eup %8989  ;;  %9009 = vrcp.f32 %v974_v25  ;;  %v976_v9 = vadd.f32 1.0, %v8988_v30  ;;  %v718_v16 = vpop.f32.mrb[56].mxu0  ;;  %v10191_v25 = vmul.f32 %v8982_v47, %v10057_v19 }
 0x172   : > { %v8992_v17 = vpop.eup %8991  ;;  %9011 = vrcp.f32 %v975_v31  ;;  %v977_v51 = vadd.f32 1.0, %v8990_v18  ;;  %v10185_v46 = vadd.f32 %v718_v16, %v9796_v14  ;;  %v720_v11 = vpop.f32.mrb[57].mxu0 }
 0x173   : > { %v8994_v5 = vpop.eup %8993  ;;  %9013 = vrcp.f32 %v976_v9  ;;  %v10188_v22 = vadd.f32 %v720_v11, %v9798_v15  ;;  %v722_v50 = vpop.f32.mrb[58].mxu0  ;;  %12327 = vst [vmem:[#allocation44_spill] sm:$0xff] %v10191_v25  ;;  %v10198_v53 = vmul.f32 %v8992_v17, %v10066_v7 }
 0x174   : > { %v8996_v2 = vpop.eup %8995  ;;  %v10194_v30 = vmul.f32 %v8994_v5, %v10073_v55  ;;  %9015 = vrcp.f32 %v977_v51  ;;  %v6832_v31 = vmul.f32 -1.442695, %v10185_v46  ;;  %v724_v18 = vpop.f32.mrb[59].mxu0  ;;  %v10205_v47 = vadd.f32 %v722_v50, %v9796_v14 }
 0x175   : > { %v8998_v16 = vpop.eup %8997  ;;  %12329 = vst [vmem:[#allocation46_spill] sm:$0xff] %v10198_v53  ;;  %v10201_v9 = vmul.f32 %v8996_v2, %v10079_v21  ;;  %9017 = vpow2.f32 %v6830_v44  ;;  %v6833_v11 = vmul.f32 -1.442695, %v10188_v22  ;;  %v10210_v17 = vadd.f32 %v724_v18, %v9798_v15 }
 0x176   : > { %12328 = vst [vmem:[#allocation45_spill] sm:$0xff] %v10194_v30  ;;  %v9000_v40 = vpop.eup %8999  ;;  %9019 = vpow2.f32 %v6831_v36  ;;  %v1307_v51 = vpack.c.bf16 %v10194_v30, %v10191_v25  ;;  %v10224_v53 = vmul.f32 %v8998_v16, %v10089_v43 }
 0x177   : > { %12330 = vst [vmem:[#allocation47_spill] sm:$0xff] %v10201_v9  ;;  %v9002_v19 = vpop.eup %9001  ;;  %v978_v55 = vadd.f32 1.0, %v9000_v40  ;;  %9021 = vpow2.f32 %v6832_v31  ;;  %v6834_v40 = vmul.f32 -1.442695, %v10205_v47 }
 0x178   : > { %v9004_v21 = vpop.eup %9003  ;;  %v979_v5 = vadd.f32 1.0, %v9002_v19  ;;  %9023 = vpow2.f32 %v6833_v11  ;;  %7908 = vmatprep.mubr.bf16.mxu0 %v1307_v51  ;;  %v6835_v19 = vmul.f32 -1.442695, %v10210_v17  ;;  %12331 = vst [vmem:[#allocation48_spill] sm:$0xff] %v10224_v53 }
 0x179   : > { %v9006_v36 = vpop.eup %9005  ;;  %9025 = vrcp.f32 %v978_v55  ;;  %v980_v44 = vadd.f32 1.0, %v9004_v21  ;;  %v728_v50 = vpop.f32.mrb[60].mxu0 }
 0x17a   : > { %v9008_v2 = vpop.eup %9007  ;;  %9027 = vrcp.f32 %v979_v5  ;;  %v981_v45 = vadd.f32 1.0, %v9006_v36  ;;  %v10216_v31 = vadd.f32 %v728_v50, %v9796_v14  ;;  %v730_v18 = vpop.f32.mrb[61].mxu0 }
 0x17b   : > { %v9010_v48 = vpop.eup %9009  ;;  %9029 = vrcp.f32 %v980_v44  ;;  %v982_v7 = vadd.f32 1.0, %v9008_v2  ;;  %v10220_v11 = vadd.f32 %v730_v18, %v9798_v15  ;;  %v732_v51 = vpop.f32.mrb[62].mxu0 }
 0x17c   : > { %v9012_v55 = vpop.eup %9011  ;;  %9031 = vrcp.f32 %v981_v45  ;;  %v6836_v21 = vmul.f32 -1.442695, %v10216_v31  ;;  %v734_v5 = vpop.f32.mrb[63].mxu0  ;;  %v10231_v18 = vmul.f32 %v9010_v48, %v10102_v8  ;;  %v10237_v45 = vadd.f32 %v732_v51, %v9796_v14 }
 0x17d   : > { %v9014_v36 = vpop.eup %9013  ;;  %v10227_v50 = vmul.f32 %v9012_v55, %v10108_v60  ;;  %9033 = vrcp.f32 %v982_v7  ;;  %v6837_v44 = vmul.f32 -1.442695, %v10220_v11  ;;  %v10240_v43 = vadd.f32 %v734_v5, %v9798_v15 }
 0x17e   : > { %v9016_v2 = vpop.eup %9015  ;;  %12333 = vst [vmem:[#allocation50_spill] sm:$0xff] %v10231_v18  ;;  %v10234_v9 = vmul.f32 %v9014_v36, %v10111_v12  ;;  %9035 = vpow2.f32 %v6834_v40  ;;  %v6838_v40 = vmul.f32 -1.442695, %v10237_v45 }
 0x17f   : > { %12332 = vst [vmem:[#allocation49_spill] sm:$0xff] %v10227_v50  ;;  %v9018_v0 = vpop.eup %9017  ;;  %9037 = vpow2.f32 %v6835_v19  ;;  %v1308_v60 = vpack.c.bf16 %v10227_v50, %v10224_v53  ;;  %v6839_v15 = vmul.f32 -1.442695, %v10240_v43 }
 0x180   : > { %12334 = vst [vmem:[#allocation51_spill] sm:$0xff] %v10234_v9  ;;  %v9020_v16 = vpop.eup %9019  ;;  %v983_v7 = vadd.f32 1.0, %v9018_v0  ;;  %9039 = vpow2.f32 %v6836_v21  ;;  %v10249_v0 = vmul.f32 %v9016_v2, %v10121_v52 }
 0x181   : > { %v9022_v8 = vpop.eup %9021  ;;  %v984_v12 = vadd.f32 1.0, %v9020_v16  ;;  %9041 = vpow2.f32 %v6837_v44  ;;  %7909 = vmatmul.mubr.bf16.gmra.mrb[84].mxu0 %v1308_v60 }
 0x182   : > { %v9024_v14 = vpop.eup %9023  ;;  %9043 = vrcp.f32 %v983_v7  ;;  %12335 = vst [vmem:[#allocation52_spill] sm:$0xff] %v10249_v0  ;;  %v985_v5 = vadd.f32 1.0, %v9022_v8 }
 0x183   : > { %v9026_v19 = vpop.eup %9025  ;;  %9045 = vrcp.f32 %v984_v12  ;;  %v986_v16 = vadd.f32 1.0, %v9024_v14 }
 0x184   : > { %v9028_v51 = vpop.eup %9027  ;;  %v10255_v44 = vmul.f32 %v9026_v19, %v10131_v29  ;;  %9047 = vpow2.f32 %v6838_v40 }
 0x185   : > { %v9030_v55 = vpop.eup %9029  ;;  %v10252_v21 = vmul.f32 %v9028_v51, %v10140_v57  ;;  %9049 = vpow2.f32 %v6839_v15 }
 0x186   : > { %v9032_v36 = vpop.eup %9031  ;;  %12337 = vst [vmem:[#allocation54_spill] sm:$0xff] %v10255_v44  ;;  %v10258_v60 = vmul.f32 %v9030_v55, %v10143_v6  ;;  %9051 = vrcp.f32 %v985_v5 }
 0x187   : > { %12336 = vst [vmem:[#allocation53_spill] sm:$0xff] %v10252_v21  ;;  %v9034_v7 = vpop.eup %9033  ;;  %v1309_v12 = vpack.c.bf16 %v10252_v21, %v10249_v0  ;;  %9053 = vrcp.f32 %v986_v16  ;;  %v10265_v15 = vmul.f32 %v9032_v36, %v10153_v49 }
 0x188   : > { %12338 = vst [vmem:[#allocation55_spill] sm:$0xff] %v10258_v60  ;;  %v9036_v52 = vpop.eup %9035  ;;  %v10271_v57 = vmul.f32 %v9034_v7, %v10159_v3  ;;  %v8716_v7 = vld [vmem:[%s12172_s5 + $0x8] sm:$0xff]  }
 0x189   : > { %v9038_v2 = vpop.eup %9037  ;;  %v987_v8 = vadd.f32 1.0, %v9036_v52  ;;  %7912 = vmatprep.mubr.bf16.mxu0 %v1309_v12  ;;  %12339 = vst [vmem:[#allocation56_spill] sm:$0xff] %v10265_v15  ;;  %v8715_v52 = vld [vmem:[%s12172_s5] sm:$0xff]  }
 0x18a   : > { %v9040_v29 = vpop.eup %9039  ;;  %v988_v19 = vadd.f32 1.0, %v9038_v2  ;;  %12341 = vst [vmem:[#allocation58_spill] sm:$0xff] %v10271_v57  ;;  %7920 = vmatprep.subr.bf16.mxu0 %v8715_v52 }
 0x18b   : > { %v9042_v6 = vpop.eup %9041  ;;  %9055 = vrcp.f32 %v987_v8  ;;  %v989_v55 = vadd.f32 1.0, %v9040_v29  ;;  %7921 = vmatpush3.bf16.msra.mxu0 %v8715_v52 }
 0x18c   : > { %v9044_v14 = vpop.eup %9043  ;;  %9057 = vrcp.f32 %v988_v19  ;;  %v990_v16 = vadd.f32 1.0, %v9042_v6  ;;  %7922 = vmatprep.subr.bf16.mxu0 %v8716_v7 }
 0x18d   : > { %v9046_v40 = vpop.eup %9045  ;;  %v10268_v51 = vmul.f32 %v9044_v14, %v10173_v58  ;;  %9059 = vrcp.f32 %v989_v55 }
 0x18e   : > { %v10274_v5 = vmul.f32 %v9046_v40, %v10176_v39  ;;  %v9048_v49 = vpop.eup %9047  ;;  %9061 = vrcp.f32 %v990_v16  ;;  %v8717_v16 = vld [vmem:[%s12172_s5 + $0x10] sm:$0xff]  }
 0x18f   : > { %12340 = vst [vmem:[#allocation57_spill] sm:$0xff] %v10268_v51  ;;  %v1310_v12 = vpack.c.bf16 %v10268_v51, %v10265_v15  ;;  %v9050_v36 = vpop.eup %9049  ;;  %v991_v2 = vadd.f32 1.0, %v9048_v49  ;;  %7923 = vmatpush3.bf16.msra.mxu0 %v8716_v7  ;;  %v8719_v7 = vld [vmem:[%s12172_s5 + $0x20] sm:$0xff]  }
 0x190   : > { %12342 = vst [vmem:[#allocation59_spill] sm:$0xff] %v10274_v5  ;;  %v992_v3 = vadd.f32 1.0, %v9050_v36  ;;  %v9052_v39 = vpop.eup %9051  ;;  %7924 = vmatprep.subr.bf16.mxu0 %v8717_v16 }
 0x191   : > { %7913 = vmatmul.mubr.bf16.gmra.mrb[88].mxu0 %v1310_v12  ;;  %9063 = vrcp.f32 %v991_v2  ;;  %v9054_v8 = vpop.eup %9053  ;;  %v10287_v6 = vmul.f32 %v9052_v39, %v10185_v46 }
 0x192   : > { %9065 = vrcp.f32 %v992_v3  ;;  %v10293_v40 = vmul.f32 %v9054_v8, %v10188_v22  ;;  %v8718_v22 = vld [vmem:[%s12172_s5 + $0x18] sm:$0xff]  }
 0x193   : > { %12343 = vst [vmem:[#allocation60_spill] sm:$0xff] %v10287_v6  ;;  %7925 = vmatpush3.bf16.msra.mxu0 %v8717_v16 }
 0x194   : > { %12345 = vst [vmem:[#allocation62_spill] sm:$0xff] %v10293_v40  ;;  %7926 = vmatprep.subr.bf16.mxu0 %v8718_v22  ;;  %v10413_v40 = vld [vmem:[%s12172_s5 + $0x40] sm:$0xff]  }
 0x195   : > { %v9056_v29 = vpop.eup %9055 }
 0x196   : > { %v9058_v19 = vpop.eup %9057  ;;  %v10290_v14 = vmul.f32 %v9056_v29, %v10205_v47  ;;  %v8722_v29 = vld [vmem:[%s12172_s5 + $0x38] sm:$0xff]  }
 0x197   : > { %v10296_v55 = vmul.f32 %v9058_v19, %v10210_v17  ;;  %v9060_v47 = vpop.eup %9059  ;;  %7927 = vmatpush3.bf16.msra.mxu0 %v8718_v22  ;;  %v1796_v19 = vand.u32 15, %v9789_v10  ;;  %v8774_v22 = vld [vmem:[%s12172_s5 + $0x1d8] sm:$0xff]  }
 0x198   : > { %12344 = vst [vmem:[#allocation61_spill] sm:$0xff] %v10290_v14  ;;  %v1311_v12 = vpack.c.bf16 %v10290_v14, %v10287_v6  ;;  %v9062_v17 = vpop.eup %9061  ;;  %v10309_v36 = vmul.f32 %v9060_v47, %v10216_v31  ;;  %7928 = vmatprep.subr.bf16.mxu0 %v8719_v7 }
 0x199   : > { %12346 = vst [vmem:[#allocation63_spill] sm:$0xff] %v10296_v55  ;;  %v10315_v3 = vmul.f32 %v9062_v17, %v10220_v11  ;;  %v8720_v11 = vld [vmem:[%s12172_s5 + $0x28] sm:$0xff]   ;;  %vm2176_vm0 = vcmp.ne.s32.totalorder %v1796_v19, 0  ;;  %v10347_v17 = vld [vmem:[%s12172_s5 + $0x100] sm:$0xff]  }
 0x19a   : > { %7916 = vmatprep.mubr.bf16.mxu0 %v1311_v12  ;;  %12347 = vst [vmem:[#allocation64_spill] sm:$0xff] %v10309_v36  ;;  %vm10338_vm2 = vmpackc.low %vm9590_vm1, %vm2176_vm0  ;;  %8400 = vmatprep.subr.bf16.mxu1 %v10347_v17 }
 0x19b   : > { %v9064_v52 = vpop.eup %9063  ;;  %12349 = vst [vmem:[#allocation66_spill] sm:$0xff] %v10315_v3  ;;  %7929 = vmatpush3.bf16.msra.mxu0 %v8719_v7  ;;  %8408 = vmatpush3.bf16.msra.mxu1 %v10347_v17  ;;  %v10369_v7 = vld [vmem:[%s12172_s5 + $0x118] sm:$0xff]  }
 0x19c   : > { %v9066_v49 = vpop.eup %9065  ;;  %v10312_v2 = vmul.f32 %v9064_v52, %v10237_v45  ;;  %7930 = vmatprep.subr.bf16.mxu0 %v8720_v11  ;;  %v9589_v45 = vmov 0.0   ;;  %v10355_v52 = vld [vmem:[%s12172_s5 + $0x108] sm:$0xff]  }
 0x19d   : > { %v10318_v39 = vmul.f32 %v9066_v49, %v10240_v43  ;;  %1753 = vst [vmem:[#allocation3] sm:$0xff] %v9589_v45  ;;  %1754 = vst [vmem:[#allocation3 + $0x8] sm:$0xff] %v9589_v45  ;;  %v8721_v43 = vld [vmem:[%s12172_s5 + $0x30] sm:$0xff]   ;;  %8401 = vmatprep.subr.bf16.mxu1 %v10355_v52 }
 0x19e   : > { %12348 = vst [vmem:[#allocation65_spill] sm:$0xff] %v10312_v2  ;;  %v1312_v8 = vpack.c.bf16 %v10312_v2, %v10309_v36  ;;  %1755 = vst [vmem:[#allocation3 + $0x10] sm:$0xff] %v9589_v45  ;;  %v10362_v49 = vld [vmem:[%s12172_s5 + $0x110] sm:$0xff]  }
 0x19f   : > { %12350 = vst [vmem:[#allocation67_spill] sm:$0xff] %v10318_v39  ;;  %1756 = vst [vmem:[#allocation3 + $0x118] sm:$0xff] %v9589_v45  ;;  %7931 = vmatpush3.bf16.msra.mxu0 %v8720_v11  ;;  %8409 = vmatpush3.bf16.msra.mxu1 %v10355_v52  ;;  %v10383_v11 = vld [vmem:[%s12172_s5 + $0x128] sm:$0xff]  }
 0x1a0   : > { %7917 = vmatmul.mubr.bf16.gmra.mrb[92].mxu0 %v1312_v8  ;;  %1757 = vst [vmem:[#allocation3 + $0x120] sm:$0xff] %v9589_v45  ;;  %1758 = vst [vmem:[#allocation3 + $0x128] sm:$0xff] %v9589_v45  ;;  %7932 = vmatprep.subr.bf16.mxu0 %v8721_v43  ;;  %v10376_v8 = vld [vmem:[%s12172_s5 + $0x120] sm:$0xff]   ;;  %v10390_v45 = vld [vmem:[%s12172_s5 + $0x130] sm:$0xff]  }
 0x1a1   : > { %8402 = vmatprep.subr.bf16.mxu1 %v10362_v49 }
 0x1a3   : > { %7933 = vmatpush3.bf16.msra.mxu0 %v8721_v43  ;;  %8410 = vmatpush3.bf16.msra.mxu1 %v10362_v49  ;;  %v10397_v43 = vld [vmem:[%s12172_s5 + $0x138] sm:$0xff]  }
 0x1a4   : > { %7934 = vmatprep.subr.bf16.mxu0 %v8722_v29  ;;  %v2305_v16 = vld [vmem:[#allocation3 + $0x7] sm:$0xff]  ;;  %8403 = vmatprep.subr.bf16.mxu1 %v10369_v7 }
 0x1a5   : > { %v2306_v12 = vld [vmem:[#allocation3 + $0xf] sm:$0xff] }
 0x1a6   : > { %v6906_v47 = vpack.c.bf16 %v2306_v12, %v2305_v16 }
 0x1a7   : > { %7935 = vmatpush3.bf16.msra.mxu0 %v8722_v29  ;;  %8411 = vmatpush3.bf16.msra.mxu1 %v10369_v7  ;;  %v10404_v29 = vld [vmem:[%s12171_s4] ss:$0 sm:$0xff] }
 0x1a8   : > { %7936 = vmatprep.mubr.msk.bf16.mxu0 %vm10338_vm2, %v6906_v47  ;;  %7968 = vmatprep.subr.bf16.mxu0 %v10347_v17 }
 0x1a9   : > { %8404 = vmatprep.subr.bf16.mxu1 %v10376_v8 }
 0x1ab   : > { %8412 = vmatpush3.bf16.msra.mxu1 %v10376_v8 }
 0x1ac   : > { %8405 = vmatprep.subr.bf16.mxu1 %v10383_v11 }
 0x1af   : > { %8413 = vmatpush3.bf16.msra.mxu1 %v10383_v11 }
 0x1b0   : > { %8406 = vmatprep.subr.bf16.mxu1 %v10390_v45 }
 0x1b3   : > { %8414 = vmatpush3.bf16.msra.mxu1 %v10390_v45 }
 0x1b4   : > { %8407 = vmatprep.subr.bf16.mxu1 %v10397_v43 }
 0x1b7   : > { %8415 = vmatpush3.bf16.msra.mxu1 %v10397_v43 }
 0x1b8   : > { %8016 = vmatprep.subr.bf16.mxu1 %v10413_v40 }
 0x1ff   : > { %v7890_v19 = vpop.f32.mrb[64].mxu0 }
 0x200   : > { %v1411_v16 = vadd.f32 %v7890_v19, %v10404_v29  ;;  %v1402_v12 = vpop.f32.mrb[65].mxu0 }
 0x201   : > { %v1403_v47 = vadd.f32 %v10404_v29, %v1402_v12  ;;  %v7891_v31 = vpop.f32.mrb[66].mxu0 }
 0x202   : > { %v6851_v46 = vmul.f32 -1.442695, %v1411_v16  ;;  %v1414_v58 = vadd.f32 %v7891_v31, %v10404_v29  ;;  %v1405_v48 = vpop.f32.mrb[67].mxu0 }
 0x203   : > { %v6849_v3 = vmul.f32 -1.442695, %v1403_v47  ;;  %v1406_v39 = vadd.f32 %v10404_v29, %v1405_v48 }
 0x204   : > { %9067 = vpow2.f32 %v6851_v46  ;;  %v6852_v55 = vmul.f32 -1.442695, %v1414_v58 }
 0x205   : > { %9069 = vpow2.f32 %v6849_v3  ;;  %v6850_v19 = vmul.f32 -1.442695, %v1406_v39 }
 0x206   : > { %9071 = vpow2.f32 %v6852_v55 }
 0x207   : > { %9073 = vpow2.f32 %v6850_v19 }
 0x20e   : > { %v9068_v12 = vpop.eup %9067 }
 0x20f   : > { %v9070_v57 = vpop.eup %9069  ;;  %v1627_v31 = vadd.f32 1.0, %v9068_v12 }
 0x210   : > { %v9072_v5 = vpop.eup %9071  ;;  %v1625_v44 = vadd.f32 1.0, %v9070_v57  ;;  %v7894_v60 = vpop.f32.mrb[68].mxu0 }
 0x211   : > { %v9074_v48 = vpop.eup %9073  ;;  %9075 = vrcp.f32 %v1627_v31  ;;  %v1628_v18 = vadd.f32 1.0, %v9072_v5  ;;  %v10417_v9 = vadd.f32 %v7894_v60, %v10404_v29  ;;  %v1418_v46 = vpop.f32.mrb[69].mxu0 }
 0x212   : > { %9077 = vrcp.f32 %v1625_v44  ;;  %v1626_v3 = vadd.f32 1.0, %v9074_v48  ;;  %v10420_v1 = vadd.f32 %v10404_v29, %v1418_v46  ;;  %v7895_v55 = vpop.f32.mrb[70].mxu0 }
 0x213   : > { %9079 = vrcp.f32 %v1628_v18  ;;  %v6855_v19 = vmul.f32 -1.442695, %v10417_v9  ;;  %v10424_v12 = vadd.f32 %v7895_v55, %v10404_v29  ;;  %v1421_v57 = vpop.f32.mrb[71].mxu0  ;;  %v1762_v55 = vadd.s32 16, %v9789_v10 }
 0x214   : > { %9081 = vrcp.f32 %v1626_v3  ;;  %v6853_v5 = vmul.f32 -1.442695, %v10420_v1  ;;  %v10428_v60 = vadd.f32 %v10404_v29, %v1421_v57  ;;  %v1764_v57 = vadd.s32 32, %v9789_v10 }
 0x215   : > { %9083 = vpow2.f32 %v6855_v19  ;;  %v6856_v44 = vmul.f32 -1.442695, %v10424_v12 }
 0x216   : > { %9085 = vpow2.f32 %v6853_v5  ;;  %v6854_v31 = vmul.f32 -1.442695, %v10428_v60 }
 0x217   : > { %9087 = vpow2.f32 %v6856_v44 }
 0x218   : > { %9089 = vpow2.f32 %v6854_v31 }
 0x21b   : > { %v9076_v18 = vpop.eup %9075 }
 0x21c   : > { %v9078_v48 = vpop.eup %9077  ;;  %v10432_v46 = vmul.f32 %v9076_v18, %v1411_v16  ;;  %v1810_v18 = vand.u32 15, %v1762_v55 }
 0x21d   : > { %v9080_v3 = vpop.eup %9079  ;;  %v10435_v32 = vmul.f32 %v9078_v48, %v1403_v47 }
 0x21e   : > { %v9082_v33 = vpop.eup %9081  ;;  %2242 = vst [vmem:[#allocation3 + $0x28] sm:$0xff] %v10432_v46  ;;  %v10438_v19 = vmul.f32 %v9080_v3, %v1414_v58  ;;  %vm2178_vm3 = vcmp.ne.s32.totalorder %v1810_v18, 0 }
 0x21f   : > { %v9084_v5 = vpop.eup %9083  ;;  %2240 = vst [vmem:[#allocation3 + $0x18] sm:$0xff] %v10435_v32  ;;  %v10442_v44 = vmul.f32 %v9082_v33, %v1406_v39  ;;  %v1824_v33 = vand.u32 15, %v1764_v57  ;;  %vm10465_vm5 = vmpackc.low %vm9590_vm1, %vm2178_vm3 }
 0x220   : > { %v9086_v31 = vpop.eup %9085  ;;  %2243 = vst [vmem:[#allocation3 + $0x30] sm:$0xff] %v10438_v19  ;;  %v1631_v47 = vadd.f32 1.0, %v9084_v5 }
 0x221   : > { %v9088_v48 = vpop.eup %9087  ;;  %2241 = vst [vmem:[#allocation3 + $0x20] sm:$0xff] %v10442_v44  ;;  %v1629_v58 = vadd.f32 1.0, %v9086_v31  ;;  %vm2180_vm4 = vcmp.ne.s32.totalorder %v1824_v33, 0 }
 0x222   : > { %v9090_v14 = vpop.eup %9089  ;;  %9091 = vrcp.f32 %v1631_v47  ;;  %v1632_v6 = vadd.f32 1.0, %v9088_v48  ;;  %v7898_v2 = vpop.f32.mrb[72].mxu0  ;;  %vm10472_vm6 = vmpackc.low %vm9590_vm1, %vm2180_vm4 }
 0x223   : > { %9093 = vrcp.f32 %v1629_v58  ;;  %v1630_v39 = vadd.f32 1.0, %v9090_v14  ;;  %v10451_v36 = vadd.f32 %v7898_v2, %v10404_v29  ;;  %v1434_v5 = vpop.f32.mrb[73].mxu0 }
 0x224   : > { %9095 = vrcp.f32 %v1632_v6  ;;  %v10454_v55 = vadd.f32 %v10404_v29, %v1434_v5  ;;  %v7899_v31 = vpop.f32.mrb[74].mxu0 }
 0x225   : > { %9097 = vrcp.f32 %v1630_v39  ;;  %v6859_v16 = vmul.f32 -1.442695, %v10451_v36  ;;  %v10458_v47 = vadd.f32 %v7899_v31, %v10404_v29  ;;  %v1437_v57 = vpop.f32.mrb[75].mxu0 }
 0x226   : > { %v6857_v14 = vmul.f32 -1.442695, %v10454_v55  ;;  %v10462_v6 = vadd.f32 %v10404_v29, %v1437_v57  ;;  %v2307_v58 = vld [vmem:[#allocation3 + $0x17] sm:$0xff]  ;;  %v12355_v57 = vmov 0 }
 0x227   : > { %v2310_v18 = vld [vmem:[#allocation3 + $0x2f] sm:$0xff]  ;;  %9099 = vpow2.f32 %v6859_v16  ;;  %v6860_v48 = vmul.f32 -1.442695, %v10458_v47  ;;  %v12356_v57 = vsel %vm10472_vm6, 4294967295, %v12355_v57 }
 0x228   : > { %v2308_v39 = vld [vmem:[#allocation3 + $0x1f] sm:$0xff]  ;;  %v2309_v5 = vld [vmem:[#allocation3 + $0x27] sm:$0xff]  ;;  %9101 = vpow2.f32 %v6857_v14  ;;  %v6858_v33 = vmul.f32 -1.442695, %v10462_v6  ;;  %12357 = vst [vmem:[#allocation68_spill] sm:$0xff] %v12356_v57  ;;  %v3594_v62 = vld [vmem:[#allocation3 + $0x2f] sm:$0xff] }
 0x229   : > { %v6909_v31 = vpack.c.bf16 %v2308_v39, %v2307_v58  ;;  %v6912_v3 = vpack.c.bf16 %v2310_v18, %v2309_v5  ;;  %9103 = vpow2.f32 %v6860_v48  ;;  %v1766_v39 = vadd.s32 48, %v9789_v10 }
 0x22a   : > { %9105 = vpow2.f32 %v6858_v33 }
 0x22b   : > { %7937 = vmatmul.mubr.msk.bf16.vlgmr.msra.gmra.mrb[96].mxu0 %vm10465_vm5, %v6909_v31 }
 0x22c   : > { %v9092_v16 = vpop.eup %9091  ;;  %7940 = vmatprep.mubr.msk.bf16.mxu0 %vm10472_vm6, %v6912_v3  ;;  %7969 = vmatpush3.bf16.msra.mxu0 %v10347_v17  ;;  %v1768_v17 = vadd.s32 64, %v9789_v10  ;;  %v1838_v3 = vand.u32 15, %v1766_v39 }
 0x22d   : > { %v9094_v14 = vpop.eup %9093  ;;  %v10482_v58 = vmul.f32 %v9092_v16, %v10417_v9  ;;  %7970 = vmatprep.subr.bf16.mxu0 %v10355_v52 }
 0x22e   : > { %v9096_v18 = vpop.eup %9095  ;;  %v10487_v48 = vmul.f32 %v9094_v14, %v10420_v1  ;;  %vm2182_vm7 = vcmp.ne.s32.totalorder %v1838_v3, 0 }
 0x22f   : > { %v9098_v5 = vpop.eup %9097  ;;  %2246 = vst [vmem:[#allocation3 + $0x48] sm:$0xff] %v10482_v58  ;;  %v10491_v33 = vmul.f32 %v9096_v18, %v10424_v12  ;;  %v1852_v18 = vand.u32 15, %v1768_v17  ;;  %vm10524_vm9 = vmpackc.low %vm9590_vm1, %vm2182_vm7 }
 0x230   : > { %2244 = vst [vmem:[#allocation3 + $0x38] sm:$0xff] %v10487_v48  ;;  %v10496_v9 = vmul.f32 %v9098_v5, %v10428_v60  ;;  %7971 = vmatpush3.bf16.msra.mxu0 %v10355_v52 }
 0x231   : > { %2247 = vst [vmem:[#allocation3 + $0x50] sm:$0xff] %v10491_v33  ;;  %7972 = vmatprep.subr.bf16.mxu0 %v10362_v49  ;;  %v9100_v31 = vpop.eup %9099  ;;  %vm2184_vm8 = vcmp.ne.s32.totalorder %v1852_v18, 0 }
 0x232   : > { %2245 = vst [vmem:[#allocation3 + $0x40] sm:$0xff] %v10496_v9  ;;  %v9102_v16 = vpop.eup %9101  ;;  %v1635_v14 = vadd.f32 1.0, %v9100_v31  ;;  %v7902_v60 = vpop.f32.mrb[76].mxu0  ;;  %vm10532_vm10 = vmpackc.low %vm9590_vm1, %vm2184_vm8 }
 0x233   : > { %v9104_v5 = vpop.eup %9103  ;;  %v1633_v52 = vadd.f32 1.0, %v9102_v16  ;;  %v10507_v21 = vadd.f32 %v7902_v60, %v10404_v29  ;;  %v1450_v39 = vpop.f32.mrb[77].mxu0 }
 0x234   : > { %7973 = vmatpush3.bf16.msra.mxu0 %v10362_v49  ;;  %v9106_v0 = vpop.eup %9105  ;;  %9107 = vrcp.f32 %v1635_v14  ;;  %v1636_v1 = vadd.f32 1.0, %v9104_v5  ;;  %v10511_v51 = vadd.f32 %v10404_v29, %v1450_v39  ;;  %v7903_v15 = vpop.f32.mrb[78].mxu0  ;;  %v12358_v5 = vmov 0 }
 0x235   : > { %7974 = vmatprep.subr.bf16.mxu0 %v10369_v7  ;;  %9109 = vrcp.f32 %v1633_v52  ;;  %v1634_v17 = vadd.f32 1.0, %v9106_v0  ;;  %v6863_v31 = vmul.f32 -1.442695, %v10507_v21  ;;  %v10516_v16 = vadd.f32 %v7903_v15, %v10404_v29  ;;  %v1453_v60 = vpop.f32.mrb[79].mxu0 }
 0x236   : > { %9111 = vrcp.f32 %v1636_v1  ;;  %v6861_v49 = vmul.f32 -1.442695, %v10511_v51  ;;  %v10520_v14 = vadd.f32 %v10404_v29, %v1453_v60  ;;  %v12359_v5 = vsel %vm10524_vm9, 4294967295, %v12358_v5 }
 0x237   : > { %9113 = vrcp.f32 %v1634_v17  ;;  %v6864_v3 = vmul.f32 -1.442695, %v10516_v16  ;;  %12360 = vst [vmem:[#allocation69_spill] sm:$0xff] %v12359_v5  ;;  %v2311_v1 = vld [vmem:[#allocation3 + $0x37] sm:$0xff]  ;;  %v12361_v17 = vmov 0  ;;  %v8760_v5 = vld [vmem:[%s12172_s5 + $0x168] sm:$0xff]  }
 0x238   : > { %v2314_v0 = vld [vmem:[#allocation3 + $0x4f] sm:$0xff]  ;;  %7975 = vmatpush3.bf16.msra.mxu0 %v10369_v7  ;;  %9115 = vpow2.f32 %v6863_v31  ;;  %v6862_v15 = vmul.f32 -1.442695, %v10520_v14  ;;  %v12362_v17 = vsel %vm10532_vm10, 4294967295, %v12361_v17 }
 0x239   : > { %v2312_v52 = vld [vmem:[#allocation3 + $0x3f] sm:$0xff]  ;;  %v2313_v39 = vld [vmem:[#allocation3 + $0x47] sm:$0xff]  ;;  %7976 = vmatprep.subr.bf16.mxu0 %v10376_v8  ;;  %9117 = vpow2.f32 %v6861_v49  ;;  %12363 = vst [vmem:[#allocation70_spill] sm:$0xff] %v12362_v17 }
 0x23a   : > { %v6915_v18 = vpack.c.bf16 %v2312_v52, %v2311_v1  ;;  %v6918_v60 = vpack.c.bf16 %v2314_v0, %v2313_v39  ;;  %9119 = vpow2.f32 %v6864_v3  ;;  %v1770_v1 = vadd.s32 80, %v9789_v10  ;;  %v3596_v61 = vld [vmem:[#allocation3 + $0x3f] sm:$0xff] }
 0x23b   : > { %9121 = vpow2.f32 %v6862_v15  ;;  %v1772_v0 = vadd.s32 96, %v9789_v10 }
 0x23c   : > { %7941 = vmatmul.mubr.msk.bf16.gmra.mrb[100].mxu0 %vm10524_vm9, %v6915_v18  ;;  %v1866_v12 = vand.u32 15, %v1770_v1 }
 0x23d   : > { %7944 = vmatprep.mubr.msk.bf16.mxu0 %vm10532_vm10, %v6918_v60  ;;  %7977 = vmatpush3.bf16.msra.mxu0 %v10376_v8  ;;  %v1880_v50 = vand.u32 15, %v1772_v0 }
 0x23e   : > { %7978 = vmatprep.subr.bf16.mxu0 %v10383_v11  ;;  %v9108_v7 = vpop.eup %9107  ;;  %vm2186_vm11 = vcmp.ne.s32.totalorder %v1866_v12, 0 }
 0x23f   : > { %v9110_v31 = vpop.eup %9109  ;;  %v1731_v49 = vmul.f32 %v9108_v7, %v10451_v36  ;;  %vm2188_vm12 = vcmp.ne.s32.totalorder %v1880_v50, 0  ;;  %vm10574_vm13 = vmpackc.low %vm9590_vm1, %vm2186_vm11 }
 0x240   : > { %v9112_v52 = vpop.eup %9111  ;;  %v1729_v3 = vmul.f32 %v9110_v31, %v10454_v55  ;;  %vm10579_vm14 = vmpackc.low %vm9590_vm1, %vm2188_vm12 }
 0x241   : > { %7979 = vmatpush3.bf16.msra.mxu0 %v10383_v11  ;;  %v9114_v15 = vpop.eup %9113  ;;  %2250 = vst [vmem:[#allocation3 + $0x68] sm:$0xff] %v1731_v49  ;;  %v1732_v39 = vmul.f32 %v9112_v52, %v10458_v47 }
 0x242   : > { %7980 = vmatprep.subr.bf16.mxu0 %v10390_v45  ;;  %v9116_v8 = vpop.eup %9115  ;;  %2248 = vst [vmem:[#allocation3 + $0x58] sm:$0xff] %v1729_v3  ;;  %v1730_v18 = vmul.f32 %v9114_v15, %v10462_v6 }
 0x243   : > { %v7906_v36 = vpop.f32.mrb[80].mxu0  ;;  %v9118_v60 = vpop.eup %9117  ;;  %2251 = vst [vmem:[#allocation3 + $0x70] sm:$0xff] %v1732_v39  ;;  %v1639_v7 = vadd.f32 1.0, %v9116_v8  ;;  %v10553_v11 = vpack.c.bf16 %v1732_v39, %v1731_v49 }
 0x244   : > { %v10551_v55 = vadd.f32 %v7906_v36, %v10404_v29  ;;  %v1466_v31 = vpop.f32.mrb[81].mxu0  ;;  %v9120_v30 = vpop.eup %9119  ;;  %2249 = vst [vmem:[#allocation3 + $0x60] sm:$0xff] %v1730_v18  ;;  %v1637_v47 = vadd.f32 1.0, %v9118_v60  ;;  %v10559_v6 = vpack.c.bf16 %v1730_v18, %v1729_v3 }
 0x245   : > { %v10556_v52 = vadd.f32 %v10404_v29, %v1466_v31  ;;  %v7907_v25 = vpop.f32.mrb[82].mxu0  ;;  %7981 = vmatpush3.bf16.msra.mxu0 %v10390_v45  ;;  %v9122_v15 = vpop.eup %9121  ;;  %9123 = vrcp.f32 %v1639_v7  ;;  %v1640_v8 = vadd.f32 1.0, %v9120_v30 }
 0x246   : > { %v6867_v36 = vmul.f32 -1.442695, %v10551_v55  ;;  %v10563_v49 = vadd.f32 %v7907_v25, %v10404_v29  ;;  %v1469_v1 = vpop.f32.mrb[83].mxu0  ;;  %7982 = vmatprep.subr.bf16.mxu0 %v10397_v43  ;;  %9125 = vrcp.f32 %v1637_v47  ;;  %v1638_v39 = vadd.f32 1.0, %v9122_v15  ;;  %v8779_v47 = vld [vmem:[%s12172_s5 + $0x200] sm:$0xff]  }
 0x247   : > { %v6865_v60 = vmul.f32 -1.442695, %v10556_v52  ;;  %v10568_v0 = vadd.f32 %v10404_v29, %v1469_v1  ;;  %9127 = vrcp.f32 %v1640_v8 }
 0x248   : > { %v6868_v45 = vmul.f32 -1.442695, %v10563_v49  ;;  %9129 = vrcp.f32 %v1638_v39 }
 0x249   : > { %v6866_v30 = vmul.f32 -1.442695, %v10568_v0  ;;  %7983 = vmatpush3.bf16.msra.mxu0 %v10397_v43  ;;  %9131 = vpow2.f32 %v6867_v36  ;;  %v2315_v18 = vld [vmem:[#allocation3 + $0x57] sm:$0xff]  ;;  %v1774_v36 = vadd.s32 112, %v9789_v10 }
 0x24a   : > { %9133 = vpow2.f32 %v6865_v60  ;;  %v2318_v3 = vld [vmem:[#allocation3 + $0x6f] sm:$0xff]  ;;  %v1776_v60 = vadd.s32 128, %v9789_v10 }
 0x24b   : > { %9135 = vpow2.f32 %v6868_v45  ;;  %v2316_v7 = vld [vmem:[#allocation3 + $0x5f] sm:$0xff]  ;;  %v2317_v31 = vld [vmem:[#allocation3 + $0x67] sm:$0xff] }
 0x24c   : > { %9137 = vpow2.f32 %v6866_v30  ;;  %v6921_v12 = vpack.c.bf16 %v2316_v7, %v2315_v18  ;;  %v6924_v43 = vpack.c.bf16 %v2318_v3, %v2317_v31  ;;  %v1908_v4 = vand.u32 15, %v1776_v60 }
 0x24e   : > { %7945 = vmatmul.mubr.msk.bf16.gmra.mrb[104].mxu0 %vm10574_vm13, %v6921_v12  ;;  %vm2192_vm0 = vcmp.ne.s32.totalorder %v1908_v4, 0 }
 0x24f   : > { %v9124_v50 = vpop.eup %9123  ;;  %7948 = vmatprep.mubr.msk.bf16.mxu0 %vm10579_vm14, %v6924_v43  ;;  %vm10619_vm4 = vmpackc.low %vm9590_vm1, %vm2192_vm0 }
 0x250   : > { %v9126_v15 = vpop.eup %9125  ;;  %v1735_v8 = vmul.f32 %v9124_v50, %v10507_v21  ;;  %v1894_v50 = vand.u32 15, %v1774_v36 }
 0x251   : > { %v9128_v1 = vpop.eup %9127  ;;  %v1733_v39 = vmul.f32 %v9126_v15, %v10511_v51 }
 0x252   : > { %v9130_v45 = vpop.eup %9129  ;;  %2254 = vst [vmem:[#allocation3 + $0x88] sm:$0xff] %v1735_v8  ;;  %v1736_v30 = vmul.f32 %v9128_v1, %v10516_v16  ;;  %vm2190_vm15 = vcmp.ne.s32.totalorder %v1894_v50, 0  ;;  %v12370_v50 = vmov 0 }
 0x253   : > { %v9132_v3 = vpop.eup %9131  ;;  %2252 = vst [vmem:[#allocation3 + $0x78] sm:$0xff] %v1733_v39  ;;  %v1734_v18 = vmul.f32 %v9130_v45, %v10520_v14  ;;  %vm10614_vm3 = vmpackc.low %vm9590_vm1, %vm2190_vm15  ;;  %v12371_v50 = vsel %vm10619_vm4, 4294967295, %v12370_v50 }
 0x254   : > { %v7910_v7 = vpop.f32.mrb[84].mxu0  ;;  %v9134_v31 = vpop.eup %9133  ;;  %2255 = vst [vmem:[#allocation3 + $0x90] sm:$0xff] %v1736_v30  ;;  %v1643_v12 = vadd.f32 1.0, %v9132_v3  ;;  %v10596_v51 = vpack.c.bf16 %v1736_v30, %v1735_v8 }
 0x255   : > { %v10594_v21 = vadd.f32 %v7910_v7, %v10404_v29  ;;  %v1482_v43 = vpop.f32.mrb[85].mxu0  ;;  %v9136_v15 = vpop.eup %9135  ;;  %2253 = vst [vmem:[#allocation3 + $0x80] sm:$0xff] %v1734_v18  ;;  %v1641_v53 = vadd.f32 1.0, %v9134_v31  ;;  %v10601_v14 = vpack.c.bf16 %v1734_v18, %v1733_v39 }
 0x256   : > { %v10599_v16 = vadd.f32 %v10404_v29, %v1482_v43  ;;  %v7911_v1 = vpop.f32.mrb[86].mxu0  ;;  %v9138_v45 = vpop.eup %9137  ;;  %9139 = vrcp.f32 %v1643_v12  ;;  %v1644_v3 = vadd.f32 1.0, %v9136_v15 }
 0x257   : > { %v6871_v7 = vmul.f32 -1.442695, %v10594_v21  ;;  %v10605_v34 = vadd.f32 %v7911_v1, %v10404_v29  ;;  %v1485_v8 = vpop.f32.mrb[87].mxu0  ;;  %9141 = vrcp.f32 %v1641_v53  ;;  %v1642_v36 = vadd.f32 1.0, %v9138_v45 }
 0x258   : > { %v6869_v30 = vmul.f32 -1.442695, %v10599_v16  ;;  %v10609_v31 = vadd.f32 %v10404_v29, %v1485_v8  ;;  %9143 = vrcp.f32 %v1644_v3  ;;  %v1778_v8 = vadd.s32 144, %v9789_v10 }
 0x259   : > { %v6872_v39 = vmul.f32 -1.442695, %v10605_v34  ;;  %9145 = vrcp.f32 %v1642_v36 }
 0x25a   : > { %v6870_v60 = vmul.f32 -1.442695, %v10609_v31  ;;  %9147 = vpow2.f32 %v6871_v7  ;;  %v2319_v12 = vld [vmem:[#allocation3 + $0x77] sm:$0xff]  ;;  %v1922_v38 = vand.u32 15, %v1778_v8 }
 0x25b   : > { %9149 = vpow2.f32 %v6869_v30  ;;  %v2322_v53 = vld [vmem:[#allocation3 + $0x8f] sm:$0xff] }
 0x25c   : > { %9151 = vpow2.f32 %v6872_v39  ;;  %v2320_v43 = vld [vmem:[#allocation3 + $0x7f] sm:$0xff]  ;;  %v2321_v15 = vld [vmem:[#allocation3 + $0x87] sm:$0xff]  ;;  %v1780_v39 = vadd.s32 160, %v9789_v10  ;;  %vm2194_vm7 = vcmp.ne.s32.totalorder %v1922_v38, 0 }
 0x25d   : > { %9153 = vpow2.f32 %v6870_v60  ;;  %v6927_v1 = vpack.c.bf16 %v2320_v43, %v2319_v12  ;;  %v6930_v45 = vpack.c.bf16 %v2322_v53, %v2321_v15  ;;  %vm10663_vm11 = vmpackc.low %vm9590_vm1, %vm2194_vm7  ;;  %v3604_v57 = vld [vmem:[#allocation3 + $0x7f] sm:$0xff] }
 0x25f   : > { %7949 = vmatmul.mubr.msk.bf16.gmra.mrb[108].mxu0 %vm10614_vm3, %v6927_v1 }
 0x260   : > { %v9140_v4 = vpop.eup %9139  ;;  %7952 = vmatprep.mubr.msk.bf16.mxu0 %vm10619_vm4, %v6930_v45 }
 0x261   : > { %v9142_v3 = vpop.eup %9141  ;;  %v1739_v7 = vmul.f32 %v9140_v4, %v10551_v55 }
 0x262   : > { %v9144_v36 = vpop.eup %9143  ;;  %v1737_v30 = vmul.f32 %v9142_v3, %v10556_v52 }
 0x263   : > { %v9146_v60 = vpop.eup %9145  ;;  %2258 = vst [vmem:[#allocation3 + $0xa8] sm:$0xff] %v1739_v7  ;;  %v1740_v53 = vmul.f32 %v9144_v36, %v10563_v49 }
 0x264   : > { %v7914_v12 = vpop.f32.mrb[88].mxu0  ;;  %v9148_v43 = vpop.eup %9147  ;;  %v1738_v45 = vmul.f32 %v9146_v60, %v10568_v0  ;;  %2256 = vst [vmem:[#allocation3 + $0x98] sm:$0xff] %v1737_v30  ;;  %v1936_v0 = vand.u32 15, %v1780_v39 }
 0x265   : > { %v10633_v15 = vadd.f32 %v7914_v12, %v10404_v29  ;;  %v1498_v1 = vpop.f32.mrb[89].mxu0  ;;  %v9150_v55 = vpop.eup %9149  ;;  %2259 = vst [vmem:[#allocation3 + $0xb0] sm:$0xff] %v1740_v53  ;;  %v1647_v4 = vadd.f32 1.0, %v9148_v43  ;;  %v10639_v59 = vpack.c.bf16 %v1740_v53, %v1739_v7  ;;  %v8732_v7 = vld [vmem:[%s12172_s5 + $0x48] sm:$0xff]  }
 0x266   : > { %v10637_v52 = vadd.f32 %v10404_v29, %v1498_v1  ;;  %v7915_v3 = vpop.f32.mrb[90].mxu0  ;;  %v9152_v49 = vpop.eup %9151  ;;  %v1645_v36 = vadd.f32 1.0, %v9150_v55  ;;  %2257 = vst [vmem:[#allocation3 + $0xa0] sm:$0xff] %v1738_v45  ;;  %v10644_v54 = vpack.c.bf16 %v1738_v45, %v1737_v30  ;;  %vm2196_vm8 = vcmp.ne.s32.totalorder %v1936_v0, 0  ;;  %v8733_v45 = vld [vmem:[%s12172_s5 + $0x50] sm:$0xff]   ;;  %v8734_v0 = vld [vmem:[%s12172_s5 + $0x58] sm:$0xff]  }
 0x267   : > { %v10642_v63 = vadd.f32 %v7915_v3, %v10404_v29  ;;  %v1501_v12 = vpop.f32.mrb[91].mxu0  ;;  %v9154_v60 = vpop.eup %9153  ;;  %9155 = vrcp.f32 %v1647_v4  ;;  %v1648_v43 = vadd.f32 1.0, %v9152_v49  ;;  %v6875_v1 = vmul.f32 -1.442695, %v10633_v15  ;;  %vm10670_vm12 = vmpackc.low %vm9590_vm1, %vm2196_vm8 }
 0x268   : > { %v10648_v20 = vadd.f32 %v10404_v29, %v1501_v12  ;;  %9157 = vrcp.f32 %v1645_v36  ;;  %v1646_v8 = vadd.f32 1.0, %v9154_v60  ;;  %v6873_v53 = vmul.f32 -1.442695, %v10637_v52  ;;  %8000 = vmatprep.mubr.bf16.mxu1 %v10644_v54 }
 0x269   : > { %9159 = vrcp.f32 %v1648_v43  ;;  %v6876_v30 = vmul.f32 -1.442695, %v10642_v63  ;;  %8001 = vmatmul.mubr.bf16.vlgmr.msra.gmra.mrb[0].mxu1 %v10639_v59  ;;  %v12372_v55 = vmov 0  ;;  %v12374_v36 = vmov 0 }
 0x26a   : > { %9161 = vrcp.f32 %v1646_v8  ;;  %v6874_v39 = vmul.f32 -1.442695, %v10648_v20  ;;  %8017 = vmatpush3.bf16.msra.mxu1 %v10413_v40  ;;  %v12373_v55 = vsel %vm10663_vm11, 4294967295, %v12372_v55  ;;  %v12375_v36 = vsel %vm10670_vm12, 4294967295, %v12374_v36 }
 0x26b   : > { %9163 = vpow2.f32 %v6875_v1  ;;  %8018 = vmatprep.subr.bf16.mxu1 %v8732_v7  ;;  %v2323_v38 = vld [vmem:[#allocation3 + $0x97] sm:$0xff]  ;;  %v1782_v8 = vadd.s32 176, %v9789_v10 }
 0x26c   : > { %9165 = vpow2.f32 %v6873_v53  ;;  %v2326_v4 = vld [vmem:[#allocation3 + $0xaf] sm:$0xff] }
 0x26d   : > { %9167 = vpow2.f32 %v6876_v30  ;;  %v2324_v3 = vld [vmem:[#allocation3 + $0x9f] sm:$0xff]  ;;  %v2325_v49 = vld [vmem:[#allocation3 + $0xa7] sm:$0xff]  ;;  %v1784_v30 = vadd.s32 192, %v9789_v10  ;;  %v1950_v13 = vand.u32 15, %v1782_v8 }
 0x26e   : > { %9169 = vpow2.f32 %v6874_v39  ;;  %v10667_v40 = vpack.c.bf16 %v2324_v3, %v2323_v38  ;;  %v10674_v12 = vpack.c.bf16 %v2326_v4, %v2325_v49  ;;  %8019 = vmatpush3.bf16.msra.mxu1 %v8732_v7  ;;  %v8735_v39 = vld [vmem:[%s12172_s5 + $0x60] sm:$0xff]  }
 0x26f   : > { %8020 = vmatprep.subr.bf16.mxu1 %v8733_v45  ;;  %v1964_v35 = vand.u32 15, %v1784_v30  ;;  %vm2198_vm15 = vcmp.ne.s32.totalorder %v1950_v13, 0  ;;  %v8737_v30 = vld [vmem:[%s12172_s5 + $0x70] sm:$0xff]  }
 0x270   : > { %7953 = vmatmul.mubr.msk.bf16.gmra.mrb[112].mxu0 %vm10663_vm11, %v10667_v40  ;;  %vm10723_vm7 = vmpackc.low %vm9590_vm1, %vm2198_vm15 }
 0x271   : > { %v9156_v60 = vpop.eup %9155  ;;  %7956 = vmatprep.mubr.msk.bf16.mxu0 %vm10670_vm12, %v10674_v12  ;;  %vm2200_vm0 = vcmp.ne.s32.totalorder %v1964_v35, 0 }
 0x272   : > { %v9158_v43 = vpop.eup %9157  ;;  %v1743_v1 = vmul.f32 %v9156_v60, %v10594_v21  ;;  %8021 = vmatpush3.bf16.msra.mxu1 %v8733_v45  ;;  %vm10730_vm8 = vmpackc.low %vm9590_vm1, %vm2200_vm0 }
 0x273   : > { %v9160_v7 = vpop.eup %9159  ;;  %v1741_v53 = vmul.f32 %v9158_v43, %v10599_v16  ;;  %8022 = vmatprep.subr.bf16.mxu1 %v8734_v0  ;;  %v7918_v3 = vpop.f32.mrb[92].mxu0 }
 0x274   : > { %v9162_v4 = vpop.eup %9161  ;;  %2262 = vst [vmem:[#allocation3 + $0xc8] sm:$0xff] %v1743_v1  ;;  %v1744_v38 = vmul.f32 %v9160_v7, %v10605_v34  ;;  %v10695_v45 = vadd.f32 %v7918_v3, %v10404_v29  ;;  %v1514_v16 = vpop.f32.mrb[93].mxu0 }
 0x275   : > { %v9164_v49 = vpop.eup %9163  ;;  %2260 = vst [vmem:[#allocation3 + $0xb8] sm:$0xff] %v1741_v53  ;;  %v1742_v21 = vmul.f32 %v9162_v4, %v10609_v31  ;;  %v10698_v37 = vadd.f32 %v10404_v29, %v1514_v16  ;;  %v7919_v26 = vpop.f32.mrb[94].mxu0 }
 0x276   : > { %v9166_v60 = vpop.eup %9165  ;;  %2263 = vst [vmem:[#allocation3 + $0xd0] sm:$0xff] %v1744_v38  ;;  %v1651_v43 = vadd.f32 1.0, %v9164_v49  ;;  %v10700_v56 = vpack.c.bf16 %v1744_v38, %v1743_v1  ;;  %8023 = vmatpush3.bf16.msra.mxu1 %v8734_v0  ;;  %v10703_v31 = vadd.f32 %v7919_v26, %v10404_v29  ;;  %v1517_v4 = vpop.f32.mrb[95].mxu0  ;;  %v6879_v24 = vmul.f32 -1.442695, %v10695_v45  ;;  %v8736_v0 = vld [vmem:[%s12172_s5 + $0x68] sm:$0xff]  }
 0x277   : > { %v9168_v34 = vpop.eup %9167  ;;  %2261 = vst [vmem:[#allocation3 + $0xc0] sm:$0xff] %v1742_v21  ;;  %v1649_v7 = vadd.f32 1.0, %v9166_v60  ;;  %v10705_v3 = vpack.c.bf16 %v1742_v21, %v1741_v53  ;;  %8024 = vmatprep.subr.bf16.mxu1 %v8735_v39  ;;  %v10709_v1 = vadd.f32 %v10404_v29, %v1517_v4  ;;  %v6877_v8 = vmul.f32 -1.442695, %v10698_v37 }
 0x278   : > { %v9170_v49 = vpop.eup %9169  ;;  %9171 = vrcp.f32 %v1651_v43  ;;  %v1652_v16 = vadd.f32 1.0, %v9168_v34  ;;  %v6880_v53 = vmul.f32 -1.442695, %v10703_v31  ;;  %v12376_v38 = vmov 0  ;;  %v8738_v34 = vld [vmem:[%s12172_s5 + $0x78] sm:$0xff]  }
 0x279   : > { %9173 = vrcp.f32 %v1649_v7  ;;  %v1650_v26 = vadd.f32 1.0, %v9170_v49  ;;  %8004 = vmatprep.mubr.bf16.mxu1 %v10705_v3  ;;  %v6878_v29 = vmul.f32 -1.442695, %v10709_v1  ;;  %v12377_v38 = vsel %vm10723_vm7, 4294967295, %v12376_v38 }
 0x27a   : > { %9175 = vrcp.f32 %v1652_v16  ;;  %8005 = vmatmul.mubr.bf16.gmra.mrb[4].mxu1 %v10700_v56  ;;  %v1786_v16 = vadd.s32 208, %v9789_v10 }
 0x27b   : > { %9177 = vrcp.f32 %v1650_v26  ;;  %8025 = vmatpush3.bf16.msra.mxu1 %v8735_v39 }
 0x27c   : > { %9179 = vpow2.f32 %v6879_v24  ;;  %8026 = vmatprep.subr.bf16.mxu1 %v8736_v0  ;;  %v2327_v13 = vld [vmem:[#allocation3 + $0xb7] sm:$0xff]  ;;  %v12378_v24 = vmov 0 }
 0x27d   : > { %9181 = vpow2.f32 %v6877_v8  ;;  %v2330_v21 = vld [vmem:[#allocation3 + $0xcf] sm:$0xff]  ;;  %v12379_v24 = vsel %vm10730_vm8, 4294967295, %v12378_v24  ;;  %v10751_v8 = vld [vmem:[%s12172_s5 + $0x80] sm:$0xff]   ;;  %v4285_v2 = vld [vmem:[#allocation3 + $0xb7] sm:$0xff] }
 0x27e   : > { %9183 = vpow2.f32 %v6880_v53  ;;  %v2328_v60 = vld [vmem:[#allocation3 + $0xbf] sm:$0xff]  ;;  %v2329_v43 = vld [vmem:[#allocation3 + $0xc7] sm:$0xff] }
 0x27f   : > { %9185 = vpow2.f32 %v6878_v29  ;;  %v10727_v39 = vpack.c.bf16 %v2328_v60, %v2327_v13  ;;  %v10734_v35 = vpack.c.bf16 %v2330_v21, %v2329_v43  ;;  %8027 = vmatpush3.bf16.msra.mxu1 %v8736_v0  ;;  %v1788_v21 = vadd.s32 224, %v9789_v10 }
 0x280   : > { %8028 = vmatprep.subr.bf16.mxu1 %v8737_v30  ;;  %v1978_v43 = vand.u32 15, %v1786_v16 }
 0x281   : > { %7957 = vmatmul.mubr.msk.bf16.gmra.mrb[116].mxu0 %vm10723_vm7, %v10727_v39  ;;  %v1992_v42 = vand.u32 15, %v1788_v21  ;;  %v12382_v21 = vmov 0 }
 0x282   : > { %v9172_v7 = vpop.eup %9171  ;;  %7960 = vmatprep.mubr.msk.bf16.mxu0 %vm10730_vm8, %v10734_v35  ;;  %vm2202_vm15 = vcmp.ne.s32.totalorder %v1978_v43, 0 }
 0x283   : > { %v9174_v4 = vpop.eup %9173  ;;  %v1747_v49 = vmul.f32 %v9172_v7, %v10633_v15  ;;  %8029 = vmatpush3.bf16.msra.mxu1 %v8737_v30  ;;  %vm2204_vm0 = vcmp.ne.s32.totalorder %v1992_v42, 0  ;;  %vm10764_vm8 = vmpackc.low %vm9590_vm1, %vm2202_vm15 }
 0x284   : > { %v9176_v0 = vpop.eup %9175  ;;  %v1745_v26 = vmul.f32 %v9174_v4, %v10637_v52  ;;  %8030 = vmatprep.subr.bf16.mxu1 %v8738_v34  ;;  %vm10771_vm7 = vmpackc.low %vm9590_vm1, %vm2204_vm0 }
 0x285   : > { %v9178_v53 = vpop.eup %9177  ;;  %2266 = vst [vmem:[#allocation3 + $0xe8] sm:$0xff] %v1747_v49  ;;  %v1748_v29 = vmul.f32 %v9176_v0, %v10642_v63  ;;  %v12383_v21 = vsel %vm10771_vm7, 4294967295, %v12382_v21 }
 0x286   : > { %v9180_v13 = vpop.eup %9179  ;;  %2264 = vst [vmem:[#allocation3 + $0xd8] sm:$0xff] %v1745_v26  ;;  %v1746_v15 = vmul.f32 %v9178_v53, %v10648_v20 }
 0x287   : > { %v9182_v30 = vpop.eup %9181  ;;  %2267 = vst [vmem:[#allocation3 + $0xf0] sm:$0xff] %v1748_v29  ;;  %v1655_v60 = vadd.f32 1.0, %v9180_v13  ;;  %v10756_v52 = vpack.c.bf16 %v1748_v29, %v1747_v49  ;;  %8031 = vmatpush3.bf16.msra.mxu1 %v8738_v34  ;;  %v12380_v34 = vmov 0 }
 0x288   : > { %v9184_v7 = vpop.eup %9183  ;;  %2265 = vst [vmem:[#allocation3 + $0xe0] sm:$0xff] %v1746_v15  ;;  %v1653_v4 = vadd.f32 1.0, %v9182_v30  ;;  %v10758_v23 = vpack.c.bf16 %v1746_v15, %v1745_v26  ;;  %8064 = vmatprep.subr.bf16.mxu1 %v10751_v8  ;;  %v12381_v34 = vsel %vm10764_vm8, 4294967295, %v12380_v34 }
 0x289   : > { %v9186_v63 = vpop.eup %9185  ;;  %9187 = vrcp.f32 %v1655_v60  ;;  %v1656_v0 = vadd.f32 1.0, %v9184_v7  ;;  %v1790_v60 = vadd.s32 240, %v9789_v10 }
 0x28a   : > { %9189 = vrcp.f32 %v1653_v4  ;;  %v1654_v20 = vadd.f32 1.0, %v9186_v63  ;;  %8008 = vmatprep.mubr.bf16.mxu1 %v10758_v23 }
 0x28b   : > { %9191 = vrcp.f32 %v1656_v0  ;;  %8009 = vmatmul.mubr.bf16.gmra.mrb[8].mxu1 %v10756_v52 }
 0x28c   : > { %9193 = vrcp.f32 %v1654_v20 }
 0x28d   : > { %v2331_v16 = vld [vmem:[#allocation3 + $0xd7] sm:$0xff] }
 0x28e   : > { %v2334_v49 = vld [vmem:[#allocation3 + $0xef] sm:$0xff] }
 0x28f   : > { %v2332_v26 = vld [vmem:[#allocation3 + $0xdf] sm:$0xff]  ;;  %v2333_v53 = vld [vmem:[#allocation3 + $0xe7] sm:$0xff] }
 0x290   : > { %v10768_v29 = vpack.c.bf16 %v2332_v26, %v2331_v16  ;;  %v10775_v13 = vpack.c.bf16 %v2334_v49, %v2333_v53  ;;  %v2006_v49 = vand.u32 15, %v1790_v60  ;;  %v9579_v26 = vld [vmem:[#allocation3] sm:$0xff] }
 0x291   : > { %v3216_v41 = vld [vmem:[#allocation3 + $0xe1] sm:$0xff] }
 0x292   : > { %7961 = vmatmul.mubr.msk.bf16.gmra.mrb[120].mxu0 %vm10764_vm8, %v10768_v29  ;;  %vm2206_vm15 = vcmp.ne.s32.totalorder %v2006_v49, 0  ;;  %v2891_v49 = vld [vmem:[#allocation3 + $0x48] sm:$0xff]  ;;  %v4290_v18 = vld [vmem:[#allocation3 + $0xdf] sm:$0xff] }
 0x293   : > { %v9188_v42 = vpop.eup %9187  ;;  %7964 = vmatprep.mubr.msk.bf16.mxu0 %vm10771_vm7, %v10775_v13  ;;  %vm10795_vm0 = vmpackc.low %vm9590_vm1, %vm2206_vm15 }
 0x294   : > { %v9190_v15 = vpop.eup %9189  ;;  %v1751_v30 = vmul.f32 %v9188_v42, %v10695_v45  ;;  %v10790_v45 = vpack.c.bf16 %v9579_v26, %v9579_v26  ;;  %v2888_v42 = vld [vmem:[#allocation3 + $0x30] sm:$0xff] }
 0x295   : > { %v9192_v43 = vpop.eup %9191  ;;  %v1749_v7 = vmul.f32 %v9190_v15, %v10698_v37  ;;  %v12385_v37 = vmov 0 }
 0x296   : > { %v9194_v4 = vpop.eup %9193  ;;  %2270 = vst [vmem:[#allocation3 + $0x108] sm:$0xff] %v1751_v30  ;;  %v1752_v63 = vmul.f32 %v9192_v43, %v10703_v31  ;;  %12384 = vst [vmem:[#allocation71_spill] sm:$0xff] %v10790_v45  ;;  %v12386_v37 = vsel %vm10795_vm0, 4294967295, %v12385_v37  ;;  %v2886_v31 = vld [vmem:[#allocation3 + $0x20] sm:$0xff]  ;;  %v2887_v43 = vld [vmem:[#allocation3 + $0x28] sm:$0xff] }
 0x297   : > { %2268 = vst [vmem:[#allocation3 + $0xf8] sm:$0xff] %v1749_v7  ;;  %v1750_v0 = vmul.f32 %v9194_v4, %v10709_v1  ;;  %v2934_v4 = vpack.c.bf16 %v2888_v42, %v2887_v43  ;;  %v3192_v42 = vld [vmem:[#allocation3 + $0x21] sm:$0xff]  ;;  %v12393_v43 = vmov 0 }
 0x298   : > { %2271 = vst [vmem:[#allocation3 + $0x110] sm:$0xff] %v1752_v63  ;;  %v2304_v20 = vpack.c.bf16 %v1752_v63, %v1751_v30  ;;  %v2885_v30 = vld [vmem:[#allocation3 + $0x18] sm:$0xff]  ;;  %v12387_v63 = vpack.c.bf16 %v10442_v44, %v10435_v32  ;;  %v12388_v44 = vpack.c.bf16 %v10438_v19, %v10432_v46  ;;  %v8744_v46 = vld [vmem:[%s12172_s5 + $0xa8] sm:$0xff]   ;;  %v12390_v19 = vpack.c.bf16 %v10491_v33, %v10482_v58  ;;  %v8747_v58 = vld [vmem:[%s12172_s5 + $0xc0] sm:$0xff]  }
 0x299   : > { %2269 = vst [vmem:[#allocation3 + $0x100] sm:$0xff] %v1750_v0  ;;  %v10788_v16 = vpack.c.bf16 %v1750_v0, %v1749_v7  ;;  %v2933_v60 = vpack.c.bf16 %v2886_v31, %v2885_v30  ;;  %v8740_v7 = vld [vmem:[%s12172_s5 + $0x88] sm:$0xff]   ;;  %v8741_v0 = vld [vmem:[%s12172_s5 + $0x90] sm:$0xff]   ;;  %v8742_v32 = vld [vmem:[%s12172_s5 + $0x98] sm:$0xff]   ;;  %v12389_v31 = vpack.c.bf16 %v10496_v9, %v10487_v48  ;;  %v1769_v30 = vadd.s32 72, %v9789_v10 }
 0x29a   : > { %v8745_v48 = vld [vmem:[%s12172_s5 + $0xb0] sm:$0xff]  }
 0x29b   : > { %8012 = vmatprep.mubr.bf16.mxu1 %v10788_v16 }
 0x29c   : > { %8013 = vmatmul.mubr.bf16.gmra.mrb[12].mxu1 %v2304_v20  ;;  %v2889_v20 = vld [vmem:[#allocation3 + $0x38] sm:$0xff] }
 0x29d   : > { %8032 = vmatprep.mubr.bf16.mxu1 %v10790_v45  ;;  %v2935_v26 = vpack.c.bf16 %v10496_v9, %v2889_v20  ;;  %v8746_v9 = vld [vmem:[%s12172_s5 + $0xb8] sm:$0xff]  }
 0x29e   : > { %v2335_v1 = vld [vmem:[#allocation3 + $0xf7] sm:$0xff] }
 0x29f   : > { %v3218_v28 = vld [vmem:[#allocation3 + $0xf1] sm:$0xff] }
 0x2a0   : > { %v2336_v53 = vld [vmem:[#allocation3 + $0xff] sm:$0xff] }
 0x2a1   : > { %v10799_v15 = vpack.c.bf16 %v2336_v53, %v2335_v1  ;;  %v8743_v1 = vld [vmem:[%s12172_s5 + $0xa0] sm:$0xff]  }
 0x2a3   : > { %7965 = vmatmul.mubr.msk.bf16.gmra.mrb[124].mxu0 %vm10795_vm0, %v10799_v15 }
 0x2a4   : > { %7984 = vmatprep.mubr.bf16.mxu0 %v12387_v63  ;;  %8033 = vmatmul.mubr.bf16.vlgmr.msra.gmra.mrb[16].mxu1 %v2933_v60  ;;  %v3194_v60 = vld [vmem:[#allocation3 + $0x31] sm:$0xff]  ;;  %v8748_v63 = vld [vmem:[%s12172_s5 + $0xc8] sm:$0xff]  }
 0x2a5   : > { %8065 = vmatpush3.bf16.msra.mxu1 %v10751_v8  ;;  %8036 = vmatprep.mubr.bf16.mxu1 %v2934_v4  ;;  %v2936_v8 = vpack.c.bf16 %v10491_v33, %v2891_v49  ;;  %v1761_v33 = vadd.s32 8, %v9789_v10  ;;  %v12395_v4 = vmov 0  ;;  %v1859_v49 = vand.u32 15, %v1769_v30 }
 0x2a6   : > { %8066 = vmatprep.subr.bf16.mxu1 %v8740_v7  ;;  %v12403_v30 = vmov 0 }
 0x2a9   : > { %8067 = vmatpush3.bf16.msra.mxu1 %v8740_v7 }
 0x2aa   : > { %8068 = vmatprep.subr.bf16.mxu1 %v8741_v0 }
 0x2ab   : > { %7985 = vmatmul.mubr.bf16.vlgmr.msra.gmra.mrb[96].mxu0 %v12388_v44  ;;  %v3195_v44 = vld [vmem:[#allocation3 + $0x39] sm:$0xff] }
 0x2ac   : > { %7988 = vmatprep.mubr.bf16.mxu0 %v12389_v31  ;;  %8037 = vmatmul.mubr.bf16.gmra.mrb[20].mxu1 %v2935_v26  ;;  %v8749_v26 = vld [vmem:[%s12172_s5 + $0xd0] sm:$0xff]   ;;  %v1773_v31 = vadd.s32 104, %v9789_v10 }
 0x2ad   : > { %8040 = vmatprep.mubr.bf16.mxu1 %v2936_v8  ;;  %8069 = vmatpush3.bf16.msra.mxu1 %v8741_v0  ;;  %v3196_v8 = vld [vmem:[#allocation3 + $0x41] sm:$0xff] }
 0x2ae   : > { %8070 = vmatprep.subr.bf16.mxu1 %v8742_v32 }
 0x2b1   : > { %8071 = vmatpush3.bf16.msra.mxu1 %v8742_v32  ;;  %v1771_v32 = vadd.s32 88, %v9789_v10 }
 0x2b2   : > { %8072 = vmatprep.subr.bf16.mxu1 %v8743_v1 }
 0x2b3   : > { %7989 = vmatmul.mubr.bf16.gmra.mrb[100].mxu0 %v12390_v19  ;;  %v10903_v19 = vpack.c.bf16 %v3196_v8, %v3195_v44  ;;  %v3204_v44 = vld [vmem:[#allocation3 + $0x81] sm:$0xff]  ;;  %v1781_v8 = vadd.s32 168, %v9789_v10 }
 0x2b4   : > { %7992 = vmatprep.mubr.bf16.mxu0 %v10559_v6  ;;  %8041 = vmatmul.mubr.bf16.gmra.mrb[24].mxu1 %v10559_v6  ;;  %v1763_v6 = vadd.s32 24, %v9789_v10 }
 0x2b5   : > { %8044 = vmatprep.mubr.bf16.mxu1 %v10553_v11  ;;  %8073 = vmatpush3.bf16.msra.mxu1 %v8743_v1  ;;  %v3198_v1 = vld [vmem:[#allocation3 + $0x51] sm:$0xff] }
 0x2b6   : > { %8074 = vmatprep.subr.bf16.mxu1 %v8744_v46 }
 0x2b9   : > { %8075 = vmatpush3.bf16.msra.mxu1 %v8744_v46  ;;  %v12397_v46 = vmov 0 }
 0x2ba   : > { %8076 = vmatprep.subr.bf16.mxu1 %v8745_v48 }
 0x2bb   : > { %7993 = vmatmul.mubr.bf16.gmra.mrb[104].mxu0 %v10553_v11  ;;  %v1803_v11 = vand.u32 15, %v1761_v33  ;;  %v8750_v33 = vld [vmem:[%s12172_s5 + $0xd8] sm:$0xff]  }
 0x2bc   : > { %7996 = vmatprep.mubr.bf16.mxu0 %v10601_v14  ;;  %8045 = vmatmul.mubr.bf16.gmra.mrb[28].mxu1 %v10601_v14  ;;  %v3189_v14 = vld [vmem:[#allocation3 + $0x9] sm:$0xff] }
 0x2bd   : > { %8048 = vmatprep.mubr.bf16.mxu1 %v10596_v51  ;;  %8077 = vmatpush3.bf16.msra.mxu1 %v8745_v48  ;;  %vm2209_vm15 = vcmp.ne.s32.totalorder %v1803_v11, 15  ;;  %v3197_v48 = vld [vmem:[#allocation3 + $0x49] sm:$0xff] }
 0x2be   : > { %8078 = vmatprep.subr.bf16.mxu1 %v8746_v9  ;;  %vm10861_vm0 = vmpackc.low %vm2209_vm15, %vm9590_vm1  ;;  %v10913_v11 = vpack.c.bf16 %v3198_v1, %v3197_v48  ;;  %v12405_v1 = vmov 0 }
 0x2c1   : > { %8079 = vmatpush3.bf16.msra.mxu1 %v8746_v9  ;;  %v12399_v9 = vmov 0 }
 0x2c2   : > { %8112 = vmatprep.subr.bf16.mxu1 %v8747_v58 }
 0x2c3   : > { %7997 = vmatmul.mubr.bf16.gmra.mrb[108].mxu0 %v10596_v51  ;;  %v1765_v51 = vadd.s32 40, %v9789_v10 }
 0x2c4   : > { %8049 = vmatmul.mubr.bf16.gmra.mrb[0].mxu1 %v10644_v54  ;;  %v3190_v54 = vld [vmem:[#allocation3 + $0x11] sm:$0xff] }
 0x2c5   : > { %8052 = vmatprep.mubr.bf16.mxu1 %v10639_v59  ;;  %v12391_v59 = vmov 0  ;;  %v1831_v53 = vand.u32 15, %v1765_v51  ;;  %v1775_v51 = vadd.s32 120, %v9789_v10 }
 0x2c6   : > { %v12392_v59 = vsel %vm10861_vm0, 4294967295, %v12391_v59 }
 0x2c7   : > { %vm2213_vm8 = vcmp.ne.s32.totalorder %v1831_v53, 15  ;;  %v3202_v53 = vld [vmem:[#allocation3 + $0x71] sm:$0xff] }
 0x2c8   : > { %vm10878_vm12 = vmpackc.low %vm2213_vm8, %vm9590_vm1  ;;  %vm2217_vm8 = vcmp.ne.s32.totalorder %v1859_v49, 15  ;;  %v1779_v49 = vadd.s32 152, %v9789_v10 }
 0x2c9   : > { %v12396_v4 = vsel %vm10878_vm12, 4294967295, %v12395_v4 }
 0x2cc   : > { %8053 = vmatmul.mubr.bf16.gmra.mrb[4].mxu1 %v10705_v3  ;;  %v7010_v3 = vpack.c.bf16 %v3190_v54, %v3189_v14  ;;  %v8751_v14 = vld [vmem:[%s12172_s5 + $0xe0] sm:$0xff]  }
 0x2cd   : > { %8056 = vmatprep.mubr.bf16.mxu1 %v10700_v56  ;;  %v1817_v56 = vand.u32 15, %v1763_v6  ;;  %v1887_v6 = vand.u32 15, %v1773_v31  ;;  %v3199_v54 = vld [vmem:[#allocation3 + $0x59] sm:$0xff]  ;;  %v3206_v31 = vld [vmem:[#allocation3 + $0x91] sm:$0xff] }
 0x2cf   : > { %vm2211_vm7 = vcmp.ne.s32.totalorder %v1817_v56, 15  ;;  %v3200_v56 = vld [vmem:[#allocation3 + $0x61] sm:$0xff] }
 0x2d0   : > { %vm10871_vm15 = vmpackc.low %vm2211_vm7, %vm9590_vm1 }
 0x2d1   : > { %v12394_v43 = vsel %vm10871_vm15, 4294967295, %v12393_v43 }
 0x2d4   : > { %8057 = vmatmul.mubr.bf16.gmra.mrb[8].mxu1 %v10758_v23  ;;  %v1767_v23 = vadd.s32 56, %v9789_v10 }
 0x2d5   : > { %8060 = vmatprep.mubr.bf16.mxu1 %v10756_v52  ;;  %v3191_v52 = vld [vmem:[#allocation3 + $0x19] sm:$0xff] }
 0x2d6   : > { %v10875_v7 = vpack.c.bf16 %v3192_v42, %v3191_v52  ;;  %v1845_v0 = vand.u32 15, %v1767_v23  ;;  %v12401_v23 = vmov 0  ;;  %v10931_v52 = vpack.c.bf16 %v3200_v56, %v3199_v54  ;;  %v3201_v42 = vld [vmem:[#allocation3 + $0x69] sm:$0xff] }
 0x2d7   : > { %v1943_v54 = vand.u32 15, %v1781_v8  ;;  %v1783_v56 = vadd.s32 184, %v9789_v10 }
 0x2d8   : > { %vm2215_vm7 = vcmp.ne.s32.totalorder %v1845_v0, 15 }
 0x2dc   : > { %8061 = vmatmul.mubr.bf16.gmra.mrb[12].mxu1 %v10788_v16  ;;  %v3193_v16 = vld [vmem:[#allocation3 + $0x29] sm:$0xff] }
 0x2dd   : > { %8080 = vmatprep.mubr.msk.bf16.mxu1 %vm10861_vm0, %v7010_v3  ;;  %v10885_v20 = vpack.c.bf16 %v3194_v60, %v3193_v16  ;;  %v1777_v3 = vadd.s32 136, %v9789_v10  ;;  %v1901_v60 = vand.u32 15, %v1775_v51  ;;  %v8752_v16 = vld [vmem:[%s12172_s5 + $0xe8] sm:$0xff]   ;;  %v8754_v51 = vld [vmem:[%s12172_s5 + $0xf8] sm:$0xff]  }
 0x2df   : > { %v1915_v0 = vand.u32 15, %v1777_v3  ;;  %v10981_v3 = vld [vmem:[%s12172_s5 + $0x140] sm:$0xff]  }
 0x2e4   : > { %8081 = vmatmul.mubr.msk.bf16.vlgmr.msra.gmra.mrb[16].mxu1 %vm10871_vm15, %v10875_v7  ;;  %vm10899_vm15 = vmpackc.low %vm2215_vm7, %vm9590_vm1 }
 0x2e5   : > { %8113 = vmatpush3.bf16.msra.mxu1 %v8747_v58  ;;  %8084 = vmatprep.mubr.msk.bf16.mxu1 %vm10878_vm12, %v10885_v20  ;;  %v12398_v46 = vsel %vm10899_vm15, 4294967295, %v12397_v46  ;;  %vm10906_vm12 = vmpackc.low %vm2217_vm8, %vm9590_vm1  ;;  %v1873_v58 = vand.u32 15, %v1771_v32  ;;  %vm2221_vm8 = vcmp.ne.s32.totalorder %v1887_v6, 15  ;;  %v3203_v32 = vld [vmem:[#allocation3 + $0x79] sm:$0xff]  ;;  %v1929_v6 = vand.u32 15, %v1779_v49 }
 0x2e6   : > { %8114 = vmatprep.subr.bf16.mxu1 %v8748_v63  ;;  %v12400_v9 = vsel %vm10906_vm12, 4294967295, %v12399_v9  ;;  %v10959_v48 = vpack.c.bf16 %v3204_v44, %v3203_v32  ;;  %v12411_v32 = vmov 0  ;;  %v1957_v44 = vand.u32 15, %v1783_v56  ;;  %v3214_v56 = vld [vmem:[#allocation3 + $0xd1] sm:$0xff] }
 0x2e7   : > { %vm2219_vm7 = vcmp.ne.s32.totalorder %v1873_v58, 15  ;;  %v3205_v58 = vld [vmem:[#allocation3 + $0x89] sm:$0xff] }
 0x2e9   : > { %8115 = vmatpush3.bf16.msra.mxu1 %v8748_v63  ;;  %v10941_v63 = vpack.c.bf16 %v3202_v53, %v3201_v42  ;;  %v3207_v53 = vld [vmem:[#allocation3 + $0x99] sm:$0xff]  ;;  %v3208_v42 = vld [vmem:[#allocation3 + $0xa1] sm:$0xff] }
 0x2ea   : > { %8116 = vmatprep.subr.bf16.mxu1 %v8749_v26  ;;  %v10989_v49 = vpack.c.bf16 %v3208_v42, %v3207_v53  ;;  %v12413_v53 = vmov 0 }
 0x2ec   : > { %8085 = vmatmul.mubr.msk.bf16.gmra.mrb[20].mxu1 %vm10899_vm15, %v10903_v19  ;;  %vm10927_vm15 = vmpackc.low %vm2219_vm7, %vm9590_vm1  ;;  %vm2223_vm7 = vcmp.ne.s32.totalorder %v1901_v60, 15  ;;  %v1785_v60 = vadd.s32 200, %v9789_v10 }
 0x2ed   : > { %8088 = vmatprep.mubr.msk.bf16.mxu1 %vm10906_vm12, %v10913_v11  ;;  %8117 = vmatpush3.bf16.msra.mxu1 %v8749_v26  ;;  %v12402_v23 = vsel %vm10927_vm15, 4294967295, %v12401_v23  ;;  %vm10934_vm12 = vmpackc.low %vm2221_vm8, %vm9590_vm1  ;;  %v8753_v26 = vld [vmem:[%s12172_s5 + $0xf0] sm:$0xff]   ;;  %vm2225_vm8 = vcmp.ne.s32.totalorder %v1915_v0, 15  ;;  %v12409_v0 = vmov 0 }
 0x2ee   : > { %8118 = vmatprep.subr.bf16.mxu1 %v8750_v33  ;;  %v12404_v30 = vsel %vm10934_vm12, 4294967295, %v12403_v30 }
 0x2f1   : > { %8119 = vmatpush3.bf16.msra.mxu1 %v8750_v33  ;;  %v12407_v33 = vmov 0 }
 0x2f2   : > { %8120 = vmatprep.subr.bf16.mxu1 %v8751_v14 }
 0x2f4   : > { %8089 = vmatmul.mubr.msk.bf16.gmra.mrb[24].mxu1 %vm10927_vm15, %v10931_v52  ;;  %vm10955_vm15 = vmpackc.low %vm2223_vm7, %vm9590_vm1  ;;  %vm2227_vm7 = vcmp.ne.s32.totalorder %v1929_v6, 15  ;;  %v3211_v6 = vld [vmem:[#allocation3 + $0xb9] sm:$0xff] }
 0x2f5   : > { %8092 = vmatprep.mubr.msk.bf16.mxu1 %vm10934_vm12, %v10941_v63  ;;  %8121 = vmatpush3.bf16.msra.mxu1 %v8751_v14  ;;  %v12406_v1 = vsel %vm10955_vm15, 4294967295, %v12405_v1  ;;  %vm10962_vm12 = vmpackc.low %vm2225_vm8, %vm9590_vm1  ;;  %v10969_v14 = vpack.c.bf16 %v3206_v31, %v3205_v58  ;;  %vm2229_vm8 = vcmp.ne.s32.totalorder %v1943_v54, 15  ;;  %v1971_v31 = vand.u32 15, %v1785_v60  ;;  %v3213_v60 = vld [vmem:[#allocation3 + $0xc9] sm:$0xff] }
 0x2f6   : > { %8122 = vmatprep.subr.bf16.mxu1 %v8752_v16  ;;  %v12408_v33 = vsel %vm10962_vm12, 4294967295, %v12407_v33  ;;  %v1787_v58 = vadd.s32 216, %v9789_v10  ;;  %v1789_v54 = vadd.s32 232, %v9789_v10 }
 0x2f9   : > { %8123 = vmatpush3.bf16.msra.mxu1 %v8752_v16  ;;  %v3210_v16 = vld [vmem:[#allocation3 + $0xb1] sm:$0xff] }
 0x2fa   : > { %8124 = vmatprep.subr.bf16.mxu1 %v8753_v26 }
 0x2fc   : > { %8093 = vmatmul.mubr.msk.bf16.gmra.mrb[28].mxu1 %vm10955_vm15, %v10959_v48  ;;  %vm10985_vm15 = vmpackc.low %vm2227_vm7, %vm9590_vm1  ;;  %vm2231_vm7 = vcmp.ne.s32.totalorder %v1957_v44, 15  ;;  %v11019_v44 = vpack.c.bf16 %v3214_v56, %v3213_v60  ;;  %v3217_v56 = vld [vmem:[#allocation3 + $0xe9] sm:$0xff]  ;;  %v12419_v60 = vmov 0 }
 0x2fd   : > { %8096 = vmatprep.mubr.msk.bf16.mxu1 %vm10962_vm12, %v10969_v14  ;;  %8125 = vmatpush3.bf16.msra.mxu1 %v8753_v26  ;;  %v12410_v0 = vsel %vm10985_vm15, 4294967295, %v12409_v0  ;;  %v3209_v26 = vld [vmem:[#allocation3 + $0xa9] sm:$0xff]  ;;  %vm10992_vm12 = vmpackc.low %vm2229_vm8, %vm9590_vm1  ;;  %vm2233_vm8 = vcmp.ne.s32.totalorder %v1971_v31, 15  ;;  %v1999_v31 = vand.u32 15, %v1789_v54  ;;  %v11040_v27 = vpack.c.bf16 %v3218_v28, %v3217_v56  ;;  %v3591_v28 = vld [vmem:[#allocation3 + $0x17] sm:$0xff] }
 0x2fe   : > { %8126 = vmatprep.subr.bf16.mxu1 %v8754_v51  ;;  %v12412_v32 = vsel %vm10992_vm12, 4294967295, %v12411_v32  ;;  %v10997_v8 = vpack.c.bf16 %v3210_v16, %v3209_v26  ;;  %vm11008_vm0 = vmpackc.low %vm2231_vm7, %vm9590_vm1  ;;  %v1985_v26 = vand.u32 15, %v1787_v58  ;;  %v8788_v16 = vld [vmem:[%s12174_s7 + $0x8] sm:$0xff]   ;;  %v8789_v58 = vld [vmem:[%s12174_s7 + $0x10] sm:$0xff]  }
 0x2ff   : > { %v12414_v53 = vsel %vm11008_vm0, 4294967295, %v12413_v53 }
 0x300   : > { %vm2235_vm7 = vcmp.ne.s32.totalorder %v1985_v26, 15 }
 0x301   : > { %8127 = vmatpush3.bf16.msra.mxu1 %v8754_v51  ;;  %v3212_v51 = vld [vmem:[#allocation3 + $0xc1] sm:$0xff] }
 0x302   : > { %8160 = vmatprep.subr.bf16.mxu1 %v10981_v3  ;;  %v11012_v42 = vpack.c.bf16 %v3212_v51, %v3211_v6  ;;  %v1791_v6 = vadd.s32 248, %v9789_v10  ;;  %v3215_v51 = vld [vmem:[#allocation3 + $0xd9] sm:$0xff] }
 0x303   : > { %v11033_v54 = vpack.c.bf16 %v3216_v41, %v3215_v51  ;;  %v3219_v10 = vld [vmem:[#allocation3 + $0xf9] sm:$0xff]  ;;  %v3220_v41 = vld [vmem:[#allocation3 + $0x101] sm:$0xff] }
 0x304   : > { %8097 = vmatmul.mubr.msk.bf16.gmra.mrb[0].mxu1 %vm10985_vm15, %v10989_v49  ;;  %vm11015_vm15 = vmpackc.low %vm2233_vm8, %vm9590_vm1  ;;  %vm2237_vm8 = vcmp.ne.s32.totalorder %v1999_v31, 15  ;;  %v2013_v26 = vand.u32 15, %v1791_v6  ;;  %v3592_v31 = vld [vmem:[#allocation3 + $0x1f] sm:$0xff]  ;;  %v11053_v6 = vpack.c.bf16 %v3220_v41, %v3219_v10  ;;  %v8756_v10 = vld [vmem:[%s12172_s5 + $0x148] sm:$0xff]  }
 0x305   : > { %8100 = vmatprep.mubr.msk.bf16.mxu1 %vm10992_vm12, %v10997_v8  ;;  %vm11029_vm12 = vmpackc.low %vm2235_vm7, %vm9590_vm1  ;;  %v7082_v56 = vpack.c.bf16 %v3592_v31, %v3591_v28  ;;  %v3597_v31 = vld [vmem:[#allocation3 + $0x47] sm:$0xff]  ;;  %v3598_v28 = vld [vmem:[#allocation3 + $0x4f] sm:$0xff] }
 0x306   : > { %vm2239_vm7 = vcmp.ne.s32.totalorder %v2013_v26, 15  ;;  %v3593_v26 = vld [vmem:[#allocation3 + $0x27] sm:$0xff]  ;;  %v8790_v51 = vld [vmem:[%s12174_s7 + $0x18] sm:$0xff]  }
 0x307   : > { %v11060_v45 = vpack.c.bf16 %v3594_v62, %v3593_v26  ;;  %v8757_v62 = vld [vmem:[%s12172_s5 + $0x150] sm:$0xff]  }
 0x30c   : > { %8101 = vmatmul.mubr.msk.bf16.gmra.mrb[4].mxu1 %vm11008_vm0, %v11012_v42  ;;  %vm11036_vm0 = vmpackc.low %vm2237_vm8, %vm9590_vm1 }
 0x30d   : > { %8104 = vmatprep.mubr.msk.bf16.mxu1 %vm11015_vm15, %v11019_v44  ;;  %v12420_v60 = vsel %vm11036_vm0, 4294967295, %v12419_v60  ;;  %vm11049_vm8 = vmpackc.low %vm2239_vm7, %vm9590_vm1  ;;  %vm12424_vm1 = vnez %v12375_v36  ;;  %vm12426_vm7 = vnez %v12377_v38 }
 0x30e   : > { %12421 = vst [vmem:[#allocation72_spill] sm:$0xff] %v12420_v60  ;;  %v3595_v60 = vld [vmem:[#allocation3 + $0x37] sm:$0xff] }
 0x30f   : > { %v11065_v41 = vpack.c.bf16 %v3596_v61, %v3595_v60  ;;  %v11077_v61 = vpack.c.bf16 %v3598_v28, %v3597_v31  ;;  %v3599_v60 = vld [vmem:[#allocation3 + $0x57] sm:$0xff]  ;;  %v3601_v31 = vld [vmem:[#allocation3 + $0x67] sm:$0xff]  ;;  %v3602_v28 = vld [vmem:[#allocation3 + $0x6f] sm:$0xff] }
 0x314   : > { %8105 = vmatmul.mubr.msk.bf16.gmra.mrb[8].mxu1 %vm11029_vm12, %v11033_v54 }
 0x315   : > { %8108 = vmatprep.mubr.msk.bf16.mxu1 %vm11036_vm0, %v11040_v27 }
 0x31c   : > { %8109 = vmatmul.mubr.msk.bf16.gmra.mrb[12].mxu1 %vm11049_vm8, %v11053_v6 }
 0x31d   : > { %8128 = vmatprep.mubr.msk.bf16.mxu1 %vm10338_vm2, %v7082_v56  ;;  %v3600_v56 = vld [vmem:[#allocation3 + $0x5f] sm:$0xff] }
 0x31e   : > { %v11082_v26 = vpack.c.bf16 %v3600_v56, %v3599_v60  ;;  %v11093_v56 = vpack.c.bf16 %v3602_v28, %v3601_v31  ;;  %v3603_v60 = vld [vmem:[#allocation3 + $0x77] sm:$0xff]  ;;  %v3606_v31 = vld [vmem:[#allocation3 + $0x8f] sm:$0xff] }
 0x31f   : > { %v11098_v17 = vpack.c.bf16 %v3604_v57, %v3603_v60  ;;  %v8762_v57 = vld [vmem:[%s12172_s5 + $0x178] sm:$0xff]  }
 0x324   : > { %8129 = vmatmul.mubr.msk.bf16.vlgmr.msra.gmra.mrb[16].mxu1 %vm10465_vm5, %v11060_v45 }
 0x325   : > { %8161 = vmatpush3.bf16.msra.mxu1 %v10981_v3  ;;  %8132 = vmatprep.mubr.msk.bf16.mxu1 %vm10472_vm6, %v11065_v41  ;;  %v8758_v3 = vld [vmem:[%s12172_s5 + $0x158] sm:$0xff]  }
 0x326   : > { %8162 = vmatprep.subr.bf16.mxu1 %v8756_v10 }
 0x329   : > { %8163 = vmatpush3.bf16.msra.mxu1 %v8756_v10  ;;  %v8759_v10 = vld [vmem:[%s12172_s5 + $0x160] sm:$0xff]  }
 0x32a   : > { %8164 = vmatprep.subr.bf16.mxu1 %v8757_v62 }
 0x32c   : > { %8133 = vmatmul.mubr.msk.bf16.gmra.mrb[20].mxu1 %vm10524_vm9, %v11077_v61 }
 0x32d   : > { %8136 = vmatprep.mubr.msk.bf16.mxu1 %vm10532_vm10, %v11082_v26  ;;  %8165 = vmatpush3.bf16.msra.mxu1 %v8757_v62  ;;  %v8761_v62 = vld [vmem:[%s12172_s5 + $0x170] sm:$0xff]  }
 0x32e   : > { %8166 = vmatprep.subr.bf16.mxu1 %v8758_v3 }
 0x331   : > { %8167 = vmatpush3.bf16.msra.mxu1 %v8758_v3  ;;  %v3605_v3 = vld [vmem:[#allocation3 + $0x87] sm:$0xff] }
 0x332   : > { %8168 = vmatprep.subr.bf16.mxu1 %v8759_v10  ;;  %v11109_v28 = vpack.c.bf16 %v3606_v31, %v3605_v3 }
 0x334   : > { %8137 = vmatmul.mubr.msk.bf16.gmra.mrb[24].mxu1 %vm10574_vm13, %v11093_v56 }
 0x335   : > { %8140 = vmatprep.mubr.msk.bf16.mxu1 %vm10579_vm14, %v11098_v17  ;;  %8169 = vmatpush3.bf16.msra.mxu1 %v8759_v10 }
 0x336   : > { %8170 = vmatprep.subr.bf16.mxu1 %v8760_v5 }
 0x339   : > { %8171 = vmatpush3.bf16.msra.mxu1 %v8760_v5  ;;  %v8763_v5 = vld [vmem:[%s12172_s5 + $0x180] sm:$0xff]  }
 0x33a   : > { %8172 = vmatprep.subr.bf16.mxu1 %v8761_v62 }
 0x33c   : > { %8141 = vmatmul.mubr.msk.bf16.gmra.mrb[28].mxu1 %vm10614_vm3, %v11109_v28 }
 0x33d   : > { %8144 = vmatprep.mubr.msk.bf16.mxu1 %vm10619_vm4, %v10667_v40  ;;  %8173 = vmatpush3.bf16.msra.mxu1 %v8761_v62  ;;  %vm12427_vm4 = vnez %v12379_v24 }
 0x33e   : > { %8174 = vmatprep.subr.bf16.mxu1 %v8762_v57 }
 0x341   : > { %8175 = vmatpush3.bf16.msra.mxu1 %v8762_v57  ;;  %v3622_v57 = vld [vmem:[#allocation3 + $0x10f] sm:$0xff] }
 0x342   : > { %8208 = vmatprep.subr.bf16.mxu1 %v8763_v5 }
 0x343   : > { %v11123_v10 = vpop.f32.mrb[112].mxu0 }
 0x344   : > { %8145 = vmatmul.mubr.msk.bf16.gmra.mrb[0].mxu1 %vm10663_vm11, %v10674_v12  ;;  %v11128_v60 = vpop.f32.mrb[113].mxu0  ;;  %vm12428_vm11 = vnez %v12381_v34 }
 0x345   : > { %8148 = vmatprep.mubr.msk.bf16.mxu1 %vm12424_vm1, %v10727_v39  ;;  %v11133_v40 = vpop.f32.mrb[114].mxu0  ;;  %vm12429_vm1 = vnez %v12383_v21 }
 0x346   : > { %v11135_v62 = vpop.f32.mrb[115].mxu0 }
 0x347   : > { %12425 = vst [vmem:[#allocation73_spill] sm:$0xff] %v11135_v62 }
 0x34c   : > { %8149 = vmatmul.mubr.msk.bf16.gmra.mrb[4].mxu1 %vm12426_vm7, %v10734_v35  ;;  %v3621_v35 = vld [vmem:[#allocation3 + $0x107] sm:$0xff]  ;;  %vm12435_vm7 = vnez %v12396_v4 }
 0x34d   : > { %8152 = vmatprep.mubr.msk.bf16.mxu1 %vm12427_vm4, %v10768_v29  ;;  %v11157_v62 = vpack.c.bf16 %v3622_v57, %v3621_v35  ;;  %vm12432_vm4 = vnez %v12386_v37  ;;  %v8764_v29 = vld [vmem:[%s12172_s5 + $0x188] sm:$0xff]   ;;  %v8781_v37 = vld [vmem:[%s12172_s5 + $0x210] sm:$0xff]  }
 0x354   : > { %8153 = vmatmul.mubr.msk.bf16.gmra.mrb[8].mxu1 %vm12428_vm11, %v10775_v13  ;;  %v11146_v12 = vpop.f32.mrb[116].mxu0  ;;  %vm12433_vm11 = vnez %v12392_v59 }
 0x355   : > { %8156 = vmatprep.mubr.msk.bf16.mxu1 %vm12429_vm1, %v10799_v15  ;;  %v11151_v39 = vpop.f32.mrb[117].mxu0  ;;  %vm12434_vm1 = vnez %v12394_v43 }
 0x356   : > { %v11153_v3 = vpop.f32.mrb[118].mxu0 }
 0x357   : > { %12430 = vst [vmem:[#allocation74_spill] sm:$0xff] %v11153_v3  ;;  %v11155_v31 = vpop.f32.mrb[119].mxu0 }
 0x358   : > { %12431 = vst [vmem:[#allocation75_spill] sm:$0xff] %v11155_v31 }
 0x35c   : > { %8157 = vmatmul.mubr.msk.bf16.gmra.mrb[12].mxu1 %vm12432_vm4, %v11157_v62 }
 0x35d   : > { %8176 = vmatprep.mubr.msk.bf16.mxu1 %vm12433_vm11, %v10875_v7  ;;  %v8765_v7 = vld [vmem:[%s12172_s5 + $0x190] sm:$0xff]   ;;  %vm12442_vm11 = vnez %v12402_v23 }
 0x364   : > { %8177 = vmatmul.mubr.msk.bf16.vlgmr.msra.gmra.mrb[16].mxu1 %vm12434_vm1, %v10885_v20  ;;  %v8766_v20 = vld [vmem:[%s12172_s5 + $0x198] sm:$0xff]   ;;  %vm12441_vm1 = vnez %v12400_v9 }
 0x365   : > { %8209 = vmatpush3.bf16.msra.mxu1 %v8763_v5  ;;  %8180 = vmatprep.mubr.msk.bf16.mxu1 %vm12435_vm7, %v10903_v19  ;;  %v11174_v13 = vpop.f32.mrb[120].mxu0  ;;  %vm12440_vm7 = vnez %v12398_v46  ;;  %v8767_v19 = vld [vmem:[%s12172_s5 + $0x1a0] sm:$0xff]   ;;  %v8768_v5 = vld [vmem:[%s12172_s5 + $0x1a8] sm:$0xff]  }
 0x366   : > { %12436 = vst [vmem:[#allocation76_spill] sm:$0xff] %v11174_v13  ;;  %v11176_v15 = vpop.f32.mrb[121].mxu0  ;;  %8210 = vmatprep.subr.bf16.mxu1 %v8764_v29 }
 0x367   : > { %12437 = vst [vmem:[#allocation77_spill] sm:$0xff] %v11176_v15  ;;  %v11181_v35 = vpop.f32.mrb[122].mxu0  ;;  %v3960_v15 = vld [vmem:[#allocation3 + $0x111] sm:$0xff] }
 0x368   : > { %12438 = vst [vmem:[#allocation78_spill] sm:$0xff] %v11181_v35  ;;  %v11183_v57 = vpop.f32.mrb[123].mxu0 }
 0x369   : > { %12439 = vst [vmem:[#allocation79_spill] sm:$0xff] %v11183_v57  ;;  %8211 = vmatpush3.bf16.msra.mxu1 %v8764_v29  ;;  %v8793_v57 = vld [vmem:[%s12174_s7 + $0x30] sm:$0xff]  }
 0x36a   : > { %8212 = vmatprep.subr.bf16.mxu1 %v8765_v7 }
 0x36c   : > { %8181 = vmatmul.mubr.msk.bf16.gmra.mrb[20].mxu1 %vm12440_vm7, %v10913_v11  ;;  %vm12443_vm7 = vnez %v12404_v30 }
 0x36d   : > { %8184 = vmatprep.mubr.msk.bf16.mxu1 %vm12441_vm1, %v10931_v52  ;;  %8213 = vmatpush3.bf16.msra.mxu1 %v8765_v7  ;;  %v8769_v52 = vld [vmem:[%s12172_s5 + $0x1b0] sm:$0xff]   ;;  %vm12452_vm1 = vnez %v12414_v53  ;;  %v8787_v53 = vld [vmem:[%s12174_s7] sm:$0xff]  }
 0x36e   : > { %8214 = vmatprep.subr.bf16.mxu1 %v8766_v20  ;;  %8352 = vmatprep.subr.bf16.mxu0 %v8787_v53 }
 0x36f   : > { %8353 = vmatpush3.bf16.msra.mxu0 %v8787_v53 }
 0x370   : > { %8354 = vmatprep.subr.bf16.mxu0 %v8788_v16 }
 0x371   : > { %8215 = vmatpush3.bf16.msra.mxu1 %v8766_v20 }
 0x372   : > { %8216 = vmatprep.subr.bf16.mxu1 %v8767_v19 }
 0x373   : > { %8355 = vmatpush3.bf16.msra.mxu0 %v8788_v16 }
 0x374   : > { %8185 = vmatmul.mubr.msk.bf16.gmra.mrb[24].mxu1 %vm12442_vm11, %v10941_v63  ;;  %v8770_v63 = vld [vmem:[%s12172_s5 + $0x1b8] sm:$0xff]   ;;  %vm12449_vm11 = vnez %v12408_v33  ;;  %8356 = vmatprep.subr.bf16.mxu0 %v8789_v58 }
 0x375   : > { %8188 = vmatprep.mubr.msk.bf16.mxu1 %vm12443_vm7, %v10959_v48  ;;  %8217 = vmatpush3.bf16.msra.mxu1 %v8767_v19  ;;  %vm12448_vm7 = vnez %v12406_v1  ;;  %v8771_v19 = vld [vmem:[%s12172_s5 + $0x1c0] sm:$0xff]  }
 0x376   : > { %v11206_v11 = vpop.f32.mrb[124].mxu0  ;;  %8218 = vmatprep.subr.bf16.mxu1 %v8768_v5 }
 0x377   : > { %12444 = vst [vmem:[#allocation80_spill] sm:$0xff] %v11206_v11  ;;  %v11211_v29 = vpop.f32.mrb[125].mxu0  ;;  %8357 = vmatpush3.bf16.msra.mxu0 %v8789_v58 }
 0x378   : > { %12445 = vst [vmem:[#allocation81_spill] sm:$0xff] %v11211_v29  ;;  %v11213_v7 = vpop.f32.mrb[126].mxu0  ;;  %8358 = vmatprep.subr.bf16.mxu0 %v8790_v51 }
 0x379   : > { %12446 = vst [vmem:[#allocation82_spill] sm:$0xff] %v11213_v7  ;;  %v11215_v20 = vpop.f32.mrb[127].mxu0  ;;  %8219 = vmatpush3.bf16.msra.mxu1 %v8768_v5 }
 0x37a   : > { %12447 = vst [vmem:[#allocation83_spill] sm:$0xff] %v11215_v20  ;;  %8220 = vmatprep.subr.bf16.mxu1 %v8769_v52 }
 0x37b   : > { %8359 = vmatpush3.bf16.msra.mxu0 %v8790_v51 }
 0x37c   : > { %8189 = vmatmul.mubr.msk.bf16.gmra.mrb[28].mxu1 %vm12448_vm7, %v10969_v14  ;;  %vm12450_vm7 = vnez %v12410_v0  ;;  %v4942_v0 = vld [vmem:[#allocation3 + $0x121] sm:$0xff] }
 0x37d   : > { %8192 = vmatprep.mubr.msk.bf16.mxu1 %vm12449_vm11, %v10989_v49  ;;  %8221 = vmatpush3.bf16.msra.mxu1 %v8769_v52  ;;  %vm12451_vm11 = vnez %v12412_v32 }
 0x37e   : > { %v11226_v48 = vpop.f32.mrb[96].mxu0  ;;  %8222 = vmatprep.subr.bf16.mxu1 %v8770_v63 }
 0x37f   : > { %v11231_v5 = vpop.f32.mrb[97].mxu0 }
 0x380   : > { %v11233_v20 = vpop.f32.mrb[98].mxu0 }
 0x381   : > { %v11235_v7 = vpop.f32.mrb[99].mxu0  ;;  %8223 = vmatpush3.bf16.msra.mxu1 %v8770_v63 }
 0x382   : > { %8256 = vmatprep.subr.bf16.mxu1 %v8771_v19 }
 0x384   : > { %8193 = vmatmul.mubr.msk.bf16.gmra.mrb[0].mxu1 %vm12450_vm7, %v10997_v8 }
 0x385   : > { %8196 = vmatprep.mubr.msk.bf16.mxu1 %vm12451_vm11, %v11012_v42 }
 0x386   : > { %v11243_v14 = vpop.f32.mrb[100].mxu0 }
 0x387   : > { %v11245_v49 = vpop.f32.mrb[101].mxu0 }
 0x388   : > { %v11247_v52 = vpop.f32.mrb[102].mxu0 }
 0x389   : > { %v11249_v29 = vpop.f32.mrb[103].mxu0 }
 0x38c   : > { %8197 = vmatmul.mubr.msk.bf16.gmra.mrb[4].mxu1 %vm12452_vm1, %v11019_v44 }
 0x38d   : > { %8200 = vmatprep.mubr.msk.bf16.mxu1 %vm11015_vm15, %v11033_v54  ;;  %v3959_v54 = vld [vmem:[#allocation3 + $0x109] sm:$0xff] }
 0x38e   : > { %v11257_v8 = vpop.f32.mrb[104].mxu0  ;;  %v11279_v3 = vpack.c.bf16 %v3960_v15, %v3959_v54  ;;  %v8773_v54 = vld [vmem:[%s12172_s5 + $0x1d0] sm:$0xff]  }
 0x38f   : > { %v11259_v63 = vpop.f32.mrb[105].mxu0  ;;  %v4281_v15 = vld [vmem:[#allocation3 + $0x97] sm:$0xff] }
 0x390   : > { %v11261_v42 = vpop.f32.mrb[106].mxu0 }
 0x391   : > { %v11263_v11 = vpop.f32.mrb[107].mxu0 }
 0x394   : > { %8201 = vmatmul.mubr.msk.bf16.gmra.mrb[8].mxu1 %vm11029_vm12, %v11040_v27  ;;  %v8772_v27 = vld [vmem:[%s12172_s5 + $0x1c8] sm:$0xff]  }
 0x395   : > { %8204 = vmatprep.mubr.msk.bf16.mxu1 %vm11036_vm0, %v11053_v6 }
 0x396   : > { %v11271_v44 = vpop.f32.mrb[108].mxu0 }
 0x397   : > { %v11273_v35 = vpop.f32.mrb[109].mxu0 }
 0x398   : > { %v11275_v13 = vpop.f32.mrb[110].mxu0 }
 0x399   : > { %v11277_v31 = vpop.f32.mrb[111].mxu0 }
 0x39c   : > { %8205 = vmatmul.mubr.msk.bf16.gmra.mrb[12].mxu1 %vm11049_vm8, %v11279_v3 }
 0x39d   : > { %8224 = vmatprep.mubr.msk.bf16.mxu1 %vm10338_vm2, %v11060_v45  ;;  %vm12457_vm2 = vnez %v12371_v50  ;;  %v4288_v45 = vld [vmem:[#allocation3 + $0xcf] sm:$0xff]  ;;  %v4291_v50 = vld [vmem:[#allocation3 + $0xe7] sm:$0xff] }
 0x3a4   : > { %8225 = vmatmul.mubr.msk.bf16.vlgmr.msra.gmra.mrb[16].mxu1 %vm10465_vm5, %v11065_v41  ;;  %v8775_v41 = vld [vmem:[%s12172_s5 + $0x1e0] sm:$0xff]   ;;  %vm12458_vm5 = vnez %v12373_v55  ;;  %v4297_v55 = vld [vmem:[#allocation3 + $0x117] sm:$0xff] }
 0x3a5   : > { %8257 = vmatpush3.bf16.msra.mxu1 %v8771_v19  ;;  %8228 = vmatprep.mubr.msk.bf16.mxu1 %vm10472_vm6, %v11077_v61  ;;  %v8776_v61 = vld [vmem:[%s12172_s5 + $0x1e8] sm:$0xff]   ;;  %vm12459_vm6 = vnez %v12375_v36  ;;  %v4298_v36 = vld [vmem:[#allocation3 + $0x11f] sm:$0xff] }
 0x3a6   : > { %8258 = vmatprep.subr.bf16.mxu1 %v8772_v27  ;;  %v4283_v19 = vld [vmem:[#allocation3 + $0xa7] sm:$0xff] }
 0x3a9   : > { %8259 = vmatpush3.bf16.msra.mxu1 %v8772_v27  ;;  %v4284_v27 = vld [vmem:[#allocation3 + $0xaf] sm:$0xff] }
 0x3aa   : > { %8260 = vmatprep.subr.bf16.mxu1 %v8773_v54  ;;  %v7250_v25 = vpack.c.bf16 %v4284_v27, %v4283_v19 }
 0x3ac   : > { %8229 = vmatmul.mubr.msk.bf16.gmra.mrb[20].mxu1 %vm10524_vm9, %v11082_v26  ;;  %v8777_v26 = vld [vmem:[%s12172_s5 + $0x1f0] sm:$0xff]   ;;  %vm12460_vm9 = vnez %v12377_v38 }
 0x3ad   : > { %8232 = vmatprep.mubr.msk.bf16.mxu1 %vm10532_vm10, %v11093_v56  ;;  %8261 = vmatpush3.bf16.msra.mxu1 %v8773_v54  ;;  %v4282_v56 = vld [vmem:[#allocation3 + $0x9f] sm:$0xff]  ;;  %vm12461_vm10 = vnez %v12379_v24 }
 0x3ae   : > { %8262 = vmatprep.subr.bf16.mxu1 %v8774_v22  ;;  %v7247_v54 = vpack.c.bf16 %v4282_v56, %v4281_v15  ;;  %v4289_v56 = vld [vmem:[#allocation3 + $0xd7] sm:$0xff]  ;;  %v4294_v15 = vld [vmem:[#allocation3 + $0xff] sm:$0xff] }
 0x3af   : > { %v7259_v19 = vpack.c.bf16 %v4290_v18, %v4289_v56  ;;  %v4608_v24 = vld [vmem:[#allocation3 + $0x40] sm:$0xff]  ;;  %v4614_v18 = vld [vmem:[#allocation3 + $0x70] sm:$0xff]  ;;  %v4613_v56 = vld [vmem:[#allocation3 + $0x68] sm:$0xff] }
 0x3b1   : > { %8263 = vmatpush3.bf16.msra.mxu1 %v8774_v22  ;;  %v4287_v22 = vld [vmem:[#allocation3 + $0xc7] sm:$0xff] }
 0x3b2   : > { %8264 = vmatprep.subr.bf16.mxu1 %v8775_v41 }
 0x3b4   : > { %8233 = vmatmul.mubr.msk.bf16.gmra.mrb[24].mxu1 %vm10574_vm13, %v11098_v17  ;;  %v8778_v17 = vld [vmem:[%s12172_s5 + $0x1f8] sm:$0xff]   ;;  %vm12462_vm13 = vnez %v12381_v34  ;;  %v4609_v34 = vld [vmem:[#allocation3 + $0x48] sm:$0xff] }
 0x3b5   : > { %8236 = vmatprep.mubr.msk.bf16.mxu1 %vm10579_vm14, %v11109_v28  ;;  %8265 = vmatpush3.bf16.msra.mxu1 %v8775_v41  ;;  %v4286_v28 = vld [vmem:[#allocation3 + $0xbf] sm:$0xff]  ;;  %vm12463_vm14 = vnez %v12383_v21  ;;  %v8780_v21 = vld [vmem:[%s12172_s5 + $0x208] sm:$0xff]  }
 0x3b6   : > { %8266 = vmatprep.subr.bf16.mxu1 %v8776_v61  ;;  %v7253_v41 = vpack.c.bf16 %v4286_v28, %v4285_v2  ;;  %v7271_v28 = vpack.c.bf16 %v4298_v36, %v4297_v55  ;;  %v4607_v2 = vld [vmem:[#allocation3 + $0x38] sm:$0xff]  ;;  %v4617_v36 = vld [vmem:[#allocation3 + $0x88] sm:$0xff] }
 0x3b9   : > { %8267 = vmatpush3.bf16.msra.mxu1 %v8776_v61  ;;  %v7256_v61 = vpack.c.bf16 %v4288_v45, %v4287_v22  ;;  %v4605_v22 = vld [vmem:[#allocation3 + $0x28] sm:$0xff]  ;;  %v4610_v45 = vld [vmem:[#allocation3 + $0x50] sm:$0xff] }
 0x3ba   : > { %8268 = vmatprep.subr.bf16.mxu1 %v8777_v26 }
 0x3bc   : > { %8237 = vmatmul.mubr.msk.bf16.gmra.mrb[28].mxu1 %vm10614_vm3, %v7247_v54  ;;  %v4293_v54 = vld [vmem:[#allocation3 + $0xf7] sm:$0xff]  ;;  %vm12465_vm3 = vnez %v12392_v59 }
 0x3bd   : > { %8240 = vmatprep.mubr.msk.bf16.mxu1 %vm12457_vm2, %v7250_v25  ;;  %8269 = vmatpush3.bf16.msra.mxu1 %v8777_v26  ;;  %v4292_v26 = vld [vmem:[#allocation3 + $0xef] sm:$0xff]  ;;  %vm12467_vm2 = vnez %v12396_v4  ;;  %v4921_v59 = vld [vmem:[#allocation3 + $0x79] sm:$0xff] }
 0x3be   : > { %8270 = vmatprep.subr.bf16.mxu1 %v8778_v17  ;;  %v7262_v27 = vpack.c.bf16 %v4292_v26, %v4291_v50  ;;  %v4606_v25 = vld [vmem:[#allocation3 + $0x30] sm:$0xff]  ;;  %v4611_v50 = vld [vmem:[#allocation3 + $0x58] sm:$0xff] }
 0x3bf   : > { %v4654_v38 = vpack.c.bf16 %v4606_v25, %v4605_v22  ;;  %v8784_v25 = vld [vmem:[%s12172_s5 + $0x228] sm:$0xff]   ;;  %v8785_v22 = vld [vmem:[%s12172_s5 + $0x230] sm:$0xff]   ;;  %v4925_v4 = vld [vmem:[#allocation3 + $0x99] sm:$0xff] }
 0x3c1   : > { %8271 = vmatpush3.bf16.msra.mxu1 %v8778_v17  ;;  %v7265_v17 = vpack.c.bf16 %v4294_v15, %v4293_v54  ;;  %v4616_v15 = vld [vmem:[#allocation3 + $0x80] sm:$0xff]  ;;  %v4618_v54 = vld [vmem:[#allocation3 + $0x90] sm:$0xff] }
 0x3c2   : > { %8304 = vmatprep.subr.bf16.mxu1 %v8779_v47 }
 0x3c4   : > { %8241 = vmatmul.mubr.msk.bf16.gmra.mrb[0].mxu1 %vm12458_vm5, %v7253_v41  ;;  %v4655_v41 = vpack.c.bf16 %v4608_v24, %v4607_v2  ;;  %v4622_v24 = vld [vmem:[#allocation3 + $0xb0] sm:$0xff]  ;;  %vm12468_vm5 = vnez %v12398_v46 }
 0x3c5   : > { %8244 = vmatprep.mubr.msk.bf16.mxu1 %vm12459_vm6, %v7256_v61  ;;  %v4612_v61 = vld [vmem:[#allocation3 + $0x60] sm:$0xff]  ;;  %vm12469_vm6 = vnez %v12400_v9 }
 0x3c6   : > { %v4657_v26 = vpack.c.bf16 %v4612_v61, %v4611_v50  ;;  %v4623_v61 = vld [vmem:[#allocation3 + $0xb8] sm:$0xff]  ;;  %v4625_v50 = vld [vmem:[#allocation3 + $0xc8] sm:$0xff] }
 0x3c7   : > { %v4929_v9 = vld [vmem:[#allocation3 + $0xb9] sm:$0xff] }
 0x3cc   : > { %8245 = vmatmul.mubr.msk.bf16.gmra.mrb[4].mxu1 %vm12460_vm9, %v7259_v19  ;;  %v8782_v19 = vld [vmem:[%s12172_s5 + $0x218] sm:$0xff]   ;;  %vm12470_vm9 = vnez %v12402_v23 }
 0x3cd   : > { %8248 = vmatprep.mubr.msk.bf16.mxu1 %vm12461_vm10, %v7262_v27  ;;  %v4658_v27 = vpack.c.bf16 %v4614_v18, %v4613_v56  ;;  %v4628_v56 = vld [vmem:[#allocation3 + $0xe0] sm:$0xff]  ;;  %vm12471_vm10 = vnez %v12404_v30 }
 0x3ce   : > { %v4933_v30 = vld [vmem:[#allocation3 + $0xd9] sm:$0xff] }
 0x3d4   : > { %8249 = vmatmul.mubr.msk.bf16.gmra.mrb[8].mxu1 %vm12462_vm13, %v7265_v17  ;;  %v4615_v17 = vld [vmem:[#allocation3 + $0x78] sm:$0xff]  ;;  %vm12472_vm13 = vnez %v12406_v1 }
 0x3d5   : > { %8252 = vmatprep.mubr.msk.bf16.mxu1 %vm12463_vm14, %v11157_v62  ;;  %v4656_v62 = vpack.c.bf16 %v4610_v45, %v4609_v34  ;;  %v4659_v55 = vpack.c.bf16 %v4616_v15, %v4615_v17  ;;  %v4619_v45 = vld [vmem:[#allocation3 + $0x98] sm:$0xff]  ;;  %v4629_v15 = vld [vmem:[#allocation3 + $0xe8] sm:$0xff]  ;;  %v4632_v17 = vld [vmem:[#allocation3 + $0x100] sm:$0xff]  ;;  %vm12473_vm14 = vnez %v12408_v33 }
 0x3d6   : > { %v8786_v34 = vld [vmem:[%s12172_s5 + $0x238] sm:$0xff]  }
 0x3d7   : > { %v4941_v33 = vld [vmem:[#allocation3 + $0x119] sm:$0xff] }
 0x3d8   : > { %v7367_v32 = vpack.c.bf16 %v4942_v0, %v4941_v33 }
 0x3dc   : > { %8253 = vmatmul.mubr.msk.bf16.gmra.mrb[12].mxu1 %vm12432_vm4, %v7271_v28  ;;  %v4660_v28 = vpack.c.bf16 %v4618_v54, %v4617_v36  ;;  %v4631_v36 = vld [vmem:[#allocation3 + $0xf8] sm:$0xff]  ;;  %vm12466_vm4 = vnez %v12394_v43 }
 0x3dd   : > { %8272 = vmatprep.mubr.bf16.mxu1 %v4654_v38  ;;  %v4620_v38 = vld [vmem:[#allocation3 + $0xa0] sm:$0xff] }
 0x3de   : > { %v4661_v2 = vpack.c.bf16 %v4620_v38, %v4619_v45  ;;  %v4912_v38 = vld [vmem:[#allocation3 + $0x31] sm:$0xff] }
 0x3e4   : > { %8273 = vmatmul.mubr.bf16.vlgmr.msra.gmra.mrb[16].mxu1 %v4655_v41  ;;  %v4621_v41 = vld [vmem:[#allocation3 + $0xa8] sm:$0xff] }
 0x3e5   : > { %8305 = vmatpush3.bf16.msra.mxu1 %v8779_v47  ;;  %8276 = vmatprep.mubr.bf16.mxu1 %v4656_v62  ;;  %v8783_v47 = vld [vmem:[%s12172_s5 + $0x220] sm:$0xff]  }
 0x3e6   : > { %8306 = vmatprep.subr.bf16.mxu1 %v8780_v21  ;;  %v4624_v62 = vld [vmem:[#allocation3 + $0xc0] sm:$0xff] }
 0x3e7   : > { %v4663_v18 = vpack.c.bf16 %v4624_v62, %v4623_v61 }
 0x3e9   : > { %8307 = vmatpush3.bf16.msra.mxu1 %v8780_v21  ;;  %v4662_v21 = vpack.c.bf16 %v4622_v24, %v4621_v41  ;;  %v4911_v24 = vld [vmem:[#allocation3 + $0x29] sm:$0xff]  ;;  %v4913_v41 = vld [vmem:[#allocation3 + $0x39] sm:$0xff] }
 0x3ea   : > { %8308 = vmatprep.subr.bf16.mxu1 %v8781_v37  ;;  %v7322_v45 = vpack.c.bf16 %v4912_v38, %v4911_v24  ;;  %v4932_v38 = vld [vmem:[#allocation3 + $0xd1] sm:$0xff]  ;;  %v4931_v24 = vld [vmem:[#allocation3 + $0xc9] sm:$0xff] }
 0x3ec   : > { %8277 = vmatmul.mubr.bf16.gmra.mrb[20].mxu1 %v4657_v26 }
 0x3ed   : > { %8280 = vmatprep.mubr.bf16.mxu1 %v4658_v27  ;;  %8309 = vmatpush3.bf16.msra.mxu1 %v8781_v37  ;;  %v4626_v37 = vld [vmem:[#allocation3 + $0xd0] sm:$0xff]  ;;  %v4627_v27 = vld [vmem:[#allocation3 + $0xd8] sm:$0xff] }
 0x3ee   : > { %8310 = vmatprep.subr.bf16.mxu1 %v8782_v19  ;;  %v4664_v26 = vpack.c.bf16 %v4626_v37, %v4625_v50  ;;  %v4915_v37 = vld [vmem:[#allocation3 + $0x49] sm:$0xff]  ;;  %v4918_v50 = vld [vmem:[#allocation3 + $0x61] sm:$0xff] }
 0x3f1   : > { %8311 = vmatpush3.bf16.msra.mxu1 %v8782_v19  ;;  %v4630_v19 = vld [vmem:[#allocation3 + $0xf0] sm:$0xff] }
 0x3f2   : > { %8312 = vmatprep.subr.bf16.mxu1 %v8783_v47  ;;  %v4666_v54 = vpack.c.bf16 %v4630_v19, %v4629_v15  ;;  %v4919_v19 = vld [vmem:[#allocation3 + $0x69] sm:$0xff]  ;;  %v4924_v15 = vld [vmem:[#allocation3 + $0x91] sm:$0xff] }
 0x3f4   : > { %8281 = vmatmul.mubr.bf16.gmra.mrb[24].mxu1 %v4659_v55  ;;  %v4634_v55 = vld [vmem:[#allocation3 + $0x110] sm:$0xff] }
 0x3f5   : > { %8284 = vmatprep.mubr.bf16.mxu1 %v4660_v28  ;;  %8313 = vmatpush3.bf16.msra.mxu1 %v8783_v47  ;;  %v4665_v47 = vpack.c.bf16 %v4628_v56, %v4627_v27  ;;  %v4633_v28 = vld [vmem:[#allocation3 + $0x108] sm:$0xff] }
 0x3f6   : > { %8314 = vmatprep.subr.bf16.mxu1 %v8784_v25 }
 0x3f9   : > { %8315 = vmatpush3.bf16.msra.mxu1 %v8784_v25  ;;  %v4667_v25 = vpack.c.bf16 %v4632_v17, %v4631_v36  ;;  %v4928_v36 = vld [vmem:[#allocation3 + $0xb1] sm:$0xff] }
 0x3fa   : > { %8316 = vmatprep.subr.bf16.mxu1 %v8785_v22 }
 0x3fc   : > { %8285 = vmatmul.mubr.bf16.gmra.mrb[28].mxu1 %v4661_v2  ;;  %v12464_v2 = vld [vmem:[#allocation71_spill] sm:$0xff] }
 0x3fd   : > { %8288 = vmatprep.mubr.bf16.mxu1 %v4662_v21  ;;  %8317 = vmatpush3.bf16.msra.mxu1 %v8785_v22  ;;  %v4668_v22 = vpack.c.bf16 %v4634_v55, %v4633_v28  ;;  %v4916_v21 = vld [vmem:[#allocation3 + $0x51] sm:$0xff]  ;;  %v4926_v55 = vld [vmem:[#allocation3 + $0xa1] sm:$0xff] }
 0x3fe   : > { %8318 = vmatprep.subr.bf16.mxu1 %v8786_v34  ;;  %v7328_v61 = vpack.c.bf16 %v4916_v21, %v4915_v37  ;;  %v7343_v46 = vpack.c.bf16 %v4926_v55, %v4925_v4  ;;  %v8795_v37 = vld [vmem:[%s12176_s9 + $0x40] sm:$0xff]  }
 0x401   : > { %8319 = vmatpush3.bf16.msra.mxu1 %v8786_v34  ;;  %v4914_v34 = vld [vmem:[#allocation3 + $0x41] sm:$0xff] }
 0x402   : > { %v7325_v62 = vpack.c.bf16 %v4914_v34, %v4913_v41  ;;  %v4936_v41 = vld [vmem:[#allocation3 + $0xf1] sm:$0xff]  ;;  %v4935_v34 = vld [vmem:[#allocation3 + $0xe9] sm:$0xff] }
 0x403   : > { %v7358_v21 = vpack.c.bf16 %v4936_v41, %v4935_v34 }
 0x404   : > { %8289 = vmatmul.mubr.bf16.gmra.mrb[0].mxu1 %v4663_v18  ;;  %v4917_v18 = vld [vmem:[#allocation3 + $0x59] sm:$0xff] }
 0x405   : > { %8292 = vmatprep.mubr.bf16.mxu1 %v4664_v26  ;;  %v4920_v26 = vld [vmem:[#allocation3 + $0x71] sm:$0xff]  ;;  %v7331_v56 = vpack.c.bf16 %v4918_v50, %v4917_v18  ;;  %v11434_v18 = vld [vmem:[%s12173_s6] ss:$0 sm:$0xff] }
 0x406   : > { %v7334_v27 = vpack.c.bf16 %v4920_v26, %v4919_v19 }
 0x40c   : > { %8293 = vmatmul.mubr.bf16.gmra.mrb[4].mxu1 %v4665_v47  ;;  %v4922_v47 = vld [vmem:[#allocation3 + $0x81] sm:$0xff] }
 0x40d   : > { %8296 = vmatprep.mubr.bf16.mxu1 %v4666_v54  ;;  %v7337_v43 = vpack.c.bf16 %v4922_v47, %v4921_v59  ;;  %v4923_v54 = vld [vmem:[#allocation3 + $0x89] sm:$0xff] }
 0x40e   : > { %v7340_v17 = vpack.c.bf16 %v4924_v15, %v4923_v54 }
 0x414   : > { %8297 = vmatmul.mubr.bf16.gmra.mrb[8].mxu1 %v4667_v25  ;;  %v4927_v25 = vld [vmem:[#allocation3 + $0xa9] sm:$0xff] }
 0x415   : > { %8300 = vmatprep.mubr.bf16.mxu1 %v4668_v22  ;;  %v7346_v28 = vpack.c.bf16 %v4928_v36, %v4927_v25  ;;  %v4930_v22 = vld [vmem:[#allocation3 + $0xc1] sm:$0xff] }
 0x416   : > { %v7349_v23 = vpack.c.bf16 %v4930_v22, %v4929_v9 }
 0x41c   : > { %8301 = vmatmul.mubr.bf16.gmra.mrb[12].mxu1 %v12464_v2  ;;  %v4934_v2 = vld [vmem:[#allocation3 + $0xe1] sm:$0xff] }
 0x41d   : > { %8320 = vmatprep.mubr.msk.bf16.mxu1 %vm12465_vm3, %v7322_v45  ;;  %v7352_v45 = vpack.c.bf16 %v4932_v38, %v4931_v24  ;;  %v7355_v1 = vpack.c.bf16 %v4934_v2, %v4933_v30 }
 0x424   : > { %8321 = vmatmul.mubr.msk.bf16.vlgmr.msra.gmra.mrb[16].mxu1 %vm12466_vm4, %v7325_v62  ;;  %v8794_v62 = vld [vmem:[%s12174_s7 + $0x38] sm:$0xff]  }
 0x425   : > { %8324 = vmatprep.mubr.msk.bf16.mxu1 %vm12467_vm2, %v7328_v61 }
 0x42c   : > { %8325 = vmatmul.mubr.msk.bf16.gmra.mrb[20].mxu1 %vm12468_vm5, %v7331_v56 }
 0x42d   : > { %8328 = vmatprep.mubr.msk.bf16.mxu1 %vm12469_vm6, %v7334_v27 }
 0x434   : > { %8329 = vmatmul.mubr.msk.bf16.gmra.mrb[24].mxu1 %vm12470_vm9, %v7337_v43 }
 0x435   : > { %8332 = vmatprep.mubr.msk.bf16.mxu1 %vm12471_vm10, %v7340_v17 }
 0x43c   : > { %8333 = vmatmul.mubr.msk.bf16.gmra.mrb[28].mxu1 %vm12472_vm13, %v7343_v46 }
 0x43d   : > { %8336 = vmatprep.mubr.msk.bf16.mxu1 %vm12473_vm14, %v7346_v28 }
 0x444   : > { %8337 = vmatmul.mubr.msk.bf16.gmra.mrb[0].mxu1 %vm12450_vm7, %v7349_v23 }
 0x445   : > { %8340 = vmatprep.mubr.msk.bf16.mxu1 %vm12451_vm11, %v7352_v45 }
 0x44c   : > { %8341 = vmatmul.mubr.msk.bf16.gmra.mrb[4].mxu1 %vm12452_vm1, %v7355_v1 }
 0x44d   : > { %8344 = vmatprep.mubr.msk.bf16.mxu1 %vm11015_vm15, %v7358_v21 }
 0x454   : > { %8345 = vmatmul.mubr.msk.bf16.gmra.mrb[8].mxu1 %vm11029_vm12, %v11053_v6  ;;  %v8791_v6 = vld [vmem:[%s12174_s7 + $0x20] sm:$0xff]  }
 0x455   : > { %8348 = vmatprep.mubr.msk.bf16.mxu1 %vm11036_vm0, %v11279_v3  ;;  %8360 = vmatprep.subr.bf16.mxu0 %v8791_v6  ;;  %v8792_v3 = vld [vmem:[%s12174_s7 + $0x28] sm:$0xff]  }
 0x456   : > { %8361 = vmatpush3.bf16.msra.mxu0 %v8791_v6 }
 0x457   : > { %8362 = vmatprep.subr.bf16.mxu0 %v8792_v3 }
 0x45a   : > { %8363 = vmatpush3.bf16.msra.mxu0 %v8792_v3 }
 0x45b   : > { %8364 = vmatprep.subr.bf16.mxu0 %v8793_v57 }
 0x45c   : > { %8349 = vmatmul.mubr.msk.bf16.gmra.mrb[12].mxu1 %vm11049_vm8, %v7367_v32 }
 0x45e   : > { %8365 = vmatpush3.bf16.msra.mxu0 %v8793_v57 }
 0x45f   : > { %8366 = vmatprep.subr.bf16.mxu0 %v8794_v62 }
 0x462   : > { %8367 = vmatpush3.bf16.msra.mxu0 %v8794_v62 }
 0x463   : > { %7760 = vmatprep.subr.bf16.mxu0 %v8795_v37 }
 0x4f7   : > { %v8322_v61 = vpop.f32.mrb[16].mxu1 }
 0x4f8   : > { %v8416_v50 = vadd.f32 %v8322_v61, %v11226_v48  ;;  %v5090_v26 = vpop.f32.mrb[17].mxu1 }
 0x4f9   : > { %v8417_v56 = vadd.f32 %v5090_v26, %v11231_v5  ;;  %v8323_v19 = vpop.f32.mrb[18].mxu1 }
 0x4fa   : > { %v11439_v27 = vadd.f32 %v8416_v50, %v11434_v18  ;;  %v8418_v59 = vadd.f32 %v8323_v19, %v11233_v20  ;;  %v5093_v47 = vpop.f32.mrb[19].mxu1 }
 0x4fb   : > { %v11443_v15 = vadd.f32 %v8417_v56, %v11434_v18  ;;  %v8419_v43 = vadd.f32 %v5093_v47, %v11235_v7 }
 0x4fc   : > { %v7372_v54 = vmul.f32 -1.442695, %v11439_v27  ;;  %v11448_v17 = vadd.f32 %v8418_v59, %v11434_v18 }
 0x4fd   : > { %v7370_v48 = vmul.f32 -1.442695, %v11443_v15  ;;  %v11452_v5 = vadd.f32 %v8419_v43, %v11434_v18 }
 0x4fe   : > { %9195 = vpow2.f32 %v7372_v54  ;;  %v7373_v4 = vmul.f32 -1.442695, %v11448_v17 }
 0x4ff   : > { %9197 = vpow2.f32 %v7370_v48  ;;  %v7371_v20 = vmul.f32 -1.442695, %v11452_v5  ;;  %v8326_v55 = vpop.f32.mrb[20].mxu1 }
 0x500   : > { %9199 = vpow2.f32 %v7373_v4  ;;  %v8420_v7 = vadd.f32 %v8326_v55, %v11243_v14  ;;  %v5106_v36 = vpop.f32.mrb[21].mxu1 }
 0x501   : > { %9201 = vpow2.f32 %v7371_v20  ;;  %v8421_v46 = vadd.f32 %v5106_v36, %v11245_v49  ;;  %v8327_v25 = vpop.f32.mrb[22].mxu1 }
 0x502   : > { %v11459_v28 = vadd.f32 %v8420_v7, %v11434_v18  ;;  %v8422_v9 = vadd.f32 %v8327_v25, %v11247_v52  ;;  %v5109_v22 = vpop.f32.mrb[23].mxu1 }
 0x503   : > { %v11463_v38 = vadd.f32 %v8421_v46, %v11434_v18  ;;  %v8423_v23 = vadd.f32 %v5109_v22, %v11249_v29 }
 0x504   : > { %v7376_v24 = vmul.f32 -1.442695, %v11459_v28  ;;  %v11468_v14 = vadd.f32 %v8422_v9, %v11434_v18 }
 0x505   : > { %v7374_v45 = vmul.f32 -1.442695, %v11463_v38  ;;  %v11472_v49 = vadd.f32 %v8423_v23, %v11434_v18 }
 0x506   : > { %9203 = vpow2.f32 %v7376_v24  ;;  %v7377_v30 = vmul.f32 -1.442695, %v11468_v14 }
 0x507   : > { %9205 = vpow2.f32 %v7374_v45  ;;  %v7375_v52 = vmul.f32 -1.442695, %v11472_v49  ;;  %v8330_v2 = vpop.f32.mrb[24].mxu1 }
 0x508   : > { %v9196_v41 = vpop.eup %9195  ;;  %9207 = vpow2.f32 %v7377_v30  ;;  %v8424_v29 = vadd.f32 %v8330_v2, %v11257_v8  ;;  %v5122_v1 = vpop.f32.mrb[25].mxu1 }
 0x509   : > { %v9198_v34 = vpop.eup %9197  ;;  %v5386_v21 = vadd.f32 1.0, %v9196_v41  ;;  %9209 = vpow2.f32 %v7375_v52  ;;  %v8425_v33 = vadd.f32 %v5122_v1, %v11259_v63  ;;  %v8331_v0 = vpop.f32.mrb[26].mxu1 }
 0x50a   : > { %v9200_v32 = vpop.eup %9199  ;;  %v5384_v53 = vadd.f32 1.0, %v9198_v34  ;;  %v11479_v16 = vadd.f32 %v8424_v29, %v11434_v18  ;;  %v8426_v58 = vadd.f32 %v8331_v0, %v11261_v42  ;;  %v5125_v51 = vpop.f32.mrb[27].mxu1 }
 0x50b   : > { %v9202_v6 = vpop.eup %9201  ;;  %9211 = vrcp.f32 %v5386_v21  ;;  %v5387_v3 = vadd.f32 1.0, %v9200_v32  ;;  %v11483_v8 = vadd.f32 %v8425_v33, %v11434_v18  ;;  %v8427_v57 = vadd.f32 %v5125_v51, %v11263_v11 }
 0x50c   : > { %9213 = vrcp.f32 %v5384_v53  ;;  %v5385_v62 = vadd.f32 1.0, %v9202_v6  ;;  %v7380_v63 = vmul.f32 -1.442695, %v11479_v16  ;;  %v11488_v37 = vadd.f32 %v8426_v58, %v11434_v18  ;;  %v12474_v53 = vld [vmem:[#allocation8_spill] sm:$0xff] }
 0x50d   : > { %9215 = vrcp.f32 %v5387_v3  ;;  %v7378_v61 = vmul.f32 -1.442695, %v11483_v8  ;;  %v11492_v42 = vadd.f32 %v8427_v57, %v11434_v18  ;;  %v12475_v57 = vld [vmem:[#allocation9_spill] sm:$0xff] }
 0x50e   : > { %9217 = vrcp.f32 %v5385_v62  ;;  %v7381_v50 = vmul.f32 -1.442695, %v11488_v37 }
 0x50f   : > { %9219 = vpow2.f32 %v7380_v63  ;;  %v7379_v26 = vmul.f32 -1.442695, %v11492_v42  ;;  %v8334_v11 = vpop.f32.mrb[28].mxu1 }
 0x510   : > { %v9204_v56 = vpop.eup %9203  ;;  %9221 = vpow2.f32 %v7378_v61  ;;  %v8428_v19 = vadd.f32 %v8334_v11, %v11271_v44  ;;  %v5138_v59 = vpop.f32.mrb[29].mxu1 }
 0x511   : > { %v9206_v47 = vpop.eup %9205  ;;  %v5390_v43 = vadd.f32 1.0, %v9204_v56  ;;  %9223 = vpow2.f32 %v7381_v50  ;;  %v8429_v54 = vadd.f32 %v5138_v59, %v11273_v35  ;;  %v8335_v48 = vpop.f32.mrb[30].mxu1 }
 0x512   : > { %v9208_v4 = vpop.eup %9207  ;;  %v5388_v20 = vadd.f32 1.0, %v9206_v47  ;;  %9225 = vpow2.f32 %v7379_v26  ;;  %v11499_v55 = vadd.f32 %v8428_v19, %v11434_v18  ;;  %v8430_v7 = vadd.f32 %v8335_v48, %v11275_v13  ;;  %v5141_v36 = vpop.f32.mrb[31].mxu1  ;;  %v12476_v26 = vld [vmem:[#allocation73_spill] sm:$0xff] }
 0x513   : > { %v9210_v46 = vpop.eup %9209  ;;  %9227 = vrcp.f32 %v5390_v43  ;;  %v5391_v25 = vadd.f32 1.0, %v9208_v4  ;;  %v11503_v44 = vadd.f32 %v8429_v54, %v11434_v18  ;;  %v8431_v9 = vadd.f32 %v5141_v36, %v11277_v31  ;;  %v12478_v36 = vld [vmem:[#allocation5_spill] sm:$0xff] }
 0x514   : > { %9229 = vrcp.f32 %v5388_v20  ;;  %v5389_v35 = vadd.f32 1.0, %v9210_v46  ;;  %v7384_v22 = vmul.f32 -1.442695, %v11499_v55  ;;  %v11508_v23 = vadd.f32 %v8430_v7, %v11434_v18  ;;  %v12477_v20 = vld [vmem:[#allocation4_spill] sm:$0xff] }
 0x515   : > { %v9212_v24 = vpop.eup %9211  ;;  %9231 = vrcp.f32 %v5391_v25  ;;  %v7382_v13 = vmul.f32 -1.442695, %v11503_v44  ;;  %v11512_v45 = vadd.f32 %v8431_v9, %v11434_v18 }
 0x516   : > { %v9214_v30 = vpop.eup %9213  ;;  %v5482_v52 = vmul.f32 %v9212_v24, %v11439_v27  ;;  %9233 = vrcp.f32 %v5389_v35  ;;  %v7385_v31 = vmul.f32 -1.442695, %v11508_v23 }
 0x517   : > { %v9216_v2 = vpop.eup %9215  ;;  %9235 = vpow2.f32 %v7384_v22  ;;  %v7383_v41 = vmul.f32 -1.442695, %v11512_v45  ;;  %v8338_v29 = vpop.f32.mrb[0].mxu1  ;;  %v5480_v34 = vmul.f32 %v9214_v30, %v11443_v15 }
 0x518   : > { %v9218_v1 = vpop.eup %9217  ;;  %v5483_v21 = vmul.f32 %v9216_v2, %v11448_v17  ;;  %9237 = vpow2.f32 %v7382_v13  ;;  %v8432_v33 = vadd.f32 %v8338_v29, %v11123_v10  ;;  %v5154_v0 = vpop.f32.mrb[1].mxu1  ;;  %v11521_v27 = vadd.f32 %v5482_v52, %v12474_v53 }
 0x519   : > { %v9220_v32 = vpop.eup %9219  ;;  %v5481_v58 = vmul.f32 %v9218_v1, %v11452_v5  ;;  %9239 = vpow2.f32 %v7385_v31  ;;  %v8433_v51 = vadd.f32 %v5154_v0, %v11128_v60  ;;  %v8339_v6 = vpop.f32.mrb[2].mxu1  ;;  %v5512_v7 = vadd.f32 %v5480_v34, %v12477_v20  ;;  %v8796_v34 = vld [vmem:[%s12176_s9] sm:$0xff]   ;;  %v12483_v20 = vld [vmem:[#allocation16_spill] sm:$0xff] }
 0x51a   : > { %v9222_v3 = vpop.eup %9221  ;;  %v5515_v62 = vadd.f32 %v5483_v21, %v12475_v57  ;;  %v5394_v15 = vadd.f32 1.0, %v9220_v32  ;;  %9241 = vpow2.f32 %v7383_v41  ;;  %v11527_v17 = vadd.f32 %v8432_v33, %v11434_v18  ;;  %v5157_v10 = vpop.f32.mrb[3].mxu1 }
 0x51b   : > { %v9224_v63 = vpop.eup %9223  ;;  %v5392_v61 = vadd.f32 1.0, %v9222_v3  ;;  %v11530_v50 = vadd.f32 %v8433_v51, %v11434_v18  ;;  %v8434_v5 = vadd.f32 %v8339_v6, %v11133_v40  ;;  %v8435_v11 = vadd.f32 %v5157_v10, %v12476_v26 }
 0x51c   : > { %v9226_v60 = vpop.eup %9225  ;;  %v5561_v56 = vpack.c.bf16 %v5515_v62, %v11521_v27  ;;  %9243 = vrcp.f32 %v5394_v15  ;;  %v5395_v19 = vadd.f32 1.0, %v9224_v63  ;;  %v7388_v59 = vmul.f32 -1.442695, %v11527_v17 }
 0x51d   : > { %v9228_v47 = vpop.eup %9227  ;;  %9245 = vrcp.f32 %v5392_v61  ;;  %v5393_v43 = vadd.f32 1.0, %v9226_v60  ;;  %v7386_v54 = vmul.f32 -1.442695, %v11530_v50  ;;  %v11538_v48 = vadd.f32 %v8434_v5, %v11434_v18  ;;  %v8798_v61 = vld [vmem:[%s12176_s9 + $0x8] sm:$0xff]  }
 0x51e   : > { %v9230_v4 = vpop.eup %9229  ;;  %9247 = vrcp.f32 %v5395_v19  ;;  %v11541_v40 = vadd.f32 %v8435_v11, %v11434_v18  ;;  %v5513_v46 = vadd.f32 %v5481_v58, %v12478_v36  ;;  %v5486_v9 = vmul.f32 %v9228_v47, %v11459_v28  ;;  %v12480_v58 = vld [vmem:[#allocation75_spill] sm:$0xff]  ;;  %v12481_v11 = vld [vmem:[#allocation12_spill] sm:$0xff] }
 0x51f   : > { %v9232_v25 = vpop.eup %9231  ;;  %v5484_v35 = vmul.f32 %v9230_v4, %v11463_v38  ;;  %9249 = vrcp.f32 %v5393_v43  ;;  %v7389_v22 = vmul.f32 -1.442695, %v11538_v48  ;;  %v8342_v24 = vpop.f32.mrb[4].mxu1 }
 0x520   : > { %v9234_v13 = vpop.eup %9233  ;;  %v5487_v30 = vmul.f32 %v9232_v25, %v11468_v14  ;;  %9251 = vpow2.f32 %v7388_v59  ;;  %v7387_v52 = vmul.f32 -1.442695, %v11541_v40  ;;  %v8436_v31 = vadd.f32 %v8342_v24, %v11146_v12  ;;  %v5170_v2 = vpop.f32.mrb[5].mxu1  ;;  %v12479_v12 = vld [vmem:[#allocation74_spill] sm:$0xff]  ;;  %v8799_v59 = vld [vmem:[%s12176_s9 + $0x50] sm:$0xff]  }
 0x521   : > { %v9236_v41 = vpop.eup %9235  ;;  %v5485_v29 = vmul.f32 %v9234_v13, %v11472_v49  ;;  %9253 = vpow2.f32 %v7386_v54  ;;  %v5560_v28 = vpack.c.bf16 %v5513_v46, %v5512_v7  ;;  %v8437_v38 = vadd.f32 %v5170_v2, %v11151_v39  ;;  %v8343_v1 = vpop.f32.mrb[6].mxu1  ;;  %v8797_v49 = vld [vmem:[%s12176_s9 + $0x48] sm:$0xff]   ;;  %v12484_v25 = vld [vmem:[#allocation76_spill] sm:$0xff]  ;;  %v12486_v2 = vld [vmem:[#allocation17_spill] sm:$0xff] }
 0x522   : > { %v9238_v21 = vpop.eup %9237  ;;  %v5398_v14 = vadd.f32 1.0, %v9236_v41  ;;  %9255 = vpow2.f32 %v7389_v22  ;;  %v11557_v33 = vadd.f32 %v8436_v31, %v11434_v18  ;;  %v8438_v0 = vadd.f32 %v8343_v1, %v12479_v12  ;;  %v5173_v32 = vpop.f32.mrb[7].mxu1  ;;  %v12485_v31 = vld [vmem:[#allocation77_spill] sm:$0xff] }
 0x523   : > { %v9240_v53 = vpop.eup %9239  ;;  %v5396_v39 = vadd.f32 1.0, %v9238_v21  ;;  %9257 = vpow2.f32 %v7387_v52  ;;  %8368 = vmatprep.mubr.bf16.mxu0 %v5560_v28  ;;  %v11564_v27 = vadd.f32 %v8437_v38, %v11434_v18  ;;  %v8439_v51 = vadd.f32 %v5173_v32, %v12480_v58  ;;  %v12487_v38 = vld [vmem:[#allocation78_spill] sm:$0xff]  ;;  %v8801_v12 = vld [vmem:[%s12176_s9 + $0x58] sm:$0xff]  }
 0x524   : > { %v9242_v6 = vpop.eup %9241  ;;  %9259 = vrcp.f32 %v5398_v14  ;;  %v5399_v3 = vadd.f32 1.0, %v9240_v53  ;;  %v7392_v57 = vmul.f32 -1.442695, %v11557_v33  ;;  %8369 = vmatmul.mubr.bf16.vlgmr.msra.gmra.mrb[128].mxu0 %v5561_v56  ;;  %v11569_v62 = vadd.f32 %v8438_v0, %v11434_v18  ;;  %v12482_v56 = vld [vmem:[#allocation13_spill] sm:$0xff] }
 0x525   : > { %9261 = vrcp.f32 %v5396_v39  ;;  %v5397_v15 = vadd.f32 1.0, %v9242_v6  ;;  %v7390_v10 = vmul.f32 -1.442695, %v11564_v27  ;;  %v11573_v63 = vadd.f32 %v8439_v51, %v11434_v18  ;;  %7761 = vmatpush3.bf16.msra.mxu0 %v8796_v34  ;;  %v12488_v39 = vld [vmem:[#allocation79_spill] sm:$0xff] }
 0x526   : > { %v9244_v5 = vpop.eup %9243  ;;  %9263 = vrcp.f32 %v5399_v3  ;;  %v7393_v26 = vmul.f32 -1.442695, %v11569_v62  ;;  %v5516_v60 = vadd.f32 %v5484_v35, %v12481_v11  ;;  %v5517_v19 = vadd.f32 %v5485_v29, %v12482_v56  ;;  %7762 = vmatprep.subr.bf16.mxu0 %v8797_v49  ;;  %v8802_v11 = vld [vmem:[%s12176_s9 + $0x18] sm:$0xff]  }
 0x527   : > { %v9246_v47 = vpop.eup %9245  ;;  %v5490_v43 = vmul.f32 %v9244_v5, %v11479_v16  ;;  %9265 = vrcp.f32 %v5397_v15  ;;  %v7391_v54 = vmul.f32 -1.442695, %v11573_v63  ;;  %v8346_v4 = vpop.f32.mrb[8].mxu1  ;;  %v5518_v7 = vadd.f32 %v5486_v9, %v12483_v20 }
 0x528   : > { %v9248_v36 = vpop.eup %9247  ;;  %v5488_v46 = vmul.f32 %v9246_v47, %v11483_v8  ;;  %9267 = vpow2.f32 %v7392_v57  ;;  %v8440_v35 = vadd.f32 %v8346_v4, %v12484_v25  ;;  %v5562_v22 = vpack.c.bf16 %v5517_v19, %v5516_v60  ;;  %v5186_v24 = vpop.f32.mrb[9].mxu1  ;;  %v12489_v57 = vld [vmem:[#allocation21_spill] sm:$0xff] }
 0x529   : > { %v9250_v13 = vpop.eup %9249  ;;  %v5491_v52 = vmul.f32 %v9248_v36, %v11488_v37  ;;  %9269 = vpow2.f32 %v7390_v10  ;;  %v8441_v16 = vadd.f32 %v5186_v24, %v12485_v31  ;;  %v5519_v41 = vadd.f32 %v5487_v30, %v12486_v2  ;;  %v8347_v29 = vpop.f32.mrb[10].mxu1  ;;  %7763 = vmatpush3.bf16.msra.mxu0 %v8798_v61  ;;  %v8800_v37 = vld [vmem:[%s12176_s9 + $0x10] sm:$0xff]  }
 0x52a   : > { %v9252_v28 = vpop.eup %9251  ;;  %v5489_v9 = vmul.f32 %v9250_v13, %v11492_v42  ;;  %9271 = vpow2.f32 %v7393_v26  ;;  %v11594_v8 = vadd.f32 %v8440_v35, %v11434_v18  ;;  %8372 = vmatprep.mubr.bf16.mxu0 %v5562_v22  ;;  %v8442_v1 = vadd.f32 %v8347_v29, %v12487_v38  ;;  %v5189_v34 = vpop.f32.mrb[11].mxu1  ;;  %7764 = vmatprep.subr.bf16.mxu0 %v8799_v59  ;;  %v12490_v59 = vld [vmem:[#allocation20_spill] sm:$0xff]  ;;  %v12493_v13 = vld [vmem:[#allocation81_spill] sm:$0xff] }
 0x52b   : > { %v9254_v21 = vpop.eup %9253  ;;  %v5402_v30 = vadd.f32 1.0, %v9252_v28  ;;  %9273 = vpow2.f32 %v7391_v54  ;;  %v11601_v14 = vadd.f32 %v8441_v16, %v11434_v18  ;;  %v5563_v42 = vpack.c.bf16 %v5519_v41, %v5518_v7  ;;  %v12491_v54 = vld [vmem:[#allocation26_spill] sm:$0xff]  ;;  %v12494_v41 = vld [vmem:[#allocation24_spill] sm:$0xff] }
 0x52c   : > { %v9256_v0 = vpop.eup %9255  ;;  %v5400_v32 = vadd.f32 1.0, %v9254_v21  ;;  %v7396_v49 = vmul.f32 -1.442695, %v11594_v8  ;;  %v11608_v53 = vadd.f32 %v8442_v1, %v11434_v18  ;;  %v8443_v58 = vadd.f32 %v5189_v34, %v12488_v39  ;;  %v12495_v1 = vld [vmem:[#allocation82_spill] sm:$0xff] }
 0x52d   : > { %v9258_v51 = vpop.eup %9257  ;;  %9275 = vrcp.f32 %v5402_v30  ;;  %v5403_v6 = vadd.f32 1.0, %v9256_v0  ;;  %v7394_v3 = vmul.f32 -1.442695, %v11601_v14  ;;  %8373 = vmatmul.mubr.bf16.gmra.mrb[132].mxu0 %v5563_v42  ;;  %v5520_v15 = vadd.f32 %v5488_v46, %v12489_v57  ;;  %v12492_v46 = vld [vmem:[#allocation80_spill] sm:$0xff]  ;;  %v12498_v57 = vld [vmem:[#allocation29_spill] sm:$0xff] }
 0x52e   : > { %v9260_v10 = vpop.eup %9259  ;;  %9277 = vrcp.f32 %v5400_v32  ;;  %v5401_v61 = vadd.f32 1.0, %v9258_v51  ;;  %v7397_v5 = vmul.f32 -1.442695, %v11608_v53  ;;  %v11615_v26 = vadd.f32 %v8443_v58, %v11434_v18  ;;  %7765 = vmatpush3.bf16.msra.mxu0 %v8800_v37  ;;  %v12497_v58 = vld [vmem:[#allocation28_spill] sm:$0xff] }
 0x52f   : > { %v9262_v60 = vpop.eup %9261  ;;  %v5494_v56 = vmul.f32 %v9260_v10, %v11499_v55  ;;  %9279 = vrcp.f32 %v5403_v6  ;;  %v8350_v19 = vpop.f32.mrb[12].mxu1  ;;  %v5521_v47 = vadd.f32 %v5489_v9, %v12490_v59  ;;  %v5522_v4 = vadd.f32 %v5490_v43, %v12491_v54  ;;  %7766 = vmatprep.subr.bf16.mxu0 %v8801_v12  ;;  %v12499_v10 = vld [vmem:[#allocation32_spill] sm:$0xff] }
 0x530   : > { %v9264_v20 = vpop.eup %9263  ;;  %v5492_v7 = vmul.f32 %v9262_v60, %v11503_v44  ;;  %9281 = vrcp.f32 %v5401_v61  ;;  %v7395_v36 = vmul.f32 -1.442695, %v11615_v26  ;;  %v8444_v25 = vadd.f32 %v8350_v19, %v12492_v46  ;;  %v5202_v35 = vpop.f32.mrb[13].mxu1  ;;  %v12500_v19 = vld [vmem:[#allocation33_spill] sm:$0xff] }
 0x531   : > { %v9266_v22 = vpop.eup %9265  ;;  %v5495_v24 = vmul.f32 %v9264_v20, %v11508_v23  ;;  %9283 = vpow2.f32 %v7396_v49  ;;  %v5564_v55 = vpack.c.bf16 %v5521_v47, %v5520_v15  ;;  %v8445_v31 = vadd.f32 %v5202_v35, %v12493_v13  ;;  %v8351_v16 = vpop.f32.mrb[14].mxu1  ;;  %v12496_v49 = vld [vmem:[#allocation83_spill] sm:$0xff]  ;;  %v12501_v35 = vld [vmem:[#allocation40_spill] sm:$0xff] }
 0x532   : > { %v9268_v2 = vpop.eup %9267  ;;  %v5493_v43 = vmul.f32 %v9266_v22, %v11512_v45  ;;  %9285 = vpow2.f32 %v7394_v3  ;;  %v11630_v44 = vadd.f32 %v8444_v25, %v11434_v18  ;;  %v5523_v29 = vadd.f32 %v5491_v52, %v12494_v41  ;;  %v5205_v28 = vpop.f32.mrb[15].mxu1  ;;  %7767 = vmatpush3.bf16.msra.mxu0 %v8802_v11 }
 0x533   : > { %v9270_v9 = vpop.eup %9269  ;;  %v5406_v38 = vadd.f32 1.0, %v9268_v2  ;;  %9287 = vpow2.f32 %v7397_v5  ;;  %8376 = vmatprep.mubr.bf16.mxu0 %v5564_v55  ;;  %v11634_v23 = vadd.f32 %v8445_v31, %v11434_v18  ;;  %v8446_v34 = vadd.f32 %v8351_v16, %v12495_v1  ;;  %v12503_v31 = vld [vmem:[#allocation36_spill] sm:$0xff]  ;;  %v12504_v16 = vld [vmem:[#allocation37_spill] sm:$0xff] }
 0x534   : > { %v9272_v37 = vpop.eup %9271  ;;  %v5404_v21 = vadd.f32 1.0, %v9270_v9  ;;  %9289 = vpow2.f32 %v7395_v36  ;;  %v7400_v45 = vmul.f32 -1.442695, %v11630_v44  ;;  %v5565_v30 = vpack.c.bf16 %v5523_v29, %v5522_v4 }
 0x535   : > { %v9274_v42 = vpop.eup %9273  ;;  %9291 = vrcp.f32 %v5406_v38  ;;  %v5407_v52 = vadd.f32 1.0, %v9272_v37  ;;  %v7398_v12 = vmul.f32 -1.442695, %v11634_v23  ;;  %v11640_v0 = vadd.f32 %v8446_v34, %v11434_v18 }
 0x536   : > { %9293 = vrcp.f32 %v5404_v21  ;;  %v5405_v32 = vadd.f32 1.0, %v9274_v42  ;;  %8377 = vmatmul.mubr.bf16.gmra.mrb[136].mxu0 %v5565_v30  ;;  %v8447_v39 = vadd.f32 %v5205_v28, %v12496_v49  ;;  %v5524_v51 = vadd.f32 %v5492_v7, %v12497_v58 }
 0x537   : > { %v9276_v6 = vpop.eup %9275  ;;  %9295 = vrcp.f32 %v5407_v52  ;;  %v7401_v3 = vmul.f32 -1.442695, %v11640_v0  ;;  %v5525_v15 = vadd.f32 %v5493_v43, %v12498_v57  ;;  %v5526_v61 = vadd.f32 %v5494_v56, %v12499_v10  ;;  %v12508_v57 = vld [vmem:[#allocation45_spill] sm:$0xff] }
 0x538   : > { %v9278_v5 = vpop.eup %9277  ;;  %v5498_v11 = vmul.f32 %v9276_v6, %v11527_v17  ;;  %9297 = vrcp.f32 %v5405_v32  ;;  %v11649_v60 = vadd.f32 %v8447_v39, %v11434_v18  ;;  %v5527_v59 = vadd.f32 %v5495_v24, %v12500_v19  ;;  %v12505_v32 = vld [vmem:[#allocation48_spill] sm:$0xff]  ;;  %v12506_v39 = vld [vmem:[#allocation49_spill] sm:$0xff] }
 0x539   : > { %v9280_v47 = vpop.eup %9279  ;;  %v5496_v54 = vmul.f32 %v9278_v5, %v11530_v50  ;;  %9299 = vpow2.f32 %v7400_v45  ;;  %v5566_v4 = vpack.c.bf16 %v5525_v15, %v5524_v51  ;;  %v12502_v50 = vld [vmem:[#allocation42_spill] sm:$0xff]  ;;  %v12507_v6 = vld [vmem:[#allocation44_spill] sm:$0xff] }
 0x53a   : > { %v9282_v20 = vpop.eup %9281  ;;  %v5499_v7 = vmul.f32 %v9280_v47, %v11538_v48  ;;  %9301 = vpow2.f32 %v7398_v12  ;;  %v7399_v56 = vmul.f32 -1.442695, %v11649_v60  ;;  %v5567_v36 = vpack.c.bf16 %v5527_v59, %v5526_v61 }
 0x53b   : > { %v9284_v46 = vpop.eup %9283  ;;  %v5497_v17 = vmul.f32 %v9282_v20, %v11541_v40  ;;  %9303 = vpow2.f32 %v7401_v3  ;;  %8380 = vmatprep.mubr.bf16.mxu0 %v5566_v4  ;;  %v5530_v22 = vadd.f32 %v5498_v11, %v12501_v35  ;;  %v5528_v48 = vadd.f32 %v5496_v54, %v12503_v31 }
 0x53c   : > { %v9286_v18 = vpop.eup %9285  ;;  %v5410_v25 = vadd.f32 1.0, %v9284_v46  ;;  %9305 = vpow2.f32 %v7399_v56  ;;  %v5531_v24 = vadd.f32 %v5499_v7, %v12502_v50  ;;  %v12509_v7 = vld [vmem:[#allocation56_spill] sm:$0xff] }
 0x53d   : > { %v9288_v55 = vpop.eup %9287  ;;  %v5408_v13 = vadd.f32 1.0, %v9286_v18  ;;  %v5529_v2 = vadd.f32 %v5497_v17, %v12504_v16  ;;  %v12511_v17 = vld [vmem:[#allocation52_spill] sm:$0xff] }
 0x53e   : > { %v9290_v43 = vpop.eup %9289  ;;  %9307 = vrcp.f32 %v5410_v25  ;;  %v5411_v41 = vadd.f32 1.0, %v9288_v55  ;;  %8381 = vmatmul.mubr.bf16.gmra.mrb[140].mxu0 %v5567_v36  ;;  %v5569_v40 = vpack.c.bf16 %v5531_v24, %v5530_v22  ;;  %v12510_v36 = vld [vmem:[#allocation57_spill] sm:$0xff] }
 0x53f   : > { %v9292_v29 = vpop.eup %9291  ;;  %9309 = vrcp.f32 %v5408_v13  ;;  %v5409_v28 = vadd.f32 1.0, %v9290_v43  ;;  %v5568_v9 = vpack.c.bf16 %v5529_v2, %v5528_v48  ;;  %v12512_v25 = vld [vmem:[#allocation53_spill] sm:$0xff]  ;;  %v12513_v48 = vld [vmem:[#allocation64_spill] sm:$0xff] }
 0x540   : > { %v9294_v38 = vpop.eup %9293  ;;  %v5502_v1 = vmul.f32 %v9292_v29, %v11557_v33  ;;  %9311 = vrcp.f32 %v5411_v41  ;;  %v12514_v2 = vld [vmem:[#allocation65_spill] sm:$0xff]  ;;  %v12515_v41 = vld [vmem:[#allocation60_spill] sm:$0xff] }
 0x541   : > { %v9296_v34 = vpop.eup %9295  ;;  %v5500_v37 = vmul.f32 %v9294_v38, %v11564_v27  ;;  %9313 = vrcp.f32 %v5409_v28  ;;  %8384 = vmatprep.mubr.bf16.mxu0 %v5568_v9  ;;  %v12516_v29 = vld [vmem:[#allocation61_spill] sm:$0xff]  ;;  %v12518_v38 = vld [vmem:[#allocation6_spill] sm:$0xff] }
 0x542   : > { %v9298_v21 = vpop.eup %9297  ;;  %v5503_v45 = vmul.f32 %v9296_v34, %v11569_v62  ;;  %v5534_v49 = vadd.f32 %v5502_v1, %v12505_v32  ;;  %v8805_v34 = vld [vmem:[%s12176_s9 + $0x68] sm:$0xff]  }
 0x543   : > { %v9300_v30 = vpop.eup %9299  ;;  %v5501_v42 = vmul.f32 %v9298_v21, %v11573_v63  ;;  %v5532_v3 = vadd.f32 %v5500_v37, %v12507_v6  ;;  %v8806_v37 = vld [vmem:[%s12176_s9 + $0x28] sm:$0xff]   ;;  %v8807_v21 = vld [vmem:[%s12176_s9 + $0x70] sm:$0xff]  }
 0x544   : > { %v9302_v52 = vpop.eup %9301  ;;  %v5414_v12 = vadd.f32 1.0, %v9300_v30  ;;  %v5535_v58 = vadd.f32 %v5503_v45, %v12506_v39  ;;  %v8808_v45 = vld [vmem:[%s12176_s9 + $0x30] sm:$0xff]   ;;  %v8809_v30 = vld [vmem:[%s12176_s9 + $0x78] sm:$0xff]  }
 0x545   : > { %v9304_v51 = vpop.eup %9303  ;;  %v5412_v33 = vadd.f32 1.0, %v9302_v52  ;;  %v5533_v27 = vadd.f32 %v5501_v42, %v12508_v57  ;;  %v8810_v42 = vld [vmem:[%s12176_s9 + $0x38] sm:$0xff]   ;;  %v11714_v52 = vld [vmem:[%s12175_s8] ss:$0 sm:$0xff] }
 0x546   : > { %v9306_v15 = vpop.eup %9305  ;;  %9315 = vrcp.f32 %v5414_v12  ;;  %v5415_v10 = vadd.f32 1.0, %v9304_v51  ;;  %8385 = vmatmul.mubr.bf16.gmra.mrb[144].mxu0 %v5569_v40  ;;  %v5571_v62 = vpack.c.bf16 %v5535_v58, %v5534_v49 }
 0x547   : > { %9317 = vrcp.f32 %v5412_v33  ;;  %v5413_v61 = vadd.f32 1.0, %v9306_v15  ;;  %v5570_v63 = vpack.c.bf16 %v5533_v27, %v5532_v3 }
 0x548   : > { %v9308_v5 = vpop.eup %9307  ;;  %9319 = vrcp.f32 %v5415_v10 }
 0x549   : > { %v9310_v11 = vpop.eup %9309  ;;  %v5506_v19 = vmul.f32 %v9308_v5, %v11594_v8  ;;  %9321 = vrcp.f32 %v5413_v61  ;;  %8388 = vmatprep.mubr.bf16.mxu0 %v5570_v63 }
 0x54a   : > { %v9312_v59 = vpop.eup %9311  ;;  %v5504_v47 = vmul.f32 %v9310_v11, %v11601_v14 }
 0x54b   : > { %v9314_v54 = vpop.eup %9313  ;;  %v5507_v4 = vmul.f32 %v9312_v59, %v11608_v53  ;;  %v5538_v56 = vadd.f32 %v5506_v19, %v12509_v7 }
 0x54c   : > { %v5505_v20 = vmul.f32 %v9314_v54, %v11615_v26  ;;  %v5536_v18 = vadd.f32 %v5504_v47, %v12511_v17 }
 0x54d   : > { %v5539_v46 = vadd.f32 %v5507_v4, %v12510_v36 }
 0x54e   : > { %8389 = vmatmul.mubr.bf16.gmra.mrb[148].mxu0 %v5571_v62  ;;  %v5537_v35 = vadd.f32 %v5505_v20, %v12512_v25 }
 0x54f   : > { %v5573_v8 = vpack.c.bf16 %v5539_v46, %v5538_v56 }
 0x550   : > { %v9316_v22 = vpop.eup %9315  ;;  %v5572_v50 = vpack.c.bf16 %v5537_v35, %v5536_v18 }
 0x551   : > { %v9318_v24 = vpop.eup %9317  ;;  %v5510_v14 = vmul.f32 %v9316_v22, %v11630_v44 }
 0x552   : > { %v9320_v55 = vpop.eup %9319  ;;  %v5508_v53 = vmul.f32 %v9318_v24, %v11634_v23  ;;  %8392 = vmatprep.mubr.bf16.mxu0 %v5572_v50  ;;  %v12517_v23 = vld [vmem:[#allocation7_spill] sm:$0xff] }
 0x553   : > { %v9322_v26 = vpop.eup %9321  ;;  %v5511_v13 = vmul.f32 %v9320_v55, %v11640_v0  ;;  %v5542_v16 = vadd.f32 %v5510_v14, %v12513_v48  ;;  %v12519_v1 = vpack.c.bf16 %v12517_v23, %v12518_v38  ;;  %v8803_v0 = vld [vmem:[%s12176_s9 + $0x60] sm:$0xff]  }
 0x554   : > { %v5509_v31 = vmul.f32 %v9322_v26, %v11649_v60  ;;  %v5540_v40 = vadd.f32 %v5508_v53, %v12515_v41  ;;  %v8804_v60 = vld [vmem:[%s12176_s9 + $0x20] sm:$0xff]   ;;  %7768 = vmatprep.subr.bf16.mxu0 %v8803_v0 }
 0x555   : > { %v5543_v43 = vadd.f32 %v5511_v13, %v12514_v2  ;;  %7769 = vmatpush3.bf16.msra.mxu0 %v8804_v60 }
 0x556   : > { %8393 = vmatmul.mubr.bf16.gmra.mrb[152].mxu0 %v5573_v8  ;;  %v5541_v28 = vadd.f32 %v5509_v31, %v12516_v29  ;;  %7770 = vmatprep.subr.bf16.mxu0 %v8805_v34 }
 0x557   : > { %v5575_v9 = vpack.c.bf16 %v5543_v43, %v5542_v16 }
 0x558   : > { %v5574_v44 = vpack.c.bf16 %v5541_v28, %v5540_v40 }
 0x559   : > { %7771 = vmatpush3.bf16.msra.mxu0 %v8806_v37 }
 0x55a   : > { %8396 = vmatprep.mubr.bf16.mxu0 %v5574_v44  ;;  %7772 = vmatprep.subr.bf16.mxu0 %v8807_v21 }
 0x55d   : > { %7773 = vmatpush3.bf16.msra.mxu0 %v8808_v45 }
 0x55e   : > { %8397 = vmatmul.mubr.bf16.gmra.mrb[156].mxu0 %v5575_v9  ;;  %7774 = vmatprep.subr.bf16.mxu0 %v8809_v30 }
 0x55f   : > { %6311 = vmatprep.mubr.bf16.mxu0 %v12519_v1 }
 0x561   : > { %7775 = vmatpush3.bf16.msra.mxu0 %v8810_v42 }
 0x5f7   : > { %v8370_v12 = vpop.f32.mrb[128].mxu0 }
 0x5f8   : > { %v11717_v32 = vadd.f32 %v8370_v12, %v11714_v52  ;;  %v5665_v49 = vpop.f32.mrb[129].mxu0 }
 0x5f9   : > { %v11720_v39 = vadd.f32 %v11714_v52, %v5665_v49  ;;  %v8371_v58 = vpop.f32.mrb[130].mxu0 }
 0x5fa   : > { %v7413_v51 = vmul.f32 -1.442695, %v11717_v32  ;;  %v11724_v33 = vadd.f32 %v8371_v58, %v11714_v52  ;;  %v5668_v6 = vpop.f32.mrb[131].mxu0 }
 0x5fb   : > { %v7411_v3 = vmul.f32 -1.442695, %v11720_v39  ;;  %v11728_v57 = vadd.f32 %v11714_v52, %v5668_v6 }
 0x5fc   : > { %9323 = vpow2.f32 %v7413_v51  ;;  %v7414_v27 = vmul.f32 -1.442695, %v11724_v33 }
 0x5fd   : > { %9325 = vpow2.f32 %v7411_v3  ;;  %v7412_v15 = vmul.f32 -1.442695, %v11728_v57 }
 0x5fe   : > { %9327 = vpow2.f32 %v7414_v27 }
 0x5ff   : > { %9329 = vpow2.f32 %v7412_v15 }
 0x600   : > { %v8374_v10 = vpop.f32.mrb[132].mxu0 }
 0x601   : > { %v11733_v62 = vadd.f32 %v8374_v10, %v11714_v52  ;;  %v5681_v61 = vpop.f32.mrb[133].mxu0 }
 0x602   : > { %v11736_v63 = vadd.f32 %v11714_v52, %v5681_v61  ;;  %v8375_v5 = vpop.f32.mrb[134].mxu0 }
 0x603   : > { %v7417_v11 = vmul.f32 -1.442695, %v11733_v62  ;;  %v11740_v19 = vadd.f32 %v8375_v5, %v11714_v52  ;;  %v5684_v59 = vpop.f32.mrb[135].mxu0 }
 0x604   : > { %v7415_v47 = vmul.f32 -1.442695, %v11736_v63  ;;  %v11744_v54 = vadd.f32 %v11714_v52, %v5684_v59 }
 0x605   : > { %9331 = vpow2.f32 %v7417_v11  ;;  %v7418_v4 = vmul.f32 -1.442695, %v11740_v19 }
 0x606   : > { %v9324_v20 = vpop.eup %9323  ;;  %9333 = vpow2.f32 %v7415_v47  ;;  %v7416_v7 = vmul.f32 -1.442695, %v11744_v54 }
 0x607   : > { %v9326_v56 = vpop.eup %9325  ;;  %v5890_v36 = vadd.f32 1.0, %v9324_v20  ;;  %9335 = vpow2.f32 %v7418_v4 }
 0x608   : > { %v9328_v46 = vpop.eup %9327  ;;  %v5888_v17 = vadd.f32 1.0, %v9326_v56  ;;  %9337 = vpow2.f32 %v7416_v7 }
 0x609   : > { %v9330_v18 = vpop.eup %9329  ;;  %9339 = vrcp.f32 %v5890_v36  ;;  %v5891_v25 = vadd.f32 1.0, %v9328_v46  ;;  %v8378_v35 = vpop.f32.mrb[136].mxu0 }
 0x60a   : > { %9341 = vrcp.f32 %v5888_v17  ;;  %v5889_v8 = vadd.f32 1.0, %v9330_v18  ;;  %v11749_v22 = vadd.f32 %v8378_v35, %v11714_v52  ;;  %v5697_v50 = vpop.f32.mrb[137].mxu0 }
 0x60b   : > { %9343 = vrcp.f32 %v5891_v25  ;;  %v11752_v24 = vadd.f32 %v11714_v52, %v5697_v50  ;;  %v8379_v14 = vpop.f32.mrb[138].mxu0  ;;  %v12521_v50 = vld [vmem:[#allocation10_spill] sm:$0xff] }
 0x60c   : > { %9345 = vrcp.f32 %v5889_v8  ;;  %v7421_v55 = vmul.f32 -1.442695, %v11749_v22  ;;  %v11756_v53 = vadd.f32 %v8379_v14, %v11714_v52  ;;  %v5700_v26 = vpop.f32.mrb[139].mxu0  ;;  %v12520_v8 = vld [vmem:[#allocation11_spill] sm:$0xff] }
 0x60d   : > { %v7419_v13 = vmul.f32 -1.442695, %v11752_v24  ;;  %v11760_v31 = vadd.f32 %v11714_v52, %v5700_v26  ;;  %v12522_v14 = vpack.c.bf16 %v12520_v8, %v12521_v50 }
 0x60e   : > { %9347 = vpow2.f32 %v7421_v55  ;;  %v7422_v48 = vmul.f32 -1.442695, %v11756_v53 }
 0x60f   : > { %v9332_v16 = vpop.eup %9331  ;;  %9349 = vpow2.f32 %v7419_v13  ;;  %v7420_v2 = vmul.f32 -1.442695, %v11760_v31 }
 0x610   : > { %v9334_v43 = vpop.eup %9333  ;;  %v5894_v41 = vadd.f32 1.0, %v9332_v16  ;;  %9351 = vpow2.f32 %v7422_v48 }
 0x611   : > { %v9336_v40 = vpop.eup %9335  ;;  %v5892_v29 = vadd.f32 1.0, %v9334_v43  ;;  %9353 = vpow2.f32 %v7420_v2  ;;  %v8382_v28 = vpop.f32.mrb[140].mxu0 }
 0x612   : > { %v9338_v9 = vpop.eup %9337  ;;  %9355 = vrcp.f32 %v5894_v41  ;;  %v5895_v44 = vadd.f32 1.0, %v9336_v40  ;;  %v11765_v23 = vadd.f32 %v8382_v28, %v11714_v52  ;;  %v5713_v38 = vpop.f32.mrb[141].mxu0 }
 0x613   : > { %v9340_v1 = vpop.eup %9339  ;;  %9357 = vrcp.f32 %v5892_v29  ;;  %v5893_v0 = vadd.f32 1.0, %v9338_v9  ;;  %v11768_v60 = vadd.f32 %v11714_v52, %v5713_v38  ;;  %v8383_v34 = vpop.f32.mrb[142].mxu0 }
 0x614   : > { %v9342_v37 = vpop.eup %9341  ;;  %9359 = vrcp.f32 %v5895_v44  ;;  %v7425_v21 = vmul.f32 -1.442695, %v11765_v23  ;;  %v11772_v45 = vadd.f32 %v8383_v34, %v11714_v52  ;;  %v5716_v30 = vpop.f32.mrb[143].mxu0  ;;  %v11779_v51 = vmul.f32 %v9340_v1, %v11717_v32 }
 0x615   : > { %v9344_v42 = vpop.eup %9343  ;;  %9361 = vrcp.f32 %v5893_v0  ;;  %v7423_v12 = vmul.f32 -1.442695, %v11768_v60  ;;  %v11776_v49 = vadd.f32 %v11714_v52, %v5716_v30  ;;  %v5984_v27 = vmul.f32 %v9342_v37, %v11720_v39 }
 0x616   : > { %v9346_v58 = vpop.eup %9345  ;;  %v11782_v6 = vmul.f32 %v9344_v42, %v11724_v33  ;;  %9363 = vpow2.f32 %v7425_v21  ;;  %v7426_v3 = vmul.f32 -1.442695, %v11772_v45 }
 0x617   : > { %v5985_v15 = vmul.f32 %v9346_v58, %v11728_v57  ;;  %9365 = vpow2.f32 %v7423_v12  ;;  %v7424_v10 = vmul.f32 -1.442695, %v11776_v49 }
 0x618   : > { %v9348_v61 = vpop.eup %9347  ;;  %9367 = vpow2.f32 %v7426_v3  ;;  %v6146_v5 = vpack.c.bf16 %v11782_v6, %v11779_v51  ;;  %v12523_v3 = vld [vmem:[#allocation15_spill] sm:$0xff] }
 0x619   : > { %v9350_v32 = vpop.eup %9349  ;;  %v6144_v11 = vpack.c.bf16 %v5985_v15, %v5984_v27  ;;  %v5898_v59 = vadd.f32 1.0, %v9348_v61  ;;  %9369 = vpow2.f32 %v7424_v10  ;;  %v8386_v33 = vpop.f32.mrb[144].mxu0  ;;  %v12524_v27 = vld [vmem:[#allocation14_spill] sm:$0xff] }
 0x61a   : > { %v9352_v47 = vpop.eup %9351  ;;  %v5896_v4 = vadd.f32 1.0, %v9350_v32  ;;  %v11791_v20 = vadd.f32 %v8386_v33, %v11714_v52  ;;  %v5729_v39 = vpop.f32.mrb[145].mxu0  ;;  %v12525_v15 = vpack.c.bf16 %v12523_v3, %v12524_v27 }
 0x61b   : > { %v9354_v57 = vpop.eup %9353  ;;  %9371 = vrcp.f32 %v5898_v59  ;;  %v5899_v7 = vadd.f32 1.0, %v9352_v47  ;;  %v11794_v56 = vadd.f32 %v11714_v52, %v5729_v39  ;;  %v8387_v36 = vpop.f32.mrb[146].mxu0  ;;  %6312 = vmatmul.mubr.bf16.vlgmr.msra.gmra.mrb[160].mxu0 %v6144_v11 }
 0x61c   : > { %v9356_v46 = vpop.eup %9355  ;;  %9373 = vrcp.f32 %v5896_v4  ;;  %v5897_v17 = vadd.f32 1.0, %v9354_v57  ;;  %v7429_v18 = vmul.f32 -1.442695, %v11791_v20  ;;  %v11798_v25 = vadd.f32 %v8387_v36, %v11714_v52  ;;  %v5732_v35 = vpop.f32.mrb[147].mxu0  ;;  %6319 = vmatprep.mubr.bf16.mxu0 %v12522_v14 }
 0x61d   : > { %v9358_v55 = vpop.eup %9357  ;;  %9375 = vrcp.f32 %v5899_v7  ;;  %v7427_v26 = vmul.f32 -1.442695, %v11794_v56  ;;  %v11805_v13 = vadd.f32 %v11714_v52, %v5732_v35  ;;  %v11809_v43 = vmul.f32 %v9356_v46, %v11733_v62 }
 0x61e   : > { %v9360_v48 = vpop.eup %9359  ;;  %9377 = vrcp.f32 %v5897_v17  ;;  %v7430_v16 = vmul.f32 -1.442695, %v11798_v25  ;;  %v5988_v28 = vmul.f32 %v9358_v55, %v11736_v63 }
 0x61f   : > { %v9362_v2 = vpop.eup %9361  ;;  %v11812_v41 = vmul.f32 %v9360_v48, %v11740_v19  ;;  %9379 = vpow2.f32 %v7429_v18  ;;  %v7428_v40 = vmul.f32 -1.442695, %v11805_v13 }
 0x620   : > { %v9364_v29 = vpop.eup %9363  ;;  %v5989_v9 = vmul.f32 %v9362_v2, %v11744_v54  ;;  %9381 = vpow2.f32 %v7427_v26 }
 0x621   : > { %v9366_v44 = vpop.eup %9365  ;;  %v5902_v38 = vadd.f32 1.0, %v9364_v29  ;;  %9383 = vpow2.f32 %v7430_v16  ;;  %v8390_v1 = vpop.f32.mrb[148].mxu0  ;;  %v6150_v62 = vpack.c.bf16 %v11812_v41, %v11809_v43  ;;  %v12527_v29 = vld [vmem:[#allocation19_spill] sm:$0xff] }
 0x622   : > { %v9368_v0 = vpop.eup %9367  ;;  %v5900_v34 = vadd.f32 1.0, %v9366_v44  ;;  %9385 = vpow2.f32 %v7428_v40  ;;  %v11820_v19 = vadd.f32 %v8390_v1, %v11714_v52  ;;  %v5745_v37 = vpop.f32.mrb[149].mxu0  ;;  %v6148_v21 = vpack.c.bf16 %v5989_v9, %v5988_v28  ;;  %v12526_v40 = vld [vmem:[#allocation18_spill] sm:$0xff] }
 0x623   : > { %v9370_v30 = vpop.eup %9369  ;;  %9387 = vrcp.f32 %v5902_v38  ;;  %v5903_v63 = vadd.f32 1.0, %v9368_v0  ;;  %v11823_v54 = vadd.f32 %v11714_v52, %v5745_v37  ;;  %v8391_v42 = vpop.f32.mrb[150].mxu0  ;;  %6320 = vmatmul.mubr.bf16.gmra.mrb[164].mxu0 %v6146_v5  ;;  %v12528_v28 = vpack.c.bf16 %v12526_v40, %v12527_v29 }
 0x624   : > { %9389 = vrcp.f32 %v5900_v34  ;;  %v5901_v12 = vadd.f32 1.0, %v9370_v30  ;;  %v7433_v58 = vmul.f32 -1.442695, %v11820_v19  ;;  %v11827_v51 = vadd.f32 %v8391_v42, %v11714_v52  ;;  %v5748_v6 = vpop.f32.mrb[151].mxu0  ;;  %6327 = vmatprep.mubr.bf16.mxu0 %v12525_v15 }
 0x625   : > { %v9372_v10 = vpop.eup %9371  ;;  %9391 = vrcp.f32 %v5903_v63  ;;  %v7431_v61 = vmul.f32 -1.442695, %v11823_v54  ;;  %v11834_v32 = vadd.f32 %v11714_v52, %v5748_v6 }
 0x626   : > { %v9374_v5 = vpop.eup %9373  ;;  %9393 = vrcp.f32 %v5901_v12  ;;  %v7434_v11 = vmul.f32 -1.442695, %v11827_v51  ;;  %v11839_v4 = vmul.f32 %v9372_v10, %v11749_v22 }
 0x627   : > { %v9376_v59 = vpop.eup %9375  ;;  %9395 = vpow2.f32 %v7433_v58  ;;  %v7432_v33 = vmul.f32 -1.442695, %v11834_v32  ;;  %v11845_v7 = vmul.f32 %v9374_v5, %v11752_v24 }
 0x628   : > { %v9378_v47 = vpop.eup %9377  ;;  %v11842_v39 = vmul.f32 %v9376_v59, %v11756_v53  ;;  %9397 = vpow2.f32 %v7431_v61 }
 0x629   : > { %v9380_v57 = vpop.eup %9379  ;;  %v11848_v36 = vmul.f32 %v9378_v47, %v11760_v31  ;;  %9399 = vpow2.f32 %v7434_v11  ;;  %v8394_v46 = vpop.f32.mrb[152].mxu0 }
 0x62a   : > { %v9382_v17 = vpop.eup %9381  ;;  %v5906_v18 = vadd.f32 1.0, %v9380_v57  ;;  %9401 = vpow2.f32 %v7432_v33  ;;  %v11851_v35 = vadd.f32 %v8394_v46, %v11714_v52  ;;  %v5761_v22 = vpop.f32.mrb[153].mxu0  ;;  %v6154_v53 = vpack.c.bf16 %v11842_v39, %v11839_v4 }
 0x62b   : > { %v9384_v8 = vpop.eup %9383  ;;  %v5904_v50 = vadd.f32 1.0, %v9382_v17  ;;  %v11856_v24 = vadd.f32 %v11714_v52, %v5761_v22  ;;  %v8395_v14 = vpop.f32.mrb[154].mxu0  ;;  %6328 = vmatmul.mubr.bf16.gmra.mrb[168].mxu0 %v6148_v21  ;;  %v6152_v31 = vpack.c.bf16 %v11848_v36, %v11845_v7  ;;  %v12529_v17 = vld [vmem:[#allocation22_spill] sm:$0xff] }
 0x62c   : > { %v9386_v55 = vpop.eup %9385  ;;  %9403 = vrcp.f32 %v5906_v18  ;;  %v5907_v26 = vadd.f32 1.0, %v9384_v8  ;;  %v7437_v48 = vmul.f32 -1.442695, %v11851_v35  ;;  %v11862_v16 = vadd.f32 %v8395_v14, %v11714_v52  ;;  %v5764_v2 = vpop.f32.mrb[155].mxu0  ;;  %6335 = vmatprep.mubr.bf16.mxu0 %v12528_v28  ;;  %v12530_v18 = vld [vmem:[#allocation23_spill] sm:$0xff] }
 0x62d   : > { %v9388_v9 = vpop.eup %9387  ;;  %9405 = vrcp.f32 %v5904_v50  ;;  %v5905_v44 = vadd.f32 1.0, %v9386_v55  ;;  %v7435_v38 = vmul.f32 -1.442695, %v11856_v24  ;;  %v11869_v1 = vadd.f32 %v11714_v52, %v5764_v2 }
 0x62e   : > { %v9390_v0 = vpop.eup %9389  ;;  %9407 = vrcp.f32 %v5907_v26  ;;  %v7438_v34 = vmul.f32 -1.442695, %v11862_v16  ;;  %v11874_v63 = vmul.f32 %v9388_v9, %v11765_v23  ;;  %v12531_v22 = vpack.c.bf16 %v12529_v17, %v12530_v18  ;;  %v12536_v17 = vld [vmem:[#allocation31_spill] sm:$0xff] }
 0x62f   : > { %v9392_v37 = vpop.eup %9391  ;;  %9409 = vrcp.f32 %v5905_v44  ;;  %v7436_v21 = vmul.f32 -1.442695, %v11869_v1  ;;  %v11880_v58 = vmul.f32 %v9390_v0, %v11768_v60  ;;  %v12532_v0 = vld [vmem:[#allocation25_spill] sm:$0xff] }
 0x630   : > { %v9394_v30 = vpop.eup %9393  ;;  %v11877_v42 = vmul.f32 %v9392_v37, %v11772_v45  ;;  %9411 = vpow2.f32 %v7437_v48 }
 0x631   : > { %v9396_v12 = vpop.eup %9395  ;;  %v11883_v6 = vmul.f32 %v9394_v30, %v11776_v49  ;;  %9413 = vpow2.f32 %v7435_v38  ;;  %v8398_v3 = vpop.f32.mrb[156].mxu0 }
 0x632   : > { %v9398_v27 = vpop.eup %9397  ;;  %v5910_v15 = vadd.f32 1.0, %v9396_v12  ;;  %9415 = vpow2.f32 %v7438_v34  ;;  %v11886_v10 = vadd.f32 %v8398_v3, %v11714_v52  ;;  %v5777_v23 = vpop.f32.mrb[157].mxu0  ;;  %v6158_v45 = vpack.c.bf16 %v11877_v42, %v11874_v63  ;;  %v12533_v34 = vld [vmem:[#allocation27_spill] sm:$0xff]  ;;  %v12551_v63 = vld [vmem:[#allocation50_spill] sm:$0xff] }
 0x633   : > { %v9400_v61 = vpop.eup %9399  ;;  %v5908_v5 = vadd.f32 1.0, %v9398_v27  ;;  %9417 = vpow2.f32 %v7436_v21  ;;  %v11891_v60 = vadd.f32 %v11714_v52, %v5777_v23  ;;  %v8399_v49 = vpop.f32.mrb[158].mxu0  ;;  %6336 = vmatmul.mubr.bf16.gmra.mrb[172].mxu0 %v6150_v62  ;;  %v6156_v11 = vpack.c.bf16 %v11883_v6, %v11880_v58  ;;  %v12541_v58 = vld [vmem:[#allocation39_spill] sm:$0xff]  ;;  %v12542_v6 = vld [vmem:[#allocation38_spill] sm:$0xff] }
 0x634   : > { %v9402_v59 = vpop.eup %9401  ;;  %9419 = vrcp.f32 %v5910_v15  ;;  %v5911_v33 = vadd.f32 1.0, %v9400_v61  ;;  %v7441_v47 = vmul.f32 -1.442695, %v11886_v10  ;;  %v11900_v57 = vadd.f32 %v8399_v49, %v11714_v52  ;;  %v5780_v46 = vpop.f32.mrb[159].mxu0  ;;  %6343 = vmatprep.mubr.bf16.mxu0 %v12531_v22 }
 0x635   : > { %9421 = vrcp.f32 %v5908_v5  ;;  %v5909_v8 = vadd.f32 1.0, %v9402_v59  ;;  %v7439_v43 = vmul.f32 -1.442695, %v11891_v60  ;;  %v11907_v41 = vadd.f32 %v11714_v52, %v5780_v46  ;;  %v12535_v46 = vld [vmem:[#allocation30_spill] sm:$0xff] }
 0x636   : > { %v9404_v62 = vpop.eup %9403  ;;  %9423 = vrcp.f32 %v5911_v33  ;;  %v7442_v50 = vmul.f32 -1.442695, %v11900_v57  ;;  %v12537_v18 = vpack.c.bf16 %v12535_v46, %v12536_v17 }
 0x637   : > { %v9406_v14 = vpop.eup %9405  ;;  %9425 = vrcp.f32 %v5909_v8  ;;  %v7440_v55 = vmul.f32 -1.442695, %v11907_v41  ;;  %v11912_v2 = vmul.f32 %v9404_v62, %v11791_v20 }
 0x638   : > { %v9408_v26 = vpop.eup %9407  ;;  %9427 = vpow2.f32 %v7441_v47  ;;  %v11918_v29 = vmul.f32 %v9406_v14, %v11794_v56  ;;  %v12534_v56 = vpack.c.bf16 %v12532_v0, %v12533_v34  ;;  %v12538_v14 = vld [vmem:[#allocation34_spill] sm:$0xff] }
 0x639   : > { %v9410_v48 = vpop.eup %9409  ;;  %v11915_v40 = vmul.f32 %v9408_v26, %v11798_v25  ;;  %9429 = vpow2.f32 %v7439_v43  ;;  %v12554_v34 = vld [vmem:[#allocation54_spill] sm:$0xff] }
 0x63a   : > { %v9412_v52 = vpop.eup %9411  ;;  %v11921_v28 = vmul.f32 %v9410_v48, %v11805_v13  ;;  %9431 = vpow2.f32 %v7442_v50 }
 0x63b   : > { %v9414_v9 = vpop.eup %9413  ;;  %v5914_v44 = vadd.f32 1.0, %v9412_v52  ;;  %9433 = vpow2.f32 %v7440_v55  ;;  %6344 = vmatmul.mubr.bf16.gmra.mrb[176].mxu0 %v6152_v31  ;;  %v6162_v20 = vpack.c.bf16 %v11915_v40, %v11912_v2  ;;  %v12539_v55 = vld [vmem:[#allocation35_spill] sm:$0xff] }
 0x63c   : > { %v9416_v25 = vpop.eup %9415  ;;  %v5912_v38 = vadd.f32 1.0, %v9414_v9  ;;  %6351 = vmatprep.mubr.bf16.mxu0 %v12534_v56  ;;  %v6160_v13 = vpack.c.bf16 %v11921_v28, %v11918_v29  ;;  %v12540_v26 = vpack.c.bf16 %v12538_v14, %v12539_v55 }
 0x63d   : > { %v9418_v37 = vpop.eup %9417  ;;  %9435 = vrcp.f32 %v5914_v44  ;;  %v5915_v21 = vadd.f32 1.0, %v9416_v25  ;;  %v12544_v25 = vld [vmem:[#allocation43_spill] sm:$0xff] }
 0x63e   : > { %v9420_v30 = vpop.eup %9419  ;;  %9437 = vrcp.f32 %v5912_v38  ;;  %v5913_v12 = vadd.f32 1.0, %v9418_v37  ;;  %v12545_v38 = vld [vmem:[#allocation41_spill] sm:$0xff]  ;;  %v12557_v37 = vld [vmem:[#allocation58_spill] sm:$0xff] }
 0x63f   : > { %v9422_v7 = vpop.eup %9421  ;;  %9439 = vrcp.f32 %v5915_v21  ;;  %v6006_v3 = vmul.f32 %v9420_v30, %v11820_v19  ;;  %v12560_v30 = vld [vmem:[#allocation62_spill] sm:$0xff] }
 0x640   : > { %v9424_v36 = vpop.eup %9423  ;;  %9441 = vrcp.f32 %v5913_v12  ;;  %v6004_v23 = vmul.f32 %v9422_v7, %v11823_v54  ;;  %v12562_v7 = vld [vmem:[#allocation67_spill] sm:$0xff] }
 0x641   : > { %v9426_v31 = vpop.eup %9425  ;;  %v6007_v27 = vmul.f32 %v9424_v36, %v11827_v51  ;;  %v12563_v36 = vld [vmem:[#allocation66_spill] sm:$0xff] }
 0x642   : > { %v9428_v15 = vpop.eup %9427  ;;  %v6005_v61 = vmul.f32 %v9426_v31, %v11834_v32  ;;  %v12564_v31 = vpack.c.bf16 %v12562_v7, %v12563_v36 }
 0x643   : > { %v9430_v5 = vpop.eup %9429  ;;  %v5918_v49 = vadd.f32 1.0, %v9428_v15  ;;  %6352 = vmatmul.mubr.bf16.gmra.mrb[180].mxu0 %v6154_v53  ;;  %v6166_v59 = vpack.c.bf16 %v6007_v27, %v6006_v3  ;;  %v11987_v27 = vld [vmem:[%s12177_s10] ss:$0 sm:$0xff] }
 0x644   : > { %v9432_v33 = vpop.eup %9431  ;;  %v5916_v47 = vadd.f32 1.0, %v9430_v5  ;;  %6359 = vmatprep.mubr.bf16.mxu0 %v12537_v18  ;;  %v6164_v19 = vpack.c.bf16 %v6005_v61, %v6004_v23 }
 0x645   : > { %v9434_v51 = vpop.eup %9433  ;;  %9443 = vrcp.f32 %v5918_v49  ;;  %v5919_v22 = vadd.f32 1.0, %v9432_v33 }
 0x646   : > { %9445 = vrcp.f32 %v5916_v47  ;;  %v5917_v54 = vadd.f32 1.0, %v9434_v51 }
 0x647   : > { %v9436_v32 = vpop.eup %9435  ;;  %9447 = vrcp.f32 %v5919_v22 }
 0x648   : > { %v9438_v8 = vpop.eup %9437  ;;  %9449 = vrcp.f32 %v5917_v54  ;;  %v6010_v39 = vmul.f32 %v9436_v32, %v11851_v35 }
 0x649   : > { %v9440_v43 = vpop.eup %9439  ;;  %v6008_v62 = vmul.f32 %v9438_v8, %v11856_v24 }
 0x64a   : > { %v9442_v4 = vpop.eup %9441  ;;  %v6011_v53 = vmul.f32 %v9440_v43, %v11862_v16 }
 0x64b   : > { %v6009_v50 = vmul.f32 %v9442_v4, %v11869_v1  ;;  %6360 = vmatmul.mubr.bf16.gmra.mrb[184].mxu0 %v6156_v11  ;;  %v12543_v11 = vpack.c.bf16 %v12541_v58, %v12542_v6 }
 0x64c   : > { %6367 = vmatprep.mubr.bf16.mxu0 %v12540_v26  ;;  %v6170_v48 = vpack.c.bf16 %v6011_v53, %v6010_v39 }
 0x64d   : > { %v6168_v2 = vpack.c.bf16 %v6009_v50, %v6008_v62 }
 0x64f   : > { %v9444_v40 = vpop.eup %9443 }
 0x650   : > { %v9446_v52 = vpop.eup %9445  ;;  %v6014_v16 = vmul.f32 %v9444_v40, %v11886_v10  ;;  %v12546_v10 = vpack.c.bf16 %v12544_v25, %v12545_v38 }
 0x651   : > { %v9448_v29 = vpop.eup %9447  ;;  %v6012_v1 = vmul.f32 %v9446_v52, %v11891_v60  ;;  %v12548_v60 = vld [vmem:[#allocation46_spill] sm:$0xff] }
 0x652   : > { %v9450_v35 = vpop.eup %9449  ;;  %v6015_v24 = vmul.f32 %v9448_v29, %v11900_v57  ;;  %v12547_v57 = vld [vmem:[#allocation47_spill] sm:$0xff] }
 0x653   : > { %v6013_v28 = vmul.f32 %v9450_v35, %v11907_v41  ;;  %6368 = vmatmul.mubr.bf16.gmra.mrb[188].mxu0 %v6158_v45  ;;  %v12549_v0 = vpack.c.bf16 %v12547_v57, %v12548_v60  ;;  %v12550_v41 = vld [vmem:[#allocation51_spill] sm:$0xff] }
 0x654   : > { %6375 = vmatprep.mubr.bf16.mxu0 %v12543_v11  ;;  %v6174_v9 = vpack.c.bf16 %v6015_v24, %v6014_v16  ;;  %v12552_v42 = vpack.c.bf16 %v12550_v41, %v12551_v63  ;;  %v12553_v45 = vld [vmem:[#allocation55_spill] sm:$0xff] }
 0x655   : > { %v6172_v44 = vpack.c.bf16 %v6013_v28, %v6012_v1  ;;  %v12555_v56 = vpack.c.bf16 %v12553_v45, %v12554_v34 }
 0x65b   : > { %6376 = vmatmul.mubr.bf16.gmra.mrb[192].mxu0 %v6160_v13  ;;  %v12556_v13 = vld [vmem:[#allocation59_spill] sm:$0xff] }
 0x65c   : > { %6383 = vmatprep.mubr.bf16.mxu0 %v12546_v10  ;;  %v12558_v21 = vpack.c.bf16 %v12556_v13, %v12557_v37 }
 0x663   : > { %6384 = vmatmul.mubr.bf16.gmra.mrb[196].mxu0 %v6162_v20  ;;  %v12559_v20 = vld [vmem:[#allocation63_spill] sm:$0xff] }
 0x664   : > { %6391 = vmatprep.mubr.bf16.mxu0 %v12549_v0  ;;  %v12561_v12 = vpack.c.bf16 %v12559_v20, %v12560_v30 }
 0x66b   : > { %6392 = vmatmul.mubr.bf16.gmra.mrb[200].mxu0 %v6164_v19 }
 0x66c   : > { %6399 = vmatprep.mubr.bf16.mxu0 %v12552_v42 }
 0x673   : > { %6400 = vmatmul.mubr.bf16.gmra.mrb[204].mxu0 %v6166_v59 }
 0x674   : > { %6407 = vmatprep.mubr.bf16.mxu0 %v12555_v56 }
 0x67b   : > { %6408 = vmatmul.mubr.bf16.gmra.mrb[208].mxu0 %v6168_v2 }
 0x67c   : > { %6415 = vmatprep.mubr.bf16.mxu0 %v12558_v21 }
 0x683   : > { %6416 = vmatmul.mubr.bf16.gmra.mrb[212].mxu0 %v6170_v48 }
 0x684   : > { %6423 = vmatprep.mubr.bf16.mxu0 %v12561_v12 }
 0x68b   : > { %6424 = vmatmul.mubr.bf16.gmra.mrb[216].mxu0 %v6172_v44 }
 0x68c   : > { %6431 = vmatprep.mubr.bf16.mxu0 %v12564_v31 }
 0x693   : > { %6432 = vmatmul.mubr.bf16.gmra.mrb[220].mxu0 %v6174_v9 }
 0x6ee   : > { %v7776_v3 = vpop.f32.mrb[160].mxu0 }
 0x6ef   : > { %v7777_v15 = vpop.f32.mrb[161].mxu0 }
 0x6f0   : > { %v7778_v23 = vadd.f32 %v7777_v15, %v7776_v3  ;;  %v7779_v61 = vpop.f32.mrb[162].mxu0 }
 0x6f1   : > { %v7780_v5 = vpop.f32.mrb[163].mxu0 }
 0x6f2   : > { %v6314_v49 = vadd.f32 %v7778_v23, %v11987_v27  ;;  %v7781_v59 = vadd.f32 %v7780_v5, %v7779_v61 }
 0x6f4   : > { %v7460_v33 = vmul.f32 -1.442695, %v6314_v49  ;;  %v6317_v47 = vadd.f32 %v7781_v59, %v11987_v27 }
 0x6f6   : > { %9451 = vpow2.f32 %v7460_v33  ;;  %v7461_v46 = vmul.f32 -1.442695, %v6317_v47  ;;  %v7782_v17 = vpop.f32.mrb[164].mxu0 }
 0x6f7   : > { %v7783_v18 = vpop.f32.mrb[165].mxu0 }
 0x6f8   : > { %9453 = vpow2.f32 %v7461_v46  ;;  %v7784_v19 = vadd.f32 %v7783_v18, %v7782_v17  ;;  %v7785_v51 = vpop.f32.mrb[166].mxu0 }
 0x6f9   : > { %v7786_v22 = vpop.f32.mrb[167].mxu0 }
 0x6fa   : > { %v11992_v54 = vadd.f32 %v7784_v19, %v11987_v27  ;;  %v7787_v32 = vadd.f32 %v7786_v22, %v7785_v51 }
 0x6fc   : > { %v7462_v8 = vmul.f32 -1.442695, %v11992_v54  ;;  %v11996_v43 = vadd.f32 %v7787_v32, %v11987_v27 }
 0x6fe   : > { %9455 = vpow2.f32 %v7462_v8  ;;  %v7463_v4 = vmul.f32 -1.442695, %v11996_v43  ;;  %v7788_v39 = vpop.f32.mrb[168].mxu0 }
 0x6ff   : > { %v7789_v53 = vpop.f32.mrb[169].mxu0 }
 0x700   : > { %v9452_v62 = vpop.eup %9451  ;;  %9457 = vpow2.f32 %v7463_v4  ;;  %v7790_v50 = vadd.f32 %v7789_v53, %v7788_v39  ;;  %v7791_v14 = vpop.f32.mrb[170].mxu0 }
 0x701   : > { %v6536_v55 = vadd.f32 1.0, %v9452_v62  ;;  %v7792_v26 = vpop.f32.mrb[171].mxu0 }
 0x702   : > { %v9454_v48 = vpop.eup %9453  ;;  %v12000_v2 = vadd.f32 %v7790_v50, %v11987_v27  ;;  %v7793_v40 = vadd.f32 %v7792_v26, %v7791_v14 }
 0x703   : > { %9459 = vrcp.f32 %v6536_v55  ;;  %v6537_v52 = vadd.f32 1.0, %v9454_v48 }
 0x704   : > { %v7464_v29 = vmul.f32 -1.442695, %v12000_v2  ;;  %v12004_v35 = vadd.f32 %v7793_v40, %v11987_v27 }
 0x705   : > { %9461 = vrcp.f32 %v6537_v52 }
 0x706   : > { %9463 = vpow2.f32 %v7464_v29  ;;  %v7465_v16 = vmul.f32 -1.442695, %v12004_v35  ;;  %v7794_v24 = vpop.f32.mrb[172].mxu0 }
 0x707   : > { %v7795_v1 = vpop.f32.mrb[173].mxu0 }
 0x708   : > { %v9456_v28 = vpop.eup %9455  ;;  %9465 = vpow2.f32 %v7465_v16  ;;  %v7796_v58 = vadd.f32 %v7795_v1, %v7794_v24  ;;  %v7797_v6 = vpop.f32.mrb[174].mxu0 }
 0x709   : > { %v6538_v11 = vadd.f32 1.0, %v9456_v28  ;;  %v7798_v9 = vpop.f32.mrb[175].mxu0 }
 0x70a   : > { %v9458_v44 = vpop.eup %9457  ;;  %v12008_v25 = vadd.f32 %v7796_v58, %v11987_v27  ;;  %v7799_v38 = vadd.f32 %v7798_v9, %v7797_v6 }
 0x70b   : > { %9467 = vrcp.f32 %v6538_v11  ;;  %v6539_v10 = vadd.f32 1.0, %v9458_v44 }
 0x70c   : > { %v7466_v57 = vmul.f32 -1.442695, %v12008_v25  ;;  %v12012_v60 = vadd.f32 %v7799_v38, %v11987_v27 }
 0x70d   : > { %v9460_v0 = vpop.eup %9459  ;;  %9469 = vrcp.f32 %v6539_v10 }
 0x70e   : > { %v6632_v41 = vmul.f32 %v9460_v0, %v6314_v49  ;;  %9471 = vpow2.f32 %v7466_v57  ;;  %v7467_v63 = vmul.f32 -1.442695, %v12012_v60  ;;  %v7800_v42 = vpop.f32.mrb[176].mxu0 }
 0x70f   : > { %v9462_v45 = vpop.eup %9461  ;;  %v7801_v34 = vpop.f32.mrb[177].mxu0 }
 0x710   : > { %v9464_v56 = vpop.eup %9463  ;;  %6664 = vst [vmem:[%s12019_s15] sm:$0xff] %v6632_v41  ;;  %v6633_v13 = vmul.f32 %v9462_v45, %v6317_v47  ;;  %9473 = vpow2.f32 %v7467_v63  ;;  %v7802_v37 = vadd.f32 %v7801_v34, %v7800_v42  ;;  %v7803_v21 = vpop.f32.mrb[178].mxu0 }
 0x711   : > { %v6540_v20 = vadd.f32 1.0, %v9464_v56  ;;  %v7804_v30 = vpop.f32.mrb[179].mxu0 }
 0x712   : > { %v9466_v12 = vpop.eup %9465  ;;  %6665 = vst [vmem:[%s12019_s15 + $0x8] sm:$0xff] %v6633_v13  ;;  %v12025_v7 = vadd.f32 %v7802_v37, %v11987_v27  ;;  %v7805_v36 = vadd.f32 %v7804_v30, %v7803_v21 }
 0x713   : > { %9475 = vrcp.f32 %v6540_v20  ;;  %v6541_v31 = vadd.f32 1.0, %v9466_v12 }
 0x714   : > { %v7468_v3 = vmul.f32 -1.442695, %v12025_v7  ;;  %v12029_v15 = vadd.f32 %v7805_v36, %v11987_v27 }
 0x715   : > { %v9468_v23 = vpop.eup %9467  ;;  %9477 = vrcp.f32 %v6541_v31 }
 0x716   : > { %v6634_v61 = vmul.f32 %v9468_v23, %v11992_v54  ;;  %9479 = vpow2.f32 %v7468_v3  ;;  %v7469_v5 = vmul.f32 -1.442695, %v12029_v15  ;;  %v7806_v49 = vpop.f32.mrb[180].mxu0 }
 0x717   : > { %v9470_v59 = vpop.eup %9469  ;;  %v7807_v33 = vpop.f32.mrb[181].mxu0 }
 0x718   : > { %v9472_v47 = vpop.eup %9471  ;;  %6666 = vst [vmem:[%s12019_s15 + $0x10] sm:$0xff] %v6634_v61  ;;  %v6635_v46 = vmul.f32 %v9470_v59, %v11996_v43  ;;  %9481 = vpow2.f32 %v7469_v5  ;;  %v7808_v17 = vadd.f32 %v7807_v33, %v7806_v49  ;;  %v7809_v18 = vpop.f32.mrb[182].mxu0 }
 0x719   : > { %v6542_v19 = vadd.f32 1.0, %v9472_v47  ;;  %v7810_v51 = vpop.f32.mrb[183].mxu0 }
 0x71a   : > { %v9474_v22 = vpop.eup %9473  ;;  %6667 = vst [vmem:[%s12019_s15 + $0x18] sm:$0xff] %v6635_v46  ;;  %v12037_v54 = vadd.f32 %v7808_v17, %v11987_v27  ;;  %v7811_v32 = vadd.f32 %v7810_v51, %v7809_v18 }
 0x71b   : > { %9483 = vrcp.f32 %v6542_v19  ;;  %v6543_v8 = vadd.f32 1.0, %v9474_v22 }
 0x71c   : > { %v7470_v4 = vmul.f32 -1.442695, %v12037_v54  ;;  %v12041_v39 = vadd.f32 %v7811_v32, %v11987_v27 }
 0x71d   : > { %v9476_v43 = vpop.eup %9475  ;;  %9485 = vrcp.f32 %v6543_v8 }
 0x71e   : > { %v6636_v53 = vmul.f32 %v9476_v43, %v12000_v2  ;;  %9487 = vpow2.f32 %v7470_v4  ;;  %v7471_v62 = vmul.f32 -1.442695, %v12041_v39  ;;  %v7812_v50 = vpop.f32.mrb[184].mxu0 }
 0x71f   : > { %v9478_v14 = vpop.eup %9477  ;;  %v7813_v55 = vpop.f32.mrb[185].mxu0 }
 0x720   : > { %v9480_v26 = vpop.eup %9479  ;;  %6668 = vst [vmem:[%s12019_s15 + $0x20] sm:$0xff] %v6636_v53  ;;  %v6637_v48 = vmul.f32 %v9478_v14, %v12004_v35  ;;  %9489 = vpow2.f32 %v7471_v62  ;;  %v7814_v40 = vadd.f32 %v7813_v55, %v7812_v50  ;;  %v7815_v52 = vpop.f32.mrb[186].mxu0 }
 0x721   : > { %v6544_v29 = vadd.f32 1.0, %v9480_v26  ;;  %v7816_v16 = vpop.f32.mrb[187].mxu0 }
 0x722   : > { %v9482_v24 = vpop.eup %9481  ;;  %6669 = vst [vmem:[%s12019_s15 + $0x28] sm:$0xff] %v6637_v48  ;;  %v12049_v2 = vadd.f32 %v7814_v40, %v11987_v27  ;;  %v7817_v1 = vadd.f32 %v7816_v16, %v7815_v52 }
 0x723   : > { %9491 = vrcp.f32 %v6544_v29  ;;  %v6545_v28 = vadd.f32 1.0, %v9482_v24 }
 0x724   : > { %v7472_v58 = vmul.f32 -1.442695, %v12049_v2  ;;  %v12053_v6 = vadd.f32 %v7817_v1, %v11987_v27 }
 0x725   : > { %v9484_v35 = vpop.eup %9483  ;;  %9493 = vrcp.f32 %v6545_v28 }
 0x726   : > { %v6638_v11 = vmul.f32 %v9484_v35, %v12008_v25  ;;  %9495 = vpow2.f32 %v7472_v58  ;;  %v7473_v9 = vmul.f32 -1.442695, %v12053_v6  ;;  %v7818_v44 = vpop.f32.mrb[188].mxu0 }
 0x727   : > { %v9486_v38 = vpop.eup %9485  ;;  %v7819_v10 = vpop.f32.mrb[189].mxu0 }
 0x728   : > { %v9488_v57 = vpop.eup %9487  ;;  %6670 = vst [vmem:[%s12019_s15 + $0x30] sm:$0xff] %v6638_v11  ;;  %v6639_v0 = vmul.f32 %v9486_v38, %v12012_v60  ;;  %9497 = vpow2.f32 %v7473_v9  ;;  %v7820_v41 = vadd.f32 %v7819_v10, %v7818_v44  ;;  %v7821_v63 = vpop.f32.mrb[190].mxu0 }
 0x729   : > { %v6546_v42 = vadd.f32 1.0, %v9488_v57  ;;  %v7822_v45 = vpop.f32.mrb[191].mxu0 }
 0x72a   : > { %v9490_v34 = vpop.eup %9489  ;;  %6671 = vst [vmem:[%s12019_s15 + $0x38] sm:$0xff] %v6639_v0  ;;  %v12061_v25 = vadd.f32 %v7820_v41, %v11987_v27  ;;  %v7823_v56 = vadd.f32 %v7822_v45, %v7821_v63 }
 0x72b   : > { %9499 = vrcp.f32 %v6546_v42  ;;  %v6547_v13 = vadd.f32 1.0, %v9490_v34 }
 0x72c   : > { %v7474_v37 = vmul.f32 -1.442695, %v12061_v25  ;;  %v12065_v21 = vadd.f32 %v7823_v56, %v11987_v27 }
 0x72d   : > { %v9492_v60 = vpop.eup %9491  ;;  %9501 = vrcp.f32 %v6547_v13 }
 0x72e   : > { %v6640_v20 = vmul.f32 %v9492_v60, %v12025_v7  ;;  %9503 = vpow2.f32 %v7474_v37  ;;  %v7475_v30 = vmul.f32 -1.442695, %v12065_v21  ;;  %v7824_v12 = vpop.f32.mrb[192].mxu0 }
 0x72f   : > { %v9494_v36 = vpop.eup %9493  ;;  %v7825_v31 = vpop.f32.mrb[193].mxu0 }
 0x730   : > { %v9496_v3 = vpop.eup %9495  ;;  %6672 = vst [vmem:[%s12019_s15 + $0x40] sm:$0xff] %v6640_v20  ;;  %v6641_v23 = vmul.f32 %v9494_v36, %v12029_v15  ;;  %9505 = vpow2.f32 %v7475_v30  ;;  %v7826_v61 = vadd.f32 %v7825_v31, %v7824_v12  ;;  %v7827_v5 = vpop.f32.mrb[194].mxu0 }
 0x731   : > { %v6548_v49 = vadd.f32 1.0, %v9496_v3  ;;  %v7828_v59 = vpop.f32.mrb[195].mxu0 }
 0x732   : > { %v9498_v33 = vpop.eup %9497  ;;  %6673 = vst [vmem:[%s12019_s15 + $0x48] sm:$0xff] %v6641_v23  ;;  %v12073_v7 = vadd.f32 %v7826_v61, %v11987_v27  ;;  %v7829_v47 = vadd.f32 %v7828_v59, %v7827_v5 }
 0x733   : > { %9507 = vrcp.f32 %v6548_v49  ;;  %v6549_v46 = vadd.f32 1.0, %v9498_v33 }
 0x734   : > { %v7476_v17 = vmul.f32 -1.442695, %v12073_v7  ;;  %v12077_v18 = vadd.f32 %v7829_v47, %v11987_v27 }
 0x735   : > { %v9500_v15 = vpop.eup %9499  ;;  %9509 = vrcp.f32 %v6549_v46 }
 0x736   : > { %v6642_v19 = vmul.f32 %v9500_v15, %v12037_v54  ;;  %9511 = vpow2.f32 %v7476_v17  ;;  %v7477_v51 = vmul.f32 -1.442695, %v12077_v18  ;;  %v7830_v22 = vpop.f32.mrb[196].mxu0 }
 0x737   : > { %v9502_v32 = vpop.eup %9501  ;;  %v7831_v8 = vpop.f32.mrb[197].mxu0 }
 0x738   : > { %v9504_v4 = vpop.eup %9503  ;;  %6674 = vst [vmem:[%s12019_s15 + $0x50] sm:$0xff] %v6642_v19  ;;  %v6643_v43 = vmul.f32 %v9502_v32, %v12041_v39  ;;  %9513 = vpow2.f32 %v7477_v51  ;;  %v7832_v53 = vadd.f32 %v7831_v8, %v7830_v22  ;;  %v7833_v62 = vpop.f32.mrb[198].mxu0 }
 0x739   : > { %v6550_v50 = vadd.f32 1.0, %v9504_v4  ;;  %v7834_v14 = vpop.f32.mrb[199].mxu0 }
 0x73a   : > { %v9506_v55 = vpop.eup %9505  ;;  %6675 = vst [vmem:[%s12019_s15 + $0x58] sm:$0xff] %v6643_v43  ;;  %v12085_v54 = vadd.f32 %v7832_v53, %v11987_v27  ;;  %v7835_v26 = vadd.f32 %v7834_v14, %v7833_v62 }
 0x73b   : > { %9515 = vrcp.f32 %v6550_v50  ;;  %v6551_v48 = vadd.f32 1.0, %v9506_v55 }
 0x73c   : > { %v7478_v40 = vmul.f32 -1.442695, %v12085_v54  ;;  %v12089_v52 = vadd.f32 %v7835_v26, %v11987_v27 }
 0x73d   : > { %v9508_v39 = vpop.eup %9507  ;;  %9517 = vrcp.f32 %v6551_v48 }
 0x73e   : > { %v6644_v29 = vmul.f32 %v9508_v39, %v12049_v2  ;;  %9519 = vpow2.f32 %v7478_v40  ;;  %v7479_v16 = vmul.f32 -1.442695, %v12089_v52  ;;  %v7836_v24 = vpop.f32.mrb[200].mxu0 }
 0x73f   : > { %v9510_v1 = vpop.eup %9509  ;;  %v7837_v28 = vpop.f32.mrb[201].mxu0 }
 0x740   : > { %v9512_v58 = vpop.eup %9511  ;;  %6676 = vst [vmem:[%s12019_s15 + $0x60] sm:$0xff] %v6644_v29  ;;  %v6645_v35 = vmul.f32 %v9510_v1, %v12053_v6  ;;  %9521 = vpow2.f32 %v7479_v16  ;;  %v7838_v11 = vadd.f32 %v7837_v28, %v7836_v24  ;;  %v7839_v9 = vpop.f32.mrb[202].mxu0 }
 0x741   : > { %v6552_v44 = vadd.f32 1.0, %v9512_v58  ;;  %v7840_v38 = vpop.f32.mrb[203].mxu0 }
 0x742   : > { %v9514_v10 = vpop.eup %9513  ;;  %6677 = vst [vmem:[%s12019_s15 + $0x68] sm:$0xff] %v6645_v35  ;;  %v12097_v2 = vadd.f32 %v7838_v11, %v11987_v27  ;;  %v7841_v57 = vadd.f32 %v7840_v38, %v7839_v9 }
 0x743   : > { %9523 = vrcp.f32 %v6552_v44  ;;  %v6553_v0 = vadd.f32 1.0, %v9514_v10 }
 0x744   : > { %v7480_v41 = vmul.f32 -1.442695, %v12097_v2  ;;  %v12101_v63 = vadd.f32 %v7841_v57, %v11987_v27 }
 0x745   : > { %v9516_v6 = vpop.eup %9515  ;;  %9525 = vrcp.f32 %v6553_v0 }
 0x746   : > { %v6646_v42 = vmul.f32 %v9516_v6, %v12061_v25  ;;  %9527 = vpow2.f32 %v7480_v41  ;;  %v7481_v45 = vmul.f32 -1.442695, %v12101_v63  ;;  %v7842_v34 = vpop.f32.mrb[204].mxu0 }
 0x747   : > { %v9518_v56 = vpop.eup %9517  ;;  %v7843_v13 = vpop.f32.mrb[205].mxu0 }
 0x748   : > { %v9520_v37 = vpop.eup %9519  ;;  %6678 = vst [vmem:[%s12019_s15 + $0x70] sm:$0xff] %v6646_v42  ;;  %v6647_v60 = vmul.f32 %v9518_v56, %v12065_v21  ;;  %9529 = vpow2.f32 %v7481_v45  ;;  %v7844_v20 = vadd.f32 %v7843_v13, %v7842_v34  ;;  %v7845_v30 = vpop.f32.mrb[206].mxu0 }
 0x749   : > { %v6554_v12 = vadd.f32 1.0, %v9520_v37  ;;  %v7846_v36 = vpop.f32.mrb[207].mxu0 }
 0x74a   : > { %v9522_v31 = vpop.eup %9521  ;;  %6679 = vst [vmem:[%s12019_s15 + $0x78] sm:$0xff] %v6647_v60  ;;  %v12109_v25 = vadd.f32 %v7844_v20, %v11987_v27  ;;  %v7847_v3 = vadd.f32 %v7846_v36, %v7845_v30 }
 0x74b   : > { %9531 = vrcp.f32 %v6554_v12  ;;  %v6555_v23 = vadd.f32 1.0, %v9522_v31 }
 0x74c   : > { %v7482_v61 = vmul.f32 -1.442695, %v12109_v25  ;;  %v12113_v5 = vadd.f32 %v7847_v3, %v11987_v27 }
 0x74d   : > { %v9524_v21 = vpop.eup %9523  ;;  %9533 = vrcp.f32 %v6555_v23 }
 0x74e   : > { %v6648_v49 = vmul.f32 %v9524_v21, %v12073_v7  ;;  %9535 = vpow2.f32 %v7482_v61  ;;  %v7483_v59 = vmul.f32 -1.442695, %v12113_v5  ;;  %v7848_v33 = vpop.f32.mrb[208].mxu0 }
 0x74f   : > { %v9526_v47 = vpop.eup %9525  ;;  %v7849_v46 = vpop.f32.mrb[209].mxu0 }
 0x750   : > { %v9528_v17 = vpop.eup %9527  ;;  %6680 = vst [vmem:[%s12019_s15 + $0x80] sm:$0xff] %v6648_v49  ;;  %v6649_v15 = vmul.f32 %v9526_v47, %v12077_v18  ;;  %9537 = vpow2.f32 %v7483_v59  ;;  %v7850_v19 = vadd.f32 %v7849_v46, %v7848_v33  ;;  %v7851_v51 = vpop.f32.mrb[210].mxu0 }
 0x751   : > { %v6556_v22 = vadd.f32 1.0, %v9528_v17  ;;  %v7852_v32 = vpop.f32.mrb[211].mxu0 }
 0x752   : > { %v9530_v8 = vpop.eup %9529  ;;  %6681 = vst [vmem:[%s12019_s15 + $0x88] sm:$0xff] %v6649_v15  ;;  %v12121_v7 = vadd.f32 %v7850_v19, %v11987_v27  ;;  %v7853_v4 = vadd.f32 %v7852_v32, %v7851_v51 }
 0x753   : > { %9539 = vrcp.f32 %v6556_v22  ;;  %v6557_v43 = vadd.f32 1.0, %v9530_v8 }
 0x754   : > { %v7484_v53 = vmul.f32 -1.442695, %v12121_v7  ;;  %v12125_v62 = vadd.f32 %v7853_v4, %v11987_v27 }
 0x755   : > { %v9532_v18 = vpop.eup %9531  ;;  %9541 = vrcp.f32 %v6557_v43 }
 0x756   : > { %v6650_v50 = vmul.f32 %v9532_v18, %v12085_v54  ;;  %9543 = vpow2.f32 %v7484_v53  ;;  %v7485_v14 = vmul.f32 -1.442695, %v12125_v62  ;;  %v7854_v55 = vpop.f32.mrb[212].mxu0 }
 0x757   : > { %v9534_v26 = vpop.eup %9533  ;;  %v7855_v48 = vpop.f32.mrb[213].mxu0 }
 0x758   : > { %v9536_v40 = vpop.eup %9535  ;;  %6682 = vst [vmem:[%s12019_s15 + $0x90] sm:$0xff] %v6650_v50  ;;  %v6651_v39 = vmul.f32 %v9534_v26, %v12089_v52  ;;  %9545 = vpow2.f32 %v7485_v14  ;;  %v7856_v29 = vadd.f32 %v7855_v48, %v7854_v55  ;;  %v7857_v16 = vpop.f32.mrb[214].mxu0 }
 0x759   : > { %v6558_v24 = vadd.f32 1.0, %v9536_v40  ;;  %v7858_v1 = vpop.f32.mrb[215].mxu0 }
 0x75a   : > { %v9538_v28 = vpop.eup %9537  ;;  %6683 = vst [vmem:[%s12019_s15 + $0x98] sm:$0xff] %v6651_v39  ;;  %v12133_v54 = vadd.f32 %v7856_v29, %v11987_v27  ;;  %v7859_v58 = vadd.f32 %v7858_v1, %v7857_v16 }
 0x75b   : > { %9547 = vrcp.f32 %v6558_v24  ;;  %v6559_v35 = vadd.f32 1.0, %v9538_v28 }
 0x75c   : > { %v7486_v11 = vmul.f32 -1.442695, %v12133_v54  ;;  %v12137_v9 = vadd.f32 %v7859_v58, %v11987_v27 }
 0x75d   : > { %v9540_v52 = vpop.eup %9539  ;;  %9549 = vrcp.f32 %v6559_v35 }
 0x75e   : > { %v6652_v44 = vmul.f32 %v9540_v52, %v12097_v2  ;;  %9551 = vpow2.f32 %v7486_v11  ;;  %v7487_v38 = vmul.f32 -1.442695, %v12137_v9  ;;  %v7860_v10 = vpop.f32.mrb[216].mxu0 }
 0x75f   : > { %v9542_v57 = vpop.eup %9541  ;;  %v7861_v0 = vpop.f32.mrb[217].mxu0 }
 0x760   : > { %v9544_v41 = vpop.eup %9543  ;;  %6684 = vst [vmem:[%s12019_s15 + $0xa0] sm:$0xff] %v6652_v44  ;;  %v6653_v6 = vmul.f32 %v9542_v57, %v12101_v63  ;;  %9553 = vpow2.f32 %v7487_v38  ;;  %v7862_v42 = vadd.f32 %v7861_v0, %v7860_v10  ;;  %v7863_v45 = vpop.f32.mrb[218].mxu0 }
 0x761   : > { %v6560_v34 = vadd.f32 1.0, %v9544_v41  ;;  %v7864_v56 = vpop.f32.mrb[219].mxu0 }
 0x762   : > { %v9546_v13 = vpop.eup %9545  ;;  %6685 = vst [vmem:[%s12019_s15 + $0xa8] sm:$0xff] %v6653_v6  ;;  %v6426_v2 = vadd.f32 %v7862_v42, %v11987_v27  ;;  %v7865_v37 = vadd.f32 %v7864_v56, %v7863_v45 }
 0x763   : > { %9555 = vrcp.f32 %v6560_v34  ;;  %v6561_v60 = vadd.f32 1.0, %v9546_v13 }
 0x764   : > { %v7488_v20 = vmul.f32 -1.442695, %v6426_v2  ;;  %v6429_v30 = vadd.f32 %v7865_v37, %v11987_v27 }
 0x765   : > { %v9548_v12 = vpop.eup %9547  ;;  %9557 = vrcp.f32 %v6561_v60 }
 0x766   : > { %v6654_v63 = vmul.f32 %v9548_v12, %v12109_v25  ;;  %9559 = vpow2.f32 %v7488_v20  ;;  %v7489_v36 = vmul.f32 -1.442695, %v6429_v30  ;;  %v7866_v31 = vpop.f32.mrb[220].mxu0 }
 0x767   : > { %v9550_v3 = vpop.eup %9549  ;;  %v7867_v23 = vpop.f32.mrb[221].mxu0 }
 0x768   : > { %v9552_v61 = vpop.eup %9551  ;;  %6686 = vst [vmem:[%s12019_s15 + $0xb0] sm:$0xff] %v6654_v63  ;;  %v6655_v21 = vmul.f32 %v9550_v3, %v12113_v5  ;;  %9561 = vpow2.f32 %v7489_v36  ;;  %v7868_v49 = vadd.f32 %v7867_v23, %v7866_v31  ;;  %v7869_v59 = vpop.f32.mrb[222].mxu0 }
 0x769   : > { %v6562_v33 = vadd.f32 1.0, %v9552_v61  ;;  %v7870_v47 = vpop.f32.mrb[223].mxu0 }
 0x76a   : > { %v9554_v46 = vpop.eup %9553  ;;  %6687 = vst [vmem:[%s12019_s15 + $0xb8] sm:$0xff] %v6655_v21  ;;  %v6434_v17 = vadd.f32 %v7868_v49, %v11987_v27  ;;  %v7871_v25 = vadd.f32 %v7870_v47, %v7869_v59 }
 0x76b   : > { %9563 = vrcp.f32 %v6562_v33  ;;  %v6563_v15 = vadd.f32 1.0, %v9554_v46 }
 0x76c   : > { %v7490_v19 = vmul.f32 -1.442695, %v6434_v17  ;;  %v6437_v51 = vadd.f32 %v7871_v25, %v11987_v27 }
 0x76d   : > { %v9556_v22 = vpop.eup %9555  ;;  %9565 = vrcp.f32 %v6563_v15 }
 0x76e   : > { %v6656_v5 = vmul.f32 %v9556_v22, %v12121_v7  ;;  %9567 = vpow2.f32 %v7490_v19  ;;  %v7491_v32 = vmul.f32 -1.442695, %v6437_v51 }
 0x76f   : > { %v9558_v8 = vpop.eup %9557 }
 0x770   : > { %v9560_v4 = vpop.eup %9559  ;;  %6688 = vst [vmem:[%s12019_s15 + $0xc0] sm:$0xff] %v6656_v5  ;;  %v6657_v43 = vmul.f32 %v9558_v8, %v12125_v62  ;;  %9569 = vpow2.f32 %v7491_v32 }
 0x771   : > { %v6564_v53 = vadd.f32 1.0, %v9560_v4 }
 0x772   : > { %v9562_v18 = vpop.eup %9561  ;;  %6689 = vst [vmem:[%s12019_s15 + $0xc8] sm:$0xff] %v6657_v43 }
 0x773   : > { %9571 = vrcp.f32 %v6564_v53  ;;  %v6565_v50 = vadd.f32 1.0, %v9562_v18 }
 0x775   : > { %v9564_v27 = vpop.eup %9563  ;;  %9573 = vrcp.f32 %v6565_v50 }
 0x776   : > { %v6658_v7 = vmul.f32 %v9564_v27, %v12133_v54 }
 0x777   : > { %v9566_v14 = vpop.eup %9565 }
 0x778   : > { %v9568_v55 = vpop.eup %9567  ;;  %6690 = vst [vmem:[%s12019_s15 + $0xd0] sm:$0xff] %v6658_v7  ;;  %v6659_v26 = vmul.f32 %v9566_v14, %v12137_v9 }
 0x779   : > { %v6566_v62 = vadd.f32 1.0, %v9568_v55 }
 0x77a   : > { %v9570_v48 = vpop.eup %9569  ;;  %6691 = vst [vmem:[%s12019_s15 + $0xd8] sm:$0xff] %v6659_v26 }
 0x77b   : > { %9575 = vrcp.f32 %v6566_v62  ;;  %v6567_v40 = vadd.f32 1.0, %v9570_v48 }
 0x77d   : > { %v9572_v39 = vpop.eup %9571  ;;  %9577 = vrcp.f32 %v6567_v40 }
 0x77e   : > { %v6660_v29 = vmul.f32 %v9572_v39, %v6426_v2 }
 0x77f   : > { %v9574_v16 = vpop.eup %9573 }
 0x780   : > { %6692 = vst [vmem:[%s12019_s15 + $0xe0] sm:$0xff] %v6660_v29  ;;  %v6661_v24 = vmul.f32 %v9574_v16, %v6429_v30 }
 0x782   : > { %6693 = vst [vmem:[%s12019_s15 + $0xe8] sm:$0xff] %v6661_v24 }
 0x785   : > { %v9576_v1 = vpop.eup %9575 }
 0x786   : > { %v6662_v28 = vmul.f32 %v9576_v1, %v6434_v17 }
 0x787   : > { %v9578_v54 = vpop.eup %9577 }
 0x788   : > { %6694 = vst [vmem:[%s12019_s15 + $0xf0] sm:$0xff] %v6662_v28  ;;  %v6663_v58 = vmul.f32 %v9578_v54, %v6437_v51 }
 0x78a   : > { %6695 = vst [vmem:[%s12019_s15 + $0xf8] sm:$0xff] %v6663_v58 }
 0x78b PF: > { %s21_s17 = sadd.s32 1, %s9586_s17  }
 0x78c   : > { %p18_p4 = scmp.ge.s32.totalorder %s21_s17, 4  }
 0x78e   :  { %20 = sbr.rel (!%p18_p4) target bundleno = 1 (0x1), region = 102 }

</bundles_post_ra>
